<compile_context>
chip_gen: v6e
topology: v6e:2x2x1
jax: 0.10.0
libtpu: 0.0.40
codegen_flags: <defaults>
</compile_context>

<pallas_src>
import functools

import numpy as np
import jax
import jax.numpy as jnp
from jax import lax
from jax.experimental import pallas as pl
from jax.experimental.pallas import tpu as pltpu

EPS = 1e-5


# ---------------------------------------------------------------------------
# Fused kernel
# ---------------------------------------------------------------------------
def _covnet_kernel(
    x_ref,                                              # (3, N*H*W)    bf16
    w1_ref, c1b_ref, g1_ref, b1_ref, m1_ref,            # conv1 / bn1
    w2_ref, c2b_ref, g2_ref, b2_ref, m2_ref,            # conv2 / bn2
    w3_ref, c3b_ref, g3_ref, b3_ref, m3_ref,            # conv3 / bn3
    fw1_ref, fb1_ref, g4_ref, b4_ref,                   # fc1 / bn4
    fw3_ref, fb3_ref,                                    # fc3
    o_ref,                                               # (10, N)       f32
    *, n_batch, img_h, img_w,
):
    hw = img_h * img_w

    def conv_bn_relu(a, w_ref, cb_ref, g_ref, b_ref, m_ref, kh, kw, step, count):
        # a: (Cin, Lin) bf16 frame.  Conv (stride 1 on a `step`-strided grid)
        # as sum over the kh*kw window of (Cout, Cin) @ (Cin, Lout) matmuls on
        # window-shifted lane slices; then bias + train-mode BN (masked to the
        # valid output positions) + ReLU, all in f32.
        lout = m_ref.shape[1]
        acc = None
        for di in range(kh):
            for dj in range(kw):
                s = step * (di * img_w + dj)
                part = jnp.dot(w_ref[di * kw + dj], a[:, s:s + lout],
                               preferred_element_type=jnp.float32)
                acc = part if acc is None else acc + part
        y = acc + cb_ref[...]                      # conv bias (cancels in BN)
        m = m_ref[...]                             # 0/1 mask of valid positions
        inv = 1.0 / float(count)
        mean = jnp.sum(y * m, axis=1, keepdims=True) * inv
        d = y - mean
        var = jnp.sum(d * d * m, axis=1, keepdims=True) * inv   # two-pass var
        y = d * lax.rsqrt(var + EPS) * g_ref[...] + b_ref[...]  # rsqrt -> EUP
        return jnp.maximum(y, 0.0)

    def pool2x2(a, step, lout):
        # 2x2 / stride-2 max-pool kept "in frame": output (i, j) stays at frame
        # position (2*step*i, 2*step*j); only the first `lout` columns survive.
        shifts = (0, step, step * img_w, step * (img_w + 1))
        r = a[:, 0:lout]
        for s in shifts[1:]:
            r = jnp.maximum(r, a[:, s:s + lout])
        return r

    oh1, ow1 = img_h - 4, img_w - 4          # conv1 (5x5) output
    oh2, ow2 = oh1 - 2, ow1 - 2              # conv2 (3x3) output
    oh3, ow3 = oh2 // 2 - 2, ow2 // 2 - 2    # conv3 (3x3) output after pool

    x = x_ref[...]                                                    # (3, M0)
    a1 = conv_bn_relu(x, w1_ref, c1b_ref, g1_ref, b1_ref, m1_ref,
                      5, 5, 1, n_batch * oh1 * ow1).astype(jnp.bfloat16)
    a2 = conv_bn_relu(a1, w2_ref, c2b_ref, g2_ref, b2_ref, m2_ref,
                      3, 3, 1, n_batch * oh2 * ow2).astype(jnp.bfloat16)
    p2 = pool2x2(a2, 1, a2.shape[1] - (img_w + 1))                    # bf16
    a3 = conv_bn_relu(p2, w3_ref, c3b_ref, g3_ref, b3_ref, m3_ref,
                      3, 3, 2, n_batch * oh3 * ow3)                   # f32
    # Final 2x2 max-pool on the stride-2 conv3 grid; AdaptiveAvgPool2d(1) on
    # the resulting 1x1 map is the identity, so the feature of image n is the
    # lane at frame position n*H*W.
    fr = pool2x2(a3, 2, a3.shape[1] - 2 * (img_w + 1))
    f = jnp.concatenate([fr[:, n * hw:n * hw + 1] for n in range(n_batch)],
                        axis=1)                                       # (72, N)

    # fc1 + bn4 + relu + fc3 (+bias), VMEM/register resident.
    hfc = jnp.dot(fw1_ref[...], f.astype(jnp.bfloat16),
                  preferred_element_type=jnp.float32) + fb1_ref[...]  # (36, N)
    inv_n = 1.0 / float(n_batch)
    mean = jnp.sum(hfc, axis=1, keepdims=True) * inv_n
    d = hfc - mean
    var = jnp.sum(d * d, axis=1, keepdims=True) * inv_n
    hfc = jnp.maximum(d * lax.rsqrt(var + EPS) * g4_ref[...] + b4_ref[...], 0.0)
    o_ref[...] = (jnp.dot(fw3_ref[...], hfc.astype(jnp.bfloat16),
                          preferred_element_type=jnp.float32) + fb3_ref[...])


# ---------------------------------------------------------------------------
# Wrapper: one pallas_call, whole-array VMEM operands, no grid
# ---------------------------------------------------------------------------
def covnet_forward(params, x):
    p = params
    n, c, h, w = x.shape
    assert c == 3 and h >= 14 and w >= 14, "CovNet expects (N, 3, >=14, >=14)"
    hw = h * w
    m0 = n * hw
    # Truncated-frame widths: each stage only needs prev_width - max_shift.
    l1 = m0 - (4 * w + 4)            # after conv1 (5x5)
    l2 = l1 - (2 * w + 2)            # after conv2 (3x3)
    lp = l2 - (w + 1)                # after 2x2 max-pool (stride-2 grid)
    l3 = lp - 2 * (2 * w + 2)        # after conv3 (3x3 on stride-2 grid)
    oh1, ow1 = h - 4, w - 4
    oh2, ow2 = oh1 - 2, ow1 - 2
    oh3, ow3 = oh2 // 2 - 2, ow2 // 2 - 2

    def frame_mask(width, oh_v, ow_v, step):
        q = np.arange(width)
        hh, ww = (q % hw) // w, (q % hw) % w
        ok = ((hh < step * oh_v) & (ww < step * ow_v)
              & (hh % step == 0) & (ww % step == 0))
        return jnp.asarray(ok, jnp.float32).reshape(1, width)

    m1 = frame_mask(l1, oh1, ow1, 1)
    m2 = frame_mask(l2, oh2, ow2, 1)
    m3 = frame_mask(l3, oh3, ow3, 2)

    # Single layout change at the kernel boundary: NCHW -> channel-major frame.
    x_cm = jnp.transpose(x, (1, 0, 2, 3)).reshape(c, m0).astype(jnp.bfloat16)

    kernel = functools.partial(_covnet_kernel, n_batch=n, img_h=h, img_w=w)
    operands = (
        x_cm,
        p["w1"], p["c1b"], p["bn1_g"], p["bn1_b"], m1,
        p["w2"], p["c2b"], p["bn2_g"], p["bn2_b"], m2,
        p["w3"], p["c3b"], p["bn3_g"], p["bn3_b"], m3,
        p["fc1_w"], p["fc1_b"], p["bn4_g"], p["bn4_b"],
        p["fc3_w"], p["fc3_b"],
    )
    out = pl.pallas_call(
        kernel,
        out_shape=jax.ShapeDtypeStruct((10, n), jnp.float32),
        in_specs=[pl.BlockSpec(memory_space=pltpu.MemorySpace.VMEM)
                  for _ in operands],
        out_specs=pl.BlockSpec(memory_space=pltpu.MemorySpace.VMEM),
    )(*operands)
    return out.T                                            # (N, 10)


# ---------------------------------------------------------------------------
# Params (PyTorch-default init), pre-packed once for the kernel layout
# ---------------------------------------------------------------------------
def init_params(key):
    ks = jax.random.split(key, 10)

    def u(k, shape, fan_in):
        b = 1.0 / np.sqrt(float(fan_in))
        return jax.random.uniform(k, shape, jnp.float32, -b, b)

    w1, b1 = u(ks[0], (16, 3, 5, 5), 75), u(ks[1], (16,), 75)
    w2, b2 = u(ks[2], (36, 16, 3, 3), 144), u(ks[3], (36,), 144)
    w3, b3 = u(ks[4], (72, 36, 3, 3), 324), u(ks[5], (72,), 324)
    fw1, fb1 = u(ks[6], (36, 72), 72), u(ks[7], (36,), 72)
    fw3, fb3 = u(ks[8], (10, 36), 36), u(ks[9], (10,), 36)

    def prep_conv(wc):
        # (OC, C, KH, KW) f32 -> (KH*KW, OC, C) bf16 so w_ref[k] is the
        # (OC, C) matrix for kernel-window offset k = di*KW + dj.
        oc, cc, kh, kw = wc.shape
        return jnp.transpose(wc, (2, 3, 0, 1)).reshape(kh * kw, oc, cc).astype(
            jnp.bfloat16)

    p = {
        "w1": prep_conv(w1), "c1b": b1.reshape(-1, 1),
        "w2": prep_conv(w2), "c2b": b2.reshape(-1, 1),
        "w3": prep_conv(w3), "c3b": b3.reshape(-1, 1),
        "fc1_w": fw1.astype(jnp.bfloat16), "fc1_b": fb1.reshape(-1, 1),
        "fc3_w": fw3.astype(jnp.bfloat16), "fc3_b": fb3.reshape(-1, 1),
    }
    for name, cdim in (("bn1", 16), ("bn2", 36), ("bn3", 72), ("bn4", 36)):
        p[name + "_g"] = jnp.ones((cdim, 1), jnp.float32)
        p[name + "_b"] = jnp.zeros((cdim, 1), jnp.float32)
    return p


# ---------------------------------------------------------------------------
# Pure-JAX reference (train-mode BN, same bf16 operand rounding as the kernel)
# ---------------------------------------------------------------------------
def reference_forward(params, x):
    p = params

    def unprep(wm, kh, kw):
        k2, oc, cc = wm.shape
        return wm.astype(jnp.float32).reshape(kh, kw, oc, cc).transpose(2, 3, 0, 1)

    def conv(xx, wc, bc):
        y = lax.conv_general_dilated(
            xx.astype(jnp.bfloat16).astype(jnp.float32), wc,
            window_strides=(1, 1), padding="VALID",
            dimension_numbers=("NCHW", "OIHW", "NCHW"))
        return y + bc.reshape(1, -1, *([1] * (y.ndim - 2)))

    def bn(y, g, b, axes):
        mean = jnp.mean(y, axis=axes, keepdims=True)
        var = jnp.mean((y - mean) ** 2, axis=axes, keepdims=True)
        shp = (1, -1) + (1,) * (y.ndim - 2)
        return (y - mean) * lax.rsqrt(var + EPS) * g.reshape(shp) + b.reshape(shp)

    def pool(y):
        nn, cc, hh, ww = y.shape
        y = y[:, :, : hh // 2 * 2, : ww // 2 * 2].reshape(
            nn, cc, hh // 2, 2, ww // 2, 2)
        return jnp.max(y, axis=(3, 5))

    y = jax.nn.relu(bn(conv(x, unprep(p["w1"], 5, 5), p["c1b"][:, 0]),
                       p["bn1_g"][:, 0], p["bn1_b"][:, 0], (0, 2, 3)))
    y = jax.nn.relu(bn(conv(y, unprep(p["w2"], 3, 3), p["c2b"][:, 0]),
                       p["bn2_g"][:, 0], p["bn2_b"][:, 0], (0, 2, 3)))
    y = pool(y)
    y = jax.nn.relu(bn(conv(y, unprep(p["w3"], 3, 3), p["c3b"][:, 0]),
                       p["bn3_g"][:, 0], p["bn3_b"][:, 0], (0, 2, 3)))
    y = pool(y)
    y = jnp.mean(y, axis=(2, 3))                     # aap(1) + view -> (N, 72)
    fw1 = p["fc1_w"].astype(jnp.float32)
    hfc = y.astype(jnp.bfloat16).astype(jnp.float32) @ fw1.T + p["fc1_b"][:, 0]
    hfc = jax.nn.relu(bn(hfc, p["bn4_g"][:, 0], p["bn4_b"][:, 0], (0,)))
    fw3 = p["fc3_w"].astype(jnp.float32)
    return hfc.astype(jnp.bfloat16).astype(jnp.float32) @ fw3.T + p["fc3_b"][:, 0]


if __name__ == "__main__":
    key = jax.random.PRNGKey(0)
    pkey, xkey = jax.random.split(key)
    params = init_params(pkey)
    # Input consistent with the module: 3 input channels, 16x16 spatial.
    x = jax.random.normal(xkey, (2, 3, 16, 16), jnp.float32)

    fwd = jax.jit(covnet_forward)
    out = jax.block_until_ready(fwd(params, x))
    assert out.shape == (2, 10), out.shape
    assert out.dtype == jnp.float32
    assert bool(jnp.all(jnp.isfinite(out)))

    ref = jax.block_until_ready(jax.jit(reference_forward)(params, x))
    np.testing.assert_allclose(np.asarray(out), np.asarray(ref),
                               rtol=5e-2, atol=5e-2)
    print("KERNEL_OK")
</pallas_src>

<mosaic_0001>
module attributes {stable_mosaic.version = 11 : i64} {
  func.func @_covnet_kernel(%arg0: memref<3x512xbf16, #tpu.memory_space<vmem>>, %arg1: memref<25x16x3xbf16, #tpu.memory_space<vmem>>, %arg2: memref<16x1xf32, #tpu.memory_space<vmem>>, %arg3: memref<16x1xf32, #tpu.memory_space<vmem>>, %arg4: memref<16x1xf32, #tpu.memory_space<vmem>>, %arg5: memref<1x444xf32, #tpu.memory_space<vmem>>, %arg6: memref<9x36x16xbf16, #tpu.memory_space<vmem>>, %arg7: memref<36x1xf32, #tpu.memory_space<vmem>>, %arg8: memref<36x1xf32, #tpu.memory_space<vmem>>, %arg9: memref<36x1xf32, #tpu.memory_space<vmem>>, %arg10: memref<1x410xf32, #tpu.memory_space<vmem>>, %arg11: memref<9x72x36xbf16, #tpu.memory_space<vmem>>, %arg12: memref<72x1xf32, #tpu.memory_space<vmem>>, %arg13: memref<72x1xf32, #tpu.memory_space<vmem>>, %arg14: memref<72x1xf32, #tpu.memory_space<vmem>>, %arg15: memref<1x325xf32, #tpu.memory_space<vmem>>, %arg16: memref<36x72xbf16, #tpu.memory_space<vmem>>, %arg17: memref<36x1xf32, #tpu.memory_space<vmem>>, %arg18: memref<36x1xf32, #tpu.memory_space<vmem>>, %arg19: memref<36x1xf32, #tpu.memory_space<vmem>>, %arg20: memref<10x36xbf16, #tpu.memory_space<vmem>>, %arg21: memref<10x1xf32, #tpu.memory_space<vmem>>, %arg22: memref<10x2xf32, #tpu.memory_space<vmem>>) attributes {dimension_semantics = [], scalar_prefetch = 0 : i64, scratch_operands = 0 : i64, tpu.core_type = #tpu.core_type<tc>} {
    %c0 = arith.constant 0 : index
    %c0_0 = arith.constant 0 : index
    %0 = vector.load %arg0[%c0, %c0_0] : memref<3x512xbf16, #tpu.memory_space<vmem>>, vector<3x512xbf16>
    %c0_1 = arith.constant 0 : index
    %c0_2 = arith.constant 0 : index
    %c0_3 = arith.constant 0 : index
    %1 = vector.load %arg1[%c0_1, %c0_2, %c0_3] : memref<25x16x3xbf16, #tpu.memory_space<vmem>>, vector<1x16x3xbf16>
    %2 = vector.shape_cast %1 : vector<1x16x3xbf16> to vector<16x3xbf16>
    %3 = vector.extract_strided_slice %0 {offsets = [0, 0], sizes = [3, 444], strides = [1, 1]} : vector<3x512xbf16> to vector<3x444xbf16>
    %cst = arith.constant dense<0.000000e+00> : vector<16x444xf32>
    %4 = tpu.matmul %2, %3, %cst {dimension_numbers = #tpu.dot_dimension_numbers<[1], [0], [0], [1], [0, 0, 1, 1], [], []>} : vector<16x3xbf16>, vector<3x444xbf16>, vector<16x444xf32> -> vector<16x444xf32>
    %c1 = arith.constant 1 : index
    %c0_4 = arith.constant 0 : index
    %c0_5 = arith.constant 0 : index
    %5 = vector.load %arg1[%c1, %c0_4, %c0_5] : memref<25x16x3xbf16, #tpu.memory_space<vmem>>, vector<1x16x3xbf16>
    %6 = vector.shape_cast %5 : vector<1x16x3xbf16> to vector<16x3xbf16>
    %7 = vector.extract_strided_slice %0 {offsets = [0, 1], sizes = [3, 444], strides = [1, 1]} : vector<3x512xbf16> to vector<3x444xbf16>
    %cst_6 = arith.constant dense<0.000000e+00> : vector<16x444xf32>
    %8 = tpu.matmul %6, %7, %cst_6 {dimension_numbers = #tpu.dot_dimension_numbers<[1], [0], [0], [1], [0, 0, 1, 1], [], []>} : vector<16x3xbf16>, vector<3x444xbf16>, vector<16x444xf32> -> vector<16x444xf32>
    %9 = arith.addf %4, %8 : vector<16x444xf32>
    %c2 = arith.constant 2 : index
    %c0_7 = arith.constant 0 : index
    %c0_8 = arith.constant 0 : index
    %10 = vector.load %arg1[%c2, %c0_7, %c0_8] : memref<25x16x3xbf16, #tpu.memory_space<vmem>>, vector<1x16x3xbf16>
    %11 = vector.shape_cast %10 : vector<1x16x3xbf16> to vector<16x3xbf16>
    %12 = vector.extract_strided_slice %0 {offsets = [0, 2], sizes = [3, 444], strides = [1, 1]} : vector<3x512xbf16> to vector<3x444xbf16>
    %cst_9 = arith.constant dense<0.000000e+00> : vector<16x444xf32>
    %13 = tpu.matmul %11, %12, %cst_9 {dimension_numbers = #tpu.dot_dimension_numbers<[1], [0], [0], [1], [0, 0, 1, 1], [], []>} : vector<16x3xbf16>, vector<3x444xbf16>, vector<16x444xf32> -> vector<16x444xf32>
    %14 = arith.addf %9, %13 : vector<16x444xf32>
    %c3 = arith.constant 3 : index
    %c0_10 = arith.constant 0 : index
    %c0_11 = arith.constant 0 : index
    %15 = vector.load %arg1[%c3, %c0_10, %c0_11] : memref<25x16x3xbf16, #tpu.memory_space<vmem>>, vector<1x16x3xbf16>
    %16 = vector.shape_cast %15 : vector<1x16x3xbf16> to vector<16x3xbf16>
    %17 = vector.extract_strided_slice %0 {offsets = [0, 3], sizes = [3, 444], strides = [1, 1]} : vector<3x512xbf16> to vector<3x444xbf16>
    %cst_12 = arith.constant dense<0.000000e+00> : vector<16x444xf32>
    %18 = tpu.matmul %16, %17, %cst_12 {dimension_numbers = #tpu.dot_dimension_numbers<[1], [0], [0], [1], [0, 0, 1, 1], [], []>} : vector<16x3xbf16>, vector<3x444xbf16>, vector<16x444xf32> -> vector<16x444xf32>
    %19 = arith.addf %14, %18 : vector<16x444xf32>
    %c4 = arith.constant 4 : index
    %c0_13 = arith.constant 0 : index
    %c0_14 = arith.constant 0 : index
    %20 = vector.load %arg1[%c4, %c0_13, %c0_14] : memref<25x16x3xbf16, #tpu.memory_space<vmem>>, vector<1x16x3xbf16>
    %21 = vector.shape_cast %20 : vector<1x16x3xbf16> to vector<16x3xbf16>
    %22 = vector.extract_strided_slice %0 {offsets = [0, 4], sizes = [3, 444], strides = [1, 1]} : vector<3x512xbf16> to vector<3x444xbf16>
    %cst_15 = arith.constant dense<0.000000e+00> : vector<16x444xf32>
    %23 = tpu.matmul %21, %22, %cst_15 {dimension_numbers = #tpu.dot_dimension_numbers<[1], [0], [0], [1], [0, 0, 1, 1], [], []>} : vector<16x3xbf16>, vector<3x444xbf16>, vector<16x444xf32> -> vector<16x444xf32>
    %24 = arith.addf %19, %23 : vector<16x444xf32>
    %c5 = arith.constant 5 : index
    %c0_16 = arith.constant 0 : index
    %c0_17 = arith.constant 0 : index
    %25 = vector.load %arg1[%c5, %c0_16, %c0_17] : memref<25x16x3xbf16, #tpu.memory_space<vmem>>, vector<1x16x3xbf16>
    %26 = vector.shape_cast %25 : vector<1x16x3xbf16> to vector<16x3xbf16>
    %27 = vector.extract_strided_slice %0 {offsets = [0, 16], sizes = [3, 444], strides = [1, 1]} : vector<3x512xbf16> to vector<3x444xbf16>
    %cst_18 = arith.constant dense<0.000000e+00> : vector<16x444xf32>
    %28 = tpu.matmul %26, %27, %cst_18 {dimension_numbers = #tpu.dot_dimension_numbers<[1], [0], [0], [1], [0, 0, 1, 1], [], []>} : vector<16x3xbf16>, vector<3x444xbf16>, vector<16x444xf32> -> vector<16x444xf32>
    %29 = arith.addf %24, %28 : vector<16x444xf32>
    %c6 = arith.constant 6 : index
    %c0_19 = arith.constant 0 : index
    %c0_20 = arith.constant 0 : index
    %30 = vector.load %arg1[%c6, %c0_19, %c0_20] : memref<25x16x3xbf16, #tpu.memory_space<vmem>>, vector<1x16x3xbf16>
    %31 = vector.shape_cast %30 : vector<1x16x3xbf16> to vector<16x3xbf16>
    %32 = vector.extract_strided_slice %0 {offsets = [0, 17], sizes = [3, 444], strides = [1, 1]} : vector<3x512xbf16> to vector<3x444xbf16>
    %cst_21 = arith.constant dense<0.000000e+00> : vector<16x444xf32>
    %33 = tpu.matmul %31, %32, %cst_21 {dimension_numbers = #tpu.dot_dimension_numbers<[1], [0], [0], [1], [0, 0, 1, 1], [], []>} : vector<16x3xbf16>, vector<3x444xbf16>, vector<16x444xf32> -> vector<16x444xf32>
    %34 = arith.addf %29, %33 : vector<16x444xf32>
    %c7 = arith.constant 7 : index
    %c0_22 = arith.constant 0 : index
    %c0_23 = arith.constant 0 : index
    %35 = vector.load %arg1[%c7, %c0_22, %c0_23] : memref<25x16x3xbf16, #tpu.memory_space<vmem>>, vector<1x16x3xbf16>
    %36 = vector.shape_cast %35 : vector<1x16x3xbf16> to vector<16x3xbf16>
    %37 = vector.extract_strided_slice %0 {offsets = [0, 18], sizes = [3, 444], strides = [1, 1]} : vector<3x512xbf16> to vector<3x444xbf16>
    %cst_24 = arith.constant dense<0.000000e+00> : vector<16x444xf32>
    %38 = tpu.matmul %36, %37, %cst_24 {dimension_numbers = #tpu.dot_dimension_numbers<[1], [0], [0], [1], [0, 0, 1, 1], [], []>} : vector<16x3xbf16>, vector<3x444xbf16>, vector<16x444xf32> -> vector<16x444xf32>
    %39 = arith.addf %34, %38 : vector<16x444xf32>
    %c8 = arith.constant 8 : index
    %c0_25 = arith.constant 0 : index
    %c0_26 = arith.constant 0 : index
    %40 = vector.load %arg1[%c8, %c0_25, %c0_26] : memref<25x16x3xbf16, #tpu.memory_space<vmem>>, vector<1x16x3xbf16>
    %41 = vector.shape_cast %40 : vector<1x16x3xbf16> to vector<16x3xbf16>
    %42 = vector.extract_strided_slice %0 {offsets = [0, 19], sizes = [3, 444], strides = [1, 1]} : vector<3x512xbf16> to vector<3x444xbf16>
    %cst_27 = arith.constant dense<0.000000e+00> : vector<16x444xf32>
    %43 = tpu.matmul %41, %42, %cst_27 {dimension_numbers = #tpu.dot_dimension_numbers<[1], [0], [0], [1], [0, 0, 1, 1], [], []>} : vector<16x3xbf16>, vector<3x444xbf16>, vector<16x444xf32> -> vector<16x444xf32>
    %44 = arith.addf %39, %43 : vector<16x444xf32>
    %c9 = arith.constant 9 : index
    %c0_28 = arith.constant 0 : index
    %c0_29 = arith.constant 0 : index
    %45 = vector.load %arg1[%c9, %c0_28, %c0_29] : memref<25x16x3xbf16, #tpu.memory_space<vmem>>, vector<1x16x3xbf16>
    %46 = vector.shape_cast %45 : vector<1x16x3xbf16> to vector<16x3xbf16>
    %47 = vector.extract_strided_slice %0 {offsets = [0, 20], sizes = [3, 444], strides = [1, 1]} : vector<3x512xbf16> to vector<3x444xbf16>
    %cst_30 = arith.constant dense<0.000000e+00> : vector<16x444xf32>
    %48 = tpu.matmul %46, %47, %cst_30 {dimension_numbers = #tpu.dot_dimension_numbers<[1], [0], [0], [1], [0, 0, 1, 1], [], []>} : vector<16x3xbf16>, vector<3x444xbf16>, vector<16x444xf32> -> vector<16x444xf32>
    %49 = arith.addf %44, %48 : vector<16x444xf32>
    %c10 = arith.constant 10 : index
    %c0_31 = arith.constant 0 : index
    %c0_32 = arith.constant 0 : index
    %50 = vector.load %arg1[%c10, %c0_31, %c0_32] : memref<25x16x3xbf16, #tpu.memory_space<vmem>>, vector<1x16x3xbf16>
    %51 = vector.shape_cast %50 : vector<1x16x3xbf16> to vector<16x3xbf16>
    %52 = vector.extract_strided_slice %0 {offsets = [0, 32], sizes = [3, 444], strides = [1, 1]} : vector<3x512xbf16> to vector<3x444xbf16>
    %cst_33 = arith.constant dense<0.000000e+00> : vector<16x444xf32>
    %53 = tpu.matmul %51, %52, %cst_33 {dimension_numbers = #tpu.dot_dimension_numbers<[1], [0], [0], [1], [0, 0, 1, 1], [], []>} : vector<16x3xbf16>, vector<3x444xbf16>, vector<16x444xf32> -> vector<16x444xf32>
    %54 = arith.addf %49, %53 : vector<16x444xf32>
    %c11 = arith.constant 11 : index
    %c0_34 = arith.constant 0 : index
    %c0_35 = arith.constant 0 : index
    %55 = vector.load %arg1[%c11, %c0_34, %c0_35] : memref<25x16x3xbf16, #tpu.memory_space<vmem>>, vector<1x16x3xbf16>
    %56 = vector.shape_cast %55 : vector<1x16x3xbf16> to vector<16x3xbf16>
    %57 = vector.extract_strided_slice %0 {offsets = [0, 33], sizes = [3, 444], strides = [1, 1]} : vector<3x512xbf16> to vector<3x444xbf16>
    %cst_36 = arith.constant dense<0.000000e+00> : vector<16x444xf32>
    %58 = tpu.matmul %56, %57, %cst_36 {dimension_numbers = #tpu.dot_dimension_numbers<[1], [0], [0], [1], [0, 0, 1, 1], [], []>} : vector<16x3xbf16>, vector<3x444xbf16>, vector<16x444xf32> -> vector<16x444xf32>
    %59 = arith.addf %54, %58 : vector<16x444xf32>
    %c12 = arith.constant 12 : index
    %c0_37 = arith.constant 0 : index
    %c0_38 = arith.constant 0 : index
    %60 = vector.load %arg1[%c12, %c0_37, %c0_38] : memref<25x16x3xbf16, #tpu.memory_space<vmem>>, vector<1x16x3xbf16>
    %61 = vector.shape_cast %60 : vector<1x16x3xbf16> to vector<16x3xbf16>
    %62 = vector.extract_strided_slice %0 {offsets = [0, 34], sizes = [3, 444], strides = [1, 1]} : vector<3x512xbf16> to vector<3x444xbf16>
    %cst_39 = arith.constant dense<0.000000e+00> : vector<16x444xf32>
    %63 = tpu.matmul %61, %62, %cst_39 {dimension_numbers = #tpu.dot_dimension_numbers<[1], [0], [0], [1], [0, 0, 1, 1], [], []>} : vector<16x3xbf16>, vector<3x444xbf16>, vector<16x444xf32> -> vector<16x444xf32>
    %64 = arith.addf %59, %63 : vector<16x444xf32>
    %c13 = arith.constant 13 : index
    %c0_40 = arith.constant 0 : index
    %c0_41 = arith.constant 0 : index
    %65 = vector.load %arg1[%c13, %c0_40, %c0_41] : memref<25x16x3xbf16, #tpu.memory_space<vmem>>, vector<1x16x3xbf16>
    %66 = vector.shape_cast %65 : vector<1x16x3xbf16> to vector<16x3xbf16>
    %67 = vector.extract_strided_slice %0 {offsets = [0, 35], sizes = [3, 444], strides = [1, 1]} : vector<3x512xbf16> to vector<3x444xbf16>
    %cst_42 = arith.constant dense<0.000000e+00> : vector<16x444xf32>
    %68 = tpu.matmul %66, %67, %cst_42 {dimension_numbers = #tpu.dot_dimension_numbers<[1], [0], [0], [1], [0, 0, 1, 1], [], []>} : vector<16x3xbf16>, vector<3x444xbf16>, vector<16x444xf32> -> vector<16x444xf32>
    %69 = arith.addf %64, %68 : vector<16x444xf32>
    %c14 = arith.constant 14 : index
    %c0_43 = arith.constant 0 : index
    %c0_44 = arith.constant 0 : index
    %70 = vector.load %arg1[%c14, %c0_43, %c0_44] : memref<25x16x3xbf16, #tpu.memory_space<vmem>>, vector<1x16x3xbf16>
    %71 = vector.shape_cast %70 : vector<1x16x3xbf16> to vector<16x3xbf16>
    %72 = vector.extract_strided_slice %0 {offsets = [0, 36], sizes = [3, 444], strides = [1, 1]} : vector<3x512xbf16> to vector<3x444xbf16>
    %cst_45 = arith.constant dense<0.000000e+00> : vector<16x444xf32>
    %73 = tpu.matmul %71, %72, %cst_45 {dimension_numbers = #tpu.dot_dimension_numbers<[1], [0], [0], [1], [0, 0, 1, 1], [], []>} : vector<16x3xbf16>, vector<3x444xbf16>, vector<16x444xf32> -> vector<16x444xf32>
    %74 = arith.addf %69, %73 : vector<16x444xf32>
    %c15 = arith.constant 15 : index
    %c0_46 = arith.constant 0 : index
    %c0_47 = arith.constant 0 : index
    %75 = vector.load %arg1[%c15, %c0_46, %c0_47] : memref<25x16x3xbf16, #tpu.memory_space<vmem>>, vector<1x16x3xbf16>
    %76 = vector.shape_cast %75 : vector<1x16x3xbf16> to vector<16x3xbf16>
    %77 = vector.extract_strided_slice %0 {offsets = [0, 48], sizes = [3, 444], strides = [1, 1]} : vector<3x512xbf16> to vector<3x444xbf16>
    %cst_48 = arith.constant dense<0.000000e+00> : vector<16x444xf32>
    %78 = tpu.matmul %76, %77, %cst_48 {dimension_numbers = #tpu.dot_dimension_numbers<[1], [0], [0], [1], [0, 0, 1, 1], [], []>} : vector<16x3xbf16>, vector<3x444xbf16>, vector<16x444xf32> -> vector<16x444xf32>
    %79 = arith.addf %74, %78 : vector<16x444xf32>
    %c16 = arith.constant 16 : index
    %c0_49 = arith.constant 0 : index
    %c0_50 = arith.constant 0 : index
    %80 = vector.load %arg1[%c16, %c0_49, %c0_50] : memref<25x16x3xbf16, #tpu.memory_space<vmem>>, vector<1x16x3xbf16>
    %81 = vector.shape_cast %80 : vector<1x16x3xbf16> to vector<16x3xbf16>
    %82 = vector.extract_strided_slice %0 {offsets = [0, 49], sizes = [3, 444], strides = [1, 1]} : vector<3x512xbf16> to vector<3x444xbf16>
    %cst_51 = arith.constant dense<0.000000e+00> : vector<16x444xf32>
    %83 = tpu.matmul %81, %82, %cst_51 {dimension_numbers = #tpu.dot_dimension_numbers<[1], [0], [0], [1], [0, 0, 1, 1], [], []>} : vector<16x3xbf16>, vector<3x444xbf16>, vector<16x444xf32> -> vector<16x444xf32>
    %84 = arith.addf %79, %83 : vector<16x444xf32>
    %c17 = arith.constant 17 : index
    %c0_52 = arith.constant 0 : index
    %c0_53 = arith.constant 0 : index
    %85 = vector.load %arg1[%c17, %c0_52, %c0_53] : memref<25x16x3xbf16, #tpu.memory_space<vmem>>, vector<1x16x3xbf16>
    %86 = vector.shape_cast %85 : vector<1x16x3xbf16> to vector<16x3xbf16>
    %87 = vector.extract_strided_slice %0 {offsets = [0, 50], sizes = [3, 444], strides = [1, 1]} : vector<3x512xbf16> to vector<3x444xbf16>
    %cst_54 = arith.constant dense<0.000000e+00> : vector<16x444xf32>
    %88 = tpu.matmul %86, %87, %cst_54 {dimension_numbers = #tpu.dot_dimension_numbers<[1], [0], [0], [1], [0, 0, 1, 1], [], []>} : vector<16x3xbf16>, vector<3x444xbf16>, vector<16x444xf32> -> vector<16x444xf32>
    %89 = arith.addf %84, %88 : vector<16x444xf32>
    %c18 = arith.constant 18 : index
    %c0_55 = arith.constant 0 : index
    %c0_56 = arith.constant 0 : index
    %90 = vector.load %arg1[%c18, %c0_55, %c0_56] : memref<25x16x3xbf16, #tpu.memory_space<vmem>>, vector<1x16x3xbf16>
    %91 = vector.shape_cast %90 : vector<1x16x3xbf16> to vector<16x3xbf16>
    %92 = vector.extract_strided_slice %0 {offsets = [0, 51], sizes = [3, 444], strides = [1, 1]} : vector<3x512xbf16> to vector<3x444xbf16>
    %cst_57 = arith.constant dense<0.000000e+00> : vector<16x444xf32>
    %93 = tpu.matmul %91, %92, %cst_57 {dimension_numbers = #tpu.dot_dimension_numbers<[1], [0], [0], [1], [0, 0, 1, 1], [], []>} : vector<16x3xbf16>, vector<3x444xbf16>, vector<16x444xf32> -> vector<16x444xf32>
    %94 = arith.addf %89, %93 : vector<16x444xf32>
    %c19 = arith.constant 19 : index
    %c0_58 = arith.constant 0 : index
    %c0_59 = arith.constant 0 : index
    %95 = vector.load %arg1[%c19, %c0_58, %c0_59] : memref<25x16x3xbf16, #tpu.memory_space<vmem>>, vector<1x16x3xbf16>
    %96 = vector.shape_cast %95 : vector<1x16x3xbf16> to vector<16x3xbf16>
    %97 = vector.extract_strided_slice %0 {offsets = [0, 52], sizes = [3, 444], strides = [1, 1]} : vector<3x512xbf16> to vector<3x444xbf16>
    %cst_60 = arith.constant dense<0.000000e+00> : vector<16x444xf32>
    %98 = tpu.matmul %96, %97, %cst_60 {dimension_numbers = #tpu.dot_dimension_numbers<[1], [0], [0], [1], [0, 0, 1, 1], [], []>} : vector<16x3xbf16>, vector<3x444xbf16>, vector<16x444xf32> -> vector<16x444xf32>
    %99 = arith.addf %94, %98 : vector<16x444xf32>
    %c20 = arith.constant 20 : index
    %c0_61 = arith.constant 0 : index
    %c0_62 = arith.constant 0 : index
    %100 = vector.load %arg1[%c20, %c0_61, %c0_62] : memref<25x16x3xbf16, #tpu.memory_space<vmem>>, vector<1x16x3xbf16>
    %101 = vector.shape_cast %100 : vector<1x16x3xbf16> to vector<16x3xbf16>
    %102 = vector.extract_strided_slice %0 {offsets = [0, 64], sizes = [3, 444], strides = [1, 1]} : vector<3x512xbf16> to vector<3x444xbf16>
    %cst_63 = arith.constant dense<0.000000e+00> : vector<16x444xf32>
    %103 = tpu.matmul %101, %102, %cst_63 {dimension_numbers = #tpu.dot_dimension_numbers<[1], [0], [0], [1], [0, 0, 1, 1], [], []>} : vector<16x3xbf16>, vector<3x444xbf16>, vector<16x444xf32> -> vector<16x444xf32>
    %104 = arith.addf %99, %103 : vector<16x444xf32>
    %c21 = arith.constant 21 : index
    %c0_64 = arith.constant 0 : index
    %c0_65 = arith.constant 0 : index
    %105 = vector.load %arg1[%c21, %c0_64, %c0_65] : memref<25x16x3xbf16, #tpu.memory_space<vmem>>, vector<1x16x3xbf16>
    %106 = vector.shape_cast %105 : vector<1x16x3xbf16> to vector<16x3xbf16>
    %107 = vector.extract_strided_slice %0 {offsets = [0, 65], sizes = [3, 444], strides = [1, 1]} : vector<3x512xbf16> to vector<3x444xbf16>
    %cst_66 = arith.constant dense<0.000000e+00> : vector<16x444xf32>
    %108 = tpu.matmul %106, %107, %cst_66 {dimension_numbers = #tpu.dot_dimension_numbers<[1], [0], [0], [1], [0, 0, 1, 1], [], []>} : vector<16x3xbf16>, vector<3x444xbf16>, vector<16x444xf32> -> vector<16x444xf32>
    %109 = arith.addf %104, %108 : vector<16x444xf32>
    %c22 = arith.constant 22 : index
    %c0_67 = arith.constant 0 : index
    %c0_68 = arith.constant 0 : index
    %110 = vector.load %arg1[%c22, %c0_67, %c0_68] : memref<25x16x3xbf16, #tpu.memory_space<vmem>>, vector<1x16x3xbf16>
    %111 = vector.shape_cast %110 : vector<1x16x3xbf16> to vector<16x3xbf16>
    %112 = vector.extract_strided_slice %0 {offsets = [0, 66], sizes = [3, 444], strides = [1, 1]} : vector<3x512xbf16> to vector<3x444xbf16>
    %cst_69 = arith.constant dense<0.000000e+00> : vector<16x444xf32>
    %113 = tpu.matmul %111, %112, %cst_69 {dimension_numbers = #tpu.dot_dimension_numbers<[1], [0], [0], [1], [0, 0, 1, 1], [], []>} : vector<16x3xbf16>, vector<3x444xbf16>, vector<16x444xf32> -> vector<16x444xf32>
    %114 = arith.addf %109, %113 : vector<16x444xf32>
    %c23 = arith.constant 23 : index
    %c0_70 = arith.constant 0 : index
    %c0_71 = arith.constant 0 : index
    %115 = vector.load %arg1[%c23, %c0_70, %c0_71] : memref<25x16x3xbf16, #tpu.memory_space<vmem>>, vector<1x16x3xbf16>
    %116 = vector.shape_cast %115 : vector<1x16x3xbf16> to vector<16x3xbf16>
    %117 = vector.extract_strided_slice %0 {offsets = [0, 67], sizes = [3, 444], strides = [1, 1]} : vector<3x512xbf16> to vector<3x444xbf16>
    %cst_72 = arith.constant dense<0.000000e+00> : vector<16x444xf32>
    %118 = tpu.matmul %116, %117, %cst_72 {dimension_numbers = #tpu.dot_dimension_numbers<[1], [0], [0], [1], [0, 0, 1, 1], [], []>} : vector<16x3xbf16>, vector<3x444xbf16>, vector<16x444xf32> -> vector<16x444xf32>
    %119 = arith.addf %114, %118 : vector<16x444xf32>
    %c24 = arith.constant 24 : index
    %c0_73 = arith.constant 0 : index
    %c0_74 = arith.constant 0 : index
    %120 = vector.load %arg1[%c24, %c0_73, %c0_74] : memref<25x16x3xbf16, #tpu.memory_space<vmem>>, vector<1x16x3xbf16>
    %121 = vector.shape_cast %120 : vector<1x16x3xbf16> to vector<16x3xbf16>
    %122 = vector.extract_strided_slice %0 {offsets = [0, 68], sizes = [3, 444], strides = [1, 1]} : vector<3x512xbf16> to vector<3x444xbf16>
    %cst_75 = arith.constant dense<0.000000e+00> : vector<16x444xf32>
    %123 = tpu.matmul %121, %122, %cst_75 {dimension_numbers = #tpu.dot_dimension_numbers<[1], [0], [0], [1], [0, 0, 1, 1], [], []>} : vector<16x3xbf16>, vector<3x444xbf16>, vector<16x444xf32> -> vector<16x444xf32>
    %124 = arith.addf %119, %123 : vector<16x444xf32>
    %c0_76 = arith.constant 0 : index
    %c0_77 = arith.constant 0 : index
    %125 = vector.load %arg2[%c0_76, %c0_77] : memref<16x1xf32, #tpu.memory_space<vmem>>, vector<16x1xf32>
    %126 = vector.broadcast %125 : vector<16x1xf32> to vector<16x444xf32>
    %127 = arith.addf %124, %126 : vector<16x444xf32>
    %c0_78 = arith.constant 0 : index
    %c0_79 = arith.constant 0 : index
    %128 = vector.load %arg5[%c0_78, %c0_79] : memref<1x444xf32, #tpu.memory_space<vmem>>, vector<1x444xf32>
    %129 = vector.broadcast %128 : vector<1x444xf32> to vector<16x444xf32>
    %130 = arith.mulf %127, %129 : vector<16x444xf32>
    %cst_80 = arith.constant dense<0.000000e+00> : vector<16xf32>
    %131 = vector.multi_reduction <add>, %130, %cst_80 [1] : vector<16x444xf32> to vector<16xf32>
    %132 = vector.shape_cast %131 : vector<16xf32> to vector<16x1xf32>
    %cst_81 = arith.constant 0.00347222225 : f32
    %133 = vector.broadcast %cst_81 : f32 to vector<16x1xf32>
    %134 = arith.mulf %132, %133 : vector<16x1xf32>
    %135 = vector.broadcast %134 : vector<16x1xf32> to vector<16x444xf32>
    %136 = arith.subf %127, %135 : vector<16x444xf32>
    %137 = arith.mulf %136, %136 : vector<16x444xf32>
    %138 = vector.broadcast %128 : vector<1x444xf32> to vector<16x444xf32>
    %139 = arith.mulf %137, %138 : vector<16x444xf32>
    %cst_82 = arith.constant dense<0.000000e+00> : vector<16xf32>
    %140 = vector.multi_reduction <add>, %139, %cst_82 [1] : vector<16x444xf32> to vector<16xf32>
    %141 = vector.shape_cast %140 : vector<16xf32> to vector<16x1xf32>
    %cst_83 = arith.constant 0.00347222225 : f32
    %142 = vector.broadcast %cst_83 : f32 to vector<16x1xf32>
    %143 = arith.mulf %141, %142 : vector<16x1xf32>
    %cst_84 = arith.constant 9.99999974E-6 : f32
    %144 = vector.broadcast %cst_84 : f32 to vector<16x1xf32>
    %145 = arith.addf %143, %144 : vector<16x1xf32>
    %146 = math.rsqrt %145 : vector<16x1xf32>
    %147 = vector.broadcast %146 : vector<16x1xf32> to vector<16x444xf32>
    %148 = arith.mulf %136, %147 : vector<16x444xf32>
    %c0_85 = arith.constant 0 : index
    %c0_86 = arith.constant 0 : index
    %149 = vector.load %arg3[%c0_85, %c0_86] : memref<16x1xf32, #tpu.memory_space<vmem>>, vector<16x1xf32>
    %150 = vector.broadcast %149 : vector<16x1xf32> to vector<16x444xf32>
    %151 = arith.mulf %148, %150 : vector<16x444xf32>
    %c0_87 = arith.constant 0 : index
    %c0_88 = arith.constant 0 : index
    %152 = vector.load %arg4[%c0_87, %c0_88] : memref<16x1xf32, #tpu.memory_space<vmem>>, vector<16x1xf32>
    %153 = vector.broadcast %152 : vector<16x1xf32> to vector<16x444xf32>
    %154 = arith.addf %151, %153 : vector<16x444xf32>
    %cst_89 = arith.constant 0.000000e+00 : f32
    %155 = vector.broadcast %cst_89 : f32 to vector<16x444xf32>
    %156 = arith.maximumf %154, %155 : vector<16x444xf32>
    %157 = arith.truncf %156 : vector<16x444xf32> to vector<16x444xbf16>
    %c0_90 = arith.constant 0 : index
    %c0_91 = arith.constant 0 : index
    %c0_92 = arith.constant 0 : index
    %158 = vector.load %arg6[%c0_90, %c0_91, %c0_92] : memref<9x36x16xbf16, #tpu.memory_space<vmem>>, vector<1x36x16xbf16>
    %159 = vector.shape_cast %158 : vector<1x36x16xbf16> to vector<36x16xbf16>
    %160 = vector.extract_strided_slice %157 {offsets = [0, 0], sizes = [16, 410], strides = [1, 1]} : vector<16x444xbf16> to vector<16x410xbf16>
    %cst_93 = arith.constant dense<0.000000e+00> : vector<36x410xf32>
    %161 = tpu.matmul %159, %160, %cst_93 {dimension_numbers = #tpu.dot_dimension_numbers<[1], [0], [0], [1], [0, 0, 1, 1], [], []>} : vector<36x16xbf16>, vector<16x410xbf16>, vector<36x410xf32> -> vector<36x410xf32>
    %c1_94 = arith.constant 1 : index
    %c0_95 = arith.constant 0 : index
    %c0_96 = arith.constant 0 : index
    %162 = vector.load %arg6[%c1_94, %c0_95, %c0_96] : memref<9x36x16xbf16, #tpu.memory_space<vmem>>, vector<1x36x16xbf16>
    %163 = vector.shape_cast %162 : vector<1x36x16xbf16> to vector<36x16xbf16>
    %164 = vector.extract_strided_slice %157 {offsets = [0, 1], sizes = [16, 410], strides = [1, 1]} : vector<16x444xbf16> to vector<16x410xbf16>
    %cst_97 = arith.constant dense<0.000000e+00> : vector<36x410xf32>
    %165 = tpu.matmul %163, %164, %cst_97 {dimension_numbers = #tpu.dot_dimension_numbers<[1], [0], [0], [1], [0, 0, 1, 1], [], []>} : vector<36x16xbf16>, vector<16x410xbf16>, vector<36x410xf32> -> vector<36x410xf32>
    %166 = arith.addf %161, %165 : vector<36x410xf32>
    %c2_98 = arith.constant 2 : index
    %c0_99 = arith.constant 0 : index
    %c0_100 = arith.constant 0 : index
    %167 = vector.load %arg6[%c2_98, %c0_99, %c0_100] : memref<9x36x16xbf16, #tpu.memory_space<vmem>>, vector<1x36x16xbf16>
    %168 = vector.shape_cast %167 : vector<1x36x16xbf16> to vector<36x16xbf16>
    %169 = vector.extract_strided_slice %157 {offsets = [0, 2], sizes = [16, 410], strides = [1, 1]} : vector<16x444xbf16> to vector<16x410xbf16>
    %cst_101 = arith.constant dense<0.000000e+00> : vector<36x410xf32>
    %170 = tpu.matmul %168, %169, %cst_101 {dimension_numbers = #tpu.dot_dimension_numbers<[1], [0], [0], [1], [0, 0, 1, 1], [], []>} : vector<36x16xbf16>, vector<16x410xbf16>, vector<36x410xf32> -> vector<36x410xf32>
    %171 = arith.addf %166, %170 : vector<36x410xf32>
    %c3_102 = arith.constant 3 : index
    %c0_103 = arith.constant 0 : index
    %c0_104 = arith.constant 0 : index
    %172 = vector.load %arg6[%c3_102, %c0_103, %c0_104] : memref<9x36x16xbf16, #tpu.memory_space<vmem>>, vector<1x36x16xbf16>
    %173 = vector.shape_cast %172 : vector<1x36x16xbf16> to vector<36x16xbf16>
    %174 = vector.extract_strided_slice %157 {offsets = [0, 16], sizes = [16, 410], strides = [1, 1]} : vector<16x444xbf16> to vector<16x410xbf16>
    %cst_105 = arith.constant dense<0.000000e+00> : vector<36x410xf32>
    %175 = tpu.matmul %173, %174, %cst_105 {dimension_numbers = #tpu.dot_dimension_numbers<[1], [0], [0], [1], [0, 0, 1, 1], [], []>} : vector<36x16xbf16>, vector<16x410xbf16>, vector<36x410xf32> -> vector<36x410xf32>
    %176 = arith.addf %171, %175 : vector<36x410xf32>
    %c4_106 = arith.constant 4 : index
    %c0_107 = arith.constant 0 : index
    %c0_108 = arith.constant 0 : index
    %177 = vector.load %arg6[%c4_106, %c0_107, %c0_108] : memref<9x36x16xbf16, #tpu.memory_space<vmem>>, vector<1x36x16xbf16>
    %178 = vector.shape_cast %177 : vector<1x36x16xbf16> to vector<36x16xbf16>
    %179 = vector.extract_strided_slice %157 {offsets = [0, 17], sizes = [16, 410], strides = [1, 1]} : vector<16x444xbf16> to vector<16x410xbf16>
    %cst_109 = arith.constant dense<0.000000e+00> : vector<36x410xf32>
    %180 = tpu.matmul %178, %179, %cst_109 {dimension_numbers = #tpu.dot_dimension_numbers<[1], [0], [0], [1], [0, 0, 1, 1], [], []>} : vector<36x16xbf16>, vector<16x410xbf16>, vector<36x410xf32> -> vector<36x410xf32>
    %181 = arith.addf %176, %180 : vector<36x410xf32>
    %c5_110 = arith.constant 5 : index
    %c0_111 = arith.constant 0 : index
    %c0_112 = arith.constant 0 : index
    %182 = vector.load %arg6[%c5_110, %c0_111, %c0_112] : memref<9x36x16xbf16, #tpu.memory_space<vmem>>, vector<1x36x16xbf16>
    %183 = vector.shape_cast %182 : vector<1x36x16xbf16> to vector<36x16xbf16>
    %184 = vector.extract_strided_slice %157 {offsets = [0, 18], sizes = [16, 410], strides = [1, 1]} : vector<16x444xbf16> to vector<16x410xbf16>
    %cst_113 = arith.constant dense<0.000000e+00> : vector<36x410xf32>
    %185 = tpu.matmul %183, %184, %cst_113 {dimension_numbers = #tpu.dot_dimension_numbers<[1], [0], [0], [1], [0, 0, 1, 1], [], []>} : vector<36x16xbf16>, vector<16x410xbf16>, vector<36x410xf32> -> vector<36x410xf32>
    %186 = arith.addf %181, %185 : vector<36x410xf32>
    %c6_114 = arith.constant 6 : index
    %c0_115 = arith.constant 0 : index
    %c0_116 = arith.constant 0 : index
    %187 = vector.load %arg6[%c6_114, %c0_115, %c0_116] : memref<9x36x16xbf16, #tpu.memory_space<vmem>>, vector<1x36x16xbf16>
    %188 = vector.shape_cast %187 : vector<1x36x16xbf16> to vector<36x16xbf16>
    %189 = vector.extract_strided_slice %157 {offsets = [0, 32], sizes = [16, 410], strides = [1, 1]} : vector<16x444xbf16> to vector<16x410xbf16>
    %cst_117 = arith.constant dense<0.000000e+00> : vector<36x410xf32>
    %190 = tpu.matmul %188, %189, %cst_117 {dimension_numbers = #tpu.dot_dimension_numbers<[1], [0], [0], [1], [0, 0, 1, 1], [], []>} : vector<36x16xbf16>, vector<16x410xbf16>, vector<36x410xf32> -> vector<36x410xf32>
    %191 = arith.addf %186, %190 : vector<36x410xf32>
    %c7_118 = arith.constant 7 : index
    %c0_119 = arith.constant 0 : index
    %c0_120 = arith.constant 0 : index
    %192 = vector.load %arg6[%c7_118, %c0_119, %c0_120] : memref<9x36x16xbf16, #tpu.memory_space<vmem>>, vector<1x36x16xbf16>
    %193 = vector.shape_cast %192 : vector<1x36x16xbf16> to vector<36x16xbf16>
    %194 = vector.extract_strided_slice %157 {offsets = [0, 33], sizes = [16, 410], strides = [1, 1]} : vector<16x444xbf16> to vector<16x410xbf16>
    %cst_121 = arith.constant dense<0.000000e+00> : vector<36x410xf32>
    %195 = tpu.matmul %193, %194, %cst_121 {dimension_numbers = #tpu.dot_dimension_numbers<[1], [0], [0], [1], [0, 0, 1, 1], [], []>} : vector<36x16xbf16>, vector<16x410xbf16>, vector<36x410xf32> -> vector<36x410xf32>
    %196 = arith.addf %191, %195 : vector<36x410xf32>
    %c8_122 = arith.constant 8 : index
    %c0_123 = arith.constant 0 : index
    %c0_124 = arith.constant 0 : index
    %197 = vector.load %arg6[%c8_122, %c0_123, %c0_124] : memref<9x36x16xbf16, #tpu.memory_space<vmem>>, vector<1x36x16xbf16>
    %198 = vector.shape_cast %197 : vector<1x36x16xbf16> to vector<36x16xbf16>
    %199 = vector.extract_strided_slice %157 {offsets = [0, 34], sizes = [16, 410], strides = [1, 1]} : vector<16x444xbf16> to vector<16x410xbf16>
    %cst_125 = arith.constant dense<0.000000e+00> : vector<36x410xf32>
    %200 = tpu.matmul %198, %199, %cst_125 {dimension_numbers = #tpu.dot_dimension_numbers<[1], [0], [0], [1], [0, 0, 1, 1], [], []>} : vector<36x16xbf16>, vector<16x410xbf16>, vector<36x410xf32> -> vector<36x410xf32>
    %201 = arith.addf %196, %200 : vector<36x410xf32>
    %c0_126 = arith.constant 0 : index
    %c0_127 = arith.constant 0 : index
    %202 = vector.load %arg7[%c0_126, %c0_127] : memref<36x1xf32, #tpu.memory_space<vmem>>, vector<36x1xf32>
    %203 = vector.broadcast %202 : vector<36x1xf32> to vector<36x410xf32>
    %204 = arith.addf %201, %203 : vector<36x410xf32>
    %c0_128 = arith.constant 0 : index
    %c0_129 = arith.constant 0 : index
    %205 = vector.load %arg10[%c0_128, %c0_129] : memref<1x410xf32, #tpu.memory_space<vmem>>, vector<1x410xf32>
    %206 = vector.broadcast %205 : vector<1x410xf32> to vector<36x410xf32>
    %207 = arith.mulf %204, %206 : vector<36x410xf32>
    %cst_130 = arith.constant dense<0.000000e+00> : vector<36xf32>
    %208 = vector.multi_reduction <add>, %207, %cst_130 [1] : vector<36x410xf32> to vector<36xf32>
    %209 = vector.shape_cast %208 : vector<36xf32> to vector<36x1xf32>
    %cst_131 = arith.constant 5.000000e-03 : f32
    %210 = vector.broadcast %cst_131 : f32 to vector<36x1xf32>
    %211 = arith.mulf %209, %210 : vector<36x1xf32>
    %212 = vector.broadcast %211 : vector<36x1xf32> to vector<36x410xf32>
    %213 = arith.subf %204, %212 : vector<36x410xf32>
    %214 = arith.mulf %213, %213 : vector<36x410xf32>
    %215 = vector.broadcast %205 : vector<1x410xf32> to vector<36x410xf32>
    %216 = arith.mulf %214, %215 : vector<36x410xf32>
    %cst_132 = arith.constant dense<0.000000e+00> : vector<36xf32>
    %217 = vector.multi_reduction <add>, %216, %cst_132 [1] : vector<36x410xf32> to vector<36xf32>
    %218 = vector.shape_cast %217 : vector<36xf32> to vector<36x1xf32>
    %cst_133 = arith.constant 5.000000e-03 : f32
    %219 = vector.broadcast %cst_133 : f32 to vector<36x1xf32>
    %220 = arith.mulf %218, %219 : vector<36x1xf32>
    %cst_134 = arith.constant 9.99999974E-6 : f32
    %221 = vector.broadcast %cst_134 : f32 to vector<36x1xf32>
    %222 = arith.addf %220, %221 : vector<36x1xf32>
    %223 = math.rsqrt %222 : vector<36x1xf32>
    %224 = vector.broadcast %223 : vector<36x1xf32> to vector<36x410xf32>
    %225 = arith.mulf %213, %224 : vector<36x410xf32>
    %c0_135 = arith.constant 0 : index
    %c0_136 = arith.constant 0 : index
    %226 = vector.load %arg8[%c0_135, %c0_136] : memref<36x1xf32, #tpu.memory_space<vmem>>, vector<36x1xf32>
    %227 = vector.broadcast %226 : vector<36x1xf32> to vector<36x410xf32>
    %228 = arith.mulf %225, %227 : vector<36x410xf32>
    %c0_137 = arith.constant 0 : index
    %c0_138 = arith.constant 0 : index
    %229 = vector.load %arg9[%c0_137, %c0_138] : memref<36x1xf32, #tpu.memory_space<vmem>>, vector<36x1xf32>
    %230 = vector.broadcast %229 : vector<36x1xf32> to vector<36x410xf32>
    %231 = arith.addf %228, %230 : vector<36x410xf32>
    %cst_139 = arith.constant 0.000000e+00 : f32
    %232 = vector.broadcast %cst_139 : f32 to vector<36x410xf32>
    %233 = arith.maximumf %231, %232 : vector<36x410xf32>
    %234 = arith.truncf %233 : vector<36x410xf32> to vector<36x410xbf16>
    %235 = vector.extract_strided_slice %234 {offsets = [0, 0], sizes = [36, 393], strides = [1, 1]} : vector<36x410xbf16> to vector<36x393xbf16>
    %236 = vector.extract_strided_slice %234 {offsets = [0, 1], sizes = [36, 393], strides = [1, 1]} : vector<36x410xbf16> to vector<36x393xbf16>
    %237 = arith.maximumf %235, %236 : vector<36x393xbf16>
    %238 = vector.extract_strided_slice %234 {offsets = [0, 16], sizes = [36, 393], strides = [1, 1]} : vector<36x410xbf16> to vector<36x393xbf16>
    %239 = arith.maximumf %237, %238 : vector<36x393xbf16>
    %240 = vector.extract_strided_slice %234 {offsets = [0, 17], sizes = [36, 393], strides = [1, 1]} : vector<36x410xbf16> to vector<36x393xbf16>
    %241 = arith.maximumf %239, %240 : vector<36x393xbf16>
    %c0_140 = arith.constant 0 : index
    %c0_141 = arith.constant 0 : index
    %c0_142 = arith.constant 0 : index
    %242 = vector.load %arg11[%c0_140, %c0_141, %c0_142] : memref<9x72x36xbf16, #tpu.memory_space<vmem>>, vector<1x72x36xbf16>
    %243 = vector.shape_cast %242 : vector<1x72x36xbf16> to vector<72x36xbf16>
    %244 = vector.extract_strided_slice %241 {offsets = [0, 0], sizes = [36, 325], strides = [1, 1]} : vector<36x393xbf16> to vector<36x325xbf16>
    %cst_143 = arith.constant dense<0.000000e+00> : vector<72x325xf32>
    %245 = tpu.matmul %243, %244, %cst_143 {dimension_numbers = #tpu.dot_dimension_numbers<[1], [0], [0], [1], [0, 0, 1, 1], [], []>} : vector<72x36xbf16>, vector<36x325xbf16>, vector<72x325xf32> -> vector<72x325xf32>
    %c1_144 = arith.constant 1 : index
    %c0_145 = arith.constant 0 : index
    %c0_146 = arith.constant 0 : index
    %246 = vector.load %arg11[%c1_144, %c0_145, %c0_146] : memref<9x72x36xbf16, #tpu.memory_space<vmem>>, vector<1x72x36xbf16>
    %247 = vector.shape_cast %246 : vector<1x72x36xbf16> to vector<72x36xbf16>
    %248 = vector.extract_strided_slice %241 {offsets = [0, 2], sizes = [36, 325], strides = [1, 1]} : vector<36x393xbf16> to vector<36x325xbf16>
    %cst_147 = arith.constant dense<0.000000e+00> : vector<72x325xf32>
    %249 = tpu.matmul %247, %248, %cst_147 {dimension_numbers = #tpu.dot_dimension_numbers<[1], [0], [0], [1], [0, 0, 1, 1], [], []>} : vector<72x36xbf16>, vector<36x325xbf16>, vector<72x325xf32> -> vector<72x325xf32>
    %250 = arith.addf %245, %249 : vector<72x325xf32>
    %c2_148 = arith.constant 2 : index
    %c0_149 = arith.constant 0 : index
    %c0_150 = arith.constant 0 : index
    %251 = vector.load %arg11[%c2_148, %c0_149, %c0_150] : memref<9x72x36xbf16, #tpu.memory_space<vmem>>, vector<1x72x36xbf16>
    %252 = vector.shape_cast %251 : vector<1x72x36xbf16> to vector<72x36xbf16>
    %253 = vector.extract_strided_slice %241 {offsets = [0, 4], sizes = [36, 325], strides = [1, 1]} : vector<36x393xbf16> to vector<36x325xbf16>
    %cst_151 = arith.constant dense<0.000000e+00> : vector<72x325xf32>
    %254 = tpu.matmul %252, %253, %cst_151 {dimension_numbers = #tpu.dot_dimension_numbers<[1], [0], [0], [1], [0, 0, 1, 1], [], []>} : vector<72x36xbf16>, vector<36x325xbf16>, vector<72x325xf32> -> vector<72x325xf32>
    %255 = arith.addf %250, %254 : vector<72x325xf32>
    %c3_152 = arith.constant 3 : index
    %c0_153 = arith.constant 0 : index
    %c0_154 = arith.constant 0 : index
    %256 = vector.load %arg11[%c3_152, %c0_153, %c0_154] : memref<9x72x36xbf16, #tpu.memory_space<vmem>>, vector<1x72x36xbf16>
    %257 = vector.shape_cast %256 : vector<1x72x36xbf16> to vector<72x36xbf16>
    %258 = vector.extract_strided_slice %241 {offsets = [0, 32], sizes = [36, 325], strides = [1, 1]} : vector<36x393xbf16> to vector<36x325xbf16>
    %cst_155 = arith.constant dense<0.000000e+00> : vector<72x325xf32>
    %259 = tpu.matmul %257, %258, %cst_155 {dimension_numbers = #tpu.dot_dimension_numbers<[1], [0], [0], [1], [0, 0, 1, 1], [], []>} : vector<72x36xbf16>, vector<36x325xbf16>, vector<72x325xf32> -> vector<72x325xf32>
    %260 = arith.addf %255, %259 : vector<72x325xf32>
    %c4_156 = arith.constant 4 : index
    %c0_157 = arith.constant 0 : index
    %c0_158 = arith.constant 0 : index
    %261 = vector.load %arg11[%c4_156, %c0_157, %c0_158] : memref<9x72x36xbf16, #tpu.memory_space<vmem>>, vector<1x72x36xbf16>
    %262 = vector.shape_cast %261 : vector<1x72x36xbf16> to vector<72x36xbf16>
    %263 = vector.extract_strided_slice %241 {offsets = [0, 34], sizes = [36, 325], strides = [1, 1]} : vector<36x393xbf16> to vector<36x325xbf16>
    %cst_159 = arith.constant dense<0.000000e+00> : vector<72x325xf32>
    %264 = tpu.matmul %262, %263, %cst_159 {dimension_numbers = #tpu.dot_dimension_numbers<[1], [0], [0], [1], [0, 0, 1, 1], [], []>} : vector<72x36xbf16>, vector<36x325xbf16>, vector<72x325xf32> -> vector<72x325xf32>
    %265 = arith.addf %260, %264 : vector<72x325xf32>
    %c5_160 = arith.constant 5 : index
    %c0_161 = arith.constant 0 : index
    %c0_162 = arith.constant 0 : index
    %266 = vector.load %arg11[%c5_160, %c0_161, %c0_162] : memref<9x72x36xbf16, #tpu.memory_space<vmem>>, vector<1x72x36xbf16>
    %267 = vector.shape_cast %266 : vector<1x72x36xbf16> to vector<72x36xbf16>
    %268 = vector.extract_strided_slice %241 {offsets = [0, 36], sizes = [36, 325], strides = [1, 1]} : vector<36x393xbf16> to vector<36x325xbf16>
    %cst_163 = arith.constant dense<0.000000e+00> : vector<72x325xf32>
    %269 = tpu.matmul %267, %268, %cst_163 {dimension_numbers = #tpu.dot_dimension_numbers<[1], [0], [0], [1], [0, 0, 1, 1], [], []>} : vector<72x36xbf16>, vector<36x325xbf16>, vector<72x325xf32> -> vector<72x325xf32>
    %270 = arith.addf %265, %269 : vector<72x325xf32>
    %c6_164 = arith.constant 6 : index
    %c0_165 = arith.constant 0 : index
    %c0_166 = arith.constant 0 : index
    %271 = vector.load %arg11[%c6_164, %c0_165, %c0_166] : memref<9x72x36xbf16, #tpu.memory_space<vmem>>, vector<1x72x36xbf16>
    %272 = vector.shape_cast %271 : vector<1x72x36xbf16> to vector<72x36xbf16>
    %273 = vector.extract_strided_slice %241 {offsets = [0, 64], sizes = [36, 325], strides = [1, 1]} : vector<36x393xbf16> to vector<36x325xbf16>
    %cst_167 = arith.constant dense<0.000000e+00> : vector<72x325xf32>
    %274 = tpu.matmul %272, %273, %cst_167 {dimension_numbers = #tpu.dot_dimension_numbers<[1], [0], [0], [1], [0, 0, 1, 1], [], []>} : vector<72x36xbf16>, vector<36x325xbf16>, vector<72x325xf32> -> vector<72x325xf32>
    %275 = arith.addf %270, %274 : vector<72x325xf32>
    %c7_168 = arith.constant 7 : index
    %c0_169 = arith.constant 0 : index
    %c0_170 = arith.constant 0 : index
    %276 = vector.load %arg11[%c7_168, %c0_169, %c0_170] : memref<9x72x36xbf16, #tpu.memory_space<vmem>>, vector<1x72x36xbf16>
    %277 = vector.shape_cast %276 : vector<1x72x36xbf16> to vector<72x36xbf16>
    %278 = vector.extract_strided_slice %241 {offsets = [0, 66], sizes = [36, 325], strides = [1, 1]} : vector<36x393xbf16> to vector<36x325xbf16>
    %cst_171 = arith.constant dense<0.000000e+00> : vector<72x325xf32>
    %279 = tpu.matmul %277, %278, %cst_171 {dimension_numbers = #tpu.dot_dimension_numbers<[1], [0], [0], [1], [0, 0, 1, 1], [], []>} : vector<72x36xbf16>, vector<36x325xbf16>, vector<72x325xf32> -> vector<72x325xf32>
    %280 = arith.addf %275, %279 : vector<72x325xf32>
    %c8_172 = arith.constant 8 : index
    %c0_173 = arith.constant 0 : index
    %c0_174 = arith.constant 0 : index
    %281 = vector.load %arg11[%c8_172, %c0_173, %c0_174] : memref<9x72x36xbf16, #tpu.memory_space<vmem>>, vector<1x72x36xbf16>
    %282 = vector.shape_cast %281 : vector<1x72x36xbf16> to vector<72x36xbf16>
    %283 = vector.extract_strided_slice %241 {offsets = [0, 68], sizes = [36, 325], strides = [1, 1]} : vector<36x393xbf16> to vector<36x325xbf16>
    %cst_175 = arith.constant dense<0.000000e+00> : vector<72x325xf32>
    %284 = tpu.matmul %282, %283, %cst_175 {dimension_numbers = #tpu.dot_dimension_numbers<[1], [0], [0], [1], [0, 0, 1, 1], [], []>} : vector<72x36xbf16>, vector<36x325xbf16>, vector<72x325xf32> -> vector<72x325xf32>
    %285 = arith.addf %280, %284 : vector<72x325xf32>
    %c0_176 = arith.constant 0 : index
    %c0_177 = arith.constant 0 : index
    %286 = vector.load %arg12[%c0_176, %c0_177] : memref<72x1xf32, #tpu.memory_space<vmem>>, vector<72x1xf32>
    %287 = vector.broadcast %286 : vector<72x1xf32> to vector<72x325xf32>
    %288 = arith.addf %285, %287 : vector<72x325xf32>
    %c0_178 = arith.constant 0 : index
    %c0_179 = arith.constant 0 : index
    %289 = vector.load %arg15[%c0_178, %c0_179] : memref<1x325xf32, #tpu.memory_space<vmem>>, vector<1x325xf32>
    %290 = vector.broadcast %289 : vector<1x325xf32> to vector<72x325xf32>
    %291 = arith.mulf %288, %290 : vector<72x325xf32>
    %cst_180 = arith.constant dense<0.000000e+00> : vector<72xf32>
    %292 = vector.multi_reduction <add>, %291, %cst_180 [1] : vector<72x325xf32> to vector<72xf32>
    %293 = vector.shape_cast %292 : vector<72xf32> to vector<72x1xf32>
    %cst_181 = arith.constant 0.055555556 : f32
    %294 = vector.broadcast %cst_181 : f32 to vector<72x1xf32>
    %295 = arith.mulf %293, %294 : vector<72x1xf32>
    %296 = vector.broadcast %295 : vector<72x1xf32> to vector<72x325xf32>
    %297 = arith.subf %288, %296 : vector<72x325xf32>
    %298 = arith.mulf %297, %297 : vector<72x325xf32>
    %299 = vector.broadcast %289 : vector<1x325xf32> to vector<72x325xf32>
    %300 = arith.mulf %298, %299 : vector<72x325xf32>
    %cst_182 = arith.constant dense<0.000000e+00> : vector<72xf32>
    %301 = vector.multi_reduction <add>, %300, %cst_182 [1] : vector<72x325xf32> to vector<72xf32>
    %302 = vector.shape_cast %301 : vector<72xf32> to vector<72x1xf32>
    %cst_183 = arith.constant 0.055555556 : f32
    %303 = vector.broadcast %cst_183 : f32 to vector<72x1xf32>
    %304 = arith.mulf %302, %303 : vector<72x1xf32>
    %cst_184 = arith.constant 9.99999974E-6 : f32
    %305 = vector.broadcast %cst_184 : f32 to vector<72x1xf32>
    %306 = arith.addf %304, %305 : vector<72x1xf32>
    %307 = math.rsqrt %306 : vector<72x1xf32>
    %308 = vector.broadcast %307 : vector<72x1xf32> to vector<72x325xf32>
    %309 = arith.mulf %297, %308 : vector<72x325xf32>
    %c0_185 = arith.constant 0 : index
    %c0_186 = arith.constant 0 : index
    %310 = vector.load %arg13[%c0_185, %c0_186] : memref<72x1xf32, #tpu.memory_space<vmem>>, vector<72x1xf32>
    %311 = vector.broadcast %310 : vector<72x1xf32> to vector<72x325xf32>
    %312 = arith.mulf %309, %311 : vector<72x325xf32>
    %c0_187 = arith.constant 0 : index
    %c0_188 = arith.constant 0 : index
    %313 = vector.load %arg14[%c0_187, %c0_188] : memref<72x1xf32, #tpu.memory_space<vmem>>, vector<72x1xf32>
    %314 = vector.broadcast %313 : vector<72x1xf32> to vector<72x325xf32>
    %315 = arith.addf %312, %314 : vector<72x325xf32>
    %cst_189 = arith.constant 0.000000e+00 : f32
    %316 = vector.broadcast %cst_189 : f32 to vector<72x325xf32>
    %317 = arith.maximumf %315, %316 : vector<72x325xf32>
    %318 = vector.extract_strided_slice %317 {offsets = [0, 0], sizes = [72, 291], strides = [1, 1]} : vector<72x325xf32> to vector<72x291xf32>
    %319 = vector.extract_strided_slice %317 {offsets = [0, 2], sizes = [72, 291], strides = [1, 1]} : vector<72x325xf32> to vector<72x291xf32>
    %320 = arith.maximumf %318, %319 : vector<72x291xf32>
    %321 = vector.extract_strided_slice %317 {offsets = [0, 32], sizes = [72, 291], strides = [1, 1]} : vector<72x325xf32> to vector<72x291xf32>
    %322 = arith.maximumf %320, %321 : vector<72x291xf32>
    %323 = vector.extract_strided_slice %317 {offsets = [0, 34], sizes = [72, 291], strides = [1, 1]} : vector<72x325xf32> to vector<72x291xf32>
    %324 = arith.maximumf %322, %323 : vector<72x291xf32>
    %325 = vector.extract_strided_slice %324 {offsets = [0, 0], sizes = [72, 1], strides = [1, 1]} : vector<72x291xf32> to vector<72x1xf32>
    %326 = vector.extract_strided_slice %324 {offsets = [0, 256], sizes = [72, 1], strides = [1, 1]} : vector<72x291xf32> to vector<72x1xf32>
    %327 = tpu.concatenate %325, %326 in 1 : vector<72x1xf32>, vector<72x1xf32> -> vector<72x2xf32>
    %c0_190 = arith.constant 0 : index
    %c0_191 = arith.constant 0 : index
    %328 = vector.load %arg16[%c0_190, %c0_191] : memref<36x72xbf16, #tpu.memory_space<vmem>>, vector<36x72xbf16>
    %329 = arith.truncf %327 : vector<72x2xf32> to vector<72x2xbf16>
    %cst_192 = arith.constant dense<0.000000e+00> : vector<36x2xf32>
    %330 = tpu.matmul %328, %329, %cst_192 {dimension_numbers = #tpu.dot_dimension_numbers<[1], [0], [0], [1], [0, 0, 1, 1], [], []>} : vector<36x72xbf16>, vector<72x2xbf16>, vector<36x2xf32> -> vector<36x2xf32>
    %c0_193 = arith.constant 0 : index
    %c0_194 = arith.constant 0 : index
    %331 = vector.load %arg17[%c0_193, %c0_194] : memref<36x1xf32, #tpu.memory_space<vmem>>, vector<36x1xf32>
    %332 = vector.broadcast %331 : vector<36x1xf32> to vector<36x2xf32>
    %333 = arith.addf %330, %332 : vector<36x2xf32>
    %cst_195 = arith.constant dense<0.000000e+00> : vector<36xf32>
    %334 = vector.multi_reduction <add>, %333, %cst_195 [1] : vector<36x2xf32> to vector<36xf32>
    %335 = vector.shape_cast %334 : vector<36xf32> to vector<36x1xf32>
    %cst_196 = arith.constant 5.000000e-01 : f32
    %336 = vector.broadcast %cst_196 : f32 to vector<36x1xf32>
    %337 = arith.mulf %335, %336 : vector<36x1xf32>
    %338 = vector.broadcast %337 : vector<36x1xf32> to vector<36x2xf32>
    %339 = arith.subf %333, %338 : vector<36x2xf32>
    %340 = arith.mulf %339, %339 : vector<36x2xf32>
    %cst_197 = arith.constant dense<0.000000e+00> : vector<36xf32>
    %341 = vector.multi_reduction <add>, %340, %cst_197 [1] : vector<36x2xf32> to vector<36xf32>
    %342 = vector.shape_cast %341 : vector<36xf32> to vector<36x1xf32>
    %cst_198 = arith.constant 5.000000e-01 : f32
    %343 = vector.broadcast %cst_198 : f32 to vector<36x1xf32>
    %344 = arith.mulf %342, %343 : vector<36x1xf32>
    %cst_199 = arith.constant 9.99999974E-6 : f32
    %345 = vector.broadcast %cst_199 : f32 to vector<36x1xf32>
    %346 = arith.addf %344, %345 : vector<36x1xf32>
    %347 = math.rsqrt %346 : vector<36x1xf32>
    %348 = vector.broadcast %347 : vector<36x1xf32> to vector<36x2xf32>
    %349 = arith.mulf %339, %348 : vector<36x2xf32>
    %c0_200 = arith.constant 0 : index
    %c0_201 = arith.constant 0 : index
    %350 = vector.load %arg18[%c0_200, %c0_201] : memref<36x1xf32, #tpu.memory_space<vmem>>, vector<36x1xf32>
    %351 = vector.broadcast %350 : vector<36x1xf32> to vector<36x2xf32>
    %352 = arith.mulf %349, %351 : vector<36x2xf32>
    %c0_202 = arith.constant 0 : index
    %c0_203 = arith.constant 0 : index
    %353 = vector.load %arg19[%c0_202, %c0_203] : memref<36x1xf32, #tpu.memory_space<vmem>>, vector<36x1xf32>
    %354 = vector.broadcast %353 : vector<36x1xf32> to vector<36x2xf32>
    %355 = arith.addf %352, %354 : vector<36x2xf32>
    %cst_204 = arith.constant 0.000000e+00 : f32
    %356 = vector.broadcast %cst_204 : f32 to vector<36x2xf32>
    %357 = arith.maximumf %355, %356 : vector<36x2xf32>
    %c0_205 = arith.constant 0 : index
    %c0_206 = arith.constant 0 : index
    %358 = vector.load %arg20[%c0_205, %c0_206] : memref<10x36xbf16, #tpu.memory_space<vmem>>, vector<10x36xbf16>
    %359 = arith.truncf %357 : vector<36x2xf32> to vector<36x2xbf16>
    %cst_207 = arith.constant dense<0.000000e+00> : vector<10x2xf32>
    %360 = tpu.matmul %358, %359, %cst_207 {dimension_numbers = #tpu.dot_dimension_numbers<[1], [0], [0], [1], [0, 0, 1, 1], [], []>} : vector<10x36xbf16>, vector<36x2xbf16>, vector<10x2xf32> -> vector<10x2xf32>
    %c0_208 = arith.constant 0 : index
    %c0_209 = arith.constant 0 : index
    %361 = vector.load %arg21[%c0_208, %c0_209] : memref<10x1xf32, #tpu.memory_space<vmem>>, vector<10x1xf32>
    %362 = vector.broadcast %361 : vector<10x1xf32> to vector<10x2xf32>
    %363 = arith.addf %360, %362 : vector<10x2xf32>
    %c0_210 = arith.constant 0 : index
    %c0_211 = arith.constant 0 : index
    %364 = vector.load %arg22[%c0_210, %c0_211] : memref<10x2xf32, #tpu.memory_space<vmem>>, vector<10x2xf32>
    tpu.vector_store %arg22[%c0_210, %c0_211], %363 {strides = array<i32>} : memref<10x2xf32, #tpu.memory_space<vmem>>, vector<10x2xf32>,
    return
  }
}

</mosaic_0001>

<bundles_post_ra>
// kernel: covnet_forward.1
= control target key start
LH: loop header
LB: loop body
LE: loop exit
PB: predicated region body
PF: predicated region fallthrough
CT: control target
= control target key end

     0   :  { %v88_v0 = vlaneseq  ;;  %v10478_v1 = vmov 1983009808   ;;  %vm117_vm0 = vcmask 1040384   ;;  %vm118_vm1 = vcmask 1041408   ;;  %s10481_s30 = smov 127   ;;  %s10484_s24 = smov 124   ;;  %s15031_s0 = inlined_call_operand.vmem [shape: bf16[3,512], index: 0, kind: input, shape index: {}]   ;;  %s15032_s1 = inlined_call_operand.vmem [shape: bf16[25,16,3], index: 1, kind: input, shape index: {}]   ;;  %s15033_s2 = inlined_call_operand.vmem [shape: f32[16,1], index: 2, kind: input, shape index: {}]   ;;  %s15034_s5 = inlined_call_operand.vmem [shape: f32[1,444], index: 5, kind: input, shape index: {}]   ;;  %s15035_s3 = inlined_call_operand.vmem [shape: f32[16,1], index: 3, kind: input, shape index: {}]   ;;  %s15036_s4 = inlined_call_operand.vmem [shape: f32[16,1], index: 4, kind: input, shape index: {}]   ;;  %s15037_s6 = inlined_call_operand.vmem [shape: bf16[9,36,16], index: 6, kind: input, shape index: {}]   ;;  %s15038_s7 = inlined_call_operand.vmem [shape: f32[36,1], index: 7, kind: input, shape index: {}]   ;;  %s15039_s10 = inlined_call_operand.vmem [shape: f32[1,410], index: 10, kind: input, shape index: {}]   ;;  %s15040_s8 = inlined_call_operand.vmem [shape: f32[36,1], index: 8, kind: input, shape index: {}]   ;;  %s15041_s9 = inlined_call_operand.vmem [shape: f32[36,1], index: 9, kind: input, shape index: {}]   ;;  %s15042_s11 = inlined_call_operand.vmem [shape: bf16[9,72,36], index: 11, kind: input, shape index: {}]   ;;  %s15043_s12 = inlined_call_operand.vmem [shape: f32[72,1], index: 12, kind: input, shape index: {}]   ;;  %s15044_s15 = inlined_call_operand.vmem [shape: f32[1,325], index: 15, kind: input, shape index: {}]   ;;  %s15045_s13 = inlined_call_operand.vmem [shape: f32[72,1], index: 13, kind: input, shape index: {}]   ;;  %s15046_s14 = inlined_call_operand.vmem [shape: f32[72,1], index: 14, kind: input, shape index: {}]   ;;  %s15047_s17 = inlined_call_operand.vmem [shape: f32[36,1], index: 17, kind: input, shape index: {}]   ;;  %s15048_s16 = inlined_call_operand.vmem [shape: bf16[36,72], index: 16, kind: input, shape index: {}]   ;;  %s15049_s18 = inlined_call_operand.vmem [shape: f32[36,1], index: 18, kind: input, shape index: {}]   ;;  %s15050_s19 = inlined_call_operand.vmem [shape: f32[36,1], index: 19, kind: input, shape index: {}]   ;;  %s15051_s21 = inlined_call_operand.vmem [shape: f32[10,1], index: 21, kind: input, shape index: {}]   ;;  %s15052_s20 = inlined_call_operand.vmem [shape: bf16[10,36], index: 20, kind: input, shape index: {}]   ;;  %s15053_s22 = inlined_call_operand.vmem [shape: f32[10,2], index: 22, kind: output, shape index: {}]  }
   0x1   :  { %15087 = sst [smem:[#allocation27_spill]] %s15031_s0  ;;  %v86_v2 = vunpack.c.l.s4 %v10478_v1  ;;  %v10479_v8 = vmov 65535   ;;  %v15067_v12 = vmov 0   ;;  %vm113_vm2 = vcmask 23552   ;;  %s10486_s25 = smov 111  }
   0x2   :  { %15088 = sst [smem:[#allocation28_spill]] %s15032_s1  ;;  %v10626_v4 = vshrl.u32 %v88_v0, 7  ;;  %v119_v9 = vsel %vm117_vm0, 4294967295, %v10479_v8  ;;  %271 = vmatprep.mubr.bf16.mxu0 %v15067_v12  ;;  %165 = vmatprep.mubr.bf16.mxu1 %v15067_v12  ;;  %s10482_s1 = smov 126   ;;  %vm109_vm3 = vcmask 1039360   ;;  %vm341_vm4 = vcmask 1031168  }
   0x3   :  { %15089 = sst [smem:[#allocation29_spill]] %s15033_s2  ;;  %v87_v5 = vunpack.c.0.s8 %v86_v2  ;;  %v10636_v13 = vsel %vm118_vm1, %v119_v9, 0  ;;  %10117 = vset.pattern.permute.xlu0 %v15067_v12  ;;  %10118 = vset.pattern.permute.xlu1 %v15067_v12  ;;  %s10487_s26 = smov 110   ;;  %vm470_vm5 = vcmask 1022976   ;;  %vm599_vm6 = vcmask 1014784  }
   0x4   :  { %15090 = sst [smem:[#allocation30_spill]] %s15034_s5  ;;  %s10488_s2 = smov 109   ;;  %vm728_vm7 = vcmask 916480   ;;  %vm857_vm8 = vcmask 908288   ;;  %vm986_vm9 = vcmask 900096   ;;  %vm1115_vm10 = vcmask 891904  }
   0x5   :  { %15091 = sst [smem:[#allocation31_spill]] %s15035_s3  ;;  %v90_v7 = vsub.s32 %v87_v5, %v10626_v4  ;;  %s10489_s27 = smov 108   ;;  %vm1244_vm11 = vcmask 883712   ;;  %vm1373_vm12 = vcmask 785408   ;;  %vm1502_vm13 = vcmask 777216  }
   0x6   :  { %15092 = sst [smem:[#allocation32_spill]] %s15036_s4  ;;  %s10483_s4 = smov 125   ;;  %vm1631_vm14 = vcmask 769024   ;;  %vm1760_vm15 = vcmask 760832   ;;  %vm1889_vm0 = vcmask 752640  }
   0x7   :  { %15093 = sst [smem:[#allocation33_spill]] %s15037_s6  ;;  %s10485_s6 = smov 112  }
   0x8   :  { %s15094_s29 = sld [smem:[#allocation27_spill]]  ;;  %s15071_s5 = smov 96  }
   0x9   :  { %s15095_s23 = sld [smem:[#allocation28_spill]]  ;;  %s10491_s28 = smov 95  }
   0xa   :  { %s10493_s3 = smov 93   ;;  %s15065_s0 = smov 92  }
   0xe   :  { %v72_v3 = vld [vmem:[%s15094_s29] sm:$0xff]  ;;  %s15069_s29 = smov 94  }
   0xf   :  { %v84_v6 = vcombine.high %v72_v3, %v72_v3  ;;  %v10629_v10 = vrot.slane %v72_v3, %v90_v7  ;;  %v10659_v18 = vld [vmem:[%s15095_s23] sm:$0xff]   ;;  %v10336_v31 = vld [vmem:[%s15095_s23 + $0x8] sm:$0xff]   ;;  %v10787_v41 = vld [vmem:[%s15095_s23 + $0x10] sm:$0xff]  }
  0x10   :  { %v10809_v53 = vld [vmem:[%s15095_s23 + $0x18] sm:$0xff]   ;;  %v10830_v1 = vld [vmem:[%s15095_s23 + $0x20] sm:$0xff]  }
  0x11   :  { %v10631_v11 = vrot.slane %v84_v6, %v90_v7  ;;  %101 = vrot.lane.b32.xlu1 %v10629_v10, %s10481_s30  ;;  %v10644_v14 = vcombine.high %v10629_v10, %v10629_v10  ;;  %v228_v16 = vand.u32 %v10636_v13, %v10629_v10 }
  0x13   :  { %v10648_v15 = vcombine.high %v10631_v11, %v10631_v11  ;;  %103 = vrot.lane.b32.xlu0 %v10644_v14, %s10481_s30  ;;  %v231_v17 = vand.u32 %v10636_v13, %v10644_v14  ;;  %v234_v44 = vand.u32 %v10636_v13, %v10631_v11 }
  0x15   :  { %107 = vrot.lane.b32.xlu1 %v10648_v15, %s10481_s30  ;;  %253 = vmatprep.subr.bf16.mxu0 %v231_v17  ;;  %v237_v36 = vand.u32 %v10636_v13, %v10648_v15 }
  0x16   :  { %254 = vmatpush1.bf16.msra.mxu0 %v228_v16 }
  0x17   :  { %105 = vrot.lane.b32.xlu0 %v10631_v11, %s10481_s30 }
  0x19   :  { %337 = vrot.lane.b32.xlu1 %v10631_v11, %s10482_s1  ;;  %9275 = vmatmul.mubr.msk.bf16.vlgmr.msra.gmra.mxu0 %vm113_vm2, %v10659_v18 }
  0x1a   :  { %392 = vmatprep.mubr.bf16.mxu0 %v15067_v12 }
  0x1b   :  { %335 = vrot.lane.b32.xlu0 %v10644_v14, %s10482_s1 }
  0x1d   :  { %339 = vrot.lane.b32.xlu1 %v10648_v15, %s10482_s1 }
  0x1f   :  { %333 = vrot.lane.b32.xlu0 %v10629_v10, %s10482_s1 }
  0x21   :  { %466 = vrot.lane.b32.xlu1 %v10631_v11, %s10483_s4 }
  0x23   :  { %464 = vrot.lane.b32.xlu0 %v10644_v14, %s10483_s4 }
  0x25   :  { %468 = vrot.lane.b32.xlu1 %v10648_v15, %s10483_s4 }
  0x27   :  { %462 = vrot.lane.b32.xlu0 %v10629_v10, %s10483_s4  ;;  %s10495_s4 = smov 80  }
  0x29   :  { %595 = vrot.lane.b32.xlu1 %v10631_v11, %s10484_s24 }
  0x2b   :  { %593 = vrot.lane.b32.xlu0 %v10644_v14, %s10484_s24 }
  0x2d   :  { %597 = vrot.lane.b32.xlu1 %v10648_v15, %s10484_s24 }
  0x2f   :  { %591 = vrot.lane.b32.xlu0 %v10629_v10, %s10484_s24 }
  0x31   :  { %724 = vrot.lane.b32.xlu1 %v10631_v11, %s10485_s6 }
  0x33   :  { %722 = vrot.lane.b32.xlu0 %v10644_v14, %s10485_s6 }
  0x35   :  { %726 = vrot.lane.b32.xlu1 %v10648_v15, %s10485_s6 }
  0x37   :  { %720 = vrot.lane.b32.xlu0 %v10629_v10, %s10485_s6 }
  0x39   :  { %853 = vrot.lane.b32.xlu1 %v10631_v11, %s10486_s25 }
  0x3b   :  { %851 = vrot.lane.b32.xlu0 %v10644_v14, %s10486_s25 }
  0x3d   :  { %855 = vrot.lane.b32.xlu1 %v10648_v15, %s10486_s25 }
  0x3f   :  { %849 = vrot.lane.b32.xlu0 %v10629_v10, %s10486_s25 }
  0x41   :  { %982 = vrot.lane.b32.xlu1 %v10631_v11, %s10487_s26 }
  0x43   :  { %980 = vrot.lane.b32.xlu0 %v10644_v14, %s10487_s26 }
  0x45   :  { %984 = vrot.lane.b32.xlu1 %v10648_v15, %s10487_s26 }
  0x47   :  { %978 = vrot.lane.b32.xlu0 %v10629_v10, %s10487_s26 }
  0x49   :  { %1111 = vrot.lane.b32.xlu1 %v10631_v11, %s10488_s2 }
  0x4b   :  { %1109 = vrot.lane.b32.xlu0 %v10644_v14, %s10488_s2 }
  0x4d   :  { %1113 = vrot.lane.b32.xlu1 %v10648_v15, %s10488_s2 }
  0x4f   :  { %1107 = vrot.lane.b32.xlu0 %v10629_v10, %s10488_s2  ;;  %s10496_s2 = smov 79  }
  0x51   :  { %1240 = vrot.lane.b32.xlu1 %v10631_v11, %s10489_s27 }
  0x53   :  { %1238 = vrot.lane.b32.xlu0 %v10644_v14, %s10489_s27 }
  0x55   :  { %1242 = vrot.lane.b32.xlu1 %v10648_v15, %s10489_s27 }
  0x57   :  { %1236 = vrot.lane.b32.xlu0 %v10629_v10, %s10489_s27  ;;  %s10499_s27 = smov 76  }
  0x59   :  { %1369 = vrot.lane.b32.xlu1 %v10631_v11, %s15071_s5 }
  0x5b   :  { %1367 = vrot.lane.b32.xlu0 %v10644_v14, %s15071_s5 }
  0x5d   :  { %1371 = vrot.lane.b32.xlu1 %v10648_v15, %s15071_s5 }
  0x5f   :  { %1365 = vrot.lane.b32.xlu0 %v10629_v10, %s15071_s5 }
  0x61   :  { %1498 = vrot.lane.b32.xlu1 %v10631_v11, %s10491_s28 }
  0x63   :  { %1496 = vrot.lane.b32.xlu0 %v10644_v14, %s10491_s28 }
  0x65   :  { %1500 = vrot.lane.b32.xlu1 %v10648_v15, %s10491_s28 }
  0x67   :  { %1494 = vrot.lane.b32.xlu0 %v10629_v10, %s10491_s28 }
  0x69   :  { %1627 = vrot.lane.b32.xlu1 %v10631_v11, %s15069_s29 }
  0x6b   :  { %1625 = vrot.lane.b32.xlu0 %v10644_v14, %s15069_s29 }
  0x6d   :  { %1629 = vrot.lane.b32.xlu1 %v10648_v15, %s15069_s29 }
  0x6f   :  { %1623 = vrot.lane.b32.xlu0 %v10629_v10, %s15069_s29 }
  0x71   :  { %1756 = vrot.lane.b32.xlu1 %v10631_v11, %s10493_s3 }
  0x73   :  { %1754 = vrot.lane.b32.xlu0 %v10644_v14, %s10493_s3 }
  0x75   :  { %1758 = vrot.lane.b32.xlu1 %v10648_v15, %s10493_s3 }
  0x77   :  { %1752 = vrot.lane.b32.xlu0 %v10629_v10, %s10493_s3  ;;  %s10498_s3 = smov 77  }
  0x79   :  { %1885 = vrot.lane.b32.xlu1 %v10631_v11, %s15065_s0 }
  0x7b   :  { %1883 = vrot.lane.b32.xlu0 %v10644_v14, %s15065_s0 }
  0x7d   :  { %1887 = vrot.lane.b32.xlu1 %v10648_v15, %s15065_s0 }
  0x7f   :  { %1881 = vrot.lane.b32.xlu0 %v10629_v10, %s15065_s0  ;;  %s15096_s0 = sld [smem:[#allocation29_spill]] }
  0x81   :  { %2014 = vrot.lane.b32.xlu1 %v10631_v11, %s10495_s4 }
  0x83   :  { %2012 = vrot.lane.b32.xlu0 %v10644_v14, %s10495_s4  ;;  %v102_v19 = vpop.permute.xlu1 %101 }
  0x85   :  { %v104_v20 = vpop.permute.xlu0 %103  ;;  %2016 = vrot.lane.b32.xlu1 %v10648_v15, %s10495_s4 }
  0x86   :  { %v110_v23 = vsel %vm109_vm3, %v102_v19, %v104_v20 }
  0x87   :  { %2010 = vrot.lane.b32.xlu0 %v10629_v10, %s10495_s4  ;;  %v108_v21 = vpop.permute.xlu1 %107  ;;  %v122_v28 = vand.u32 %v10636_v13, %v110_v23  ;;  %s10497_s4 = smov 78  }
  0x88   :  { %v131_v25 = vand.u32 %v10636_v13, %v108_v21 }
  0x89   :  { %v106_v22 = vpop.permute.xlu0 %105  ;;  %2143 = vrot.lane.b32.xlu1 %v10631_v11, %s10496_s2 }
  0x8a   :  { %v111_v24 = vsel %vm109_vm3, %v104_v20, %v106_v22  ;;  %v112_v29 = vsel %vm109_vm3, %v106_v22, %v108_v21  ;;  %v10854_v20 = vld [vmem:[%s15095_s23 + $0x28] sm:$0xff]  }
  0x8b   :  { %2141 = vrot.lane.b32.xlu0 %v10644_v14, %s10496_s2  ;;  %v125_v26 = vand.u32 %v10636_v13, %v111_v24  ;;  %v338_v27 = vpop.permute.xlu1 %337  ;;  %v128_v35 = vand.u32 %v10636_v13, %v112_v29 }
  0x8d   :  { %147 = vmatprep.subr.bf16.mxu1 %v125_v26  ;;  %v336_v30 = vpop.permute.xlu0 %335  ;;  %2145 = vrot.lane.b32.xlu1 %v10648_v15, %s10496_s2 }
  0x8e   :  { %148 = vmatpush1.bf16.msra.mxu1 %v122_v28  ;;  %v343_v32 = vsel %vm341_vm4, %v336_v30, %v338_v27 }
  0x8f   :  { %2139 = vrot.lane.b32.xlu0 %v10629_v10, %s10496_s2  ;;  %190 = vmatprep.subr.bf16.mxu1 %v131_v25  ;;  %v352_v33 = vand.u32 %v343_v32, %v10636_v13  ;;  %v340_v34 = vpop.permute.xlu1 %339  ;;  %s15063_s2 = smov 64   ;;  %v10878_v32 = vld [vmem:[%s15095_s23 + $0x30] sm:$0xff]  }
  0x90   :  { %v358_v47 = vand.u32 %v340_v34, %v10636_v13  ;;  %v344_v50 = vsel %vm341_vm4, %v338_v27, %v340_v34 }
  0x91   :  { %9272 = vmatmul.mubr.msk.bf16.vlgmr.msra.gmra.mxu1 %vm113_vm2, %v10336_v31  ;;  %v334_v37 = vpop.permute.xlu0 %333  ;;  %374 = vmatprep.subr.bf16.mxu0 %v352_v33  ;;  %v355_v55 = vand.u32 %v344_v50, %v10636_v13 }
  0x92   :  { %v342_v38 = vsel %vm341_vm4, %v334_v37, %v336_v30  ;;  %191 = vmatpush1.bf16.msra.mxu1 %v128_v35  ;;  %2272 = vrot.lane.b32.xlu1 %v10631_v11, %s10497_s4 }
  0x93   :  { %v349_v39 = vand.u32 %v342_v38, %v10636_v13  ;;  %2270 = vrot.lane.b32.xlu0 %v10644_v14, %s10497_s4  ;;  %208 = vmatprep.mubr.bf16.mxu1 %v15067_v12  ;;  %v467_v40 = vpop.permute.xlu1 %466 }
  0x94   :  { %296 = vmatprep.subr.bf16.mxu1 %v237_v36 }
  0x95   :  { %v465_v42 = vpop.permute.xlu0 %464  ;;  %375 = vmatpush1.bf16.msra.mxu0 %v349_v39 }
  0x96   :  { %v472_v43 = vsel %vm470_vm5, %v465_v42, %v467_v40  ;;  %2274 = vrot.lane.b32.xlu1 %v10648_v15, %s10497_s4 }
  0x97   :  { %2268 = vrot.lane.b32.xlu0 %v10629_v10, %s10497_s4  ;;  %v481_v45 = vand.u32 %v472_v43, %v10636_v13  ;;  %v469_v46 = vpop.permute.xlu1 %468  ;;  %s10501_s4 = smov 63  }
  0x98   :  { %9280 = vmatmul.mubr.msk.bf16.vlgmr.msra.gmra.mxu0 %vm113_vm2, %v10787_v41  ;;  %v487_v59 = vand.u32 %v469_v46, %v10636_v13  ;;  %v473_v62 = vsel %vm470_vm5, %v467_v40, %v469_v46 }
  0x99   :  { %v463_v48 = vpop.permute.xlu0 %462  ;;  %9273 = vmatmul.mubr.msk.bf16.vlgmr.msra.gmra.mxu1 %vm113_vm2, %v10336_v31  ;;  %503 = vmatprep.subr.bf16.mxu0 %v481_v45  ;;  %v484_v3 = vand.u32 %v473_v62, %v10636_v13 }
  0x9a   :  { %v471_v49 = vsel %vm470_vm5, %v463_v48, %v465_v42  ;;  %2401 = vrot.lane.b32.xlu1 %v10631_v11, %s10498_s3  ;;  %297 = vmatpush1.bf16.msra.mxu1 %v234_v44  ;;  %v10902_v44 = vld [vmem:[%s15095_s23 + $0x38] sm:$0xff]   ;;  %vm2018_vm5 = vcmask 654336  }
  0x9b   :  { %v478_v51 = vand.u32 %v471_v49, %v10636_v13  ;;  %2399 = vrot.lane.b32.xlu0 %v10644_v14, %s10498_s3  ;;  %521 = vmatprep.mubr.bf16.mxu0 %v15067_v12  ;;  %v596_v52 = vpop.permute.xlu1 %595 }
  0x9c   :  { %314 = vmatprep.mubr.bf16.mxu1 %v15067_v12  ;;  %417 = vmatprep.subr.bf16.mxu1 %v358_v47 }
  0x9d   :  { %v594_v54 = vpop.permute.xlu0 %593  ;;  %504 = vmatpush1.bf16.msra.mxu0 %v478_v51 }
  0x9e   :  { %v601_v56 = vsel %vm599_vm6, %v594_v54, %v596_v52  ;;  %2403 = vrot.lane.b32.xlu1 %v10648_v15, %s10498_s3 }
  0x9f   :  { %2397 = vrot.lane.b32.xlu0 %v10629_v10, %s10498_s3  ;;  %v610_v57 = vand.u32 %v601_v56, %v10636_v13  ;;  %v598_v58 = vpop.permute.xlu1 %597  ;;  %v10343_v56 = vld [vmem:[%s15095_s23 + $0x40] sm:$0xff]  }
  0xa0   :  { %9285 = vmatmul.mubr.msk.bf16.vlgmr.msra.gmra.mxu0 %vm113_vm2, %v10809_v53  ;;  %v616_v8 = vand.u32 %v598_v58, %v10636_v13  ;;  %v602_v17 = vsel %vm599_vm6, %v596_v52, %v598_v58 }
  0xa1   :  { %v592_v60 = vpop.permute.xlu0 %591  ;;  %9276 = vmatmul.mubr.msk.bf16.vlgmr.msra.gmra.mxu1 %vm113_vm2, %v10659_v18  ;;  %632 = vmatprep.subr.bf16.mxu0 %v610_v57  ;;  %v613_v22 = vand.u32 %v602_v17, %v10636_v13 }
  0xa2   :  { %v600_v61 = vsel %vm599_vm6, %v592_v60, %v594_v54  ;;  %418 = vmatpush1.bf16.msra.mxu1 %v355_v55  ;;  %2530 = vrot.lane.b32.xlu1 %v10631_v11, %s10499_s27 }
  0xa3   :  { %v607_v63 = vand.u32 %v600_v61, %v10636_v13  ;;  %2528 = vrot.lane.b32.xlu0 %v10644_v14, %s10499_s27  ;;  %650 = vmatprep.mubr.bf16.mxu0 %v15067_v12  ;;  %v725_v0 = vpop.permute.xlu1 %724 }
  0xa4   :  { %435 = vmatprep.mubr.bf16.mxu1 %v15067_v12  ;;  %546 = vmatprep.subr.bf16.mxu1 %v487_v59 }
  0xa5   :  { %v723_v2 = vpop.permute.xlu0 %722  ;;  %633 = vmatpush1.bf16.msra.mxu0 %v607_v63 }
  0xa6   :  { %v730_v5 = vsel %vm728_vm7, %v723_v2, %v725_v0  ;;  %2532 = vrot.lane.b32.xlu1 %v10648_v15, %s10499_s27 }
  0xa7   :  { %2526 = vrot.lane.b32.xlu0 %v10629_v10, %s10499_s27  ;;  %v739_v6 = vand.u32 %v730_v5, %v10636_v13  ;;  %v727_v7 = vpop.permute.xlu1 %726  ;;  %s15059_s27 = smov 62   ;;  %v10344_v5 = vld [vmem:[%s15095_s23 + $0x48] sm:$0xff]  }
  0xa8   :  { %9290 = vmatmul.mubr.msk.bf16.vlgmr.msra.gmra.mxu0 %vm113_vm2, %v10830_v1  ;;  %v745_v26 = vand.u32 %v727_v7, %v10636_v13  ;;  %v731_v29 = vsel %vm728_vm7, %v725_v0, %v727_v7 }
  0xa9   :  { %v721_v9 = vpop.permute.xlu0 %720  ;;  %9281 = vmatmul.mubr.msk.bf16.vlgmr.msra.gmra.mxu1 %vm113_vm2, %v10787_v41  ;;  %761 = vmatprep.subr.bf16.mxu0 %v739_v6  ;;  %v742_v34 = vand.u32 %v731_v29, %v10636_v13 }
  0xaa   :  { %v729_v16 = vsel %vm728_vm7, %v721_v9, %v723_v2  ;;  %547 = vmatpush1.bf16.msra.mxu1 %v484_v3  ;;  %2659 = vrot.lane.b32.xlu1 %v10631_v11, %s15063_s2 }
  0xab   :  { %v736_v18 = vand.u32 %v729_v16, %v10636_v13  ;;  %2657 = vrot.lane.b32.xlu0 %v10644_v14, %s15063_s2  ;;  %779 = vmatprep.mubr.bf16.mxu0 %v15067_v12  ;;  %v854_v19 = vpop.permute.xlu1 %853 }
  0xac   :  { %564 = vmatprep.mubr.bf16.mxu1 %v15067_v12  ;;  %675 = vmatprep.subr.bf16.mxu1 %v616_v8 }
  0xad   :  { %v852_v21 = vpop.permute.xlu0 %851  ;;  %762 = vmatpush1.bf16.msra.mxu0 %v736_v18 }
  0xae   :  { %v859_v23 = vsel %vm857_vm8, %v852_v21, %v854_v19  ;;  %2661 = vrot.lane.b32.xlu1 %v10648_v15, %s15063_s2 }
  0xaf   :  { %2655 = vrot.lane.b32.xlu0 %v10629_v10, %s15063_s2  ;;  %v868_v24 = vand.u32 %v859_v23, %v10636_v13  ;;  %v856_v25 = vpop.permute.xlu1 %855 }
  0xb0   :  { %9295 = vmatmul.mubr.msk.bf16.vlgmr.msra.gmra.mxu0 %vm113_vm2, %v10854_v20  ;;  %v874_v38 = vand.u32 %v856_v25, %v10636_v13  ;;  %v860_v41 = vsel %vm857_vm8, %v854_v19, %v856_v25  ;;  %v10345_v19 = vld [vmem:[%s15095_s23 + $0x50] sm:$0xff]  }
  0xb1   :  { %v850_v27 = vpop.permute.xlu0 %849  ;;  %9286 = vmatmul.mubr.msk.bf16.vlgmr.msra.gmra.mxu1 %vm113_vm2, %v10809_v53  ;;  %890 = vmatprep.subr.bf16.mxu0 %v868_v24  ;;  %v871_v46 = vand.u32 %v860_v41, %v10636_v13 }
  0xb2   :  { %v858_v28 = vsel %vm857_vm8, %v850_v27, %v852_v21  ;;  %676 = vmatpush1.bf16.msra.mxu1 %v613_v22  ;;  %2788 = vrot.lane.b32.xlu1 %v10631_v11, %s10501_s4 }
  0xb3   :  { %v865_v30 = vand.u32 %v858_v28, %v10636_v13  ;;  %2786 = vrot.lane.b32.xlu0 %v10644_v14, %s10501_s4  ;;  %908 = vmatprep.mubr.bf16.mxu0 %v15067_v12  ;;  %v983_v31 = vpop.permute.xlu1 %982 }
  0xb4   :  { %693 = vmatprep.mubr.bf16.mxu1 %v15067_v12  ;;  %804 = vmatprep.subr.bf16.mxu1 %v745_v26 }
  0xb5   :  { %v981_v33 = vpop.permute.xlu0 %980  ;;  %891 = vmatpush1.bf16.msra.mxu0 %v865_v30 }
  0xb6   :  { %v988_v35 = vsel %vm986_vm9, %v981_v33, %v983_v31  ;;  %2790 = vrot.lane.b32.xlu1 %v10648_v15, %s10501_s4 }
  0xb7   :  { %2784 = vrot.lane.b32.xlu0 %v10629_v10, %s10501_s4  ;;  %v997_v36 = vand.u32 %v988_v35, %v10636_v13  ;;  %v985_v37 = vpop.permute.xlu1 %984  ;;  %s10503_s4 = smov 61  }
  0xb8   :  { %9300 = vmatmul.mubr.msk.bf16.vlgmr.msra.gmra.mxu0 %vm113_vm2, %v10878_v32  ;;  %v1003_v50 = vand.u32 %v985_v37, %v10636_v13  ;;  %v989_v53 = vsel %vm986_vm9, %v983_v31, %v985_v37  ;;  %v10346_v31 = vld [vmem:[%s15095_s23 + $0x58] sm:$0xff]  }
  0xb9   :  { %v979_v39 = vpop.permute.xlu0 %978  ;;  %9291 = vmatmul.mubr.msk.bf16.vlgmr.msra.gmra.mxu1 %vm113_vm2, %v10830_v1  ;;  %1019 = vmatprep.subr.bf16.mxu0 %v997_v36  ;;  %v1000_v58 = vand.u32 %v989_v53, %v10636_v13 }
  0xba   :  { %v987_v40 = vsel %vm986_vm9, %v979_v39, %v981_v33  ;;  %805 = vmatpush1.bf16.msra.mxu1 %v742_v34  ;;  %2917 = vrot.lane.b32.xlu1 %v10631_v11, %s15059_s27 }
  0xbb   :  { %v994_v42 = vand.u32 %v987_v40, %v10636_v13  ;;  %2915 = vrot.lane.b32.xlu0 %v10644_v14, %s15059_s27  ;;  %1037 = vmatprep.mubr.bf16.mxu0 %v15067_v12  ;;  %v1112_v43 = vpop.permute.xlu1 %1111 }
  0xbc   :  { %822 = vmatprep.mubr.bf16.mxu1 %v15067_v12  ;;  %933 = vmatprep.subr.bf16.mxu1 %v874_v38 }
  0xbd   :  { %v1110_v45 = vpop.permute.xlu0 %1109  ;;  %1020 = vmatpush1.bf16.msra.mxu0 %v994_v42 }
  0xbe   :  { %v1117_v47 = vsel %vm1115_vm10, %v1110_v45, %v1112_v43  ;;  %2919 = vrot.lane.b32.xlu1 %v10648_v15, %s15059_s27 }
  0xbf   :  { %2913 = vrot.lane.b32.xlu0 %v10629_v10, %s15059_s27  ;;  %v1126_v48 = vand.u32 %v1117_v47, %v10636_v13  ;;  %v1114_v49 = vpop.permute.xlu1 %1113  ;;  %s15061_s27 = smov 60  }
  0xc0   :  { %9305 = vmatmul.mubr.msk.bf16.vlgmr.msra.gmra.mxu0 %vm113_vm2, %v10902_v44  ;;  %v1132_v62 = vand.u32 %v1114_v49, %v10636_v13  ;;  %v1118_v1 = vsel %vm1115_vm10, %v1112_v43, %v1114_v49  ;;  %v10347_v43 = vld [vmem:[%s15095_s23 + $0x60] sm:$0xff]  }
  0xc1   :  { %v1108_v51 = vpop.permute.xlu0 %1107  ;;  %9296 = vmatmul.mubr.msk.bf16.vlgmr.msra.gmra.mxu1 %vm113_vm2, %v10854_v20  ;;  %1148 = vmatprep.subr.bf16.mxu0 %v1126_v48 }
  0xc2   :  { %v1116_v52 = vsel %vm1115_vm10, %v1108_v51, %v1110_v45  ;;  %934 = vmatpush1.bf16.msra.mxu1 %v871_v46  ;;  %3046 = vrot.lane.b32.xlu1 %v10631_v11, %s10503_s4  ;;  %vm2147_vm10 = vcmask 646144  }
  0xc3   :  { %v1123_v54 = vand.u32 %v1116_v52, %v10636_v13  ;;  %3044 = vrot.lane.b32.xlu0 %v10644_v14, %s10503_s4  ;;  %1166 = vmatprep.mubr.bf16.mxu0 %v15067_v12  ;;  %v1241_v55 = vpop.permute.xlu1 %1240 }
  0xc4   :  { %951 = vmatprep.mubr.bf16.mxu1 %v15067_v12  ;;  %1062 = vmatprep.subr.bf16.mxu1 %v1003_v50 }
  0xc5   :  { %v1239_v57 = vpop.permute.xlu0 %1238  ;;  %1149 = vmatpush1.bf16.msra.mxu0 %v1123_v54 }
  0xc6   :  { %v1246_v59 = vsel %vm1244_vm11, %v1239_v57, %v1241_v55  ;;  %3048 = vrot.lane.b32.xlu1 %v10648_v15, %s10503_s4 }
  0xc7   :  { %3042 = vrot.lane.b32.xlu0 %v10629_v10, %s10503_s4  ;;  %v1255_v60 = vand.u32 %v1246_v59, %v10636_v13  ;;  %v1243_v61 = vpop.permute.xlu1 %1242  ;;  %s15148_s4 = sld [smem:[#allocation31_spill]] }
  0xc8   :  { %9310 = vmatmul.mubr.msk.bf16.vlgmr.msra.gmra.mxu0 %vm113_vm2, %v10343_v56 }
  0xc9   :  { %v1237_v63 = vpop.permute.xlu0 %1236  ;;  %9301 = vmatmul.mubr.msk.bf16.vlgmr.msra.gmra.mxu1 %vm113_vm2, %v10878_v32  ;;  %1277 = vmatprep.subr.bf16.mxu0 %v1255_v60 }
  0xca   :  { %v1245_v0 = vsel %vm1244_vm11, %v1237_v63, %v1239_v57  ;;  %1063 = vmatpush1.bf16.msra.mxu1 %v1000_v58  ;;  %3175 = vrot.lane.b32.xlu1 %v10631_v11, %s15061_s27  ;;  %v1129_v11 = vand.u32 %v1118_v1, %v10636_v13 }
  0xcb   :  { %v1252_v2 = vand.u32 %v1245_v0, %v10636_v13  ;;  %3173 = vrot.lane.b32.xlu0 %v10644_v14, %s15061_s27  ;;  %1295 = vmatprep.mubr.bf16.mxu0 %v15067_v12  ;;  %v1370_v3 = vpop.permute.xlu1 %1369  ;;  %v1261_v14 = vand.u32 %v1243_v61, %v10636_v13 }
  0xcc   :  { %1080 = vmatprep.mubr.bf16.mxu1 %v15067_v12  ;;  %1191 = vmatprep.subr.bf16.mxu1 %v1132_v62 }
  0xcd   :  { %v1368_v6 = vpop.permute.xlu0 %1367  ;;  %1278 = vmatpush1.bf16.msra.mxu0 %v1252_v2 }
  0xce   :  { %v1375_v7 = vsel %vm1373_vm12, %v1368_v6, %v1370_v3  ;;  %3177 = vrot.lane.b32.xlu1 %v10648_v15, %s15061_s27  ;;  %v1247_v15 = vsel %vm1244_vm11, %v1241_v55, %v1243_v61  ;;  %v10348_v55 = vld [vmem:[%s15095_s23 + $0x68] sm:$0xff]   ;;  %vm2276_vm11 = vcmask 637952  }
  0xcf   :  { %3171 = vrot.lane.b32.xlu0 %v10629_v10, %s15061_s27  ;;  %v1384_v8 = vand.u32 %v1375_v7, %v10636_v13  ;;  %v1372_v9 = vpop.permute.xlu1 %1371  ;;  %v1258_v21 = vand.u32 %v1247_v15, %v10636_v13  ;;  %s15146_s27 = sld [smem:[#allocation30_spill]] }
  0xd0   :  { %9315 = vmatmul.mubr.msk.bf16.vlgmr.msra.gmra.mxu0 %vm113_vm2, %v10344_v5  ;;  %v1390_v23 = vand.u32 %v1372_v9, %v10636_v13  ;;  %v1376_v28 = vsel %vm1373_vm12, %v1370_v3, %v1372_v9  ;;  %v10349_v3 = vld [vmem:[%s15095_s23 + $0x70] sm:$0xff]  }
  0xd1   :  { %v1366_v16 = vpop.permute.xlu0 %1365  ;;  %9306 = vmatmul.mubr.msk.bf16.vlgmr.msra.gmra.mxu1 %vm113_vm2, %v10902_v44  ;;  %1406 = vmatprep.subr.bf16.mxu0 %v1384_v8  ;;  %v1387_v33 = vand.u32 %v1376_v28, %v10636_v13 }
  0xd2   :  { %v1374_v17 = vsel %vm1373_vm12, %v1366_v16, %v1368_v6  ;;  %1192 = vmatpush1.bf16.msra.mxu1 %v1129_v11  ;;  %1424 = vmatprep.mubr.bf16.mxu0 %v15067_v12 }
  0xd3   :  { %v1381_v18 = vand.u32 %v1374_v17, %v10636_v13  ;;  %v1499_v10 = vpop.permute.xlu1 %1498  ;;  %1209 = vmatprep.mubr.bf16.mxu1 %v15067_v12  ;;  %1320 = vmatprep.subr.bf16.mxu1 %v1261_v14 }
  0xd5   :  { %v1497_v20 = vpop.permute.xlu0 %1496  ;;  %1407 = vmatpush1.bf16.msra.mxu0 %v1381_v18 }
  0xd6   :  { %v1504_v22 = vsel %vm1502_vm13, %v1497_v20, %v1499_v10 }
  0xd7   :  { %v1513_v24 = vand.u32 %v1504_v22, %v10636_v13  ;;  %v1501_v25 = vpop.permute.xlu1 %1500 }
  0xd8   :  { %9320 = vmatmul.mubr.msk.bf16.vlgmr.msra.gmra.mxu0 %vm113_vm2, %v10345_v19  ;;  %v1519_v35 = vand.u32 %v1501_v25, %v10636_v13  ;;  %v1505_v40 = vsel %vm1502_vm13, %v1499_v10, %v1501_v25  ;;  %v10350_v10 = vld [vmem:[%s15095_s23 + $0x78] sm:$0xff]  }
  0xd9   :  { %v1495_v26 = vpop.permute.xlu0 %1494  ;;  %9311 = vmatmul.mubr.msk.bf16.vlgmr.msra.gmra.mxu1 %vm113_vm2, %v10343_v56  ;;  %1535 = vmatprep.subr.bf16.mxu0 %v1513_v24  ;;  %v1516_v45 = vand.u32 %v1505_v40, %v10636_v13 }
  0xda   :  { %v1503_v27 = vsel %vm1502_vm13, %v1495_v26, %v1497_v20  ;;  %1321 = vmatpush1.bf16.msra.mxu1 %v1258_v21  ;;  %1553 = vmatprep.mubr.bf16.mxu0 %v15067_v12 }
  0xdb   :  { %v1510_v29 = vand.u32 %v1503_v27, %v10636_v13  ;;  %v1628_v30 = vpop.permute.xlu1 %1627  ;;  %1338 = vmatprep.mubr.bf16.mxu1 %v15067_v12  ;;  %1449 = vmatprep.subr.bf16.mxu1 %v1390_v23 }
  0xdd   :  { %v1626_v32 = vpop.permute.xlu0 %1625  ;;  %1536 = vmatpush1.bf16.msra.mxu0 %v1510_v29  ;;  %v10351_v29 = vld [vmem:[%s15095_s23 + $0x80] sm:$0xff]  }
  0xde   :  { %v1633_v34 = vsel %vm1631_vm14, %v1626_v32, %v1628_v30 }
  0xdf   :  { %v1642_v36 = vand.u32 %v1633_v34, %v10636_v13  ;;  %v1630_v37 = vpop.permute.xlu1 %1629 }
  0xe0   :  { %9325 = vmatmul.mubr.msk.bf16.vlgmr.msra.gmra.mxu0 %vm113_vm2, %v10346_v31  ;;  %v1648_v47 = vand.u32 %v1630_v37, %v10636_v13  ;;  %v1634_v52 = vsel %vm1631_vm14, %v1628_v30, %v1630_v37 }
  0xe1   :  { %v1624_v38 = vpop.permute.xlu0 %1623  ;;  %9316 = vmatmul.mubr.msk.bf16.vlgmr.msra.gmra.mxu1 %vm113_vm2, %v10344_v5  ;;  %1664 = vmatprep.subr.bf16.mxu0 %v1642_v36  ;;  %v1645_v57 = vand.u32 %v1634_v52, %v10636_v13  ;;  %v3293_v52 = vld [vmem:[%s15096_s0 + $0x8] sm:$0xff] }
  0xe2   :  { %v1632_v39 = vsel %vm1631_vm14, %v1624_v38, %v1626_v32  ;;  %1450 = vmatpush1.bf16.msra.mxu1 %v1387_v33  ;;  %1682 = vmatprep.mubr.bf16.mxu0 %v15067_v12 }
  0xe3   :  { %v1639_v41 = vand.u32 %v1632_v39, %v10636_v13  ;;  %v1757_v42 = vpop.permute.xlu1 %1756  ;;  %1467 = vmatprep.mubr.bf16.mxu1 %v15067_v12  ;;  %1578 = vmatprep.subr.bf16.mxu1 %v1519_v35 }
  0xe4   :  { %3301 = vperm.xlu1 %10118, %v3293_v52  }
  0xe5   :  { %v1755_v44 = vpop.permute.xlu0 %1754  ;;  %1665 = vmatpush1.bf16.msra.mxu0 %v1639_v41  ;;  %v10352_v41 = vld [vmem:[%s15095_s23 + $0x88] sm:$0xff]  }
  0xe6   :  { %v1762_v46 = vsel %vm1760_vm15, %v1755_v44, %v1757_v42 }
  0xe7   :  { %v1771_v48 = vand.u32 %v1762_v46, %v10636_v13  ;;  %v1759_v49 = vpop.permute.xlu1 %1758  ;;  %v3292_v46 = vld [vmem:[%s15096_s0] sm:$0xff]  ;;  %s15149_s0 = sld [smem:[#allocation32_spill]] }
  0xe8   :  { %9330 = vmatmul.mubr.msk.bf16.vlgmr.msra.gmra.mxu0 %vm113_vm2, %v10347_v43  ;;  %v1777_v59 = vand.u32 %v1759_v49, %v10636_v13  ;;  %v1763_v0 = vsel %vm1760_vm15, %v1757_v42, %v1759_v49  ;;  %3296 = vperm.xlu0 %10117, %v3292_v46  }
  0xe9   :  { %v1753_v50 = vpop.permute.xlu0 %1752  ;;  %9321 = vmatmul.mubr.msk.bf16.vlgmr.msra.gmra.mxu1 %vm113_vm2, %v10345_v19  ;;  %1793 = vmatprep.subr.bf16.mxu0 %v1771_v48  ;;  %v1774_v6 = vand.u32 %v1763_v0, %v10636_v13 }
  0xea   :  { %v1761_v51 = vsel %vm1760_vm15, %v1753_v50, %v1755_v44  ;;  %1579 = vmatpush1.bf16.msra.mxu1 %v1516_v45  ;;  %1811 = vmatprep.mubr.bf16.mxu0 %v15067_v12  ;;  %vm2405_vm15 = vcmask 629760  }
  0xeb   :  { %v1768_v53 = vand.u32 %v1761_v51, %v10636_v13  ;;  %v1886_v54 = vpop.permute.xlu1 %1885  ;;  %1596 = vmatprep.mubr.bf16.mxu1 %v15067_v12  ;;  %1707 = vmatprep.subr.bf16.mxu1 %v1648_v47 }
  0xed   :  { %v1884_v56 = vpop.permute.xlu0 %1883  ;;  %1794 = vmatpush1.bf16.msra.mxu0 %v1768_v53 }
  0xee   :  { %v1891_v58 = vsel %vm1889_vm0, %v1884_v56, %v1886_v54 }
  0xef   :  { %v1900_v60 = vand.u32 %v1891_v58, %v10636_v13  ;;  %v1888_v61 = vpop.permute.xlu1 %1887 }
  0xf0   :  { %9335 = vmatmul.mubr.msk.bf16.vlgmr.msra.gmra.mxu0 %vm113_vm2, %v10348_v55  ;;  %v1906_v7 = vand.u32 %v1888_v61, %v10636_v13  ;;  %v1892_v17 = vsel %vm1889_vm0, %v1886_v54, %v1888_v61 }
  0xf1   :  { %v1882_v62 = vpop.permute.xlu0 %1881  ;;  %9326 = vmatmul.mubr.msk.bf16.vlgmr.msra.gmra.mxu1 %vm113_vm2, %v10346_v31  ;;  %1922 = vmatprep.subr.bf16.mxu0 %v1900_v60  ;;  %v1903_v20 = vand.u32 %v1892_v17, %v10636_v13 }
  0xf2   :  { %v1890_v63 = vsel %vm1889_vm0, %v1882_v62, %v1884_v56  ;;  %1708 = vmatpush1.bf16.msra.mxu1 %v1645_v57  ;;  %1940 = vmatprep.mubr.bf16.mxu0 %v15067_v12 }
  0xf3   :  { %v1897_v1 = vand.u32 %v1890_v63, %v10636_v13  ;;  %v2015_v2 = vpop.permute.xlu1 %2014  ;;  %1725 = vmatprep.mubr.bf16.mxu1 %v15067_v12  ;;  %1836 = vmatprep.subr.bf16.mxu1 %v1777_v59 }
  0xf5   :  { %v2013_v5 = vpop.permute.xlu0 %2012  ;;  %1923 = vmatpush1.bf16.msra.mxu0 %v1897_v1 }
  0xf6   :  { %v2020_v11 = vsel %vm2018_vm5, %v2013_v5, %v2015_v2 }
  0xf7   :  { %v2029_v14 = vand.u32 %v2020_v11, %v10636_v13  ;;  %v2017_v8 = vpop.permute.xlu1 %2016 }
  0xf8   :  { %9340 = vmatmul.mubr.msk.bf16.vlgmr.msra.gmra.mxu0 %vm113_vm2, %v10349_v3  ;;  %v2035_v22 = vand.u32 %v2017_v8, %v10636_v13  ;;  %v2021_v27 = vsel %vm2018_vm5, %v2015_v2, %v2017_v8 }
  0xf9   :  { %v2011_v9 = vpop.permute.xlu0 %2010  ;;  %9331 = vmatmul.mubr.msk.bf16.vlgmr.msra.gmra.mxu1 %vm113_vm2, %v10347_v43  ;;  %2051 = vmatprep.subr.bf16.mxu0 %v2029_v14  ;;  %v2032_v32 = vand.u32 %v2021_v27, %v10636_v13 }
  0xfa   :  { %v2019_v16 = vsel %vm2018_vm5, %v2011_v9, %v2013_v5  ;;  %1837 = vmatpush1.bf16.msra.mxu1 %v1774_v6  ;;  %2069 = vmatprep.mubr.bf16.mxu0 %v15067_v12  ;;  %vm2534_vm5 = vcmask 621568  }
  0xfb   :  { %v2026_v15 = vand.u32 %v2019_v16, %v10636_v13  ;;  %v2144_v18 = vpop.permute.xlu1 %2143  ;;  %1854 = vmatprep.mubr.bf16.mxu1 %v15067_v12  ;;  %1965 = vmatprep.subr.bf16.mxu1 %v1906_v7 }
  0xfd   :  { %v2142_v19 = vpop.permute.xlu0 %2141  ;;  %2052 = vmatpush1.bf16.msra.mxu0 %v2026_v15 }
  0xfe   :  { %v2149_v21 = vsel %vm2147_vm10, %v2142_v19, %v2144_v18 }
  0xff   :  { %v2158_v23 = vand.u32 %v2149_v21, %v10636_v13  ;;  %v2146_v24 = vpop.permute.xlu1 %2145 }
 0x100   :  { %9345 = vmatmul.mubr.msk.bf16.vlgmr.msra.gmra.mxu0 %vm113_vm2, %v10350_v10  ;;  %v2164_v34 = vand.u32 %v2146_v24, %v10636_v13  ;;  %v2150_v39 = vsel %vm2147_vm10, %v2144_v18, %v2146_v24 }
 0x101   :  { %v2140_v25 = vpop.permute.xlu0 %2139  ;;  %9336 = vmatmul.mubr.msk.bf16.vlgmr.msra.gmra.mxu1 %vm113_vm2, %v10348_v55  ;;  %2180 = vmatprep.subr.bf16.mxu0 %v2158_v23  ;;  %v2161_v44 = vand.u32 %v2150_v39, %v10636_v13  ;;  %v10353_v55 = vld [vmem:[%s15095_s23 + $0x90] sm:$0xff]  }
 0x102   :  { %v2148_v26 = vsel %vm2147_vm10, %v2140_v25, %v2142_v19  ;;  %1966 = vmatpush1.bf16.msra.mxu1 %v1903_v20  ;;  %2198 = vmatprep.mubr.bf16.mxu0 %v15067_v12  ;;  %vm2663_vm10 = vcmask 523264  }
 0x103   :  { %v2155_v28 = vand.u32 %v2148_v26, %v10636_v13  ;;  %1983 = vmatprep.mubr.bf16.mxu1 %v15067_v12  ;;  %2094 = vmatprep.subr.bf16.mxu1 %v2035_v22 }
 0x104   :  { %v2273_v30 = vpop.permute.xlu1 %2272 }
 0x105   :  { %v2271_v31 = vpop.permute.xlu0 %2270  ;;  %2181 = vmatpush1.bf16.msra.mxu0 %v2155_v28 }
 0x106   :  { %v2278_v33 = vsel %vm2276_vm11, %v2271_v31, %v2273_v30 }
 0x107   :  { %v2287_v35 = vand.u32 %v2278_v33, %v10636_v13 }
 0x108   :  { %9350 = vmatmul.mubr.msk.bf16.vlgmr.msra.gmra.mxu0 %vm113_vm2, %v10351_v29  ;;  %v2275_v36 = vpop.permute.xlu1 %2274 }
 0x109   :  { %v2269_v37 = vpop.permute.xlu0 %2268  ;;  %9341 = vmatmul.mubr.msk.bf16.vlgmr.msra.gmra.mxu1 %vm113_vm2, %v10349_v3  ;;  %2309 = vmatprep.subr.bf16.mxu0 %v2287_v35  ;;  %v2293_v47 = vand.u32 %v2275_v36, %v10636_v13  ;;  %v2279_v53 = vsel %vm2276_vm11, %v2273_v30, %v2275_v36  ;;  %v10354_v3 = vld [vmem:[%s15095_s23 + $0x98] sm:$0xff]   ;;  %v10356_v30 = vld [vmem:[%s15095_s23 + $0xa8] sm:$0xff]  }
 0x10a   :  { %v2277_v38 = vsel %vm2276_vm11, %v2269_v37, %v2271_v31  ;;  %2095 = vmatpush1.bf16.msra.mxu1 %v2032_v32  ;;  %2327 = vmatprep.mubr.bf16.mxu0 %v15067_v12  ;;  %v2290_v58 = vand.u32 %v2279_v53, %v10636_v13  ;;  %vm2792_vm11 = vcmask 515072  }
 0x10b   :  { %v2284_v40 = vand.u32 %v2277_v38, %v10636_v13  ;;  %2112 = vmatprep.mubr.bf16.mxu1 %v15067_v12  ;;  %2223 = vmatprep.subr.bf16.mxu1 %v2164_v34 }
 0x10c   :  { %v2402_v42 = vpop.permute.xlu1 %2401 }
 0x10d   :  { %v2400_v43 = vpop.permute.xlu0 %2399  ;;  %2310 = vmatpush1.bf16.msra.mxu0 %v2284_v40 }
 0x10e   :  { %v2407_v45 = vsel %vm2405_vm15, %v2400_v43, %v2402_v42 }
 0x10f   :  { %v2416_v48 = vand.u32 %v2407_v45, %v10636_v13 }
 0x110   :  { %9355 = vmatmul.mubr.msk.bf16.vlgmr.msra.gmra.mxu0 %vm113_vm2, %v10352_v41  ;;  %v2404_v49 = vpop.permute.xlu1 %2403 }
 0x111   :  { %v2398_v50 = vpop.permute.xlu0 %2397  ;;  %9346 = vmatmul.mubr.msk.bf16.vlgmr.msra.gmra.mxu1 %vm113_vm2, %v10350_v10  ;;  %2438 = vmatprep.subr.bf16.mxu0 %v2416_v48  ;;  %v2422_v60 = vand.u32 %v2404_v49, %v10636_v13  ;;  %v2408_v1 = vsel %vm2405_vm15, %v2402_v42, %v2404_v49  ;;  %v10355_v10 = vld [vmem:[%s15095_s23 + $0xa0] sm:$0xff]   ;;  %v10357_v42 = vld [vmem:[%s15095_s23 + $0xb0] sm:$0xff]  }
 0x112   :  { %v2406_v51 = vsel %vm2405_vm15, %v2398_v50, %v2400_v43  ;;  %2224 = vmatpush1.bf16.msra.mxu1 %v2161_v44  ;;  %2456 = vmatprep.mubr.bf16.mxu0 %v15067_v12  ;;  %v2419_v11 = vand.u32 %v2408_v1, %v10636_v13  ;;  %vm2921_vm15 = vcmask 506880   ;;  %v10359_v1 = vld [vmem:[%s15095_s23 + $0xc0] sm:$0xff]  }
 0x113   :  { %v2413_v54 = vand.u32 %v2406_v51, %v10636_v13  ;;  %2241 = vmatprep.mubr.bf16.mxu1 %v15067_v12  ;;  %2352 = vmatprep.subr.bf16.mxu1 %v2293_v47 }
 0x114   :  { %v2531_v56 = vpop.permute.xlu1 %2530 }
 0x115   :  { %v2529_v57 = vpop.permute.xlu0 %2528  ;;  %2439 = vmatpush1.bf16.msra.mxu0 %v2413_v54  ;;  %v10358_v54 = vld [vmem:[%s15095_s23 + $0xb8] sm:$0xff]  }
 0x116   :  { %v2536_v59 = vsel %vm2534_vm5, %v2529_v57, %v2531_v56 }
 0x117   :  { %v2545_v61 = vand.u32 %v2536_v59, %v10636_v13 }
 0x118   :  { %9360 = vmatmul.mubr.msk.bf16.vlgmr.msra.gmra.mxu0 %vm113_vm2, %v10353_v55  ;;  %v2533_v62 = vpop.permute.xlu1 %2532 }
 0x119   :  { %v2527_v63 = vpop.permute.xlu0 %2526  ;;  %9351 = vmatmul.mubr.msk.bf16.vlgmr.msra.gmra.mxu1 %vm113_vm2, %v10351_v29  ;;  %2567 = vmatprep.subr.bf16.mxu0 %v2545_v61  ;;  %v2551_v14 = vand.u32 %v2533_v62, %v10636_v13  ;;  %v2537_v15 = vsel %vm2534_vm5, %v2531_v56, %v2533_v62 }
 0x11a   :  { %v2535_v0 = vsel %vm2534_vm5, %v2527_v63, %v2529_v57  ;;  %2353 = vmatpush1.bf16.msra.mxu1 %v2290_v58  ;;  %2585 = vmatprep.mubr.bf16.mxu0 %v15067_v12  ;;  %v2548_v21 = vand.u32 %v2537_v15, %v10636_v13  ;;  %vm3050_vm5 = vcmask 498688  }
 0x11b   :  { %v2542_v2 = vand.u32 %v2535_v0, %v10636_v13  ;;  %2370 = vmatprep.mubr.bf16.mxu1 %v15067_v12  ;;  %2481 = vmatprep.subr.bf16.mxu1 %v2422_v60 }
 0x11c   :  { %v2660_v5 = vpop.permute.xlu1 %2659 }
 0x11d   :  { %v2658_v6 = vpop.permute.xlu0 %2657  ;;  %2568 = vmatpush1.bf16.msra.mxu0 %v2542_v2 }
 0x11e   :  { %v2665_v7 = vsel %vm2663_vm10, %v2658_v6, %v2660_v5 }
 0x11f   :  { %v2674_v8 = vand.u32 %v2665_v7, %v10636_v13 }
 0x120   :  { %9365 = vmatmul.mubr.msk.bf16.vlgmr.msra.gmra.mxu0 %vm113_vm2, %v10354_v3  ;;  %v2662_v9 = vpop.permute.xlu1 %2661 }
 0x121   :  { %v2656_v16 = vpop.permute.xlu0 %2655  ;;  %9356 = vmatmul.mubr.msk.bf16.vlgmr.msra.gmra.mxu1 %vm113_vm2, %v10352_v41  ;;  %2696 = vmatprep.subr.bf16.mxu0 %v2674_v8  ;;  %v2680_v23 = vand.u32 %v2662_v9, %v10636_v13  ;;  %v2666_v28 = vsel %vm2663_vm10, %v2660_v5, %v2662_v9 }
 0x122   :  { %v2664_v17 = vsel %vm2663_vm10, %v2656_v16, %v2658_v6  ;;  %2482 = vmatpush1.bf16.msra.mxu1 %v2419_v11  ;;  %2714 = vmatprep.mubr.bf16.mxu0 %v15067_v12  ;;  %v2677_v33 = vand.u32 %v2666_v28, %v10636_v13  ;;  %v273_v6 = vpop.f32.mrf.mxu0 }
 0x123   :  { %v2671_v18 = vand.u32 %v2664_v17, %v10636_v13  ;;  %2499 = vmatprep.mubr.bf16.mxu1 %v15067_v12  ;;  %2610 = vmatprep.subr.bf16.mxu1 %v2551_v14 }
 0x124   :  { %v2789_v19 = vpop.permute.xlu1 %2788  ;;  %v275_v7 = vpop.f32.mrf.mxu0 }
 0x125   :  { %v2787_v20 = vpop.permute.xlu0 %2786  ;;  %2697 = vmatpush1.bf16.msra.mxu0 %v2671_v18 }
 0x126   :  { %v2794_v22 = vsel %vm2792_vm11, %v2787_v20, %v2789_v19  ;;  %v277_v8 = vpop.f32.mrf.mxu0 }
 0x127   :  { %v2803_v24 = vand.u32 %v2794_v22, %v10636_v13 }
 0x128   :  { %9370 = vmatmul.mubr.msk.bf16.vlgmr.msra.gmra.mxu0 %vm113_vm2, %v10355_v10  ;;  %v2791_v25 = vpop.permute.xlu1 %2790  ;;  %v11179_v17 = vpop.f32.mrf.mxu0 }
 0x129   :  { %v2785_v26 = vpop.permute.xlu0 %2784  ;;  %9361 = vmatmul.mubr.msk.bf16.vlgmr.msra.gmra.mxu1 %vm113_vm2, %v10353_v55  ;;  %2825 = vmatprep.subr.bf16.mxu0 %v2803_v24  ;;  %v2809_v35 = vand.u32 %v2791_v25, %v10636_v13  ;;  %v2795_v40 = vsel %vm2792_vm11, %v2789_v19, %v2791_v25 }
 0x12a   :  { %v2793_v27 = vsel %vm2792_vm11, %v2785_v26, %v2787_v20  ;;  %2611 = vmatpush1.bf16.msra.mxu1 %v2548_v21  ;;  %2843 = vmatprep.mubr.bf16.mxu0 %v15067_v12  ;;  %v2806_v45 = vand.u32 %v2795_v40, %v10636_v13  ;;  %vm3179_vm11 = vcmask 490496  }
 0x12b   :  { %v2800_v29 = vand.u32 %v2793_v27, %v10636_v13  ;;  %2628 = vmatprep.mubr.bf16.mxu1 %v15067_v12  ;;  %2739 = vmatprep.subr.bf16.mxu1 %v2680_v23 }
 0x12c   :  { %v2918_v31 = vpop.permute.xlu1 %2917 }
 0x12d   :  { %v2916_v32 = vpop.permute.xlu0 %2915  ;;  %2826 = vmatpush1.bf16.msra.mxu0 %v2800_v29 }
 0x12e   :  { %v2923_v34 = vsel %vm2921_vm15, %v2916_v32, %v2918_v31 }
 0x12f   :  { %v2932_v36 = vand.u32 %v2923_v34, %v10636_v13 }
 0x130   :  { %9375 = vmatmul.mubr.msk.bf16.vlgmr.msra.gmra.mxu0 %vm113_vm2, %v10356_v30  ;;  %v2920_v37 = vpop.permute.xlu1 %2919 }
 0x131   :  { %v2914_v38 = vpop.permute.xlu0 %2913  ;;  %9366 = vmatmul.mubr.msk.bf16.vlgmr.msra.gmra.mxu1 %vm113_vm2, %v10354_v3  ;;  %2954 = vmatprep.subr.bf16.mxu0 %v2932_v36  ;;  %v2938_v47 = vand.u32 %v2920_v37, %v10636_v13  ;;  %v2924_v52 = vsel %vm2921_vm15, %v2918_v31, %v2920_v37 }
 0x132   :  { %v2922_v39 = vsel %vm2921_vm15, %v2914_v38, %v2916_v32  ;;  %2740 = vmatpush1.bf16.msra.mxu1 %v2677_v33  ;;  %2972 = vmatprep.mubr.bf16.mxu0 %v15067_v12  ;;  %v2935_v57 = vand.u32 %v2924_v52, %v10636_v13 }
 0x133   :  { %v2929_v41 = vand.u32 %v2922_v39, %v10636_v13  ;;  %2757 = vmatprep.mubr.bf16.mxu1 %v15067_v12  ;;  %2868 = vmatprep.subr.bf16.mxu1 %v2809_v35 }
 0x134   :  { %v3047_v43 = vpop.permute.xlu1 %3046 }
 0x135   :  { %v3045_v44 = vpop.permute.xlu0 %3044  ;;  %2955 = vmatpush1.bf16.msra.mxu0 %v2929_v41 }
 0x136   :  { %v3052_v46 = vsel %vm3050_vm5, %v3045_v44, %v3047_v43 }
 0x137   :  { %v3061_v48 = vand.u32 %v3052_v46, %v10636_v13 }
 0x138   :  { %9380 = vmatmul.mubr.msk.bf16.vlgmr.msra.gmra.mxu0 %vm113_vm2, %v10357_v42  ;;  %v3049_v49 = vpop.permute.xlu1 %3048 }
 0x139   :  { %v3043_v50 = vpop.permute.xlu0 %3042  ;;  %9371 = vmatmul.mubr.msk.bf16.vlgmr.msra.gmra.mxu1 %vm113_vm2, %v10355_v10  ;;  %3083 = vmatprep.subr.bf16.mxu0 %v3061_v48  ;;  %v3067_v59 = vand.u32 %v3049_v49, %v10636_v13  ;;  %v3053_v63 = vsel %vm3050_vm5, %v3047_v43, %v3049_v49 }
 0x13a   :  { %v3051_v51 = vsel %vm3050_vm5, %v3043_v50, %v3045_v44  ;;  %2869 = vmatpush1.bf16.msra.mxu1 %v2806_v45  ;;  %3101 = vmatprep.mubr.bf16.mxu0 %v15067_v12  ;;  %v3064_v3 = vand.u32 %v3053_v63, %v10636_v13  ;;  %vm5196_vm5 = vcmask 207872  }
 0x13b   :  { %v3058_v53 = vand.u32 %v3051_v51, %v10636_v13  ;;  %2886 = vmatprep.mubr.bf16.mxu1 %v15067_v12  ;;  %2997 = vmatprep.subr.bf16.mxu1 %v2938_v47 }
 0x13c   :  { %v3176_v55 = vpop.permute.xlu1 %3175 }
 0x13d   :  { %v3174_v56 = vpop.permute.xlu0 %3173  ;;  %3084 = vmatpush1.bf16.msra.mxu0 %v3058_v53 }
 0x13e   :  { %v3181_v58 = vsel %vm3179_vm11, %v3174_v56, %v3176_v55 }
 0x13f   :  { %v3190_v60 = vand.u32 %v3181_v58, %v10636_v13 }
 0x140   :  { %9385 = vmatmul.mubr.msk.bf16.vlgmr.msra.gmra.mxu0 %vm113_vm2, %v10358_v54  ;;  %v3178_v2 = vpop.permute.xlu1 %3177 }
 0x141   :  { %v3172_v61 = vpop.permute.xlu0 %3171  ;;  %9376 = vmatmul.mubr.msk.bf16.vlgmr.msra.gmra.mxu1 %vm113_vm2, %v10356_v30  ;;  %3212 = vmatprep.subr.bf16.mxu0 %v3190_v60  ;;  %v3196_v5 = vand.u32 %v3178_v2, %v10636_v13  ;;  %v3182_v11 = vsel %vm3179_vm11, %v3176_v55, %v3178_v2 }
 0x142   :  { %v3180_v62 = vsel %vm3179_vm11, %v3172_v61, %v3174_v56  ;;  %2998 = vmatpush1.bf16.msra.mxu1 %v2935_v57  ;;  %3230 = vmatprep.mubr.bf16.mxu0 %v15067_v12  ;;  %v3193_v14 = vand.u32 %v3182_v11, %v10636_v13 }
 0x143   :  { %v3187_v0 = vand.u32 %v3180_v62, %v10636_v13  ;;  %3015 = vmatprep.mubr.bf16.mxu1 %v15067_v12  ;;  %3126 = vmatprep.subr.bf16.mxu1 %v3067_v59 }
 0x145   :  { %3213 = vmatpush1.bf16.msra.mxu0 %v3187_v0 }
 0x148   :  { %9390 = vmatmul.mubr.msk.bf16.vlgmr.msra.gmra.mxu0 %vm113_vm2, %v10359_v1 }
 0x149   :  { %9381 = vmatmul.mubr.msk.bf16.vlgmr.msra.gmra.mxu1 %vm113_vm2, %v10357_v42  ;;  %3544 = vmatprep.mubr.bf16.mxu0 %v15067_v12 }
 0x14a   :  { %3127 = vmatpush1.bf16.msra.mxu1 %v3064_v3  ;;  %3144 = vmatprep.mubr.bf16.mxu1 %v15067_v12 }
 0x14b   :  { %3255 = vmatprep.subr.bf16.mxu1 %v3196_v5 }
 0x151   :  { %v167_v9 = vpop.f32.mrf.mxu1  ;;  %9386 = vmatmul.mubr.msk.bf16.vlgmr.msra.gmra.mxu1 %vm113_vm2, %v10358_v54 }
 0x152   :  { %3256 = vmatpush1.bf16.msra.mxu1 %v3193_v14  ;;  %3273 = vmatprep.mubr.bf16.mxu1 %v15067_v12  ;;  %v274_v18 = vadd.f32 %v273_v6, %v167_v9 }
 0x153   :  { %v169_v16 = vpop.f32.mrf.mxu1 }
 0x154   :  { %v276_v20 = vadd.f32 %v275_v7, %v169_v16 }
 0x155   :  { %v171_v15 = vpop.f32.mrf.mxu1 }
 0x156   :  { %v278_v23 = vadd.f32 %v277_v8, %v171_v15 }
 0x157   :  { %v11181_v10 = vpop.f32.mrf.mxu1 }
 0x158   :  { %v394_v19 = vpop.f32.mrf.mxu0 }
 0x159   :  { %v446_v21 = vadd.f32 %v394_v19, %v274_v18  ;;  %v210_v22 = vpop.f32.mrf.mxu1  ;;  %9391 = vmatmul.mubr.msk.bf16.vlgmr.msra.gmra.mxu1 %vm113_vm2, %v10359_v1  ;;  %vm3502_vm2 = vcmask 130048  }
 0x15a   :  { %v396_v13 = vpop.f32.mrf.mxu0  ;;  %3605 = vmatprep.mubr.bf16.mxu1 %v15067_v12 }
 0x15b   :  { %v447_v24 = vadd.f32 %v396_v13, %v276_v20  ;;  %v212_v25 = vpop.f32.mrf.mxu1 }
 0x15c   :  { %v398_v26 = vpop.f32.mrf.mxu0 }
 0x15d   :  { %v450_v27 = vadd.f32 %v398_v26, %v278_v23  ;;  %v214_v28 = vpop.f32.mrf.mxu1 }
 0x15e   :  { %v11185_v29 = vpop.f32.mrf.mxu0 }
 0x15f   :  { %v11187_v30 = vpop.f32.mrf.mxu1 }
 0x160   :  { %v523_v31 = vpop.f32.mrf.mxu0 }
 0x161   :  { %v575_v32 = vadd.f32 %v523_v31, %v446_v21  ;;  %v316_v33 = vpop.f32.mrf.mxu1 }
 0x162   :  { %v317_v34 = vadd.f32 %v316_v33, %v210_v22  ;;  %v525_v35 = vpop.f32.mrf.mxu0 }
 0x163   :  { %v576_v36 = vadd.f32 %v525_v35, %v447_v24  ;;  %v318_v37 = vpop.f32.mrf.mxu1 }
 0x164   :  { %v319_v38 = vadd.f32 %v318_v37, %v212_v25  ;;  %v527_v39 = vpop.f32.mrf.mxu0 }
 0x165   :  { %v579_v40 = vadd.f32 %v527_v39, %v450_v27  ;;  %v320_v41 = vpop.f32.mrf.mxu1 }
 0x166   :  { %v321_v42 = vadd.f32 %v320_v41, %v214_v28  ;;  %v11189_v43 = vpop.f32.mrf.mxu0 }
 0x167   :  { %v11191_v44 = vpop.f32.mrf.mxu1 }
 0x168   :  { %v652_v45 = vpop.f32.mrf.mxu0 }
 0x169   :  { %v704_v46 = vadd.f32 %v652_v45, %v575_v32  ;;  %v437_v47 = vpop.f32.mrf.mxu1 }
 0x16a   :  { %v448_v48 = vadd.f32 %v437_v47, %v317_v34  ;;  %v654_v49 = vpop.f32.mrf.mxu0 }
 0x16b   :  { %v705_v50 = vadd.f32 %v654_v49, %v576_v36  ;;  %v439_v51 = vpop.f32.mrf.mxu1 }
 0x16c   :  { %v449_v52 = vadd.f32 %v439_v51, %v319_v38  ;;  %v656_v53 = vpop.f32.mrf.mxu0 }
 0x16d   :  { %v708_v54 = vadd.f32 %v656_v53, %v579_v40  ;;  %v441_v55 = vpop.f32.mrf.mxu1 }
 0x16e   :  { %v452_v56 = vadd.f32 %v441_v55, %v321_v42  ;;  %v11193_v57 = vpop.f32.mrf.mxu0 }
 0x16f   :  { %v11195_v58 = vpop.f32.mrf.mxu1 }
 0x170   :  { %v781_v59 = vpop.f32.mrf.mxu0 }
 0x171   :  { %v833_v60 = vadd.f32 %v781_v59, %v704_v46  ;;  %v566_v61 = vpop.f32.mrf.mxu1 }
 0x172   :  { %v577_v62 = vadd.f32 %v566_v61, %v448_v48  ;;  %v783_v63 = vpop.f32.mrf.mxu0 }
 0x173   :  { %v834_v0 = vadd.f32 %v783_v63, %v705_v50  ;;  %v568_v1 = vpop.f32.mrf.mxu1 }
 0x174   :  { %v578_v2 = vadd.f32 %v568_v1, %v449_v52  ;;  %v785_v3 = vpop.f32.mrf.mxu0 }
 0x175   :  { %v837_v5 = vadd.f32 %v785_v3, %v708_v54  ;;  %v570_v6 = vpop.f32.mrf.mxu1 }
 0x176   :  { %v581_v11 = vadd.f32 %v570_v6, %v452_v56  ;;  %v11197_v7 = vpop.f32.mrf.mxu0 }
 0x177   :  { %v11199_v14 = vpop.f32.mrf.mxu1 }
 0x178   :  { %v910_v8 = vpop.f32.mrf.mxu0 }
 0x179   :  { %v962_v9 = vadd.f32 %v910_v8, %v833_v60  ;;  %v695_v16 = vpop.f32.mrf.mxu1 }
 0x17a   :  { %v706_v15 = vadd.f32 %v695_v16, %v577_v62  ;;  %v912_v18 = vpop.f32.mrf.mxu0 }
 0x17b   :  { %v963_v19 = vadd.f32 %v912_v18, %v834_v0  ;;  %v697_v20 = vpop.f32.mrf.mxu1 }
 0x17c   :  { %v707_v21 = vadd.f32 %v697_v20, %v578_v2  ;;  %v914_v22 = vpop.f32.mrf.mxu0 }
 0x17d   :  { %v966_v13 = vadd.f32 %v914_v22, %v837_v5  ;;  %v699_v23 = vpop.f32.mrf.mxu1 }
 0x17e   :  { %v710_v24 = vadd.f32 %v699_v23, %v581_v11  ;;  %v11201_v25 = vpop.f32.mrf.mxu0 }
 0x17f   :  { %v11203_v26 = vpop.f32.mrf.mxu1 }
 0x180   :  { %v1039_v27 = vpop.f32.mrf.mxu0 }
 0x181   :  { %v1091_v28 = vadd.f32 %v1039_v27, %v962_v9  ;;  %v824_v31 = vpop.f32.mrf.mxu1 }
 0x182   :  { %v835_v32 = vadd.f32 %v824_v31, %v706_v15  ;;  %v1041_v33 = vpop.f32.mrf.mxu0 }
 0x183   :  { %v1092_v34 = vadd.f32 %v1041_v33, %v963_v19  ;;  %v826_v35 = vpop.f32.mrf.mxu1 }
 0x184   :  { %v836_v36 = vadd.f32 %v826_v35, %v707_v21  ;;  %v1043_v37 = vpop.f32.mrf.mxu0 }
 0x185   :  { %v1095_v38 = vadd.f32 %v1043_v37, %v966_v13  ;;  %v828_v39 = vpop.f32.mrf.mxu1 }
 0x186   :  { %v839_v40 = vadd.f32 %v828_v39, %v710_v24  ;;  %v11205_v41 = vpop.f32.mrf.mxu0 }
 0x187   :  { %v11207_v42 = vpop.f32.mrf.mxu1 }
 0x188   :  { %v1168_v45 = vpop.f32.mrf.mxu0 }
 0x189   :  { %v1220_v46 = vadd.f32 %v1168_v45, %v1091_v28  ;;  %v953_v47 = vpop.f32.mrf.mxu1 }
 0x18a   :  { %v964_v48 = vadd.f32 %v953_v47, %v835_v32  ;;  %v1170_v49 = vpop.f32.mrf.mxu0 }
 0x18b   :  { %v1221_v50 = vadd.f32 %v1170_v49, %v1092_v34  ;;  %v955_v51 = vpop.f32.mrf.mxu1 }
 0x18c   :  { %v965_v52 = vadd.f32 %v955_v51, %v836_v36  ;;  %v1172_v53 = vpop.f32.mrf.mxu0 }
 0x18d   :  { %v1224_v54 = vadd.f32 %v1172_v53, %v1095_v38  ;;  %v957_v55 = vpop.f32.mrf.mxu1 }
 0x18e   :  { %v968_v56 = vadd.f32 %v957_v55, %v839_v40  ;;  %v11209_v59 = vpop.f32.mrf.mxu0 }
 0x18f   :  { %v11211_v60 = vpop.f32.mrf.mxu1 }
 0x190   :  { %v1297_v61 = vpop.f32.mrf.mxu0 }
 0x191   :  { %v1349_v62 = vadd.f32 %v1297_v61, %v1220_v46  ;;  %v1082_v63 = vpop.f32.mrf.mxu1 }
 0x192   :  { %v1093_v0 = vadd.f32 %v1082_v63, %v964_v48  ;;  %v1299_v1 = vpop.f32.mrf.mxu0 }
 0x193   :  { %v1350_v2 = vadd.f32 %v1299_v1, %v1221_v50  ;;  %v1084_v3 = vpop.f32.mrf.mxu1 }
 0x194   :  { %v1094_v5 = vadd.f32 %v1084_v3, %v965_v52  ;;  %v1301_v6 = vpop.f32.mrf.mxu0 }
 0x195   :  { %v1353_v11 = vadd.f32 %v1301_v6, %v1224_v54  ;;  %v1086_v8 = vpop.f32.mrf.mxu1 }
 0x196   :  { %v1097_v9 = vadd.f32 %v1086_v8, %v968_v56  ;;  %v11213_v16 = vpop.f32.mrf.mxu0 }
 0x197   :  { %v11215_v15 = vpop.f32.mrf.mxu1 }
 0x198   :  { %v1426_v18 = vpop.f32.mrf.mxu0 }
 0x199   :  { %v1478_v19 = vadd.f32 %v1426_v18, %v1349_v62  ;;  %v1211_v20 = vpop.f32.mrf.mxu1 }
 0x19a   :  { %v1222_v21 = vadd.f32 %v1211_v20, %v1093_v0  ;;  %v1428_v22 = vpop.f32.mrf.mxu0 }
 0x19b   :  { %v1479_v13 = vadd.f32 %v1428_v22, %v1350_v2  ;;  %v1213_v23 = vpop.f32.mrf.mxu1 }
 0x19c   :  { %v1223_v24 = vadd.f32 %v1213_v23, %v1094_v5  ;;  %v1430_v27 = vpop.f32.mrf.mxu0 }
 0x19d   :  { %v1482_v28 = vadd.f32 %v1430_v27, %v1353_v11  ;;  %v1215_v31 = vpop.f32.mrf.mxu1 }
 0x19e   :  { %v1226_v32 = vadd.f32 %v1215_v31, %v1097_v9  ;;  %v11217_v33 = vpop.f32.mrf.mxu0 }
 0x19f   :  { %v11219_v34 = vpop.f32.mrf.mxu1 }
 0x1a0   :  { %v1555_v35 = vpop.f32.mrf.mxu0 }
 0x1a1   :  { %v1607_v36 = vadd.f32 %v1555_v35, %v1478_v19  ;;  %v1340_v37 = vpop.f32.mrf.mxu1 }
 0x1a2   :  { %v1351_v38 = vadd.f32 %v1340_v37, %v1222_v21  ;;  %v1557_v39 = vpop.f32.mrf.mxu0 }
 0x1a3   :  { %v1608_v40 = vadd.f32 %v1557_v39, %v1479_v13  ;;  %v1342_v45 = vpop.f32.mrf.mxu1 }
 0x1a4   :  { %v1352_v46 = vadd.f32 %v1342_v45, %v1223_v24  ;;  %v1559_v47 = vpop.f32.mrf.mxu0 }
 0x1a5   :  { %v1611_v48 = vadd.f32 %v1559_v47, %v1482_v28  ;;  %v1344_v49 = vpop.f32.mrf.mxu1 }
 0x1a6   :  { %v1355_v50 = vadd.f32 %v1344_v49, %v1226_v32  ;;  %v11221_v51 = vpop.f32.mrf.mxu0 }
 0x1a7   :  { %v11223_v52 = vpop.f32.mrf.mxu1 }
 0x1a8   :  { %v1684_v53 = vpop.f32.mrf.mxu0 }
 0x1a9   :  { %v1736_v54 = vadd.f32 %v1684_v53, %v1607_v36  ;;  %v1469_v55 = vpop.f32.mrf.mxu1 }
 0x1aa   :  { %v1480_v56 = vadd.f32 %v1469_v55, %v1351_v38  ;;  %v1686_v61 = vpop.f32.mrf.mxu0 }
 0x1ab   :  { %v1737_v62 = vadd.f32 %v1686_v61, %v1608_v40  ;;  %v1471_v63 = vpop.f32.mrf.mxu1 }
 0x1ac   :  { %v1481_v0 = vadd.f32 %v1471_v63, %v1352_v46  ;;  %v1688_v1 = vpop.f32.mrf.mxu0 }
 0x1ad   :  { %v1740_v2 = vadd.f32 %v1688_v1, %v1611_v48  ;;  %v1473_v3 = vpop.f32.mrf.mxu1 }
 0x1ae   :  { %v1484_v5 = vadd.f32 %v1473_v3, %v1355_v50  ;;  %v11225_v6 = vpop.f32.mrf.mxu0 }
 0x1af   :  { %v11227_v11 = vpop.f32.mrf.mxu1 }
 0x1b0   :  { %v1813_v8 = vpop.f32.mrf.mxu0 }
 0x1b1   :  { %v11229_v9 = vadd.f32 %v1813_v8, %v1736_v54  ;;  %v1598_v18 = vpop.f32.mrf.mxu1 }
 0x1b2   :  { %v1609_v19 = vadd.f32 %v1598_v18, %v1480_v56  ;;  %v1815_v20 = vpop.f32.mrf.mxu0 }
 0x1b3   :  { %v11231_v21 = vadd.f32 %v1815_v20, %v1737_v62  ;;  %v1600_v22 = vpop.f32.mrf.mxu1 }
 0x1b4   :  { %v1610_v13 = vadd.f32 %v1600_v22, %v1481_v0  ;;  %v1817_v23 = vpop.f32.mrf.mxu0 }
 0x1b5   :  { %v11233_v24 = vadd.f32 %v1817_v23, %v1740_v2  ;;  %v1602_v27 = vpop.f32.mrf.mxu1 }
 0x1b6   :  { %v1613_v28 = vadd.f32 %v1602_v27, %v1484_v5  ;;  %v11235_v31 = vpop.f32.mrf.mxu0 }
 0x1b7   :  { %v11237_v32 = vpop.f32.mrf.mxu1 }
 0x1b8   :  { %v11239_v35 = vpop.f32.mrf.mxu0 }
 0x1b9   :  { %v1727_v36 = vpop.f32.mrf.mxu1 }
 0x1ba   :  { %v1738_v37 = vadd.f32 %v1727_v36, %v1609_v19  ;;  %v11241_v38 = vpop.f32.mrf.mxu0 }
 0x1bb   :  { %v1729_v39 = vpop.f32.mrf.mxu1 }
 0x1bc   :  { %v1739_v40 = vadd.f32 %v1729_v39, %v1610_v13  ;;  %v11243_v45 = vpop.f32.mrf.mxu0 }
 0x1bd   :  { %v1731_v46 = vpop.f32.mrf.mxu1 }
 0x1be   :  { %v1742_v47 = vadd.f32 %v1731_v46, %v1613_v28  ;;  %v11245_v48 = vpop.f32.mrf.mxu0 }
 0x1bf   :  { %v11247_v49 = vpop.f32.mrf.mxu1 }
 0x1c0   :  { %v11249_v50 = vpop.f32.mrf.mxu0 }
 0x1c1   :  { %v1856_v53 = vpop.f32.mrf.mxu1 }
 0x1c2   :  { %v11251_v54 = vadd.f32 %v1856_v53, %v1738_v37  ;;  %v11253_v55 = vpop.f32.mrf.mxu0 }
 0x1c3   :  { %v1858_v56 = vpop.f32.mrf.mxu1 }
 0x1c4   :  { %v11255_v61 = vadd.f32 %v1858_v56, %v1739_v40  ;;  %v11257_v62 = vpop.f32.mrf.mxu0 }
 0x1c5   :  { %v1860_v63 = vpop.f32.mrf.mxu1 }
 0x1c6   :  { %v11259_v0 = vadd.f32 %v1860_v63, %v1742_v47  ;;  %v11261_v1 = vpop.f32.mrf.mxu0 }
 0x1c7   :  { %v11263_v2 = vpop.f32.mrf.mxu1 }
 0x1c8   :  { %15097 = vst [vmem:[#allocation2_spill] sm:$0xff] %v11259_v0  ;;  %15098 = vst [vmem:[#allocation3_spill] sm:$0xff] %v11263_v2  ;;  %v11265_v3 = vpop.f32.mrf.mxu0 }
 0x1c9   :  { %v11267_v5 = vpop.f32.mrf.mxu1 }
 0x1ca   :  { %v11269_v8 = vpop.f32.mrf.mxu0 }
 0x1cb   :  { %v11271_v18 = vpop.f32.mrf.mxu1 }
 0x1cc   :  { %v11273_v19 = vpop.f32.mrf.mxu0 }
 0x1cd   :  { %v11275_v20 = vpop.f32.mrf.mxu1 }
 0x1ce   :  { %15099 = vst [vmem:[#allocation4_spill] sm:$0xff] %v11275_v20  ;;  %v11277_v22 = vpop.f32.mrf.mxu0 }
 0x1cf   :  { %v11279_v13 = vpop.f32.mrf.mxu1 }
 0x1d0   :  { %15100 = vst [vmem:[#allocation5_spill] sm:$0xff] %v11279_v13  ;;  %v11281_v23 = vpop.f32.mrf.mxu0 }
 0x1d1   :  { %v11283_v27 = vpop.f32.mrf.mxu1 }
 0x1d2   :  { %15101 = vst [vmem:[#allocation6_spill] sm:$0xff] %v11283_v27  ;;  %v11285_v28 = vpop.f32.mrf.mxu0 }
 0x1d3   :  { %v11287_v36 = vpop.f32.mrf.mxu1 }
 0x1d4   :  { %15102 = vst [vmem:[#allocation7_spill] sm:$0xff] %v11287_v36  ;;  %v11289_v37 = vpop.f32.mrf.mxu0 }
 0x1d5   :  { %15103 = vst [vmem:[#allocation8_spill] sm:$0xff] %v11289_v37  ;;  %v11291_v39 = vpop.f32.mrf.mxu1 }
 0x1d6   :  { %15104 = vst [vmem:[#allocation9_spill] sm:$0xff] %v11291_v39  ;;  %v11293_v40 = vpop.f32.mrf.mxu0 }
 0x1d7   :  { %v11295_v46 = vpop.f32.mrf.mxu1 }
 0x1d8   :  { %15105 = vst [vmem:[#allocation10_spill] sm:$0xff] %v11295_v46  ;;  %v11297_v47 = vpop.f32.mrf.mxu0 }
 0x1d9   :  { %v11299_v53 = vpop.f32.mrf.mxu1 }
 0x1da   :  { %15106 = vst [vmem:[#allocation11_spill] sm:$0xff] %v11299_v53  ;;  %v11301_v56 = vpop.f32.mrf.mxu0 }
 0x1db   :  { %v11303_v63 = vpop.f32.mrf.mxu1 }
 0x1dc   :  { %15107 = vst [vmem:[#allocation12_spill] sm:$0xff] %v11303_v63  ;;  %v11305_v12 = vpop.f32.mrf.mxu0 }
 0x1dd   :  { %15108 = vst [vmem:[#allocation13_spill] sm:$0xff] %v11305_v12  ;;  %v11307_v13 = vpop.f32.mrf.mxu1 }
 0x1de   :  { %15109 = vst [vmem:[#allocation14_spill] sm:$0xff] %v11307_v13  ;;  %v11309_v36 = vpop.f32.mrf.mxu0  ;;  %v280_v13 = vadd.f32 %v11179_v17, %v11181_v10 }
 0x1df   :  { %15110 = vst [vmem:[#allocation15_spill] sm:$0xff] %v11309_v36  ;;  %v11311_v20 = vpop.f32.mrf.mxu1 }
 0x1e0   :  { %15111 = vst [vmem:[#allocation16_spill] sm:$0xff] %v11311_v20  ;;  %v11313_v39 = vpop.f32.mrf.mxu0 }
 0x1e1   :  { %15112 = vst [vmem:[#allocation17_spill] sm:$0xff] %v11313_v39  ;;  %v11315_v0 = vpop.f32.mrf.mxu1  ;;  %v451_v39 = vadd.f32 %v11185_v29, %v280_v13 }
 0x1e2   :  { %15113 = vst [vmem:[#allocation18_spill] sm:$0xff] %v11315_v0  ;;  %v11317_v46 = vpop.f32.mrf.mxu0 }
 0x1e3   :  { %v11319_v2 = vpop.f32.mrf.mxu1 }
 0x1e4   :  { %15114 = vst [vmem:[#allocation19_spill] sm:$0xff] %v11319_v2  ;;  %v11321_v53 = vpop.f32.mrf.mxu0  ;;  %v580_v2 = vadd.f32 %v11189_v43, %v451_v39  ;;  %v323_v43 = vadd.f32 %v11191_v44, %v11187_v30 }
 0x1e5   :  { %15115 = vst [vmem:[#allocation20_spill] sm:$0xff] %v11321_v53  ;;  %v11323_v37 = vpop.f32.mrf.mxu1 }
 0x1e6   :  { %15116 = vst [vmem:[#allocation21_spill] sm:$0xff] %v11323_v37  ;;  %v11325_v63 = vpop.f32.mrf.mxu0 }
 0x1e7   :  { %15117 = vst [vmem:[#allocation22_spill] sm:$0xff] %v11325_v63  ;;  %v11329_v12 = vpop.f32.mrf.mxu1  ;;  %v709_v63 = vadd.f32 %v11193_v57, %v580_v2 }
 0x1e8   :  { %15118 = vst [vmem:[#allocation23_spill] sm:$0xff] %v11329_v12  ;;  %v11331_v20 = vpop.f32.mrf.mxu0 }
 0x1e9   :  { %v11334_v0 = vpop.f32.mrf.mxu1  ;;  %v838_v10 = vadd.f32 %v11197_v7, %v709_v63 }
 0x1ea   :  { %15119 = vst [vmem:[#allocation24_spill] sm:$0xff] %v11334_v0  ;;  %v11336_v36 = vpop.f32.mrf.mxu0 }
 0x1eb   :  { %v11339_v53 = vpop.f32.mrf.mxu1  ;;  %v967_v13 = vadd.f32 %v11201_v25, %v838_v10 }
 0x1ec   :  { %v11341_v37 = vpop.f32.mrf.mxu0 }
 0x1ed   :  { %v11344_v27 = vpop.f32.mrf.mxu1  ;;  %v1096_v57 = vadd.f32 %v11205_v41, %v967_v13 }
 0x1ee   :  { %15120 = vst [vmem:[#allocation25_spill] sm:$0xff] %v11344_v27  ;;  %v11346_v17 = vpop.f32.mrf.mxu0  ;;  %v453_v27 = vadd.f32 %v11195_v58, %v323_v43 }
 0x1ef   :  { %v11349_v12 = vpop.f32.mrf.mxu1  ;;  %v1225_v63 = vadd.f32 %v11209_v59, %v1096_v57 }
 0x1f0   :  { %15121 = vst [vmem:[#allocation26_spill] sm:$0xff] %v11349_v12  ;;  %v11351_v29 = vpop.f32.mrf.mxu0  ;;  %v582_v25 = vadd.f32 %v11199_v14, %v453_v27 }
 0x1f1   :  { %v11354_v0 = vpop.f32.mrf.mxu1  ;;  %v1354_v30 = vadd.f32 %v11213_v16, %v1225_v63 }
 0x1f2   :  { %v11358_v39 = vpop.f32.mrf.mxu0  ;;  %v711_v41 = vadd.f32 %v11203_v26, %v582_v25  ;;  %v1995_v25 = vadd.f32 %v11241_v38, %v11231_v21 }
 0x1f3   :  { %v11361_v2 = vpop.f32.mrf.mxu1  ;;  %v1483_v58 = vadd.f32 %v11217_v33, %v1354_v30 }
 0x1f4   :  { %v11364_v7 = vpop.f32.mrf.mxu0  ;;  %v840_v59 = vadd.f32 %v11207_v42, %v711_v41 }
 0x1f5   :  { %v11367_v12 = vpop.f32.mrf.mxu1  ;;  %v1612_v14 = vadd.f32 %v11221_v51, %v1483_v58  ;;  %v1994_v51 = vadd.f32 %v11239_v35, %v11229_v9  ;;  %v1998_v9 = vadd.f32 %v11243_v45, %v11233_v24 }
 0x1f6   :  { %v11370_v10 = vpop.f32.mrf.mxu0  ;;  %v969_v16 = vadd.f32 %v11211_v60, %v840_v59  ;;  %v2124_v60 = vadd.f32 %v11253_v55, %v1995_v25 }
 0x1f7   :  { %v11373_v44 = vpop.f32.mrf.mxu1  ;;  %v1741_v26 = vadd.f32 %v11225_v6, %v1612_v14  ;;  %v2123_v38 = vadd.f32 %v11249_v50, %v1994_v51 }
 0x1f8   :  { %v11376_v13 = vpop.f32.mrf.mxu0  ;;  %v1098_v30 = vadd.f32 %v11215_v15, %v969_v16  ;;  %v2253_v15 = vadd.f32 %v11269_v8, %v2124_v60  ;;  %v2127_v8 = vadd.f32 %v11257_v62, %v1998_v9  ;;  %v11448_v60 = vsub.s32 1, %v10626_v4  ;;  %v15127_v9 = vld [vmem:[#allocation2_spill] sm:$0xff] }
 0x1f9   :  { %v11379_v43 = vpop.f32.mrf.mxu1  ;;  %v1870_v41 = vadd.f32 %v11235_v31, %v1741_v26 }
 0x1fa   :  { %v11382_v57 = vpop.f32.mrf.mxu0  ;;  %v1227_v6 = vadd.f32 %v11219_v34, %v1098_v30  ;;  %v2252_v34 = vadd.f32 %v11265_v3, %v2123_v38  ;;  %v2382_v55 = vadd.f32 %v11285_v28, %v2253_v15  ;;  %v1996_v3 = vadd.f32 %v11267_v5, %v11251_v54  ;;  %v15122_v5 = vld [vmem:[#allocation6_spill] sm:$0xff] }
 0x1fb   :  { %v11385_v27 = vpop.f32.mrf.mxu1  ;;  %v1999_v21 = vadd.f32 %v11245_v48, %v1870_v41  ;;  %v2256_v62 = vadd.f32 %v11273_v19, %v2127_v8  ;;  %v1997_v54 = vadd.f32 %v11271_v18, %v11255_v61  ;;  %v15123_v19 = vld [vmem:[#allocation8_spill] sm:$0xff] }
 0x1fc   :  { %v11388_v63 = vpop.f32.mrf.mxu0  ;;  %v1356_v31 = vadd.f32 %v11223_v52, %v1227_v6  ;;  %v2381_v25 = vadd.f32 %v11281_v23, %v2252_v34  ;;  %v2511_v24 = vadd.f32 %v11301_v56, %v2382_v55  ;;  %v2125_v41 = vadd.f32 %v15122_v5, %v1996_v3  ;;  %v15128_v61 = vld [vmem:[#allocation4_spill] sm:$0xff]  ;;  %v15130_v55 = vld [vmem:[#allocation11_spill] sm:$0xff] }
 0x1fd   :  { %v11393_v33 = vpop.f32.mrf.mxu1  ;;  %v2128_v35 = vadd.f32 %v11261_v1, %v1999_v21  ;;  %v2385_v6 = vadd.f32 %v15123_v19, %v2256_v62  ;;  %v2000_v18 = vadd.f32 %v15128_v61, %v15127_v9  ;;  %v15135_v5 = vld [vmem:[#allocation12_spill] sm:$0xff] }
 0x1fe   :  { %v11396_v42 = vpop.f32.mrf.mxu0  ;;  %v1485_v48 = vadd.f32 %v11227_v11, %v1356_v31  ;;  %v11435_v11 = vsub.s32 0, %v10626_v4  ;;  %v2510_v23 = vadd.f32 %v11297_v47, %v2381_v25  ;;  %v2640_v56 = vadd.f32 %v11317_v46, %v2511_v24  ;;  %v15125_v47 = vld [vmem:[#allocation17_spill] sm:$0xff]  ;;  %v15132_v24 = vld [vmem:[#allocation22_spill] sm:$0xff] }
 0x1ff   :  { %v11402_v58 = vpop.f32.mrf.mxu1  ;;  %v2257_v52 = vadd.f32 %v11277_v22, %v2128_v35  ;;  %v15129_v35 = vld [vmem:[#allocation7_spill] sm:$0xff] }
 0x200   :  { %v11405_v59 = vpop.f32.mrf.mxu0  ;;  %v1614_v1 = vadd.f32 %v11237_v32, %v1485_v48  ;;  %v2639_v38 = vadd.f32 %v15125_v47, %v2510_v23  ;;  %v2769_v46 = vadd.f32 %v11336_v36, %v2640_v56  ;;  %v2126_v34 = vadd.f32 %v15129_v35, %v1997_v54  ;;  %v15134_v56 = vld [vmem:[#allocation9_spill] sm:$0xff]  ;;  %v15137_v47 = vld [vmem:[#allocation20_spill] sm:$0xff] }
 0x201   :  { %v11410_v14 = vpop.f32.mrf.mxu1  ;;  %v2386_v22 = vadd.f32 %v11293_v40, %v2257_v52  ;;  %v15124_v40 = vld [vmem:[#allocation15_spill] sm:$0xff]  ;;  %v2254_v48 = vadd.f32 %v15130_v55, %v2125_v41  ;;  %v15131_v52 = vld [vmem:[#allocation13_spill] sm:$0xff] }
 0x202   :  { %v3105_v16 = vpop.f32.mrf.mxu0  ;;  %v1743_v32 = vadd.f32 %v11247_v49, %v1614_v1  ;;  %v15126_v49 = vld [vmem:[#allocation3_spill] sm:$0xff]  ;;  %v2514_v25 = vadd.f32 %v15131_v52, %v2385_v6  ;;  %v2768_v3 = vadd.f32 %v11331_v20, %v2639_v38  ;;  %v2898_v36 = vadd.f32 %v11358_v39, %v2769_v46  ;;  %v15138_v38 = vld [vmem:[#allocation10_spill] sm:$0xff] }
 0x203   :  { %v11418_v26 = vpop.f32.mrf.mxu1  ;;  %v2515_v21 = vadd.f32 %v15124_v40, %v2386_v22  ;;  %v15133_v22 = vld [vmem:[#allocation5_spill] sm:$0xff]  ;;  %v2255_v19 = vadd.f32 %v15135_v5, %v2126_v34  ;;  %v15136_v40 = vld [vmem:[#allocation18_spill] sm:$0xff] }
 0x204   :  { %v11421_v50 = vpop.f32.mrf.mxu0  ;;  %v1872_v31 = vadd.f32 %v15126_v49, %v1743_v32  ;;  %v2129_v32 = vadd.f32 %v15134_v56, %v2000_v18  ;;  %v2383_v54 = vadd.f32 %v15136_v40, %v2254_v48  ;;  %v2643_v41 = vadd.f32 %v15137_v47, %v2514_v25  ;;  %v15139_v46 = vld [vmem:[#allocation14_spill] sm:$0xff]  ;;  %v15141_v18 = vld [vmem:[#allocation24_spill] sm:$0xff] }
 0x205   :  { %v11427_v45 = vpop.f32.mrf.mxu1  ;;  %v2644_v1 = vadd.f32 %v15132_v24, %v2515_v21  ;;  %v2897_v6 = vadd.f32 %v11351_v29, %v2768_v3  ;;  %v3027_v21 = vadd.f32 %v11382_v57, %v2898_v36  ;;  %v15142_v25 = vld [vmem:[#allocation16_spill] sm:$0xff]  ;;  %v15143_v24 = vld [vmem:[#allocation21_spill] sm:$0xff]  ;;  %v15147_v47 = vld [vmem:[#allocation26_spill] sm:$0xff] }
 0x206   :  { %v11432_v28 = vpop.f32.mrf.mxu0  ;;  %v2001_v23 = vadd.f32 %v15133_v22, %v1872_v31  ;;  %v2258_v9 = vadd.f32 %v15139_v46, %v2129_v32  ;;  %v15140_v31 = vld [vmem:[#allocation19_spill] sm:$0xff]  ;;  %v2512_v35 = vadd.f32 %v15141_v18, %v2383_v54  ;;  %v2772_v55 = vadd.f32 %v11341_v37, %v2643_v41 }
 0x207   :  { %v11441_v30 = vpop.f32.mrf.mxu1  ;;  %v2773_v49 = vadd.f32 %v11346_v17, %v2644_v1  ;;  %v2384_v61 = vadd.f32 %v15140_v31, %v2255_v19  ;;  %v3026_v17 = vadd.f32 %v11376_v13, %v2897_v6  ;;  %v3156_v52 = vadd.f32 %v3105_v16, %v3027_v21  ;;  %v15144_v32 = vld [vmem:[#allocation23_spill] sm:$0xff]  ;;  %v15145_v16 = vld [vmem:[#allocation25_spill] sm:$0xff]  ;;  %v3297_v6 = vpop.permute.xlu0 %3296 }
 0x208   :  { %v3232_v51 = vpop.f32.mrf.mxu0  ;;  %v2130_v39 = vadd.f32 %v15138_v38, %v2001_v23  ;;  %v2387_v1 = vadd.f32 %v15143_v24, %v2258_v9  ;;  %v2641_v36 = vadd.f32 %v11354_v0, %v2512_v35  ;;  %v2901_v22 = vadd.f32 %v11364_v7, %v2772_v55  ;;  %v3312_v0 = vld [vmem:[%s15146_s27] sm:$0xf]  ;;  %s15150_s27 = sld [smem:[#allocation33_spill]] }
 0x209   :  { %v11454_v15 = vpop.f32.mrf.mxu1  ;;  %v2902_v48 = vadd.f32 %v11370_v10, %v2773_v49  ;;  %v2513_v3 = vadd.f32 %v11339_v53, %v2384_v61  ;;  %v3155_v37 = vadd.f32 %v11405_v59, %v3026_v17  ;;  %v15073_v61 = vsub.s32 3, %v10626_v4 }
 0x20a   :  { %v3234_v8 = vpop.f32.mrf.mxu0  ;;  %v2259_v57 = vadd.f32 %v15142_v25, %v2130_v39  ;;  %v2516_v5 = vadd.f32 %v15145_v16, %v2387_v1  ;;  %v2770_v40 = vadd.f32 %v11379_v43, %v2641_v36  ;;  %v3030_v7 = vadd.f32 %v11388_v63, %v2901_v22 }
 0x20b   :  { %v3019_v62 = vpop.f32.mrf.mxu1  ;;  %v3031_v23 = vadd.f32 %v11396_v42, %v2902_v48  ;;  %v3285_v56 = vadd.f32 %v3234_v8, %v3156_v52  ;;  %v2642_v19 = vadd.f32 %v11361_v2, %v2513_v3  ;;  %v3284_v59 = vadd.f32 %v3232_v51, %v3155_v37 }
 0x20c   :  { %v3236_v34 = vpop.f32.mrf.mxu0  ;;  %v2388_v13 = vadd.f32 %v15144_v32, %v2259_v57  ;;  %v11497_v8 = vrot.slane %v3312_v0, %v11448_v60  ;;  %v2645_v2 = vadd.f32 %v11367_v12, %v2516_v5  ;;  %v2899_v49 = vadd.f32 %v11410_v14, %v2770_v40 }
 0x20d   :  { %v3021_v20 = vpop.f32.mrf.mxu1  ;;  %v3160_v42 = vadd.f32 %v11432_v28, %v3031_v23  ;;  %v2771_v43 = vadd.f32 %v11385_v27, %v2642_v19  ;;  %v3159_v21 = vadd.f32 %v11421_v50, %v3030_v7  ;;  %v11504_v38 = vadd.f32 %v3297_v6, %v3285_v56 }
 0x20e   :  { %v3238_v53 = vpop.f32.mrf.mxu0  ;;  %v2517_v41 = vadd.f32 %v15147_v47, %v2388_v13  ;;  %v11507_v51 = vsub.s32 2, %v10626_v4  ;;  %v2774_v46 = vadd.f32 %v11393_v33, %v2645_v2  ;;  %v3028_v27 = vadd.f32 %v11454_v15, %v2899_v49  ;;  %v3407_v49 = vld [vmem:[%s15148_s4] sm:$0xff] }
 0x20f   :  { %v3023_v29 = vpop.f32.mrf.mxu1  ;;  %v3289_v63 = vadd.f32 %v3238_v53, %v3160_v42  ;;  %v2900_v12 = vadd.f32 %v11418_v26, %v2771_v43  ;;  %v3304_v9 = vadd.f32 %v3297_v6, %v3284_v59  ;;  %v11514_v14 = vrot.slane %v3312_v0, %v11435_v11  ;;  %v3408_v43 = vld [vmem:[%s15148_s4 + $0x8] sm:$0xff] }
 0x210   :  { %v2646_v39 = vadd.f32 %v11373_v44, %v2517_v41  ;;  %v3288_v50 = vadd.f32 %v3236_v34, %v3159_v21  ;;  %v2903_v35 = vadd.f32 %v11427_v45, %v2774_v46  ;;  %v3302_v44 = vpop.permute.xlu1 %3301  ;;  %v3335_v33 = vmul.f32 %v11497_v8, %v11504_v38 }
 0x211   :  { %v3146_v10 = vpop.f32.mrf.mxu1  ;;  %v3029_v55 = vadd.f32 %v3019_v62, %v2900_v12  ;;  %v3309_v26 = vadd.f32 %v3302_v44, %v3289_v63  ;;  %v11522_v17 = vrot.slane %v3312_v0, %v11507_v51  ;;  %v3329_v62 = vrot.slane %v3312_v0, %v15073_v61 }
 0x212   :  { %v2775_v18 = vadd.f32 %v11402_v58, %v2646_v39  ;;  %v3157_v48 = vadd.f32 %v3146_v10, %v3028_v27  ;;  %v3032_v52 = vadd.f32 %v3021_v20, %v2903_v35  ;;  %v3334_v58 = vmul.f32 %v11514_v14, %v3304_v9 }
 0x213   :  { %v3148_v54 = vpop.f32.mrf.mxu1  ;;  %v3308_v24 = vadd.f32 %v3302_v44, %v3288_v50  ;;  %v3339_v56 = vmul.f32 %v11497_v8, %v3309_v26 }
 0x214   :  { %v2904_v34 = vadd.f32 %v11441_v30, %v2775_v18  ;;  %v3158_v25 = vadd.f32 %v3148_v54, %v3029_v55  ;;  %v3342_v23 = vadd.f32 %v3335_v33, %v3334_v58 }
 0x215   :  { %v3150_v28 = vpop.f32.mrf.mxu1  ;;  %v3338_v16 = vmul.f32 %v11514_v14, %v3308_v24 }
 0x216   :  { %v3033_v1 = vadd.f32 %v3023_v29, %v2904_v34  ;;  %v3161_v3 = vadd.f32 %v3150_v28, %v3032_v52 }
 0x217   :  { %v3152_v31 = vpop.f32.mrf.mxu1  ;;  %v3349_v42 = vadd.f32 %v3339_v56, %v3338_v16 }
 0x218   :  { %v3162_v10 = vadd.f32 %v3152_v31, %v3033_v1 }
 0x219   :  { %v3275_v15 = vpop.f32.mrf.mxu1 }
 0x21a   :  { %v3286_v57 = vadd.f32 %v3275_v15, %v3157_v48 }
 0x21b   :  { %v3277_v45 = vpop.f32.mrf.mxu1 }
 0x21c   :  { %v3306_v36 = vadd.f32 %v3297_v6, %v3286_v57  ;;  %v3287_v22 = vadd.f32 %v3277_v45, %v3158_v25 }
 0x21d   :  { %v3279_v37 = vpop.f32.mrf.mxu1 }
 0x21e   :  { %v3336_v30 = vmul.f32 %v11522_v17, %v3306_v36  ;;  %v3307_v20 = vadd.f32 %v3297_v6, %v3287_v22  ;;  %v3290_v32 = vadd.f32 %v3279_v37, %v3161_v3 }
 0x21f   :  { %v3281_v13 = vpop.f32.mrf.mxu1 }
 0x220   :  { %v3337_v5 = vmul.f32 %v3329_v62, %v3307_v20  ;;  %v3310_v19 = vadd.f32 %v3302_v44, %v3290_v32  ;;  %v3291_v40 = vadd.f32 %v3281_v13, %v3162_v10  ;;  %v3343_v0 = vadd.f32 %v3342_v23, %v3336_v30 }
 0x222   :  { %v3340_v29 = vmul.f32 %v11522_v17, %v3310_v19  ;;  %v3311_v53 = vadd.f32 %v3302_v44, %v3291_v40  ;;  %v3345_v7 = vsel %vm3179_vm11, %v3337_v5, 0.0 }
 0x223   :  { %v3346_v59 = vadd.f32 %v3345_v7, %v3343_v0 }
 0x224   :  { %v3341_v54 = vmul.f32 %v3329_v62, %v3311_v53  ;;  %v3350_v47 = vadd.f32 %v3349_v42, %v3340_v29 }
 0x225   :  { %3347 = vadd.xlane.f32.xlu1 %v3346_v59 }
 0x226   :  { %v3351_v41 = vsel %vm3179_vm11, %v3341_v54, 0.0 }
 0x227   :  { %v3352_v2 = vadd.f32 %v3351_v41, %v3350_v47 }
 0x229   :  { %3353 = vadd.xlane.f32.xlu0 %v3352_v2 }
 0x236   :  { %3416 = vperm.xlu1 %10118, %v3408_v43  }
 0x23f   :  { %3411 = vperm.xlu0 %10117, %v3407_v49  }
 0x2ae   :  { %v3348_v6 = vpop.xlane.xlu1 %3347 }
 0x2af   :  { %v3355_v21 = vmul.f32 0.0034722222, %v3348_v6 }
 0x2b1   :  { %v3357_v63 = vsub.f32 %v3304_v9, %v3355_v21  ;;  %v3358_v28 = vsub.f32 %v11504_v38, %v3355_v21  ;;  %v3359_v39 = vsub.f32 %v3306_v36, %v3355_v21  ;;  %v3360_v46 = vsub.f32 %v3307_v20, %v3355_v21 }
 0x2b2   :  { %v3354_v12 = vpop.xlane.xlu0 %3353 }
 0x2b3   :  { %v3365_v27 = vmul.f32 %v3357_v63, %v3357_v63  ;;  %v3366_v50 = vmul.f32 %v3358_v28, %v3358_v28  ;;  %v3356_v31 = vmul.f32 0.0034722222, %v3354_v12  ;;  %v3367_v18 = vmul.f32 %v3359_v39, %v3359_v39 }
 0x2b4   :  { %v3368_v35 = vmul.f32 %v3360_v46, %v3360_v46 }
 0x2b5   :  { %v3361_v55 = vsub.f32 %v3308_v24, %v3356_v31  ;;  %v3362_v44 = vsub.f32 %v3309_v26, %v3356_v31  ;;  %v3363_v48 = vsub.f32 %v3310_v19, %v3356_v31  ;;  %v3364_v33 = vsub.f32 %v3311_v53, %v3356_v31 }
 0x2b6   :  { %v3373_v15 = vmul.f32 %v3365_v27, %v11514_v14  ;;  %v3374_v34 = vmul.f32 %v3366_v50, %v11497_v8  ;;  %v3376_v52 = vmul.f32 %v3368_v35, %v3329_v62  ;;  %v3375_v58 = vmul.f32 %v3367_v18, %v11522_v17 }
 0x2b7   :  { %v3369_v9 = vmul.f32 %v3361_v55, %v3361_v55  ;;  %v3370_v25 = vmul.f32 %v3362_v44, %v3362_v44  ;;  %v3371_v38 = vmul.f32 %v3363_v48, %v3363_v48  ;;  %v3372_v57 = vmul.f32 %v3364_v33, %v3364_v33 }
 0x2b8   :  { %v3381_v45 = vadd.f32 %v3374_v34, %v3373_v15  ;;  %v3383_v36 = vsel %vm3179_vm11, %v3376_v52, 0.0 }
 0x2b9   :  { %v3377_v1 = vmul.f32 %v3369_v9, %v11514_v14  ;;  %v3378_v3 = vmul.f32 %v3370_v25, %v11497_v8  ;;  %v3380_v26 = vmul.f32 %v3372_v57, %v3329_v62  ;;  %v3379_v22 = vmul.f32 %v3371_v38, %v11522_v17  ;;  %v3427_v14 = vld [vmem:[%s15149_s0] sm:$0xff]  ;;  %v3428_v8 = vld [vmem:[%s15149_s0 + $0x8] sm:$0xff]  ;;  %v3417_v17 = vpop.permute.xlu1 %3416 }
 0x2ba   :  { %v3382_v24 = vadd.f32 %v3381_v45, %v3375_v58  ;;  %v3412_v62 = vpop.permute.xlu0 %3411 }
 0x2bb   :  { %v3387_v23 = vadd.f32 %v3378_v3, %v3377_v1  ;;  %v3389_v10 = vsel %vm3179_vm11, %v3380_v26, 0.0  ;;  %v5077_v26 = vld [vmem:[%s15038_s7 + $0x20] sm:$0xf] }
 0x2bc   :  { %v3384_v37 = vadd.f32 %v3383_v36, %v3382_v24  ;;  %v5075_v24 = vld [vmem:[%s15038_s7 + $0x10] sm:$0xff]  ;;  %v5073_v36 = vld [vmem:[%s15038_s7] sm:$0xff] }
 0x2bd   :  { %v3388_v56 = vadd.f32 %v3387_v23, %v3379_v22  ;;  %v5076_v22 = vld [vmem:[%s15038_s7 + $0x18] sm:$0xff]  ;;  %v5074_v23 = vld [vmem:[%s15038_s7 + $0x8] sm:$0xff] }
 0x2be   :  { %3385 = vadd.xlane.f32.xlu0 %v3384_v37 }
 0x2bf   :  { %v3390_v30 = vadd.f32 %v3389_v10, %v3388_v56 }
 0x2c1   :  { %3391 = vadd.xlane.f32.xlu1 %v3390_v30 }
 0x2d2   :  { %3431 = vperm.xlu1 %10118, %v3427_v14  }
 0x2d4   :  { %3436 = vperm.xlu0 %10117, %v3428_v8  }
 0x347   :  { %v3386_v20 = vpop.xlane.xlu0 %3385 }
 0x348   :  { %v3393_v32 = vmul.f32 0.0034722222, %v3386_v20 }
 0x34a   :  { %v3395_v13 = vadd.f32 1e-05, %v3393_v32  ;;  %v3392_v16 = vpop.xlane.xlu1 %3391 }
 0x34b   :  { %v3394_v5 = vmul.f32 0.0034722222, %v3392_v16  ;;  %v15151_v16 = vmov 0  }
 0x34c   :  { %10436 = vrsqrt.f32 %v3395_v13 }
 0x34d   :  { %v3396_v19 = vadd.f32 1e-05, %v3394_v5 }
 0x34e   :  { %v3432_v49 = vpop.permute.xlu1 %3431 }
 0x34f   :  { %10438 = vrsqrt.f32 %v3396_v19  ;;  %v10361_v19 = vld [vmem:[%s15150_s27 + $0x1c] sm:$0xff]  }
 0x359   :  { %v10437_v40 = vpop.eup %10436 }
 0x35a   :  { %v3399_v0 = vmul.f32 %v10437_v40, %v3357_v63  ;;  %v3400_v29 = vmul.f32 %v10437_v40, %v3358_v28  ;;  %v3401_v53 = vmul.f32 %v10437_v40, %v3359_v39  ;;  %v3402_v7 = vmul.f32 %v10437_v40, %v3360_v46  ;;  %v3437_v63 = vpop.permute.xlu0 %3436  ;;  %v10362_v40 = vld [vmem:[%s15150_s27 + $0x24] ss:$0 sps:$4 sm:$0x33]  }
 0x35c   :  { %v10439_v42 = vpop.eup %10438  ;;  %v3420_v59 = vmul.f32 %v3412_v62, %v3400_v29  ;;  %v3421_v54 = vmul.f32 %v3412_v62, %v3401_v53  ;;  %v3419_v6 = vmul.f32 %v3412_v62, %v3399_v0  ;;  %v3422_v21 = vmul.f32 %v3412_v62, %v3402_v7  ;;  %v10363_v53 = vld [vmem:[%s15150_s27] sm:$0xff]  }
 0x35d   :  { %v3403_v47 = vmul.f32 %v10439_v42, %v3361_v55  ;;  %v3404_v41 = vmul.f32 %v10439_v42, %v3362_v44  ;;  %v3405_v2 = vmul.f32 %v10439_v42, %v3363_v48  ;;  %v3406_v43 = vmul.f32 %v10439_v42, %v3364_v33 }
 0x35e   :  { %v3440_v12 = vadd.f32 %v3432_v49, %v3420_v59  ;;  %v3441_v27 = vadd.f32 %v3432_v49, %v3421_v54  ;;  %v3439_v34 = vadd.f32 %v3432_v49, %v3419_v6  ;;  %v3442_v52 = vadd.f32 %v3432_v49, %v3422_v21  ;;  %v10366_v6 = vld [vmem:[%s15150_s27 + $0x28] sm:$0xff]  }
 0x35f   :  { %v3423_v50 = vmul.f32 %v3417_v17, %v3403_v47  ;;  %v3424_v31 = vmul.f32 %v3417_v17, %v3404_v41  ;;  %v3425_v18 = vmul.f32 %v3417_v17, %v3405_v2  ;;  %v3426_v35 = vmul.f32 %v3417_v17, %v3406_v43  ;;  %v10360_v17 = vld [vmem:[%s15150_s27 + $0x14] sm:$0xff]   ;;  %v10364_v41 = vld [vmem:[%s15150_s27 + $0x8] sm:$0xff]   ;;  %v10365_v2 = vld [vmem:[%s15150_s27 + $0x10] ss:$0 sps:$4 sm:$0x33]  }
 0x360   :  { %v3448_v55 = vmax.f32 %v3440_v12, 0.0  ;;  %v3449_v44 = vmax.f32 %v3441_v27, 0.0  ;;  %v3447_v58 = vmax.f32 %v3439_v34, 0.0  ;;  %v3450_v45 = vmax.f32 %v3442_v52, 0.0 }
 0x361   :  { %v3443_v28 = vadd.f32 %v3437_v63, %v3423_v50  ;;  %v3444_v39 = vadd.f32 %v3437_v63, %v3424_v31  ;;  %v3445_v46 = vadd.f32 %v3437_v63, %v3425_v18  ;;  %v3446_v15 = vadd.f32 %v3437_v63, %v3426_v35  ;;  %v10367_v18 = vld [vmem:[%s15150_s27 + $0x30] sm:$0xff]   ;;  %v10368_v35 = vld [vmem:[%s15150_s27 + $0x38] ss:$0 sps:$4 sm:$0x33]  }
 0x363   :  { %v3451_v48 = vmax.f32 %v3443_v28, 0.0  ;;  %v3452_v33 = vmax.f32 %v3444_v39, 0.0  ;;  %v3453_v9 = vmax.f32 %v3445_v46, 0.0  ;;  %v3454_v25 = vmax.f32 %v3446_v15, 0.0  ;;  %v10369_v39 = vld [vmem:[%s15150_s27 + $0x3c] sm:$0xff]  }
 0x365   :  { %v3456_v38 = vpack.c.bf16 %v3452_v33, %v3448_v55  ;;  %v11555_v57 = vpack.c.bf16 %v3453_v9, %v3449_v44  ;;  %v11560_v1 = vpack.c.bf16 %v3451_v48, %v3447_v58  ;;  %v3458_v3 = vpack.c.bf16 %v3454_v25, %v3450_v45  ;;  %v10370_v44 = vld [vmem:[%s15150_s27 + $0x44] sm:$0xff]   ;;  %v10371_v48 = vld [vmem:[%s15150_s27 + $0x4c] ss:$0 sps:$4 sm:$0x33]   ;;  %v10372_v25 = vld [vmem:[%s15150_s27 + $0x50] sm:$0xff]  }
 0x367   :  { %3491 = vrot.lane.b32.xlu0 %v11555_v57, %s10481_s30  ;;  %3489 = vrot.lane.b32.xlu1 %v3456_v38, %s10481_s30 }
 0x36b   :  { %3493 = vrot.lane.b32.xlu0 %v3458_v3, %s10481_s30  ;;  %3487 = vrot.lane.b32.xlu1 %v11560_v1, %s10481_s30 }
 0x36f   :  { %3801 = vrot.lane.b32.xlu0 %v11555_v57, %s10482_s1  ;;  %3799 = vrot.lane.b32.xlu1 %v3456_v38, %s10482_s1 }
 0x373   :  { %3803 = vrot.lane.b32.xlu0 %v3458_v3, %s10482_s1  ;;  %3797 = vrot.lane.b32.xlu1 %v11560_v1, %s10482_s1 }
 0x377   :  { %3986 = vrot.lane.b32.xlu0 %v11555_v57, %s10485_s6  ;;  %3984 = vrot.lane.b32.xlu1 %v3456_v38, %s10485_s6 }
 0x37b   :  { %3988 = vrot.lane.b32.xlu0 %v3458_v3, %s10485_s6  ;;  %3982 = vrot.lane.b32.xlu1 %v11560_v1, %s10485_s6 }
 0x37f   :  { %4171 = vrot.lane.b32.xlu0 %v11555_v57, %s10486_s25  ;;  %4169 = vrot.lane.b32.xlu1 %v3456_v38, %s10486_s25 }
 0x383   :  { %4173 = vrot.lane.b32.xlu0 %v3458_v3, %s10486_s25  ;;  %4167 = vrot.lane.b32.xlu1 %v11560_v1, %s10486_s25 }
 0x387   :  { %4356 = vrot.lane.b32.xlu0 %v11555_v57, %s10487_s26  ;;  %4354 = vrot.lane.b32.xlu1 %v3456_v38, %s10487_s26 }
 0x38b   :  { %4358 = vrot.lane.b32.xlu0 %v3458_v3, %s10487_s26  ;;  %4352 = vrot.lane.b32.xlu1 %v11560_v1, %s10487_s26 }
 0x38f   :  { %4541 = vrot.lane.b32.xlu0 %v11555_v57, %s15071_s5  ;;  %4539 = vrot.lane.b32.xlu1 %v3456_v38, %s15071_s5 }
 0x393   :  { %4543 = vrot.lane.b32.xlu0 %v3458_v3, %s15071_s5  ;;  %4537 = vrot.lane.b32.xlu1 %v11560_v1, %s15071_s5 }
 0x397   :  { %4726 = vrot.lane.b32.xlu0 %v11555_v57, %s10491_s28  ;;  %4724 = vrot.lane.b32.xlu1 %v3456_v38, %s10491_s28 }
 0x39b   :  { %4728 = vrot.lane.b32.xlu0 %v3458_v3, %s10491_s28  ;;  %4722 = vrot.lane.b32.xlu1 %v11560_v1, %s10491_s28 }
 0x39f   :  { %4911 = vrot.lane.b32.xlu0 %v11555_v57, %s15069_s29  ;;  %4909 = vrot.lane.b32.xlu1 %v3456_v38, %s15069_s29 }
 0x3a3   :  { %4913 = vrot.lane.b32.xlu0 %v3458_v3, %s15069_s29  ;;  %4907 = vrot.lane.b32.xlu1 %v11560_v1, %s15069_s29  ;;  %s15202_s29 = smov 60  }
 0x3a7   :  { %5090 = vperm.xlu0 %10117, %v5075_v24   ;;  %5100 = vperm.xlu1 %10118, %v5077_v26   ;;  %v10374_v24 = vld [vmem:[%s15150_s27 + $0x60] ss:$0 sps:$4 sm:$0x33]  }
 0x3ab   :  { %5080 = vperm.xlu0 %10117, %v5073_v36   ;;  %5095 = vperm.xlu1 %10118, %v5076_v22   ;;  %v10375_v22 = vld [vmem:[%s15150_s27 + $0x64] sm:$0xff]  }
 0x3af   :  { %5085 = vperm.xlu1 %10118, %v5074_v23  }
 0x3d9   :  { %v3492_v37 = vpop.permute.xlu0 %3491  ;;  %v3490_v56 = vpop.permute.xlu1 %3489 }
 0x3da   :  { %v3496_v10 = vsel %vm109_vm3, %v3490_v56, %v3492_v37 }
 0x3db   :  { %3526 = vmatprep.subr.bf16.mxu0 %v3496_v10 }
 0x3dd   :  { %v3494_v30 = vpop.permute.xlu0 %3493  ;;  %v3488_v14 = vpop.permute.xlu1 %3487 }
 0x3de   :  { %v3495_v8 = vsel %vm109_vm3, %v3488_v14, %v3490_v56  ;;  %3587 = vmatprep.subr.bf16.mxu1 %v3494_v30  ;;  %v3497_v62 = vsel %vm109_vm3, %v3492_v37, %v3494_v30  ;;  %v10376_v14 = vld [vmem:[%s15150_s27 + $0x6c] sm:$0xff]  }
 0x3df   :  { %3527 = vmatpush1.bf16.msra.mxu0 %v3495_v8  ;;  %3588 = vmatpush1.bf16.msra.mxu1 %v3497_v62  ;;  %v10377_v8 = vld [vmem:[%s15150_s27 + $0x74] ss:$0 sps:$4 sm:$0x33]  }
 0x3e0   :  { %3670 = vmatprep.subr.bf16.mxu0 %v3456_v38  ;;  %3731 = vmatprep.subr.bf16.mxu1 %v3458_v3  ;;  %v10373_v3 = vld [vmem:[%s15150_s27 + $0x58] sm:$0xff]  }
 0x3e1   :  { %v3802_v20 = vpop.permute.xlu0 %3801  ;;  %v3800_v32 = vpop.permute.xlu1 %3799 }
 0x3e2   :  { %9400 = vmatmul.mubr.msk.bf16.vlgmr.msra.gmra.mxu0 %vm3502_vm2, %v10360_v17  ;;  %9403 = vmatmul.mubr.msk.bf16.vlgmr.msra.gmra.mxu1 %vm3502_vm2, %v10360_v17  ;;  %v3806_v13 = vsel %vm341_vm4, %v3800_v32, %v3802_v20 }
 0x3e3   :  { %3671 = vmatpush1.bf16.msra.mxu0 %v11560_v1  ;;  %3732 = vmatpush1.bf16.msra.mxu1 %v11555_v57 }
 0x3e4   :  { %3835 = vmatprep.subr.bf16.mxu0 %v3806_v13  ;;  %3615 = vmatprep.mubr.bf16.mxu1 %v15151_v16 }
 0x3e5   :  { %v3804_v5 = vpop.permute.xlu0 %3803  ;;  %3554 = vmatprep.mubr.bf16.mxu0 %v15151_v16  ;;  %v3798_v0 = vpop.permute.xlu1 %3797 }
 0x3e6   :  { %3896 = vmatprep.subr.bf16.mxu1 %v3804_v5  ;;  %v3805_v42 = vsel %vm341_vm4, %v3798_v0, %v3800_v32  ;;  %v3807_v59 = vsel %vm341_vm4, %v3802_v20, %v3804_v5  ;;  %v10378_v20 = vld [vmem:[%s15150_s27 + $0x78] sm:$0xff]   ;;  %v10379_v0 = vld [vmem:[%s15150_s27 + $0x80] sm:$0xff]  }
 0x3e9   :  { %v3987_v29 = vpop.permute.xlu0 %3986  ;;  %v3985_v7 = vpop.permute.xlu1 %3984 }
 0x3ea   :  { %9401 = vmatmul.mubr.msk.bf16.gmra.mxu0 %vm3502_vm2, %v10361_v19  ;;  %9404 = vmatmul.mubr.msk.bf16.gmra.mxu1 %vm3502_vm2, %v10361_v19  ;;  %v3991_v47 = vsel %vm728_vm7, %v3985_v7, %v3987_v29 }
 0x3eb   :  { %3625 = vmatprep.mubr.bf16.mxu1 %v15151_v16  ;;  %3564 = vmatprep.mubr.bf16.mxu0 %v15151_v16 }
 0x3ed   :  { %v3989_v54 = vpop.permute.xlu0 %3988  ;;  %v3983_v43 = vpop.permute.xlu1 %3982 }
 0x3ee   :  { %v3990_v12 = vsel %vm728_vm7, %v3983_v43, %v3985_v7  ;;  %v3992_v27 = vsel %vm728_vm7, %v3987_v29, %v3989_v54  ;;  %v10380_v29 = vld [vmem:[%s15150_s27 + $0x88] ss:$0 sps:$4 sm:$0x33]  }
 0x3f1   :  { %v4172_v49 = vpop.permute.xlu0 %4171  ;;  %v4170_v21 = vpop.permute.xlu1 %4169 }
 0x3f2   :  { %9402 = vmatmul.mubr.msk.bf16.gmra.mxu0 %vm3502_vm2, %v10362_v40  ;;  %9405 = vmatmul.mubr.msk.bf16.gmra.mxu1 %vm3502_vm2, %v10362_v40  ;;  %v4176_v31 = vsel %vm857_vm8, %v4170_v21, %v4172_v49 }
 0x3f3   :  { %3749 = vmatprep.mubr.bf16.mxu1 %v15151_v16  ;;  %3688 = vmatprep.mubr.bf16.mxu0 %v15151_v16 }
 0x3f5   :  { %v4174_v50 = vpop.permute.xlu0 %4173  ;;  %v4168_v63 = vpop.permute.xlu1 %4167 }
 0x3f6   :  { %v4175_v15 = vsel %vm857_vm8, %v4168_v63, %v4170_v21  ;;  %v4177_v34 = vsel %vm857_vm8, %v4172_v49, %v4174_v50 }
 0x3f9   :  { %v4357_v28 = vpop.permute.xlu0 %4356  ;;  %v4355_v46 = vpop.permute.xlu1 %4354 }
 0x3fa   :  { %9409 = vmatmul.mubr.msk.bf16.vlgmr.msra.gmra.mxu0 %vm3502_vm2, %v10363_v53  ;;  %9412 = vmatmul.mubr.msk.bf16.vlgmr.msra.gmra.mxu1 %vm3502_vm2, %v10363_v53  ;;  %v4361_v55 = vsel %vm986_vm9, %v4355_v46, %v4357_v28  ;;  %v10381_v53 = vld [vmem:[%s15150_s27 + $0x8c] sm:$0xff]  }
 0x3fb   :  { %3836 = vmatpush1.bf16.msra.mxu0 %v3805_v42  ;;  %3897 = vmatpush1.bf16.msra.mxu1 %v3807_v59 }
 0x3fc   :  { %4020 = vmatprep.subr.bf16.mxu0 %v3991_v47  ;;  %4081 = vmatprep.subr.bf16.mxu1 %v3989_v54  ;;  %v10382_v54 = vld [vmem:[%s15150_s27 + $0x94] sm:$0xff]   ;;  %v10383_v47 = vld [vmem:[%s15150_s27 + $0x9c] ss:$0 sps:$4 sm:$0x33]  }
 0x3fd   :  { %3759 = vmatprep.mubr.bf16.mxu1 %v15151_v16  ;;  %3698 = vmatprep.mubr.bf16.mxu0 %v15151_v16  ;;  %v4359_v52 = vpop.permute.xlu0 %4358  ;;  %v4353_v33 = vpop.permute.xlu1 %4352 }
 0x3fe   :  { %v4360_v57 = vsel %vm986_vm9, %v4353_v33, %v4355_v46  ;;  %v4362_v58 = vsel %vm986_vm9, %v4357_v28, %v4359_v52  ;;  %vm5167_vm9 = vcmask 211968  }
 0x401   :  { %v4542_v9 = vpop.permute.xlu0 %4541  ;;  %v4540_v38 = vpop.permute.xlu1 %4539 }
 0x402   :  { %9410 = vmatmul.mubr.msk.bf16.gmra.mxu0 %vm3502_vm2, %v10364_v41  ;;  %9413 = vmatmul.mubr.msk.bf16.gmra.mxu1 %vm3502_vm2, %v10364_v41  ;;  %v4546_v1 = vsel %vm1373_vm12, %v4540_v38, %v4542_v9  ;;  %v10384_v41 = vld [vmem:[%s15150_s27 + $0xa0] sm:$0xff]  }
 0x403   :  { %3769 = vmatprep.mubr.bf16.mxu1 %v15151_v16  ;;  %3708 = vmatprep.mubr.bf16.mxu0 %v15151_v16 }
 0x405   :  { %v4544_v45 = vpop.permute.xlu0 %4543  ;;  %v4538_v26 = vpop.permute.xlu1 %4537 }
 0x406   :  { %v4545_v37 = vsel %vm1373_vm12, %v4538_v26, %v4540_v38  ;;  %v4547_v56 = vsel %vm1373_vm12, %v4542_v9, %v4544_v45 }
 0x409   :  { %v4727_v36 = vpop.permute.xlu0 %4726  ;;  %v4725_v23 = vpop.permute.xlu1 %4724 }
 0x40a   :  { %9411 = vmatmul.mubr.msk.bf16.gmra.mxu0 %vm3502_vm2, %v10365_v2  ;;  %9414 = vmatmul.mubr.msk.bf16.gmra.mxu1 %vm3502_vm2, %v10365_v2  ;;  %v4731_v30 = vsel %vm1502_vm13, %v4725_v23, %v4727_v36 }
 0x40b   :  { %3914 = vmatprep.mubr.bf16.mxu1 %v15151_v16  ;;  %3853 = vmatprep.mubr.bf16.mxu0 %v15151_v16 }
 0x40d   :  { %v4729_v10 = vpop.permute.xlu0 %4728  ;;  %v4723_v62 = vpop.permute.xlu1 %4722 }
 0x40e   :  { %v4730_v13 = vsel %vm1502_vm13, %v4723_v62, %v4725_v23  ;;  %v4732_v5 = vsel %vm1502_vm13, %v4727_v36, %v4729_v10  ;;  %vm5190_vm13 = vcmask 1043456  }
 0x411   :  { %v4912_v17 = vpop.permute.xlu0 %4911  ;;  %v4910_v32 = vpop.permute.xlu1 %4909 }
 0x412   :  { %9423 = vmatmul.mubr.msk.bf16.vlgmr.msra.gmra.mxu0 %vm3502_vm2, %v10366_v6  ;;  %9426 = vmatmul.mubr.msk.bf16.vlgmr.msra.gmra.mxu1 %vm3502_vm2, %v10366_v6  ;;  %v4916_v40 = vsel %vm1631_vm14, %v4910_v32, %v4912_v17 }
 0x413   :  { %4021 = vmatpush1.bf16.msra.mxu0 %v3990_v12  ;;  %4082 = vmatpush1.bf16.msra.mxu1 %v3992_v27  ;;  %v10385_v27 = vld [vmem:[%s15150_s27 + $0xa8] sm:$0xff]  }
 0x414   :  { %4205 = vmatprep.subr.bf16.mxu0 %v4176_v31  ;;  %4266 = vmatprep.subr.bf16.mxu1 %v4174_v50 }
 0x415   :  { %3863 = vmatprep.mubr.bf16.mxu0 %v15151_v16  ;;  %3924 = vmatprep.mubr.bf16.mxu1 %v15151_v16  ;;  %v4914_v19 = vpop.permute.xlu0 %4913  ;;  %v4908_v7 = vpop.permute.xlu1 %4907 }
 0x416   :  { %v4915_v42 = vsel %vm1631_vm14, %v4908_v7, %v4910_v32  ;;  %v4917_v59 = vsel %vm1631_vm14, %v4912_v17, %v4914_v19 }
 0x41a   :  { %9424 = vmatmul.mubr.msk.bf16.gmra.mxu0 %vm3502_vm2, %v10367_v18  ;;  %9427 = vmatmul.mubr.msk.bf16.gmra.mxu1 %vm3502_vm2, %v10367_v18 }
 0x41b   :  { %3873 = vmatprep.mubr.bf16.mxu0 %v15151_v16  ;;  %3934 = vmatprep.mubr.bf16.mxu1 %v15151_v16 }
 0x422   :  { %9428 = vmatmul.mubr.msk.bf16.gmra.mxu1 %vm3502_vm2, %v10368_v35  ;;  %9425 = vmatmul.mubr.msk.bf16.gmra.mxu0 %vm3502_vm2, %v10368_v35 }
 0x423   :  { %4038 = vmatprep.mubr.bf16.mxu0 %v15151_v16  ;;  %4099 = vmatprep.mubr.bf16.mxu1 %v15151_v16 }
 0x42a   :  { %9437 = vmatmul.mubr.msk.bf16.vlgmr.msra.gmra.mxu0 %vm3502_vm2, %v10369_v39  ;;  %9440 = vmatmul.mubr.msk.bf16.vlgmr.msra.gmra.mxu1 %vm3502_vm2, %v10369_v39 }
 0x42b   :  { %4206 = vmatpush1.bf16.msra.mxu0 %v4175_v15  ;;  %4267 = vmatpush1.bf16.msra.mxu1 %v4177_v34  ;;  %v10386_v15 = vld [vmem:[%s15150_s27 + $0xb0] ss:$0 sps:$4 sm:$0x33]  }
 0x42c   :  { %4390 = vmatprep.subr.bf16.mxu0 %v4361_v55  ;;  %4451 = vmatprep.subr.bf16.mxu1 %v4359_v52 }
 0x42d   :  { %4048 = vmatprep.mubr.bf16.mxu0 %v15151_v16  ;;  %4109 = vmatprep.mubr.bf16.mxu1 %v15151_v16 }
 0x432   :  { %9438 = vmatmul.mubr.msk.bf16.gmra.mxu0 %vm3502_vm2, %v10370_v44  ;;  %9441 = vmatmul.mubr.msk.bf16.gmra.mxu1 %vm3502_vm2, %v10370_v44 }
 0x433   :  { %4058 = vmatprep.mubr.bf16.mxu0 %v15151_v16  ;;  %4119 = vmatprep.mubr.bf16.mxu1 %v15151_v16 }
 0x43a   :  { %9439 = vmatmul.mubr.msk.bf16.gmra.mxu0 %vm3502_vm2, %v10371_v48  ;;  %9442 = vmatmul.mubr.msk.bf16.gmra.mxu1 %vm3502_vm2, %v10371_v48 }
 0x43b   :  { %4223 = vmatprep.mubr.bf16.mxu0 %v15151_v16  ;;  %4284 = vmatprep.mubr.bf16.mxu1 %v15151_v16 }
 0x442   :  { %9451 = vmatmul.mubr.msk.bf16.vlgmr.msra.gmra.mxu0 %vm3502_vm2, %v10372_v25  ;;  %9454 = vmatmul.mubr.msk.bf16.vlgmr.msra.gmra.mxu1 %vm3502_vm2, %v10372_v25 }
 0x443   :  { %4391 = vmatpush1.bf16.msra.mxu0 %v4360_v57  ;;  %4452 = vmatpush1.bf16.msra.mxu1 %v4362_v58 }
 0x444   :  { %4575 = vmatprep.subr.bf16.mxu0 %v4546_v1  ;;  %4636 = vmatprep.subr.bf16.mxu1 %v4544_v45 }
 0x445   :  { %4233 = vmatprep.mubr.bf16.mxu0 %v15151_v16  ;;  %4294 = vmatprep.mubr.bf16.mxu1 %v15151_v16 }
 0x44a   :  { %9452 = vmatmul.mubr.msk.bf16.gmra.mxu0 %vm3502_vm2, %v10373_v3  ;;  %9455 = vmatmul.mubr.msk.bf16.gmra.mxu1 %vm3502_vm2, %v10373_v3 }
 0x44b   :  { %4243 = vmatprep.mubr.bf16.mxu0 %v15151_v16  ;;  %4304 = vmatprep.mubr.bf16.mxu1 %v15151_v16 }
 0x452   :  { %9453 = vmatmul.mubr.msk.bf16.gmra.mxu0 %vm3502_vm2, %v10374_v24  ;;  %9456 = vmatmul.mubr.msk.bf16.gmra.mxu1 %vm3502_vm2, %v10374_v24 }
 0x453   :  { %4408 = vmatprep.mubr.bf16.mxu0 %v15151_v16  ;;  %4469 = vmatprep.mubr.bf16.mxu1 %v15151_v16 }
 0x45a   :  { %9465 = vmatmul.mubr.msk.bf16.vlgmr.msra.gmra.mxu0 %vm3502_vm2, %v10375_v22  ;;  %9468 = vmatmul.mubr.msk.bf16.vlgmr.msra.gmra.mxu1 %vm3502_vm2, %v10375_v22 }
 0x45b   :  { %4576 = vmatpush1.bf16.msra.mxu0 %v4545_v37  ;;  %4637 = vmatpush1.bf16.msra.mxu1 %v4547_v56 }
 0x45c   :  { %4760 = vmatprep.subr.bf16.mxu0 %v4731_v30  ;;  %4821 = vmatprep.subr.bf16.mxu1 %v4729_v10 }
 0x45d   :  { %4418 = vmatprep.mubr.bf16.mxu0 %v15151_v16  ;;  %4479 = vmatprep.mubr.bf16.mxu1 %v15151_v16 }
 0x462   :  { %9466 = vmatmul.mubr.msk.bf16.gmra.mxu0 %vm3502_vm2, %v10376_v14  ;;  %9469 = vmatmul.mubr.msk.bf16.gmra.mxu1 %vm3502_vm2, %v10376_v14 }
 0x463   :  { %4428 = vmatprep.mubr.bf16.mxu0 %v15151_v16  ;;  %4489 = vmatprep.mubr.bf16.mxu1 %v15151_v16 }
 0x46a   :  { %9467 = vmatmul.mubr.msk.bf16.gmra.mxu0 %vm3502_vm2, %v10377_v8  ;;  %9470 = vmatmul.mubr.msk.bf16.gmra.mxu1 %vm3502_vm2, %v10377_v8 }
 0x46b   :  { %4593 = vmatprep.mubr.bf16.mxu0 %v15151_v16  ;;  %4654 = vmatprep.mubr.bf16.mxu1 %v15151_v16 }
 0x472   :  { %9479 = vmatmul.mubr.msk.bf16.vlgmr.msra.gmra.mxu0 %vm3502_vm2, %v10378_v20  ;;  %9482 = vmatmul.mubr.msk.bf16.vlgmr.msra.gmra.mxu1 %vm3502_vm2, %v10378_v20 }
 0x473   :  { %4761 = vmatpush1.bf16.msra.mxu0 %v4730_v13  ;;  %4822 = vmatpush1.bf16.msra.mxu1 %v4732_v5 }
 0x474   :  { %4945 = vmatprep.subr.bf16.mxu0 %v4916_v40  ;;  %5006 = vmatprep.subr.bf16.mxu1 %v4914_v19 }
 0x475   :  { %4603 = vmatprep.mubr.bf16.mxu0 %v15151_v16  ;;  %4664 = vmatprep.mubr.bf16.mxu1 %v15151_v16 }
 0x47a   :  { %9480 = vmatmul.mubr.msk.bf16.gmra.mxu0 %vm3502_vm2, %v10379_v0  ;;  %9483 = vmatmul.mubr.msk.bf16.gmra.mxu1 %vm3502_vm2, %v10379_v0 }
 0x47b   :  { %4613 = vmatprep.mubr.bf16.mxu0 %v15151_v16  ;;  %4674 = vmatprep.mubr.bf16.mxu1 %v15151_v16 }
 0x482   :  { %9481 = vmatmul.mubr.msk.bf16.gmra.mxu0 %vm3502_vm2, %v10380_v29  ;;  %9484 = vmatmul.mubr.msk.bf16.gmra.mxu1 %vm3502_vm2, %v10380_v29 }
 0x483   :  { %4778 = vmatprep.mubr.bf16.mxu0 %v15151_v16  ;;  %4839 = vmatprep.mubr.bf16.mxu1 %v15151_v16 }
 0x48a   :  { %9493 = vmatmul.mubr.msk.bf16.vlgmr.msra.gmra.mxu0 %vm3502_vm2, %v10381_v53  ;;  %9496 = vmatmul.mubr.msk.bf16.vlgmr.msra.gmra.mxu1 %vm3502_vm2, %v10381_v53 }
 0x48b   :  { %4946 = vmatpush1.bf16.msra.mxu0 %v4915_v42  ;;  %5007 = vmatpush1.bf16.msra.mxu1 %v4917_v59 }
 0x48c   :  { %4788 = vmatprep.mubr.bf16.mxu0 %v15151_v16  ;;  %4849 = vmatprep.mubr.bf16.mxu1 %v15151_v16 }
 0x492   :  { %9494 = vmatmul.mubr.msk.bf16.gmra.mxu0 %vm3502_vm2, %v10382_v54  ;;  %9497 = vmatmul.mubr.msk.bf16.gmra.mxu1 %vm3502_vm2, %v10382_v54 }
 0x493   :  { %4798 = vmatprep.mubr.bf16.mxu0 %v15151_v16  ;;  %4859 = vmatprep.mubr.bf16.mxu1 %v15151_v16 }
 0x49a   :  { %9495 = vmatmul.mubr.msk.bf16.gmra.mxu0 %vm3502_vm2, %v10383_v47  ;;  %9498 = vmatmul.mubr.msk.bf16.gmra.mxu1 %vm3502_vm2, %v10383_v47 }
 0x49b   :  { %4963 = vmatprep.mubr.bf16.mxu0 %v15151_v16  ;;  %5024 = vmatprep.mubr.bf16.mxu1 %v15151_v16 }
 0x4a2   :  { %v3546_v2 = vpop.f32.mrf.mxu0  ;;  %v3607_v43 = vpop.f32.mrf.mxu1  ;;  %9507 = vmatmul.mubr.msk.bf16.vlgmr.msra.gmra.mxu0 %vm3502_vm2, %v10384_v41  ;;  %9510 = vmatmul.mubr.msk.bf16.vlgmr.msra.gmra.mxu1 %vm3502_vm2, %v10384_v41 }
 0x4a3   :  { %4973 = vmatprep.mubr.bf16.mxu0 %v15151_v16  ;;  %5034 = vmatprep.mubr.bf16.mxu1 %v15151_v16 }
 0x4a4   :  { %v3548_v49 = vpop.f32.mrf.mxu0  ;;  %v3609_v6 = vpop.f32.mrf.mxu1 }
 0x4a6   :  { %v3550_v21 = vpop.f32.mrf.mxu0  ;;  %v3611_v12 = vpop.f32.mrf.mxu1 }
 0x4a8   :  { %v11826_v50 = vpop.f32.mrf.mxu0  ;;  %v11828_v31 = vpop.f32.mrf.mxu1 }
 0x4aa   :  { %v3556_v18 = vpop.f32.mrf.mxu0  ;;  %v3617_v35 = vpop.f32.mrf.mxu1  ;;  %9508 = vmatmul.mubr.msk.bf16.gmra.mxu0 %vm3502_vm2, %v10385_v27  ;;  %9511 = vmatmul.mubr.msk.bf16.gmra.mxu1 %vm3502_vm2, %v10385_v27 }
 0x4ab   :  { %4983 = vmatprep.mubr.bf16.mxu0 %v15151_v16  ;;  %5044 = vmatprep.mubr.bf16.mxu1 %v15151_v16 }
 0x4ac   :  { %v3558_v63 = vpop.f32.mrf.mxu0  ;;  %v3619_v28 = vpop.f32.mrf.mxu1 }
 0x4ae   :  { %v3560_v39 = vpop.f32.mrf.mxu0  ;;  %v3621_v46 = vpop.f32.mrf.mxu1 }
 0x4b0   :  { %v11837_v34 = vpop.f32.mrf.mxu0  ;;  %v11839_v52 = vpop.f32.mrf.mxu1 }
 0x4b2   :  { %v3566_v55 = vpop.f32.mrf.mxu0  ;;  %v3627_v44 = vpop.f32.mrf.mxu1  ;;  %9509 = vmatmul.mubr.msk.bf16.gmra.mxu0 %vm3502_vm2, %v10386_v15  ;;  %9512 = vmatmul.mubr.msk.bf16.gmra.mxu1 %vm3502_vm2, %v10386_v15  ;;  %vm10506_vm2 = vmmov 0  }
 0x4b3   :  { %5787 = vmatprep.mubr.bf16.mxu0 %v15151_v16 }
 0x4b4   :  { %v3568_v48 = vpop.f32.mrf.mxu0  ;;  %v3629_v33 = vpop.f32.mrf.mxu1 }
 0x4b6   :  { %v3570_v9 = vpop.f32.mrf.mxu0  ;;  %v3631_v25 = vpop.f32.mrf.mxu1 }
 0x4b8   :  { %v3571_v38 = vpop.f32.mrf.mxu0  ;;  %v3632_v57 = vpop.f32.mrf.mxu1 }
 0x4ba   :  { %v3690_v58 = vpop.f32.mrf.mxu0  ;;  %v3751_v45 = vpop.f32.mrf.mxu1 }
 0x4bb   :  { %v3691_v1 = vadd.f32 %v3690_v58, %v3546_v2  ;;  %v3752_v3 = vadd.f32 %v3751_v45, %v3607_v43 }
 0x4bc   :  { %v3692_v24 = vpop.f32.mrf.mxu0  ;;  %v3753_v26 = vpop.f32.mrf.mxu1 }
 0x4bd   :  { %v3693_v36 = vadd.f32 %v3692_v24, %v3548_v49  ;;  %v3754_v22 = vadd.f32 %v3753_v26, %v3609_v6 }
 0x4be   :  { %v3694_v23 = vpop.f32.mrf.mxu0  ;;  %v3755_v37 = vpop.f32.mrf.mxu1 }
 0x4bf   :  { %v3695_v56 = vadd.f32 %v3694_v23, %v3550_v21  ;;  %v3756_v10 = vadd.f32 %v3755_v37, %v3611_v12 }
 0x4c0   :  { %v11844_v30 = vpop.f32.mrf.mxu0  ;;  %v11846_v14 = vpop.f32.mrf.mxu1 }
 0x4c2   :  { %v3700_v8 = vpop.f32.mrf.mxu0  ;;  %v3761_v62 = vpop.f32.mrf.mxu1 }
 0x4c3   :  { %v3701_v17 = vadd.f32 %v3700_v8, %v3556_v18  ;;  %v3762_v20 = vadd.f32 %v3761_v62, %v3617_v35 }
 0x4c4   :  { %v3702_v32 = vpop.f32.mrf.mxu0  ;;  %v3763_v13 = vpop.f32.mrf.mxu1 }
 0x4c5   :  { %v3703_v5 = vadd.f32 %v3702_v32, %v3558_v63  ;;  %v3764_v19 = vadd.f32 %v3763_v13, %v3619_v28 }
 0x4c6   :  { %v3704_v40 = vpop.f32.mrf.mxu0  ;;  %v3765_v0 = vpop.f32.mrf.mxu1 }
 0x4c7   :  { %v3705_v29 = vadd.f32 %v3704_v40, %v3560_v39  ;;  %v3766_v53 = vadd.f32 %v3765_v0, %v3621_v46 }
 0x4c8   :  { %v11848_v7 = vpop.f32.mrf.mxu0  ;;  %v11850_v42 = vpop.f32.mrf.mxu1 }
 0x4ca   :  { %v3710_v59 = vpop.f32.mrf.mxu0  ;;  %v3771_v54 = vpop.f32.mrf.mxu1 }
 0x4cb   :  { %v3711_v47 = vadd.f32 %v3710_v59, %v3566_v55  ;;  %v3772_v41 = vadd.f32 %v3771_v54, %v3627_v44 }
 0x4cc   :  { %v3712_v2 = vpop.f32.mrf.mxu0  ;;  %v3773_v43 = vpop.f32.mrf.mxu1 }
 0x4cd   :  { %v3713_v49 = vadd.f32 %v3712_v2, %v3568_v48  ;;  %v3774_v6 = vadd.f32 %v3773_v43, %v3629_v33 }
 0x4ce   :  { %v3714_v21 = vpop.f32.mrf.mxu0  ;;  %v3775_v12 = vpop.f32.mrf.mxu1 }
 0x4d0   :  { %v3715_v27 = vpop.f32.mrf.mxu0  ;;  %v3776_v18 = vpop.f32.mrf.mxu1 }
 0x4d2   :  { %v3855_v35 = vpop.f32.mrf.mxu0  ;;  %v3916_v63 = vpop.f32.mrf.mxu1 }
 0x4d3   :  { %v3943_v28 = vadd.f32 %v3855_v35, %v3691_v1  ;;  %v3945_v39 = vadd.f32 %v3916_v63, %v3752_v3 }
 0x4d4   :  { %v3857_v46 = vpop.f32.mrf.mxu0  ;;  %v3918_v15 = vpop.f32.mrf.mxu1 }
 0x4d5   :  { %v3944_v9 = vadd.f32 %v3857_v46, %v3693_v36  ;;  %v3946_v25 = vadd.f32 %v3918_v15, %v3754_v22 }
 0x4d6   :  { %v3859_v38 = vpop.f32.mrf.mxu0  ;;  %v3920_v57 = vpop.f32.mrf.mxu1 }
 0x4d7   :  { %v3947_v55 = vadd.f32 %v3859_v38, %v3695_v56  ;;  %v3949_v44 = vadd.f32 %v3920_v57, %v3756_v10 }
 0x4d8   :  { %v11852_v58 = vpop.f32.mrf.mxu0  ;;  %v11854_v48 = vpop.f32.mrf.mxu1 }
 0x4da   :  { %v3865_v33 = vpop.f32.mrf.mxu0  ;;  %v3926_v45 = vpop.f32.mrf.mxu1 }
 0x4db   :  { %v3951_v24 = vadd.f32 %v3865_v33, %v3701_v17  ;;  %v3953_v26 = vadd.f32 %v3926_v45, %v3762_v20 }
 0x4dc   :  { %v3867_v23 = vpop.f32.mrf.mxu0  ;;  %v3928_v37 = vpop.f32.mrf.mxu1 }
 0x4dd   :  { %v3952_v1 = vadd.f32 %v3867_v23, %v3703_v5  ;;  %v3954_v3 = vadd.f32 %v3928_v37, %v3764_v19 }
 0x4de   :  { %v3869_v8 = vpop.f32.mrf.mxu0  ;;  %v3930_v62 = vpop.f32.mrf.mxu1 }
 0x4df   :  { %v3955_v36 = vadd.f32 %v3869_v8, %v3705_v29  ;;  %v3957_v22 = vadd.f32 %v3930_v62, %v3766_v53 }
 0x4e0   :  { %v11856_v32 = vpop.f32.mrf.mxu0  ;;  %v11858_v56 = vpop.f32.mrf.mxu1 }
 0x4e2   :  { %v3875_v10 = vpop.f32.mrf.mxu0  ;;  %v3936_v13 = vpop.f32.mrf.mxu1 }
 0x4e3   :  { %v3959_v40 = vadd.f32 %v3875_v10, %v3711_v47  ;;  %v3961_v0 = vadd.f32 %v3936_v13, %v3772_v41 }
 0x4e4   :  { %v3877_v59 = vpop.f32.mrf.mxu0  ;;  %v3938_v54 = vpop.f32.mrf.mxu1 }
 0x4e5   :  { %v3960_v17 = vadd.f32 %v3877_v59, %v3713_v49  ;;  %v3962_v20 = vadd.f32 %v3938_v54, %v3774_v6 }
 0x4e6   :  { %v3879_v2 = vpop.f32.mrf.mxu0  ;;  %v3940_v43 = vpop.f32.mrf.mxu1 }
 0x4e8   :  { %v3880_v5 = vpop.f32.mrf.mxu0  ;;  %v3941_v19 = vpop.f32.mrf.mxu1 }
 0x4ea   :  { %v4040_v21 = vpop.f32.mrf.mxu0  ;;  %v4101_v12 = vpop.f32.mrf.mxu1 }
 0x4eb   :  { %v4128_v29 = vadd.f32 %v4040_v21, %v3943_v28  ;;  %v4130_v53 = vadd.f32 %v4101_v12, %v3945_v39 }
 0x4ec   :  { %v4042_v27 = vpop.f32.mrf.mxu0  ;;  %v4103_v18 = vpop.f32.mrf.mxu1 }
 0x4ed   :  { %v4129_v35 = vadd.f32 %v4042_v27, %v3944_v9  ;;  %v4131_v63 = vadd.f32 %v4103_v18, %v3946_v25 }
 0x4ee   :  { %v4044_v46 = vpop.f32.mrf.mxu0  ;;  %v4105_v15 = vpop.f32.mrf.mxu1 }
 0x4ef   :  { %v4132_v47 = vadd.f32 %v4044_v46, %v3947_v55  ;;  %v4134_v41 = vadd.f32 %v4105_v15, %v3949_v44 }
 0x4f0   :  { %v11860_v38 = vpop.f32.mrf.mxu0  ;;  %v11862_v49 = vpop.f32.mrf.mxu1 }
 0x4f2   :  { %v4050_v6 = vpop.f32.mrf.mxu0  ;;  %v4111_v57 = vpop.f32.mrf.mxu1 }
 0x4f3   :  { %v4136_v33 = vadd.f32 %v4050_v6, %v3951_v24  ;;  %v4138_v45 = vadd.f32 %v4111_v57, %v3953_v26 }
 0x4f4   :  { %v4052_v23 = vpop.f32.mrf.mxu0  ;;  %v4113_v37 = vpop.f32.mrf.mxu1 }
 0x4f5   :  { %v4137_v28 = vadd.f32 %v4052_v23, %v3952_v1  ;;  %v4139_v39 = vadd.f32 %v4113_v37, %v3954_v3 }
 0x4f6   :  { %v4054_v8 = vpop.f32.mrf.mxu0  ;;  %v4115_v62 = vpop.f32.mrf.mxu1 }
 0x4f7   :  { %v4140_v9 = vadd.f32 %v4054_v8, %v3955_v36  ;;  %v4142_v25 = vadd.f32 %v4115_v62, %v3957_v22 }
 0x4f8   :  { %v11864_v10 = vpop.f32.mrf.mxu0  ;;  %v11866_v55 = vpop.f32.mrf.mxu1 }
 0x4fa   :  { %v4060_v44 = vpop.f32.mrf.mxu0  ;;  %v4121_v13 = vpop.f32.mrf.mxu1 }
 0x4fb   :  { %v4144_v59 = vadd.f32 %v4060_v44, %v3959_v40  ;;  %v4146_v54 = vadd.f32 %v4121_v13, %v3961_v0 }
 0x4fc   :  { %v4062_v2 = vpop.f32.mrf.mxu0  ;;  %v4123_v43 = vpop.f32.mrf.mxu1 }
 0x4fd   :  { %v4145_v24 = vadd.f32 %v4062_v2, %v3960_v17  ;;  %v4147_v26 = vadd.f32 %v4123_v43, %v3962_v20 }
 0x4fe   :  { %v4064_v5 = vpop.f32.mrf.mxu0  ;;  %v4125_v19 = vpop.f32.mrf.mxu1 }
 0x500   :  { %v4065_v1 = vpop.f32.mrf.mxu0  ;;  %v4126_v3 = vpop.f32.mrf.mxu1 }
 0x502   :  { %v4225_v21 = vpop.f32.mrf.mxu0  ;;  %v4286_v12 = vpop.f32.mrf.mxu1 }
 0x503   :  { %v4313_v36 = vadd.f32 %v4225_v21, %v4128_v29  ;;  %v4315_v22 = vadd.f32 %v4286_v12, %v4130_v53 }
 0x504   :  { %v4227_v27 = vpop.f32.mrf.mxu0  ;;  %v4288_v18 = vpop.f32.mrf.mxu1 }
 0x505   :  { %v4314_v46 = vadd.f32 %v4227_v27, %v4129_v35  ;;  %v4316_v15 = vadd.f32 %v4288_v18, %v4131_v63 }
 0x506   :  { %v4229_v6 = vpop.f32.mrf.mxu0  ;;  %v4290_v57 = vpop.f32.mrf.mxu1 }
 0x507   :  { %v4317_v40 = vadd.f32 %v4229_v6, %v4132_v47  ;;  %v4319_v0 = vadd.f32 %v4290_v57, %v4134_v41 }
 0x508   :  { %v11868_v23 = vpop.f32.mrf.mxu0  ;;  %v11870_v17 = vpop.f32.mrf.mxu1 }
 0x50a   :  { %v4235_v20 = vpop.f32.mrf.mxu0  ;;  %v4296_v37 = vpop.f32.mrf.mxu1 }
 0x50b   :  { %v4321_v8 = vadd.f32 %v4235_v20, %v4136_v33  ;;  %v4323_v62 = vadd.f32 %v4296_v37, %v4138_v45 }
 0x50c   :  { %v4237_v44 = vpop.f32.mrf.mxu0  ;;  %v4298_v13 = vpop.f32.mrf.mxu1 }
 0x50d   :  { %v4322_v29 = vadd.f32 %v4237_v44, %v4137_v28  ;;  %v4324_v53 = vadd.f32 %v4298_v13, %v4139_v39 }
 0x50e   :  { %v4239_v2 = vpop.f32.mrf.mxu0  ;;  %v4300_v43 = vpop.f32.mrf.mxu1 }
 0x50f   :  { %v4325_v35 = vadd.f32 %v4239_v2, %v4140_v9  ;;  %v4327_v63 = vadd.f32 %v4300_v43, %v4142_v25 }
 0x510   :  { %v11872_v5 = vpop.f32.mrf.mxu0  ;;  %v11874_v47 = vpop.f32.mrf.mxu1 }
 0x512   :  { %v4245_v41 = vpop.f32.mrf.mxu0  ;;  %v4306_v19 = vpop.f32.mrf.mxu1 }
 0x513   :  { %v4329_v1 = vadd.f32 %v4245_v41, %v4144_v59  ;;  %v4331_v3 = vadd.f32 %v4306_v19, %v4146_v54 }
 0x514   :  { %v4247_v21 = vpop.f32.mrf.mxu0  ;;  %v4308_v12 = vpop.f32.mrf.mxu1 }
 0x515   :  { %v4330_v33 = vadd.f32 %v4247_v21, %v4145_v24  ;;  %v4332_v45 = vadd.f32 %v4308_v12, %v4147_v26 }
 0x516   :  { %v4249_v27 = vpop.f32.mrf.mxu0  ;;  %v4310_v18 = vpop.f32.mrf.mxu1 }
 0x518   :  { %v4250_v28 = vpop.f32.mrf.mxu0  ;;  %v4311_v39 = vpop.f32.mrf.mxu1 }
 0x51a   :  { %v4410_v6 = vpop.f32.mrf.mxu0  ;;  %v4471_v57 = vpop.f32.mrf.mxu1 }
 0x51b   :  { %v4498_v9 = vadd.f32 %v4410_v6, %v4313_v36  ;;  %v4500_v25 = vadd.f32 %v4471_v57, %v4315_v22 }
 0x51c   :  { %v4412_v20 = vpop.f32.mrf.mxu0  ;;  %v4473_v37 = vpop.f32.mrf.mxu1 }
 0x51d   :  { %v4499_v44 = vadd.f32 %v4412_v20, %v4314_v46  ;;  %v4501_v13 = vadd.f32 %v4473_v37, %v4316_v15 }
 0x51e   :  { %v4414_v2 = vpop.f32.mrf.mxu0  ;;  %v4475_v43 = vpop.f32.mrf.mxu1 }
 0x51f   :  { %v11876_v59 = vadd.f32 %v4414_v2, %v4317_v40  ;;  %v11878_v54 = vadd.f32 %v4475_v43, %v4319_v0 }
 0x520   :  { %v11880_v24 = vpop.f32.mrf.mxu0  ;;  %v11882_v26 = vpop.f32.mrf.mxu1 }
 0x522   :  { %v4420_v41 = vpop.f32.mrf.mxu0  ;;  %v4481_v19 = vpop.f32.mrf.mxu1 }
 0x523   :  { %v11884_v21 = vadd.f32 %v4420_v41, %v4321_v8  ;;  %v11886_v36 = vadd.f32 %v4481_v19, %v4323_v62 }
 0x524   :  { %v4422_v22 = vpop.f32.mrf.mxu0  ;;  %v4483_v12 = vpop.f32.mrf.mxu1 }
 0x525   :  { %v11888_v46 = vadd.f32 %v4422_v22, %v4322_v29  ;;  %v11890_v15 = vadd.f32 %v4483_v12, %v4324_v53 }
 0x526   :  { %v4424_v40 = vpop.f32.mrf.mxu0  ;;  %v4485_v27 = vpop.f32.mrf.mxu1 }
 0x527   :  { %v11892_v0 = vadd.f32 %v4424_v40, %v4325_v35  ;;  %v11894_v18 = vadd.f32 %v4485_v27, %v4327_v63 }
 0x528   :  { %v11896_v28 = vpop.f32.mrf.mxu0  ;;  %v11898_v39 = vpop.f32.mrf.mxu1 }
 0x52a   :  { %v4430_v8 = vpop.f32.mrf.mxu0  ;;  %v4491_v6 = vpop.f32.mrf.mxu1 }
 0x52b   :  { %v11900_v62 = vadd.f32 %v4430_v8, %v4329_v1  ;;  %v11902_v57 = vadd.f32 %v4491_v6, %v4331_v3 }
 0x52c   :  { %v4432_v29 = vpop.f32.mrf.mxu0  ;;  %v4493_v20 = vpop.f32.mrf.mxu1 }
 0x52d   :  { %v11904_v53 = vadd.f32 %v4432_v29, %v4330_v33  ;;  %v11906_v37 = vadd.f32 %v4493_v20, %v4332_v45 }
 0x52e   :  { %v4434_v35 = vpop.f32.mrf.mxu0  ;;  %v4495_v2 = vpop.f32.mrf.mxu1 }
 0x52f   :  { %15152 = vst [vmem:[#allocation6_spill] sm:$0xff] %v11904_v53  ;;  %15153 = vst [vmem:[#allocation8_spill] sm:$0xff] %v11906_v37 }
 0x530   :  { %v4435_v63 = vpop.f32.mrf.mxu0  ;;  %v4496_v43 = vpop.f32.mrf.mxu1 }
 0x532   :  { %v4595_v41 = vpop.f32.mrf.mxu0  ;;  %v4656_v19 = vpop.f32.mrf.mxu1 }
 0x533   :  { %v11908_v22 = vadd.f32 %v4595_v41, %v4498_v9  ;;  %v11910_v12 = vadd.f32 %v4656_v19, %v4500_v25 }
 0x534   :  { %v4597_v1 = vpop.f32.mrf.mxu0  ;;  %v4658_v40 = vpop.f32.mrf.mxu1 }
 0x535   :  { %15154 = vst [vmem:[#allocation15_spill] sm:$0xff] %v11908_v22  ;;  %15155 = vst [vmem:[#allocation17_spill] sm:$0xff] %v11910_v12  ;;  %v11912_v3 = vadd.f32 %v4597_v1, %v4499_v44  ;;  %v11914_v27 = vadd.f32 %v4658_v40, %v4501_v13 }
 0x536   :  { %v11916_v33 = vpop.f32.mrf.mxu0  ;;  %v11918_v45 = vpop.f32.mrf.mxu1 }
 0x537   :  { %15156 = vst [vmem:[#allocation3_spill] sm:$0xff] %v11912_v3  ;;  %15157 = vst [vmem:[#allocation2_spill] sm:$0xff] %v11914_v27 }
 0x538   :  { %v11920_v8 = vpop.f32.mrf.mxu0  ;;  %v11922_v6 = vpop.f32.mrf.mxu1 }
 0x53a   :  { %v11924_v29 = vpop.f32.mrf.mxu0  ;;  %v11926_v9 = vpop.f32.mrf.mxu1 }
 0x53c   :  { %v11928_v25 = vpop.f32.mrf.mxu0  ;;  %v11930_v20 = vpop.f32.mrf.mxu1 }
 0x53e   :  { %v11932_v44 = vpop.f32.mrf.mxu0  ;;  %v11934_v13 = vpop.f32.mrf.mxu1 }
 0x540   :  { %v11936_v35 = vpop.f32.mrf.mxu0  ;;  %v11938_v2 = vpop.f32.mrf.mxu1 }
 0x542   :  { %v11940_v63 = vpop.f32.mrf.mxu0  ;;  %v11942_v43 = vpop.f32.mrf.mxu1 }
 0x543   :  { %15158 = vst [vmem:[#allocation4_spill] sm:$0xff] %v11942_v43 }
 0x544   :  { %v11944_v41 = vpop.f32.mrf.mxu0  ;;  %v11946_v19 = vpop.f32.mrf.mxu1 }
 0x545   :  { %15159 = vst [vmem:[#allocation7_spill] sm:$0xff] %v11944_v41 }
 0x546   :  { %v4619_v1 = vpop.f32.mrf.mxu0  ;;  %v4680_v40 = vpop.f32.mrf.mxu1 }
 0x548   :  { %v4620_v61 = vpop.f32.mrf.mxu0  ;;  %v4681_v16 = vpop.f32.mrf.mxu1 }
 0x54a   :  { %v11948_v27 = vpop.f32.mrf.mxu0  ;;  %v11950_v3 = vpop.f32.mrf.mxu1 }
 0x54b   :  { %15160 = vst [vmem:[#allocation11_spill] sm:$0xff] %v11948_v27  ;;  %15161 = vst [vmem:[#allocation13_spill] sm:$0xff] %v11950_v3 }
 0x54c   :  { %v11952_v12 = vpop.f32.mrf.mxu0  ;;  %v11954_v22 = vpop.f32.mrf.mxu1 }
 0x54d   :  { %15162 = vst [vmem:[#allocation22_spill] sm:$0xff] %v11952_v12  ;;  %15163 = vst [vmem:[#allocation5_spill] sm:$0xff] %v11954_v22 }
 0x54e   :  { %v11956_v37 = vpop.f32.mrf.mxu0  ;;  %v11958_v53 = vpop.f32.mrf.mxu1 }
 0x54f   :  { %15164 = vst [vmem:[#allocation9_spill] sm:$0xff] %v11958_v53  ;;  %v3697_v53 = vadd.f32 %v11844_v30, %v11826_v50  ;;  %v11998_v30 = vpop.permute.xlu1 %5100 }
 0x550   :  { %v11960_v43 = vpop.f32.mrf.mxu0  ;;  %v11962_v41 = vpop.f32.mrf.mxu1  ;;  %15173 = vst [vmem:[#allocation21_spill] sm:$0xff] %v11998_v30 }
 0x551   :  { %15165 = vst [vmem:[#allocation12_spill] sm:$0xff] %v11962_v41  ;;  %v3758_v41 = vadd.f32 %v11846_v14, %v11828_v31 }
 0x552   :  { %v11964_v1 = vpop.f32.mrf.mxu0  ;;  %v11966_v61 = vpop.f32.mrf.mxu1 }
 0x553   :  { %15166 = vst [vmem:[#allocation18_spill] sm:$0xff] %v11964_v1  ;;  %15167 = vst [vmem:[#allocation20_spill] sm:$0xff] %v11966_v61 }
 0x554   :  { %v11968_v16 = vpop.f32.mrf.mxu0  ;;  %v11970_v40 = vpop.f32.mrf.mxu1 }
 0x555   :  { %15168 = vst [vmem:[#allocation10_spill] sm:$0xff] %v11970_v40  ;;  %v3707_v40 = vadd.f32 %v11848_v7, %v11837_v34  ;;  %v5123_v34 = vld [vmem:[%s15039_s10] sm:$0xf] }
 0x556   :  { %v11972_v3 = vpop.f32.mrf.mxu0  ;;  %v11974_v12 = vpop.f32.mrf.mxu1 }
 0x557   :  { %15169 = vst [vmem:[#allocation14_spill] sm:$0xff] %v11972_v3  ;;  %15170 = vst [vmem:[#allocation19_spill] sm:$0xff] %v11974_v12  ;;  %v3768_v12 = vadd.f32 %v11850_v42, %v11839_v52  ;;  %v3956_v31 = vadd.f32 %v11856_v32, %v3707_v40 }
 0x558   :  { %v11976_v22 = vpop.f32.mrf.mxu0  ;;  %v11978_v27 = vpop.f32.mrf.mxu1 }
 0x559   :  { %15171 = vst [vmem:[#allocation24_spill] sm:$0xff] %v11976_v22  ;;  %15172 = vst [vmem:[#allocation16_spill] sm:$0xff] %v11978_v27  ;;  %v3948_v22 = vadd.f32 %v11852_v58, %v3697_v53  ;;  %v3950_v27 = vadd.f32 %v11854_v48, %v3758_v41  ;;  %v3958_v14 = vadd.f32 %v11858_v56, %v3768_v12 }
 0x55a   :  { %v11984_v1 = vpop.f32.mrf.mxu0  ;;  %v11986_v61 = vpop.f32.mrf.mxu1  ;;  %v4141_v48 = vadd.f32 %v11864_v10, %v3956_v31  ;;  %v12012_v12 = vrot.slane %v5123_v34, %v11435_v11  ;;  %v12020_v10 = vrot.slane %v5123_v34, %v11507_v51 }
 0x55b   :  { %v4133_v52 = vadd.f32 %v11860_v38, %v3948_v22  ;;  %v4135_v7 = vadd.f32 %v11862_v49, %v3950_v27  ;;  %v4143_v53 = vadd.f32 %v11866_v55, %v3958_v14  ;;  %v12017_v49 = vrot.slane %v5123_v34, %v11448_v60 }
 0x55c   :  { %v11994_v3 = vpop.f32.mrf.mxu0  ;;  %v11996_v50 = vpop.f32.mrf.mxu1  ;;  %v4326_v30 = vadd.f32 %v11872_v5, %v4141_v48  ;;  %v15174_v27 = vsub.s32 3, %v10626_v4  ;;  %v4691_v4 = vadd.f32 %v11924_v29, %v11884_v21  ;;  %v15184_v48 = vld [vmem:[#allocation22_spill] sm:$0xff] }
 0x55d   :  { %v4318_v41 = vadd.f32 %v11868_v23, %v4133_v52  ;;  %v4320_v32 = vadd.f32 %v11870_v17, %v4135_v7  ;;  %v4328_v38 = vadd.f32 %v11874_v47, %v4143_v53  ;;  %v12032_v5 = vpop.permute.xlu1 %5095  ;;  %v4687_v52 = vadd.f32 %v11916_v33, %v11876_v59 }
 0x55e   :  { %v4804_v42 = vpop.f32.mrf.mxu0  ;;  %v4865_v58 = vpop.f32.mrf.mxu1  ;;  %v12030_v31 = vrot.slane %v5123_v34, %v15174_v27  ;;  %v4511_v47 = vadd.f32 %v11896_v28, %v4326_v30  ;;  %v4693_v28 = vadd.f32 %v11926_v9, %v11886_v36  ;;  %v4694_v59 = vadd.f32 %v11930_v20, %v11890_v15  ;;  %v15176_v9 = vld [vmem:[#allocation6_spill] sm:$0xff]  ;;  %v15177_v15 = vld [vmem:[#allocation7_spill] sm:$0xff]  ;;  %v15181_v30 = vld [vmem:[#allocation17_spill] sm:$0xff] }
 0x55f   :  { %v4503_v55 = vadd.f32 %v11880_v24, %v4318_v41  ;;  %v4505_v23 = vadd.f32 %v11882_v26, %v4320_v32  ;;  %v4513_v14 = vadd.f32 %v11898_v39, %v4328_v38  ;;  %v4689_v24 = vadd.f32 %v11918_v45, %v11878_v54  ;;  %v15183_v58 = vld [vmem:[#allocation3_spill] sm:$0xff] }
 0x560   :  { %v4805_v40 = vpop.f32.mrf.mxu0  ;;  %v4866_v56 = vpop.f32.mrf.mxu1  ;;  %v4692_v39 = vadd.f32 %v11928_v25, %v11888_v46  ;;  %v4695_v54 = vadd.f32 %v11932_v44, %v11892_v0  ;;  %v4697_v33 = vadd.f32 %v11934_v13, %v11894_v18  ;;  %v4696_v21 = vadd.f32 %v11936_v35, %v4511_v47  ;;  %v15175_v46 = vld [vmem:[#allocation4_spill] sm:$0xff]  ;;  %v15179_v13 = vld [vmem:[#allocation15_spill] sm:$0xff] }
 0x561   :  { %v4688_v26 = vadd.f32 %v11920_v8, %v4503_v55  ;;  %v4690_v7 = vadd.f32 %v11922_v6, %v4505_v23  ;;  %v4698_v45 = vadd.f32 %v11938_v2, %v4513_v14  ;;  %v4699_v8 = vadd.f32 %v11940_v63, %v11900_v62  ;;  %v15178_v18 = vld [vmem:[#allocation8_spill] sm:$0xff]  ;;  %v15180_v35 = vld [vmem:[#allocation11_spill] sm:$0xff]  ;;  %v15182_v62 = vld [vmem:[#allocation13_spill] sm:$0xff]  ;;  %v5086_v32 = vpop.permute.xlu1 %5085 }
 0x562   :  { %v12024_v17 = vpop.f32.mrf.mxu0  ;;  %v12026_v22 = vpop.f32.mrf.mxu1  ;;  %v4701_v29 = vadd.f32 %v15175_v46, %v11902_v57  ;;  %v4700_v25 = vadd.f32 %v15177_v15, %v15176_v9  ;;  %v4872_v0 = vadd.f32 %v11956_v37, %v4687_v52  ;;  %v4702_v44 = vadd.f32 %v11946_v19, %v15178_v18  ;;  %v15185_v40 = vld [vmem:[#allocation9_spill] sm:$0xff]  ;;  %v15186_v56 = vld [vmem:[#allocation18_spill] sm:$0xff]  ;;  %v15189_v47 = vld [vmem:[#allocation12_spill] sm:$0xff] }
 0x563   :  { %v4873_v20 = vadd.f32 %v11960_v43, %v4688_v26  ;;  %v4868_v2 = vadd.f32 %v15180_v35, %v15179_v13  ;;  %v12072_v63 = vadd.f32 %v15182_v62, %v15181_v30  ;;  %v4869_v57 = vadd.f32 %v15184_v48, %v15183_v58  ;;  %v15187_v19 = vld [vmem:[#allocation2_spill] sm:$0xff]  ;;  %v15188_v23 = vld [vmem:[#allocation5_spill] sm:$0xff]  ;;  %v15190_v52 = vld [vmem:[#allocation20_spill] sm:$0xff]  ;;  %v5091_v18 = vpop.permute.xlu0 %5090 }
 0x564   :  { %v4967_v34 = vpop.f32.mrf.mxu0  ;;  %v12044_v42 = vpop.f32.mrf.mxu1  ;;  %v4874_v37 = vadd.f32 %v15185_v40, %v4689_v24  ;;  %v4876_v43 = vadd.f32 %v15186_v56, %v4691_v4  ;;  %v12080_v27 = vadd.f32 %v15188_v23, %v15187_v19  ;;  %v4875_v14 = vadd.f32 %v15189_v47, %v4690_v7  ;;  %v15191_v13 = vld [vmem:[#allocation10_spill] sm:$0xff] }
 0x565   :  { %v4878_v26 = vadd.f32 %v15190_v52, %v4693_v28  ;;  %v4877_v46 = vadd.f32 %v11968_v16, %v4692_v39  ;;  %v4879_v35 = vadd.f32 %v15191_v13, %v4694_v59  ;;  %v15194_v28 = vld [vmem:[#allocation24_spill] sm:$0xff]  ;;  %v4885_v23 = vadd.f32 %v11994_v3, %v4700_v25 }
 0x566   :  { %v4969_v36 = vpop.f32.mrf.mxu0  ;;  %v5030_v6 = vpop.f32.mrf.mxu1  ;;  %v4881_v40 = vadd.f32 %v15194_v28, %v4696_v21  ;;  %v15195_v59 = vld [vmem:[#allocation16_spill] sm:$0xff] }
 0x567   :  { %v5057_v38 = vadd.f32 %v4969_v36, %v4872_v0  ;;  %v5059_v24 = vadd.f32 %v5030_v6, %v4874_v37  ;;  %v15192_v36 = vld [vmem:[#allocation14_spill] sm:$0xff]  ;;  %v4883_v6 = vadd.f32 %v15195_v59, %v4698_v45  ;;  %v4884_v37 = vadd.f32 %v11984_v1, %v4699_v8 }
 0x568   :  { %v4971_v53 = vpop.f32.mrf.mxu0  ;;  %v5032_v41 = vpop.f32.mrf.mxu1  ;;  %v4880_v0 = vadd.f32 %v15192_v36, %v4695_v54 }
 0x569   :  { %v5058_v55 = vadd.f32 %v4971_v53, %v4873_v20  ;;  %v15193_v20 = vld [vmem:[#allocation19_spill] sm:$0xff]  ;;  %v5060_v58 = vadd.f32 %v5032_v41, %v4875_v14  ;;  %v12091_v16 = vadd.f32 %v5086_v32, %v5057_v38  ;;  %v12098_v41 = vadd.f32 %v5086_v32, %v5059_v24 }
 0x56a   :  { %v4975_v9 = vpop.f32.mrf.mxu0  ;;  %v5036_v15 = vpop.f32.mrf.mxu1  ;;  %v4882_v62 = vadd.f32 %v15193_v20, %v4697_v33  ;;  %v4886_v33 = vadd.f32 %v11986_v61, %v4701_v29  ;;  %v5053_v14 = vadd.f32 %v12024_v17, %v4868_v2 }
 0x56b   :  { %v12086_v30 = vadd.f32 %v5086_v32, %v5058_v55  ;;  %v5061_v4 = vadd.f32 %v4975_v9, %v4876_v43  ;;  %v5063_v48 = vadd.f32 %v5036_v15, %v4878_v26  ;;  %v5054_v43 = vadd.f32 %v4967_v34, %v4869_v57  ;;  %v12111_v57 = vpop.permute.xlu0 %5080 }
 0x56c   :  { %v4977_v7 = vpop.f32.mrf.mxu0  ;;  %v5038_v53 = vpop.f32.mrf.mxu1  ;;  %v12105_v47 = vadd.f32 %v5086_v32, %v5060_v58  ;;  %v5149_v61 = vmul.f32 %v12012_v12, %v12091_v16  ;;  %v4887_v32 = vadd.f32 %v11996_v50, %v4702_v44  ;;  %v5151_v15 = vmul.f32 %v12020_v10, %v12098_v41 }
 0x56d   :  { %v12093_v39 = vadd.f32 %v5091_v18, %v5061_v4  ;;  %v5062_v56 = vadd.f32 %v4977_v7, %v4877_v46  ;;  %v5064_v55 = vadd.f32 %v5038_v53, %v4879_v35  ;;  %v5150_v21 = vmul.f32 %v12017_v49, %v12086_v30  ;;  %v15196_v7 = vld [vmem:[#allocation21_spill] sm:$0xff] }
 0x56e   :  { %v4979_v54 = vpop.f32.mrf.mxu0  ;;  %v5040_v19 = vpop.f32.mrf.mxu1  ;;  %v12107_v45 = vadd.f32 %v5091_v18, %v5063_v48  ;;  %v12122_v52 = vadd.f32 %v12111_v57, %v5054_v43  ;;  %v5152_v36 = vmul.f32 %v12030_v31, %v12105_v47 }
 0x56f   :  { %v12102_v38 = vadd.f32 %v5091_v18, %v5062_v56  ;;  %v12109_v1 = vadd.f32 %v5091_v18, %v5064_v55  ;;  %v5153_v29 = vmul.f32 %v12012_v12, %v12093_v39  ;;  %v5065_v26 = vadd.f32 %v4979_v54, %v4880_v0 }
 0x570   :  { %v4981_v34 = vpop.f32.mrf.mxu0  ;;  %v5042_v8 = vpop.f32.mrf.mxu1  ;;  %v5172_v18 = vadd.f32 %v5150_v21, %v5149_v61  ;;  %v5155_v24 = vmul.f32 %v12020_v10, %v12107_v45  ;;  %v5067_v0 = vadd.f32 %v5040_v19, %v4882_v62 }
 0x571   :  { %v5154_v3 = vmul.f32 %v12017_v49, %v12102_v38  ;;  %v5066_v25 = vadd.f32 %v4981_v34, %v4881_v40  ;;  %v5156_v35 = vmul.f32 %v12030_v31, %v12109_v1  ;;  %v12136_v48 = vadd.f32 %v12032_v5, %v5065_v26 }
 0x572   :  { %v4985_v46 = vpop.f32.mrf.mxu0  ;;  %v5046_v9 = vpop.f32.mrf.mxu1  ;;  %v5173_v34 = vadd.f32 %v5172_v18, %v5151_v15 }
 0x573   :  { %v5178_v13 = vadd.f32 %v5154_v3, %v5153_v29  ;;  %v12131_v50 = vadd.f32 %v12032_v5, %v5066_v25  ;;  %v5069_v17 = vadd.f32 %v4985_v46, %v4884_v37  ;;  %v5071_v44 = vadd.f32 %v5046_v9, %v4886_v33 }
 0x574   :  { %v4987_v2 = vpop.f32.mrf.mxu0  ;;  %v5048_v4 = vpop.f32.mrf.mxu1  ;;  %v5068_v37 = vadd.f32 %v5042_v8, %v4883_v6  ;;  %v5180_v55 = vsel %vm5167_vm9, %v5156_v35, 0.0  ;;  %v12156_v6 = vadd.f32 %v12111_v57, %v5053_v14  ;;  %v5055_v8 = vadd.f32 %v12026_v22, %v12072_v63 }
 0x575   :  { %v5070_v20 = vadd.f32 %v4987_v2, %v4885_v23  ;;  %v5072_v58 = vadd.f32 %v5048_v4, %v4887_v32  ;;  %v12139_v53 = vadd.f32 %v15196_v7, %v5069_v17  ;;  %v12142_v28 = vadd.f32 %v15196_v7, %v5071_v44 }
 0x576   :  { %v4989_v40 = vpop.f32.mrf.mxu0  ;;  %v5050_v56 = vpop.f32.mrf.mxu1  ;;  %v5179_v59 = vadd.f32 %v5178_v13, %v5155_v24  ;;  %v5158_v54 = vmul.f32 %v12017_v49, %v12131_v50  ;;  %v5056_v3 = vadd.f32 %v12044_v42, %v12080_v27  ;;  %v5157_v25 = vmul.f32 %v12012_v12, %v12136_v48 }
 0x577   :  { %v12145_v43 = vadd.f32 %v15196_v7, %v5070_v20  ;;  %v12148_v62 = vadd.f32 %v15196_v7, %v5072_v58  ;;  %v5161_v19 = vmul.f32 %v12012_v12, %v12139_v53  ;;  %v5163_v61 = vmul.f32 %v12020_v10, %v12142_v28 }
 0x578   :  { %v4990_v33 = vpop.f32.mrf.mxu0  ;;  %v5051_v21 = vpop.f32.mrf.mxu1  ;;  %v5181_v23 = vadd.f32 %v5180_v55, %v5179_v59  ;;  %v12169_v32 = vadd.f32 %v12032_v5, %v5067_v0  ;;  %v5174_v14 = vsel %vm5167_vm9, %v5152_v36, 0.0  ;;  %v12173_v22 = vadd.f32 %v12032_v5, %v5068_v37  ;;  %v5338_v37 = vld [vmem:[%s15040_s8 + $0x20] sm:$0xf]  ;;  %v5336_v55 = vld [vmem:[%s15040_s8 + $0x10] sm:$0xff] }
 0x579   :  { %v5162_v29 = vmul.f32 %v12017_v49, %v12145_v43  ;;  %v5191_v63 = vsel %vm5190_vm13, %v5161_v19, 0.0  ;;  %v5164_v46 = vmul.f32 %v12030_v31, %v12148_v62  ;;  %v5146_v42 = vmul.f32 %v12017_v49, %v12122_v52  ;;  %v5388_v19 = vld [vmem:[%s15041_s9 + $0x20] sm:$0xf] }
 0x57a   :  { %5182 = vadd.xlane.f32.xlu1 %v5181_v23  ;;  %v5184_v27 = vadd.f32 %v5158_v54, %v5157_v25  ;;  %v5175_v15 = vadd.f32 %v5174_v14, %v5173_v34  ;;  %v5194_v18 = vsel %vm5190_vm13, %v5163_v61, 0.0  ;;  %v5145_v13 = vmul.f32 %v12012_v12, %v12156_v6  ;;  %v5337_v54 = vld [vmem:[%s15040_s8 + $0x18] sm:$0xff] }
 0x57b   :  { %v5192_v26 = vsel %vm5190_vm13, %v5162_v29, 0.0  ;;  %v12185_v5 = vadd.f32 %v12111_v57, %v5055_v8  ;;  %v5159_v35 = vmul.f32 %v12020_v10, %v12169_v32  ;;  %v12190_v17 = vadd.f32 %v12111_v57, %v5056_v3 }
 0x57c   :  { %v5193_v9 = vadd.f32 %v5192_v26, %v5191_v63  ;;  %v5160_v44 = vmul.f32 %v12030_v31, %v12173_v22  ;;  %v5197_v2 = vsel %vm5196_vm5, %v5164_v46, 0.0  ;;  %v5165_v4 = vadd.f32 %v5146_v42, %v5145_v13 }
 0x57d   :  { %v5185_v0 = vadd.f32 %v5184_v27, %v5159_v35  ;;  %v5147_v20 = vmul.f32 %v12020_v10, %v12185_v5  ;;  %v5148_v58 = vmul.f32 %v12030_v31, %v12190_v17 }
 0x57e   :  { %5176 = vadd.xlane.f32.xlu1 %v5175_v15  ;;  %v5195_v24 = vadd.f32 %v5194_v18, %v5193_v9  ;;  %v5186_v7 = vsel %vm5167_vm9, %v5160_v44, 0.0 }
 0x57f   :  { %v5187_v40 = vadd.f32 %v5186_v7, %v5185_v0  ;;  %v5166_v57 = vadd.f32 %v5165_v4, %v5147_v20  ;;  %v5168_v56 = vsel %vm5167_vm9, %v5148_v58, 0.0 }
 0x580   :  { %v5198_v36 = vadd.f32 %v5197_v2, %v5195_v24 }
 0x581   :  { %v5169_v59 = vadd.f32 %v5168_v56, %v5166_v57 }
 0x582   :  { %5199 = vadd.xlane.f32.xlu0 %v5198_v36 }
 0x586   :  { %5188 = vadd.xlane.f32.xlu0 %v5187_v40 }
 0x58a   :  { %5170 = vadd.xlane.f32.xlu0 %v5169_v59 }
 0x58f   :  { %5361 = vperm.xlu1 %10118, %v5338_v37  }
 0x593   :  { %5351 = vperm.xlu1 %10118, %v5336_v55  }
 0x597   :  { %5356 = vperm.xlu1 %10118, %v5337_v54  }
 0x5a0   :  { %5411 = vperm.xlu0 %10117, %v5388_v19  }
 0x603   :  { %v5183_v33 = vpop.xlane.xlu1 %5182 }
 0x604   :  { %v5203_v21 = vmul.f32 0.005, %v5183_v33 }
 0x606   :  { %v12214_v34 = vsub.f32 %v12093_v39, %v5203_v21  ;;  %v12217_v61 = vsub.f32 %v12102_v38, %v5203_v21  ;;  %v12247_v42 = vsub.f32 %v12109_v1, %v5203_v21 }
 0x607   :  { %v5177_v23 = vpop.xlane.xlu1 %5176 }
 0x608   :  { %v5202_v8 = vmul.f32 0.005, %v5177_v23  ;;  %v5234_v39 = vmul.f32 %v12214_v34, %v12214_v34 }
 0x60a   :  { %v12220_v29 = vsub.f32 %v12091_v16, %v5202_v8  ;;  %v12223_v3 = vsub.f32 %v12086_v30, %v5202_v8  ;;  %v12226_v25 = vsub.f32 %v12098_v41, %v5202_v8  ;;  %v12229_v14 = vsub.f32 %v12105_v47, %v5202_v8 }
 0x60b   :  { %v5200_v63 = vpop.xlane.xlu0 %5199  ;;  %v12238_v30 = vsub.f32 %v12107_v45, %v5203_v21  ;;  %v5235_v41 = vmul.f32 %v12217_v61, %v12217_v61 }
 0x60c   :  { %v5230_v38 = vmul.f32 %v12220_v29, %v12220_v29  ;;  %v5231_v16 = vmul.f32 %v12223_v3, %v12223_v3  ;;  %v5205_v26 = vmul.f32 0.005, %v5200_v63  ;;  %v5232_v47 = vmul.f32 %v12226_v25, %v12226_v25 }
 0x60d   :  { %v5233_v46 = vmul.f32 %v12229_v14, %v12229_v14  ;;  %v5255_v4 = vmul.f32 %v5235_v41, %v12017_v49 }
 0x60e   :  { %v12250_v27 = vsub.f32 %v12139_v53, %v5205_v26  ;;  %v12253_v9 = vsub.f32 %v12145_v43, %v5205_v26  ;;  %v12256_v45 = vsub.f32 %v12142_v28, %v5205_v26  ;;  %v12259_v15 = vsub.f32 %v12148_v62, %v5205_v26 }
 0x60f   :  { %v5189_v18 = vpop.xlane.xlu0 %5188  ;;  %v5250_v13 = vmul.f32 %v5230_v38, %v12012_v12  ;;  %v5251_v35 = vmul.f32 %v5231_v16, %v12017_v49  ;;  %v5253_v1 = vmul.f32 %v5233_v46, %v12030_v31  ;;  %v5254_v28 = vmul.f32 %v5234_v39, %v12012_v12 }
 0x610   :  { %v5242_v53 = vmul.f32 %v12250_v27, %v12250_v27  ;;  %v5243_v43 = vmul.f32 %v12253_v9, %v12253_v9  ;;  %v5204_v24 = vmul.f32 0.005, %v5189_v18  ;;  %v5252_v44 = vmul.f32 %v5232_v47, %v12020_v10 }
 0x611   :  { %v5272_v62 = vadd.f32 %v5251_v35, %v5250_v13  ;;  %v5244_v2 = vmul.f32 %v12256_v45, %v12256_v45  ;;  %v5274_v57 = vsel %vm5167_vm9, %v5253_v1, 0.0  ;;  %v5245_v56 = vmul.f32 %v12259_v15, %v12259_v15 }
 0x612   :  { %v12274_v36 = vsub.f32 %v12136_v48, %v5204_v24  ;;  %v12277_v0 = vsub.f32 %v12131_v50, %v5204_v24  ;;  %v12280_v20 = vsub.f32 %v12169_v32, %v5204_v24  ;;  %v12283_v58 = vsub.f32 %v12173_v22, %v5204_v24 }
 0x613   :  { %v5171_v7 = vpop.xlane.xlu0 %5170  ;;  %v5273_v40 = vadd.f32 %v5272_v62, %v5252_v44  ;;  %v5262_v59 = vmul.f32 %v5242_v53, %v12012_v12  ;;  %v5263_v37 = vmul.f32 %v5243_v43, %v12017_v49  ;;  %v5264_v19 = vmul.f32 %v5244_v2, %v12020_v10 }
 0x614   :  { %v5238_v48 = vmul.f32 %v12274_v36, %v12274_v36  ;;  %v5239_v50 = vmul.f32 %v12277_v0, %v12277_v0  ;;  %v5201_v32 = vmul.f32 0.005, %v5171_v7  ;;  %v5240_v55 = vmul.f32 %v12280_v20, %v12280_v20 }
 0x615   :  { %v5275_v22 = vadd.f32 %v5274_v57, %v5273_v40  ;;  %v5241_v54 = vmul.f32 %v12283_v58, %v12283_v58  ;;  %v5290_v16 = vsel %vm5190_vm13, %v5262_v59, 0.0  ;;  %v5291_v47 = vsel %vm5190_vm13, %v5263_v37, 0.0 }
 0x616   :  { %v12300_v33 = vsub.f32 %v12156_v6, %v5201_v32  ;;  %v12303_v21 = vsub.f32 %v12122_v52, %v5201_v32  ;;  %v12306_v23 = vsub.f32 %v12185_v5, %v5201_v32  ;;  %v12309_v8 = vsub.f32 %v12190_v17, %v5201_v32 }
 0x617   :  { %5276 = vadd.xlane.f32.xlu0 %v5275_v22  ;;  %v5258_v63 = vmul.f32 %v5238_v48, %v12012_v12  ;;  %v5259_v39 = vmul.f32 %v5239_v50, %v12017_v49  ;;  %v5261_v38 = vmul.f32 %v5241_v54, %v12030_v31  ;;  %v5260_v26 = vmul.f32 %v5240_v55, %v12020_v10  ;;  %v5386_v55 = vld [vmem:[%s15041_s9 + $0x10] sm:$0xff]  ;;  %v5334_v54 = vld [vmem:[%s15040_s8] sm:$0xff] }
 0x618   :  { %v5226_v6 = vmul.f32 %v12300_v33, %v12300_v33  ;;  %v5227_v52 = vmul.f32 %v12303_v21, %v12303_v21  ;;  %v5228_v5 = vmul.f32 %v12306_v23, %v12306_v23  ;;  %v5229_v17 = vmul.f32 %v12309_v8, %v12309_v8 }
 0x619   :  { %v5284_v41 = vadd.f32 %v5259_v39, %v5258_v63  ;;  %v5236_v46 = vmul.f32 %v12238_v30, %v12238_v30  ;;  %v5237_v35 = vmul.f32 %v12247_v42, %v12247_v42  ;;  %v5278_v1 = vadd.f32 %v5255_v4, %v5254_v28  ;;  %v5384_v63 = vld [vmem:[%s15041_s9] sm:$0xff]  ;;  %v12359_v39 = vpop.permute.xlu1 %5361 }
 0x61a   :  { %v5246_v18 = vmul.f32 %v5226_v6, %v12012_v12  ;;  %v5247_v13 = vmul.f32 %v5227_v52, %v12017_v49  ;;  %v5249_v43 = vmul.f32 %v5229_v17, %v12030_v31  ;;  %v5265_v24 = vmul.f32 %v5245_v56, %v12030_v31 }
 0x61b   :  { %v5285_v53 = vadd.f32 %v5284_v41, %v5260_v26  ;;  %v5292_v44 = vadd.f32 %v5291_v47, %v5290_v16  ;;  %v5286_v62 = vsel %vm5167_vm9, %v5261_v38, 0.0  ;;  %v5248_v2 = vmul.f32 %v5228_v5, %v12020_v10  ;;  %v12361_v38 = vpop.permute.xlu0 %5411 }
 0x61c   :  { %v5266_v7 = vadd.f32 %v5247_v13, %v5246_v18  ;;  %v5293_v40 = vsel %vm5190_vm13, %v5264_v19, 0.0  ;;  %v5256_v59 = vmul.f32 %v5236_v46, %v12020_v10  ;;  %v5268_v28 = vsel %vm5167_vm9, %v5249_v43, 0.0  ;;  %v5387_v10 = vld [vmem:[%s15041_s9 + $0x18] sm:$0xff]  ;;  %v5385_v19 = vld [vmem:[%s15041_s9 + $0x8] sm:$0xff]  ;;  %s15198_s9 = smov 94  }
 0x61d   :  { %v5287_v12 = vadd.f32 %v5286_v62, %v5285_v53  ;;  %v5294_v57 = vadd.f32 %v5293_v40, %v5292_v44  ;;  %v5257_v4 = vmul.f32 %v5237_v35, %v12030_v31  ;;  %v5295_v56 = vsel %vm5196_vm5, %v5265_v24, 0.0  ;;  %v5335_v31 = vld [vmem:[%s15040_s8 + $0x8] sm:$0xff]  ;;  %v12363_v16 = vpop.permute.xlu1 %5351  ;;  %s15197_s8 = smov 96  }
 0x61e   :  { %v5267_v49 = vadd.f32 %v5266_v7, %v5248_v2  ;;  %v5279_v50 = vadd.f32 %v5278_v1, %v5256_v59 }
 0x61f   :  { %5288 = vadd.xlane.f32.xlu0 %v5287_v12  ;;  %v5296_v32 = vadd.f32 %v5295_v56, %v5294_v57  ;;  %v5280_v37 = vsel %vm5167_vm9, %v5257_v4, 0.0 }
 0x620   :  { %v5269_v48 = vadd.f32 %v5268_v28, %v5267_v49  ;;  %v5281_v22 = vadd.f32 %v5280_v37, %v5279_v50 }
 0x621   :  { %v12365_v52 = vpop.permute.xlu1 %5356 }
 0x622   :  { %5270 = vadd.xlane.f32.xlu1 %v5269_v48 }
 0x623   :  { %5297 = vadd.xlane.f32.xlu0 %v5296_v32 }
 0x626   :  { %5282 = vadd.xlane.f32.xlu1 %v5281_v22 }
 0x637   :  { %5406 = vperm.xlu1 %10118, %v5387_v10  }
 0x639   :  { %5401 = vperm.xlu0 %10117, %v5386_v55  }
 0x63b   :  { %5346 = vperm.xlu1 %10118, %v5335_v31  }
 0x63d   :  { %5341 = vperm.xlu0 %10117, %v5334_v54  }
 0x63f   :  { %5396 = vperm.xlu1 %10118, %v5385_v19  }
 0x641   :  { %5391 = vperm.xlu0 %10117, %v5384_v63  }
 0x6a0   :  { %v5277_v6 = vpop.xlane.xlu0 %5276 }
 0x6a1   :  { %v5300_v5 = vmul.f32 0.005, %v5277_v6 }
 0x6a3   :  { %v5305_v41 = vadd.f32 1e-05, %v5300_v5 }
 0x6a5   :  { %10440 = vrsqrt.f32 %v5305_v41 }
 0x6a8   :  { %v5289_v17 = vpop.xlane.xlu0 %5288 }
 0x6a9   :  { %v5302_v26 = vmul.f32 0.005, %v5289_v17 }
 0x6ab   :  { %v5271_v47 = vpop.xlane.xlu1 %5270  ;;  %v5307_v18 = vadd.f32 1e-05, %v5302_v26 }
 0x6ac   :  { %v5299_v46 = vmul.f32 0.005, %v5271_v47  ;;  %v5298_v53 = vpop.xlane.xlu0 %5297 }
 0x6ae   :  { %v5304_v13 = vadd.f32 1e-05, %v5299_v46 }
 0x6af   :  { %v5283_v35 = vpop.xlane.xlu1 %5282 }
 0x6b0   :  { %10442 = vrsqrt.f32 %v5304_v13  ;;  %v5301_v1 = vmul.f32 0.005, %v5283_v35 }
 0x6b1   :  { %10444 = vrsqrt.f32 %v5307_v18 }
 0x6b2   :  { %v5306_v43 = vadd.f32 1e-05, %v5301_v1  ;;  %v10441_v2 = vpop.eup %10440 }
 0x6b3   :  { %v12367_v24 = vpop.permute.xlu1 %5406  ;;  %v5319_v28 = vmul.f32 %v10441_v2, %v12223_v3  ;;  %v5320_v4 = vmul.f32 %v10441_v2, %v12226_v25 }
 0x6b4   :  { %10446 = vrsqrt.f32 %v5306_v43  ;;  %v12369_v44 = vpop.permute.xlu0 %5401 }
 0x6b7   :  { %v5347_v62 = vpop.permute.xlu1 %5346 }
 0x6b8   :  { %v5342_v7 = vpop.permute.xlu0 %5341  ;;  %v5369_v10 = vmul.f32 %v5347_v62, %v5319_v28  ;;  %v5370_v55 = vmul.f32 %v5347_v62, %v5320_v4 }
 0x6bb   :  { %v5397_v32 = vpop.permute.xlu1 %5396 }
 0x6bc   :  { %v5392_v31 = vpop.permute.xlu0 %5391  ;;  %v5419_v25 = vadd.f32 %v5397_v32, %v5369_v10  ;;  %v5420_v19 = vadd.f32 %v5397_v32, %v5370_v55 }
 0x6bd   :  { %v10443_v40 = vpop.eup %10442 }
 0x6be   :  { %v5315_v12 = vmul.f32 %v10443_v40, %v12303_v21  ;;  %v5316_v57 = vmul.f32 %v10443_v40, %v12306_v23  ;;  %v5317_v49 = vmul.f32 %v10443_v40, %v12309_v8  ;;  %v12374_v59 = vpop.eup %10444  ;;  %v5314_v48 = vmul.f32 %v10443_v40, %v12300_v33 }
 0x6bf   :  { %v5328_v23 = vmul.f32 %v12374_v59, %v12280_v20  ;;  %v5321_v8 = vmul.f32 %v10441_v2, %v12229_v14  ;;  %v5303_v33 = vmul.f32 0.005, %v5298_v53  ;;  %v5326_v20 = vmul.f32 %v12374_v59, %v12274_v36 }
 0x6c0   :  { %v5365_v56 = vmul.f32 %v5342_v7, %v5315_v12  ;;  %v5366_v50 = vmul.f32 %v5342_v7, %v5316_v57  ;;  %v5367_v22 = vmul.f32 %v5342_v7, %v5317_v49  ;;  %v5364_v6 = vmul.f32 %v5342_v7, %v5314_v48 }
 0x6c1   :  { %v10447_v37 = vpop.eup %10446  ;;  %v5371_v5 = vmul.f32 %v5347_v62, %v5321_v8  ;;  %v5318_v14 = vmul.f32 %v10441_v2, %v12220_v29  ;;  %v5378_v47 = vmul.f32 %v12365_v52, %v5328_v23  ;;  %v5439_v18 = vmax.f32 %v5419_v25, 0.0 }
 0x6c2   :  { %v5324_v21 = vmul.f32 %v10447_v37, %v12238_v30  ;;  %v5415_v3 = vadd.f32 %v5392_v31, %v5365_v56  ;;  %v5416_v54 = vadd.f32 %v5392_v31, %v5366_v50  ;;  %v5322_v63 = vmul.f32 %v10447_v37, %v12214_v34 }
 0x6c3   :  { %v5417_v26 = vadd.f32 %v5392_v31, %v5367_v22  ;;  %v5421_v46 = vadd.f32 %v5397_v32, %v5371_v5  ;;  %v5440_v13 = vmax.f32 %v5420_v19, 0.0  ;;  %v5308_v35 = vadd.f32 1e-05, %v5303_v33 }
 0x6c4   :  { %v5374_v17 = vmul.f32 %v12363_v16, %v5324_v21  ;;  %v5435_v41 = vmax.f32 %v5415_v3, 0.0  ;;  %v5436_v30 = vmax.f32 %v5416_v54, 0.0  ;;  %v5372_v34 = vmul.f32 %v12363_v16, %v5322_v63 }
 0x6c5   :  { %v5368_v1 = vmul.f32 %v5347_v62, %v5318_v14  ;;  %v5414_v53 = vadd.f32 %v5392_v31, %v5364_v6  ;;  %v5437_v7 = vmax.f32 %v5417_v26, 0.0  ;;  %v5376_v36 = vmul.f32 %v12365_v52, %v5326_v20 }
 0x6c6   :  { %v5424_v43 = vadd.f32 %v12369_v44, %v5374_v17  ;;  %v12391_v40 = vpack.c.bf16 %v5440_v13, %v5436_v30  ;;  %v12393_v12 = vpack.c.bf16 %v5439_v18, %v5435_v41  ;;  %v5428_v29 = vadd.f32 %v12367_v24, %v5378_v47 }
 0x6c7   :  { %v5418_v2 = vadd.f32 %v5397_v32, %v5368_v1  ;;  %v5441_v57 = vmax.f32 %v5421_v46, 0.0  ;;  %10448 = vrsqrt.f32 %v5308_v35  ;;  %v5323_v62 = vmul.f32 %v10447_v37, %v12217_v61 }
 0x6c8   :  { %5482 = vrot.lane.b32.xlu1 %v12391_v40, %s10481_s30  ;;  %5480 = vrot.lane.b32.xlu0 %v12393_v12, %s10481_s30  ;;  %v5422_v49 = vadd.f32 %v12369_v44, %v5372_v34  ;;  %v5444_v28 = vmax.f32 %v5424_v43, 0.0  ;;  %v5434_v4 = vmax.f32 %v5414_v53, 0.0  ;;  %v5327_v56 = vmul.f32 %v12374_v59, %v12277_v0 }
 0x6c9   :  { %v12403_v48 = vpack.c.bf16 %v5441_v57, %v5437_v7  ;;  %v5426_v50 = vadd.f32 %v12367_v24, %v5376_v36  ;;  %v5448_v32 = vmax.f32 %v5428_v29, 0.0  ;;  %v5438_v22 = vmax.f32 %v5418_v2, 0.0 }
 0x6ca   :  { %v5325_v61 = vmul.f32 %v10447_v37, %v12247_v42  ;;  %v5373_v10 = vmul.f32 %v12363_v16, %v5323_v62  ;;  %v5442_v55 = vmax.f32 %v5422_v49, 0.0  ;;  %v5329_v0 = vmul.f32 %v12374_v59, %v12283_v58 }
 0x6cb   :  { %v12414_v21 = vpack.c.bf16 %v5448_v32, %v5444_v28  ;;  %v12416_v23 = vpack.c.bf16 %v5438_v22, %v5434_v4  ;;  %v5377_v8 = vmul.f32 %v12365_v52, %v5327_v56  ;;  %v5446_v31 = vmax.f32 %v5426_v50, 0.0 }
 0x6cc   :  { %5539 = vrot.lane.b32.xlu1 %v12391_v40, %s10485_s6  ;;  %5484 = vrot.lane.b32.xlu0 %v12403_v48, %s10481_s30  ;;  %v5375_v42 = vmul.f32 %v12363_v16, %v5325_v61  ;;  %v5423_v37 = vadd.f32 %v12369_v44, %v5373_v10  ;;  %v5379_v54 = vmul.f32 %v12365_v52, %v5329_v0 }
 0x6cd   :  { %v12427_v3 = vpack.c.bf16 %v5446_v31, %v5442_v55  ;;  %v5427_v25 = vadd.f32 %v12367_v24, %v5377_v8 }
 0x6ce   :  { %v5425_v59 = vadd.f32 %v12369_v44, %v5375_v42  ;;  %v5443_v19 = vmax.f32 %v5423_v37, 0.0  ;;  %v5429_v16 = vadd.f32 %v12367_v24, %v5379_v54 }
 0x6cf   :  { %v5447_v33 = vmax.f32 %v5427_v25, 0.0 }
 0x6d0   :  { %5490 = vrot.lane.b32.xlu1 %v12414_v21, %s10481_s30  ;;  %5478 = vrot.lane.b32.xlu0 %v12416_v23, %s10481_s30  ;;  %v5445_v52 = vmax.f32 %v5425_v59, 0.0  ;;  %v5449_v5 = vmax.f32 %v5429_v16, 0.0 }
 0x6d1   :  { %v12441_v63 = vpack.c.bf16 %v5447_v33, %v5443_v19 }
 0x6d2   :  { %v12448_v24 = vpack.c.bf16 %v5449_v5, %v5445_v52 }
 0x6d4   :  { %5486 = vrot.lane.b32.xlu1 %v12427_v3, %s10481_s30  ;;  %5537 = vrot.lane.b32.xlu0 %v12393_v12, %s10485_s6  ;;  %v10449_v58 = vpop.eup %10448 }
 0x6d5   :  { %v5331_v6 = vmul.f32 %v10449_v58, %v12253_v9  ;;  %v5333_v17 = vmul.f32 %v10449_v58, %v12259_v15  ;;  %v5330_v26 = vmul.f32 %v10449_v58, %v12250_v27  ;;  %v5332_v20 = vmul.f32 %v10449_v58, %v12256_v45 }
 0x6d7   :  { %v5381_v44 = vmul.f32 %v12359_v39, %v5331_v6  ;;  %v5383_v41 = vmul.f32 %v12359_v39, %v5333_v17  ;;  %v5380_v30 = vmul.f32 %v12359_v39, %v5330_v26  ;;  %v5382_v47 = vmul.f32 %v12359_v39, %v5332_v20 }
 0x6d8   :  { %5547 = vrot.lane.b32.xlu1 %v12414_v21, %s10485_s6  ;;  %5541 = vrot.lane.b32.xlu0 %v12403_v48, %s10485_s6  ;;  %v15076_v17 = vmov 0.0  }
 0x6d9   :  { %v5431_v9 = vadd.f32 %v12361_v38, %v5381_v44  ;;  %v5433_v15 = vadd.f32 %v12361_v38, %v5383_v41  ;;  %v5430_v14 = vadd.f32 %v12361_v38, %v5380_v30  ;;  %v5432_v13 = vadd.f32 %v12361_v38, %v5382_v47  ;;  %9821 = vmatprep.subr.bf16.mxu1 %v15076_v17 }
 0x6da   :  { %9827 = vmatprep.mubr.msk.bf16.mxu1 %vm10506_vm2, %v15076_v17 }
 0x6db   :  { %v5451_v27 = vmax.f32 %v5431_v9, 0.0  ;;  %v5453_v46 = vmax.f32 %v5433_v15, 0.0  ;;  %v5450_v18 = vmax.f32 %v5430_v14, 0.0  ;;  %v5452_v34 = vmax.f32 %v5432_v13, 0.0 }
 0x6dc   :  { %5543 = vrot.lane.b32.xlu1 %v12427_v3, %s10485_s6  ;;  %5488 = vrot.lane.b32.xlu0 %v12441_v63, %s10481_s30 }
 0x6dd   :  { %v12472_v45 = vpack.c.bf16 %v5451_v27, %v5451_v27  ;;  %v12479_v35 = vpack.c.bf16 %v5453_v46, %v5453_v46  ;;  %v12481_v39 = vpack.c.bf16 %v5450_v18, %v5450_v18  ;;  %v12487_v1 = vpack.c.bf16 %v5452_v34, %v5452_v34 }
 0x6e0   :  { %5602 = vrot.lane.b32.xlu1 %v12441_v63, %s10486_s25  ;;  %5492 = vrot.lane.b32.xlu0 %v12448_v24, %s10481_s30 }
 0x6e4   :  { %5606 = vrot.lane.b32.xlu1 %v12448_v24, %s10486_s25  ;;  %5545 = vrot.lane.b32.xlu0 %v12441_v63, %s10485_s6 }
 0x6e8   :  { %5600 = vrot.lane.b32.xlu1 %v12427_v3, %s10486_s25  ;;  %5549 = vrot.lane.b32.xlu0 %v12448_v24, %s10485_s6 }
 0x6ec   :  { %5496 = vrot.lane.b32.xlu1 %v12472_v45, %s10481_s30  ;;  %5604 = vrot.lane.b32.xlu0 %v12414_v21, %s10486_s25 }
 0x6f0   :  { %5500 = vrot.lane.b32.xlu1 %v12479_v35, %s10481_s30  ;;  %5494 = vrot.lane.b32.xlu0 %v12481_v39, %s10481_s30 }
 0x6f4   :  { %5553 = vrot.lane.b32.xlu1 %v12472_v45, %s10485_s6  ;;  %5498 = vrot.lane.b32.xlu0 %v12487_v1, %s10481_s30  ;;  %s15199_s30 = smov 92  }
 0x6f8   :  { %5557 = vrot.lane.b32.xlu1 %v12479_v35, %s10485_s6  ;;  %5551 = vrot.lane.b32.xlu0 %v12481_v39, %s10485_s6 }
 0x6fc   :  { %5608 = vrot.lane.b32.xlu1 %v12481_v39, %s10486_s25  ;;  %5555 = vrot.lane.b32.xlu0 %v12487_v1, %s10485_s6 }
 0x700   :  { %5612 = vrot.lane.b32.xlu1 %v12487_v1, %s10486_s25  ;;  %5610 = vrot.lane.b32.xlu0 %v12472_v45, %s10486_s25 }
 0x704   :  { %5535 = vrot.lane.b32.xlu1 %v12416_v23, %s10485_s6  ;;  %5614 = vrot.lane.b32.xlu0 %v12479_v35, %s10486_s25  ;;  %s15201_s6 = smov 62  }
 0x708   :  { %5596 = vrot.lane.b32.xlu1 %v12391_v40, %s10486_s25  ;;  %5594 = vrot.lane.b32.xlu0 %v12393_v12, %s10486_s25 }
 0x70c   :  { %5592 = vrot.lane.b32.xlu1 %v12416_v23, %s10486_s25  ;;  %5598 = vrot.lane.b32.xlu0 %v12403_v48, %s10486_s25 }
 0x73a   :  { %v12517_v38 = vpop.permute.xlu1 %5482  ;;  %v12519_v53 = vpop.permute.xlu0 %5480 }
 0x73e   :  { %v12521_v43 = vpop.permute.xlu1 %5539  ;;  %v12523_v7 = vpop.permute.xlu0 %5484 }
 0x742   :  { %v5491_v36 = vpop.permute.xlu1 %5490  ;;  %v12525_v29 = vpop.permute.xlu0 %5478 }
 0x746   :  { %v5487_v2 = vpop.permute.xlu1 %5486  ;;  %v12527_v57 = vpop.permute.xlu0 %5537 }
 0x74a   :  { %v5548_v62 = vpop.permute.xlu1 %5547  ;;  %v12529_v49 = vpop.permute.xlu0 %5541 }
 0x74e   :  { %v5544_v28 = vpop.permute.xlu1 %5543  ;;  %v5489_v4 = vpop.permute.xlu0 %5488 }
 0x74f   :  { %v5506_v61 = vsel %vm109_vm3, %v5489_v4, %v5491_v36  ;;  %v5505_v20 = vsel %vm109_vm3, %v5487_v2, %v5489_v4 }
 0x750   :  { %v5528_v8 = vmax.bf16 %v5506_v61, %v12441_v63 }
 0x752   :  { %v5603_v56 = vpop.permute.xlu1 %5602  ;;  %v12531_v50 = vpop.permute.xlu0 %5492 }
 0x756   :  { %v12533_v32 = vpop.permute.xlu1 %5606  ;;  %v5546_v22 = vpop.permute.xlu0 %5545 }
 0x757   :  { %v5563_v0 = vsel %vm728_vm7, %v5546_v22, %v5548_v62  ;;  %v5562_v18 = vsel %vm728_vm7, %v5544_v28, %v5546_v22 }
 0x758   :  { %v5585_v31 = vmax.bf16 %v5563_v0, %v5528_v8  ;;  %v5507_v0 = vsel %vm109_vm3, %v5491_v36, %v12531_v50 }
 0x759   :  { %v5529_v36 = vmax.bf16 %v5507_v0, %v12414_v21 }
 0x75a   :  { %v5601_v10 = vpop.permute.xlu1 %5600  ;;  %v12536_v55 = vpop.permute.xlu0 %5549 }
 0x75b   :  { %v5619_v28 = vsel %vm857_vm8, %v5601_v10, %v5603_v56 }
 0x75e   :  { %v5497_v42 = vpop.permute.xlu1 %5496  ;;  %v5605_v37 = vpop.permute.xlu0 %5604 }
 0x75f   :  { %v5620_v54 = vsel %vm857_vm8, %v5603_v56, %v5605_v37 }
 0x760   :  { %v12541_v25 = vmax.bf16 %v5620_v54, %v5585_v31  ;;  %v5503_v54 = vsel %vm109_vm3, %v12519_v53, %v12517_v38 }
 0x762   :  { %v12543_v58 = vpop.permute.xlu1 %5500  ;;  %5708 = vrot.lane.b32.xlu1 %v12541_v25, %s10482_s1  ;;  %v5495_v59 = vpop.permute.xlu0 %5494 }
 0x763   :  { %v5508_v63 = vsel %vm109_vm3, %v5495_v59, %v5497_v42  ;;  %v5621_v59 = vsel %vm857_vm8, %v5605_v37, %v12533_v32 }
 0x764   :  { %v5531_v41 = vmax.bf16 %v5508_v63, %v12481_v39  ;;  %v5524_v63 = vmax.bf16 %v5503_v54, %v12393_v12  ;;  %v10388_v54 = vld [vmem:[%s15042_s11 + $0x2c] sm:$0xff]  }
 0x766   :  { %v5554_v19 = vpop.permute.xlu1 %5553  ;;  %v5499_v16 = vpop.permute.xlu0 %5498 }
 0x767   :  { %v5509_v6 = vsel %vm109_vm3, %v5497_v42, %v5499_v16  ;;  %v5510_v27 = vsel %vm109_vm3, %v5499_v16, %v12543_v58 }
 0x768   :  { %v5532_v30 = vmax.bf16 %v5509_v6, %v12472_v45  ;;  %v5527_v45 = vmax.bf16 %v5505_v20, %v12427_v3  ;;  %v5533_v2 = vmax.bf16 %v5510_v27, %v12487_v1  ;;  %v5564_v1 = vsel %vm728_vm7, %v5548_v62, %v12536_v55 }
 0x769   :  { %v5504_v62 = vsel %vm109_vm3, %v12517_v38, %v12523_v7  ;;  %v5586_v21 = vmax.bf16 %v5564_v1, %v5529_v36  ;;  %v5561_v38 = vsel %vm728_vm7, %v12521_v43, %v12529_v49 }
 0x76a   :  { %v12547_v33 = vpop.permute.xlu1 %5557  ;;  %v5552_v52 = vpop.permute.xlu0 %5551  ;;  %v5584_v22 = vmax.bf16 %v5562_v18, %v5527_v45  ;;  %v5525_v37 = vmax.bf16 %v5504_v62, %v12391_v40 }
 0x76b   :  { %v5565_v26 = vsel %vm728_vm7, %v5552_v52, %v5554_v19  ;;  %v5560_v52 = vsel %vm728_vm7, %v12527_v57, %v12521_v43  ;;  %v12610_v6 = vmax.bf16 %v5621_v59, %v5586_v21  ;;  %v15203_v59 = vmov 0  }
 0x76c   :  { %v5588_v15 = vmax.bf16 %v5565_v26, %v5531_v41  ;;  %v12584_v56 = vmax.bf16 %v5619_v28, %v5584_v22  ;;  %v5581_v26 = vmax.bf16 %v5560_v52, %v5524_v63  ;;  %v8013_v52 = vld [vmem:[%s15043_s12 + $0x30] sm:$0xff] }
 0x76e   :  { %v5609_v5 = vpop.permute.xlu1 %5608  ;;  %v5556_v44 = vpop.permute.xlu0 %5555 }
 0x76f   :  { %v5566_v9 = vsel %vm728_vm7, %v5554_v19, %v5556_v44  ;;  %v5567_v13 = vsel %vm728_vm7, %v5556_v44, %v12547_v33 }
 0x770   :  { %v5589_v14 = vmax.bf16 %v5566_v9, %v5532_v30  ;;  %v5590_v8 = vmax.bf16 %v5567_v13, %v5533_v2  ;;  %v5582_v9 = vmax.bf16 %v5561_v38, %v5525_v37  ;;  %v8014_v38 = vld [vmem:[%s15043_s12 + $0x38] sm:$0xff] }
 0x772   :  { %v5613_v47 = vpop.permute.xlu1 %5612  ;;  %v5611_v46 = vpop.permute.xlu0 %5610 }
 0x773   :  { %v5622_v34 = vsel %vm857_vm8, %v5609_v5, %v5611_v46  ;;  %v5623_v39 = vsel %vm857_vm8, %v5611_v46, %v5613_v47  ;;  %v5502_v5 = vsel %vm109_vm3, %v12525_v29, %v12519_v53  ;;  %vm5730_vm3 = vcmask 293888  }
 0x774   :  { %v12566_v4 = vmax.bf16 %v5622_v34, %v5588_v15  ;;  %v12568_v61 = vmax.bf16 %v5623_v39, %v5589_v14  ;;  %v5523_v43 = vmax.bf16 %v5502_v5, %v12416_v23  ;;  %v5534_v23 = vmax.bf16 %v12543_v58, %v12479_v35  ;;  %v8012_v5 = vld [vmem:[%s15043_s12 + $0x28] sm:$0xff] }
 0x775   :  { %v5530_v35 = vmax.bf16 %v12531_v50, %v12448_v24 }
 0x776   :  { %v5536_v31 = vpop.permute.xlu1 %5535  ;;  %5714 = vrot.lane.b32.xlu1 %v12568_v61, %s10482_s1  ;;  %5712 = vrot.lane.b32.xlu0 %v12566_v4, %s10482_s1  ;;  %v12577_v3 = vpop.permute.xlu0 %5614  ;;  %v5947_v36 = vsel %vm118_vm1, %v12566_v4, 0 }
 0x777   :  { %v5624_v42 = vsel %vm857_vm8, %v5613_v47, %v12577_v3  ;;  %v5559_v12 = vsel %vm728_vm7, %v5536_v31, %v12527_v57  ;;  %v5591_v57 = vmax.bf16 %v12547_v33, %v5534_v23  ;;  %v5587_v58 = vmax.bf16 %v12536_v55, %v5530_v35 }
 0x778   :  { %v12586_v10 = vmax.bf16 %v5624_v42, %v5590_v8  ;;  %v5580_v27 = vmax.bf16 %v5559_v12, %v5523_v43  ;;  %v5526_v33 = vmax.bf16 %v12523_v7, %v12403_v48  ;;  %v10387_v8 = vld [vmem:[%s15042_s11 + $0x24] sm:$0xff]   ;;  %vm8919_vm7 = vcmask 7168  }
 0x779   :  { %v12716_v14 = vmax.bf16 %v12577_v3, %v5591_v57  ;;  %v12740_v47 = vmax.bf16 %v12533_v32, %v5587_v58  ;;  %v8007_v43 = vld [vmem:[%s15043_s12] sm:$0xff] }
 0x77a   :  { %v5597_v19 = vpop.permute.xlu1 %5596  ;;  %5706 = vrot.lane.b32.xlu1 %v12584_v56, %s10482_s1  ;;  %5716 = vrot.lane.b32.xlu0 %v12586_v10, %s10482_s1  ;;  %v5595_v16 = vpop.permute.xlu0 %5594  ;;  %v5583_v24 = vmax.bf16 %v12529_v49, %v5526_v33  ;;  %v5953_v1 = vsel %vm118_vm1, %v12586_v10, 0 }
 0x77b   :  { %v5617_v44 = vsel %vm857_vm8, %v5595_v16, %v5597_v19 }
 0x77c   :  { %v12625_v20 = vmax.bf16 %v5617_v44, %v5581_v26  ;;  %v10392_v44 = vld [vmem:[%s15042_s11] sm:$0xff]   ;;  %v8009_v26 = vld [vmem:[%s15043_s12 + $0x10] sm:$0xff] }
 0x77e   :  { %v5593_v41 = vpop.permute.xlu1 %5592  ;;  %5710 = vrot.lane.b32.xlu0 %v12610_v6, %s10482_s1  ;;  %v12618_v30 = vpop.permute.xlu0 %5598 }
 0x77f   :  { %v5618_v40 = vsel %vm857_vm8, %v5597_v19, %v12618_v30  ;;  %v5616_v29 = vsel %vm857_vm8, %v5593_v41, %v5595_v16  ;;  %v12748_v50 = vmax.bf16 %v12618_v30, %v5583_v24  ;;  %v10391_v16 = vld [vmem:[%s15042_s11 + $0x44] ss:$0 sps:$4 sm:$0xff]   ;;  %v8010_v30 = vld [vmem:[%s15043_s12 + $0x18] sm:$0xff]  ;;  %vm9051_vm8 = vcmask 15360  }
 0x780   :  { %v12627_v53 = vmax.bf16 %v5618_v40, %v5582_v9  ;;  %v12634_v15 = vmax.bf16 %v5616_v29, %v5580_v27 }
 0x782   :  { %5702 = vrot.lane.b32.xlu0 %v12625_v20, %s10482_s1  ;;  %5704 = vrot.lane.b32.xlu1 %v12627_v53, %s10482_s1 }
 0x786   :  { %5700 = vrot.lane.b32.xlu0 %v12634_v15, %s10482_s1  ;;  %6153 = vrot.lane.b32.xlu1 %v12566_v4, %s10484_s24 }
 0x78a   :  { %6149 = vrot.lane.b32.xlu0 %v12541_v25, %s10484_s24  ;;  %6157 = vrot.lane.b32.xlu1 %v12586_v10, %s10484_s24 }
 0x78e   :  { %6155 = vrot.lane.b32.xlu0 %v12568_v61, %s10484_s24  ;;  %6151 = vrot.lane.b32.xlu1 %v12610_v6, %s10484_s24 }
 0x792   :  { %6147 = vrot.lane.b32.xlu0 %v12584_v56, %s10484_s24  ;;  %6143 = vrot.lane.b32.xlu1 %v12625_v20, %s10484_s24 }
 0x796   :  { %6145 = vrot.lane.b32.xlu0 %v12627_v53, %s10484_s24  ;;  %6141 = vrot.lane.b32.xlu1 %v12634_v15, %s10484_s24  ;;  %s15200_s24 = smov 64  }
 0x79a   :  { %6420 = vrot.lane.b32.xlu0 %v12566_v4, %s15197_s8  ;;  %6416 = vrot.lane.b32.xlu1 %v12541_v25, %s15197_s8 }
 0x79e   :  { %6424 = vrot.lane.b32.xlu0 %v12586_v10, %s15197_s8  ;;  %6422 = vrot.lane.b32.xlu1 %v12568_v61, %s15197_s8 }
 0x7a2   :  { %6418 = vrot.lane.b32.xlu0 %v12610_v6, %s15197_s8  ;;  %6414 = vrot.lane.b32.xlu1 %v12584_v56, %s15197_s8 }
 0x7a6   :  { %6410 = vrot.lane.b32.xlu0 %v12625_v20, %s15197_s8  ;;  %6412 = vrot.lane.b32.xlu1 %v12627_v53, %s15197_s8 }
 0x7aa   :  { %6408 = vrot.lane.b32.xlu0 %v12634_v15, %s15197_s8  ;;  %6687 = vrot.lane.b32.xlu1 %v12566_v4, %s15198_s9 }
 0x7ae   :  { %6683 = vrot.lane.b32.xlu0 %v12541_v25, %s15198_s9  ;;  %6691 = vrot.lane.b32.xlu1 %v12586_v10, %s15198_s9 }
 0x7b2   :  { %6689 = vrot.lane.b32.xlu0 %v12568_v61, %s15198_s9  ;;  %6685 = vrot.lane.b32.xlu1 %v12610_v6, %s15198_s9 }
 0x7b6   :  { %6681 = vrot.lane.b32.xlu0 %v12584_v56, %s15198_s9  ;;  %6677 = vrot.lane.b32.xlu1 %v12625_v20, %s15198_s9 }
 0x7ba   :  { %6679 = vrot.lane.b32.xlu0 %v12627_v53, %s15198_s9  ;;  %6675 = vrot.lane.b32.xlu1 %v12634_v15, %s15198_s9 }
 0x7be   :  { %6954 = vrot.lane.b32.xlu0 %v12566_v4, %s15199_s30  ;;  %6950 = vrot.lane.b32.xlu1 %v12541_v25, %s15199_s30 }
 0x7c2   :  { %6958 = vrot.lane.b32.xlu0 %v12586_v10, %s15199_s30  ;;  %6956 = vrot.lane.b32.xlu1 %v12568_v61, %s15199_s30 }
 0x7c6   :  { %6952 = vrot.lane.b32.xlu0 %v12610_v6, %s15199_s30  ;;  %6948 = vrot.lane.b32.xlu1 %v12584_v56, %s15199_s30 }
 0x7ca   :  { %6944 = vrot.lane.b32.xlu0 %v12625_v20, %s15199_s30  ;;  %6946 = vrot.lane.b32.xlu1 %v12627_v53, %s15199_s30 }
 0x7ce   :  { %6942 = vrot.lane.b32.xlu0 %v12634_v15, %s15199_s30  ;;  %7222 = vrot.lane.b32.xlu1 %v12541_v25, %s15200_s24 }
 0x7d2   :  { %7234 = vrot.lane.b32.xlu0 %v12716_v14, %s15200_s24  ;;  %7228 = vrot.lane.b32.xlu1 %v12566_v4, %s15200_s24 }
 0x7d4   :  { %v5709_v55 = vpop.permute.xlu1 %5708 }
 0x7d6   :  { %7224 = vrot.lane.b32.xlu0 %v12610_v6, %s15200_s24  ;;  %7232 = vrot.lane.b32.xlu1 %v12586_v10, %s15200_s24 }
 0x7da   :  { %7230 = vrot.lane.b32.xlu0 %v12568_v61, %s15200_s24  ;;  %7220 = vrot.lane.b32.xlu1 %v12584_v56, %s15200_s24 }
 0x7de   :  { %7214 = vrot.lane.b32.xlu0 %v12625_v20, %s15200_s24  ;;  %7216 = vrot.lane.b32.xlu1 %v12627_v53, %s15200_s24 }
 0x7e2   :  { %7226 = vrot.lane.b32.xlu0 %v12740_v47, %s15200_s24  ;;  %7212 = vrot.lane.b32.xlu1 %v12634_v15, %s15200_s24 }
 0x7e6   :  { %7218 = vrot.lane.b32.xlu0 %v12748_v50, %s15200_s24  ;;  %7498 = vrot.lane.b32.xlu1 %v12541_v25, %s15201_s6 }
 0x7e8   :  { %v5713_v48 = vpop.permute.xlu0 %5712  ;;  %v5715_v7 = vpop.permute.xlu1 %5714 }
 0x7e9   :  { %v5722_v49 = vsel %vm341_vm4, %v5713_v48, %v5715_v7  ;;  %v10396_v48 = vld [vmem:[%s15042_s11 + $0x20] ss:$0 sps:$4 sm:$0xff]  }
 0x7ea   :  { %7510 = vrot.lane.b32.xlu0 %v12716_v14, %s15201_s6  ;;  %7504 = vrot.lane.b32.xlu1 %v12566_v4, %s15201_s6  ;;  %v5747_v13 = vsel %vm118_vm1, %v5722_v49, 0 }
 0x7ec   :  { %v5717_v32 = vpop.permute.xlu0 %5716  ;;  %v5707_v34 = vpop.permute.xlu1 %5706 }
 0x7ed   :  { %v5723_v46 = vsel %vm341_vm4, %v5715_v7, %v5717_v32  ;;  %v5753_v18 = vsel %vm118_vm1, %v5717_v32, 0  ;;  %v5720_v2 = vsel %vm341_vm4, %v5707_v34, %v5709_v55  ;;  %v10397_v32 = vld [vmem:[%s15042_s11 + $0x48] sm:$0xff]  }
 0x7ee   :  { %7500 = vrot.lane.b32.xlu0 %v12610_v6, %s15201_s6  ;;  %7508 = vrot.lane.b32.xlu1 %v12586_v10, %s15201_s6 }
 0x7ef   :  { %9527 = vmatprep.subr.msk.bf16.mxu0 %vm118_vm1, %v5723_v46  ;;  %9822 = vmatpush3.bf16.msra.mxu1 %v5753_v18 }
 0x7f0   :  { %5766 = vmatpush1.bf16.msra.mxu0 %v5747_v13  ;;  %v5711_v39 = vpop.permute.xlu0 %5710  ;;  %9823 = vmatprep.subr.bf16.mxu1 %v15076_v17 }
 0x7f1   :  { %v5721_v45 = vsel %vm341_vm4, %v5709_v55, %v5711_v39 }
 0x7f2   :  { %7506 = vrot.lane.b32.xlu0 %v12568_v61, %s15201_s6  ;;  %7496 = vrot.lane.b32.xlu1 %v12584_v56, %s15201_s6 }
 0x7f3   :  { %5767 = vmatprep.subr.bf16.mxu0 %v5721_v45  ;;  %9824 = vmatpush3.bf16.msra.mxu1 %v5711_v39 }
 0x7f4   :  { %5768 = vmatpush1.bf16.msra.mxu0 %v5720_v2  ;;  %v5705_v0 = vpop.permute.xlu1 %5704  ;;  %v5703_v28 = vpop.permute.xlu0 %5702  ;;  %9825 = vmatprep.subr.bf16.mxu1 %v15076_v17  ;;  %v10398_v2 = vld [vmem:[%s15042_s11 + $0x50] sm:$0xff]  }
 0x7f5   :  { %v5719_v22 = vsel %vm341_vm4, %v5703_v28, %v5705_v0 }
 0x7f6   :  { %7490 = vrot.lane.b32.xlu0 %v12625_v20, %s15201_s6  ;;  %7492 = vrot.lane.b32.xlu1 %v12627_v53, %s15201_s6 }
 0x7f7   :  { %5769 = vmatprep.subr.bf16.mxu0 %v5719_v22  ;;  %9826 = vmatpush3.bf16.msra.mxu1 %v5705_v0 }
 0x7f8   :  { %v5701_v31 = vpop.permute.xlu0 %5700  ;;  %9847 = vmatprep.subr.bf16.mxu1 %v15076_v17  ;;  %v12809_v62 = vpop.permute.xlu1 %6153 }
 0x7f9   :  { %v5718_v3 = vsel %vm341_vm4, %v5701_v31, %v5703_v28 }
 0x7fa   :  { %9828 = vmatmul.mubr.msk.bf16.vlgmr.msra.gmra.mxu1 %vm5730_vm3, %v10387_v8  ;;  %7502 = vrot.lane.b32.xlu0 %v12740_v47, %s15201_s6 }
 0x7fb   :  { %7488 = vrot.lane.b32.xlu1 %v12634_v15, %s15201_s6  ;;  %5770 = vmatpush1.bf16.msra.mxu0 %v5718_v3 }
 0x7fc   :  { %9848 = vmatpush3.bf16.msra.mxu1 %v5953_v1  ;;  %9543 = vmatprep.subr.msk.bf16.mxu0 %vm118_vm1, %v12568_v61  ;;  %v12797_v42 = vpop.permute.xlu0 %6149 }
 0x7fd   :  { %9849 = vmatprep.subr.bf16.mxu1 %v15076_v17  ;;  %9831 = vmatprep.mubr.msk.bf16.mxu1 %vm10506_vm2, %v15076_v17 }
 0x7fe   :  { %9528 = vmatmul.mubr.msk.bf16.vlgmr.msra.gmra.mxu0 %vm5730_vm3, %v10387_v8  ;;  %7494 = vrot.lane.b32.xlu0 %v12748_v50, %s15201_s6 }
 0x7ff   :  { %7774 = vrot.lane.b32.xlu1 %v12541_v25, %s15202_s29  ;;  %5966 = vmatpush1.bf16.msra.mxu0 %v5947_v36 }
 0x800   :  { %9850 = vmatpush3.bf16.msra.mxu1 %v12610_v6  ;;  %5967 = vmatprep.subr.bf16.mxu0 %v12541_v25  ;;  %v6156_v21 = vpop.permute.xlu0 %6155  ;;  %v6158_v25 = vpop.permute.xlu1 %6157 }
 0x801   :  { %9851 = vmatprep.subr.bf16.mxu1 %v15076_v17  ;;  %5797 = vmatprep.mubr.bf16.mxu0 %v15203_v59  ;;  %v6164_v19 = vsel %vm599_vm6, %v6156_v21, %v6158_v25  ;;  %v6193_v12 = vsel %vm118_vm1, %v6158_v25, 0  ;;  %v6163_v40 = vsel %vm599_vm6, %v12809_v62, %v6156_v21  ;;  %v10401_v21 = vld [vmem:[%s15042_s11 + $0x68] ss:$0 sps:$4 sm:$0xff]  }
 0x802   :  { %9832 = vmatmul.mubr.msk.bf16.gmra.mxu1 %vm5730_vm3, %v10388_v54  ;;  %7786 = vrot.lane.b32.xlu0 %v12716_v14, %s15202_s29  ;;  %v6187_v27 = vsel %vm118_vm1, %v6163_v40, 0 }
 0x803   :  { %7780 = vrot.lane.b32.xlu1 %v12566_v4, %s15202_s29  ;;  %5968 = vmatpush1.bf16.msra.mxu0 %v12584_v56  ;;  %v10389_v4 = vld [vmem:[%s15042_s11 + $0x34] sm:$0xff]  }
 0x804   :  { %9852 = vmatpush3.bf16.msra.mxu1 %v12627_v53  ;;  %5969 = vmatprep.subr.bf16.mxu0 %v12625_v20  ;;  %v6148_v37 = vpop.permute.xlu0 %6147 }
 0x805   :  { %9835 = vmatprep.mubr.msk.bf16.mxu1 %vm10506_vm2, %v15076_v17  ;;  %9873 = vmatprep.subr.bf16.mxu1 %v15076_v17  ;;  %v6161_v57 = vsel %vm599_vm6, %v6148_v37, %v12797_v42  ;;  %v10403_v37 = vld [vmem:[%s15042_s11 + $0x74] sm:$0xff]  }
 0x806   :  { %9529 = vmatmul.mubr.msk.bf16.gmra.mxu0 %vm5730_vm3, %v10388_v54  ;;  %7776 = vrot.lane.b32.xlu0 %v12610_v6, %s15202_s29  ;;  %v8011_v6 = vld [vmem:[%s15043_s12 + $0x20] sm:$0xff] }
 0x807   :  { %7784 = vrot.lane.b32.xlu1 %v12586_v10, %s15202_s29  ;;  %5970 = vmatpush1.bf16.msra.mxu0 %v12634_v15  ;;  %v10390_v10 = vld [vmem:[%s15042_s11 + $0x3c] sm:$0xff]  }
 0x808   :  { %9568 = vmatprep.subr.msk.bf16.mxu0 %vm118_vm1, %v6164_v19  ;;  %5807 = vmatprep.mubr.bf16.mxu0 %v15203_v59  ;;  %v6146_v41 = vpop.permute.xlu0 %6145  ;;  %v10400_v54 = vld [vmem:[%s15042_s11 + $0x60] sm:$0xff]   ;;  %v10402_v19 = vld [vmem:[%s15042_s11 + $0x6c] sm:$0xff]  }
 0x80a   :  { %9836 = vmatmul.mubr.msk.bf16.gmra.mxu1 %vm5730_vm3, %v10389_v4  ;;  %7782 = vrot.lane.b32.xlu0 %v12568_v61, %s15202_s29  ;;  %v6152_v61 = vpop.permute.xlu1 %6151 }
 0x80b   :  { %7772 = vrot.lane.b32.xlu1 %v12584_v56, %s15202_s29  ;;  %9839 = vmatprep.mubr.msk.bf16.mxu1 %vm10506_vm2, %v15076_v17  ;;  %v8015_v56 = vld [vmem:[%s15043_s12 + $0x40] sm:$0xff]  ;;  %v6162_v23 = vsel %vm599_vm6, %v12797_v42, %v6152_v61  ;;  %v10399_v42 = vld [vmem:[%s15042_s11 + $0x58] sm:$0xff]  }
 0x80c   :  { %v6421_v29 = vpop.permute.xlu0 %6420 }
 0x80e   :  { %9530 = vmatmul.mubr.msk.bf16.gmra.mxu0 %vm5730_vm3, %v10389_v4  ;;  %7766 = vrot.lane.b32.xlu0 %v12625_v20, %s15202_s29  ;;  %v6144_v63 = vpop.permute.xlu1 %6143  ;;  %v8008_v20 = vld [vmem:[%s15043_s12 + $0x8] sm:$0xff] }
 0x80f   :  { %7768 = vrot.lane.b32.xlu1 %v12627_v53, %s15202_s29  ;;  %5817 = vmatprep.mubr.bf16.mxu0 %v15203_v59  ;;  %v6160_v14 = vsel %vm599_vm6, %v6144_v63, %v6146_v41 }
 0x810   :  { %v6425_v58 = vpop.permute.xlu0 %6424 }
 0x811   :  { %v6460_v13 = vsel %vm118_vm1, %v6425_v58, 0 }
 0x812   :  { %9840 = vmatmul.mubr.msk.bf16.gmra.mxu1 %vm5730_vm3, %v10390_v10  ;;  %7778 = vrot.lane.b32.xlu0 %v12740_v47, %s15202_s29  ;;  %v6142_v9 = vpop.permute.xlu1 %6141  ;;  %v10394_v47 = vld [vmem:[%s15042_s11 + $0x10] sm:$0xff]  }
 0x813   :  { %7764 = vrot.lane.b32.xlu1 %v12634_v15, %s15202_s29  ;;  %9843 = vmatprep.mubr.msk.bf16.mxu1 %vm10506_vm2, %v15076_v17  ;;  %v10393_v15 = vld [vmem:[%s15042_s11 + $0x8] sm:$0xff]   ;;  %v6159_v33 = vsel %vm599_vm6, %v6142_v9, %v6144_v63  ;;  %vm8133_vm6 = vcmask 564224  }
 0x814   :  { %v6419_v55 = vpop.permute.xlu0 %6418 }
 0x816   :  { %9531 = vmatmul.mubr.msk.bf16.gmra.mxu0 %vm5730_vm3, %v10390_v10  ;;  %7770 = vrot.lane.b32.xlu0 %v12748_v50, %s15202_s29  ;;  %v12910_v53 = vpop.permute.xlu1 %6416  ;;  %v10395_v50 = vld [vmem:[%s15042_s11 + $0x18] sm:$0xff]  }
 0x817   :  { %8058 = vperm.xlu1 %10118, %v8015_v56   ;;  %5827 = vmatprep.mubr.bf16.mxu0 %v15203_v59  ;;  %v6429_v0 = vsel %vm1373_vm12, %v12910_v53, %v6419_v55 }
 0x818   :  { %v6411_v7 = vpop.permute.xlu0 %6410 }
 0x81a   :  { %9844 = vmatmul.mubr.msk.bf16.gmra.mxu1 %vm5730_vm3, %v10391_v16  ;;  %8048 = vperm.xlu0 %10117, %v8013_v52   ;;  %v6423_v35 = vpop.permute.xlu1 %6422 }
 0x81b   :  { %8053 = vperm.xlu1 %10118, %v8014_v38   ;;  %9853 = vmatprep.mubr.msk.bf16.mxu1 %vm10506_vm2, %v15076_v17  ;;  %v6431_v24 = vsel %vm1373_vm12, %v6423_v35, %v6425_v58  ;;  %v6430_v34 = vsel %vm1373_vm12, %v6421_v29, %v6423_v35  ;;  %v10406_v29 = vld [vmem:[%s15042_s11 + $0x8c] ss:$0 sps:$4 sm:$0xff]  }
 0x81c   :  { %v6409_v46 = vpop.permute.xlu0 %6408  ;;  %v6454_v45 = vsel %vm118_vm1, %v6430_v34, 0 }
 0x81d   :  { %v6426_v3 = vsel %vm1373_vm12, %v6409_v46, %v6411_v7 }
 0x81e   :  { %9532 = vmatmul.mubr.msk.bf16.gmra.mxu0 %vm5730_vm3, %v10391_v16  ;;  %8038 = vperm.xlu0 %10117, %v8011_v6   ;;  %v6415_v49 = vpop.permute.xlu1 %6414 }
 0x81f   :  { %8043 = vperm.xlu1 %10118, %v8012_v5   ;;  %5987 = vmatprep.mubr.bf16.mxu0 %v15203_v59  ;;  %v6428_v22 = vsel %vm1373_vm12, %v6415_v49, %v12910_v53 }
 0x820   :  { %v12966_v39 = vpop.permute.xlu0 %6683 }
 0x822   :  { %9854 = vmatmul.mubr.msk.bf16.vlgmr.msra.gmra.mxu1 %vm5730_vm3, %v10392_v44  ;;  %8028 = vperm.xlu0 %10117, %v8009_v26   ;;  %v6413_v18 = vpop.permute.xlu1 %6412 }
 0x823   :  { %9874 = vmatpush3.bf16.msra.mxu1 %v6193_v12  ;;  %8033 = vperm.xlu1 %10118, %v8010_v30   ;;  %v6427_v8 = vsel %vm1373_vm12, %v6411_v7, %v6413_v18  ;;  %v10404_v30 = vld [vmem:[%s15042_s11 + $0x7c] sm:$0xff]  }
 0x824   :  { %9875 = vmatprep.subr.bf16.mxu1 %v15076_v17  ;;  %9857 = vmatprep.mubr.msk.bf16.mxu1 %vm10506_vm2, %v15076_v17  ;;  %v6690_v31 = vpop.permute.xlu0 %6689 }
 0x826   :  { %9544 = vmatmul.mubr.msk.bf16.vlgmr.msra.gmra.mxu0 %vm5730_vm3, %v10392_v44  ;;  %8018 = vperm.xlu0 %10117, %v8007_v43   ;;  %v6688_v28 = vpop.permute.xlu1 %6687  ;;  %v10405_v43 = vld [vmem:[%s15042_s11 + $0x84] sm:$0xff]  }
 0x827   :  { %6206 = vmatpush1.bf16.msra.mxu0 %v6187_v27  ;;  %9876 = vmatpush3.bf16.msra.mxu1 %v6152_v61  ;;  %v6697_v16 = vsel %vm1631_vm14, %v6688_v28, %v6690_v31  ;;  %v10411_v28 = vld [vmem:[%s15042_s11 + $0xb0] ss:$0 sps:$4 sm:$0xff]  }
 0x828   :  { %8023 = vperm.xlu1 %10118, %v8008_v20   ;;  %6207 = vmatprep.subr.bf16.mxu0 %v6162_v23  ;;  %v6682_v4 = vpop.permute.xlu0 %6681  ;;  %v6721_v63 = vsel %vm118_vm1, %v6697_v16, 0  ;;  %v10407_v23 = vld [vmem:[%s15042_s11 + $0x90] sm:$0xff]  }
 0x829   :  { %9877 = vmatprep.subr.bf16.mxu1 %v15076_v17  ;;  %5997 = vmatprep.mubr.bf16.mxu0 %v15203_v59  ;;  %v6695_v5 = vsel %vm1631_vm14, %v6682_v4, %v12966_v39 }
 0x82a   :  { %9858 = vmatmul.mubr.msk.bf16.gmra.mxu1 %vm5730_vm3, %v10393_v15  ;;  %v6692_v1 = vpop.permute.xlu1 %6691 }
 0x82b   :  { %6208 = vmatpush1.bf16.msra.mxu0 %v6161_v57  ;;  %9878 = vmatpush3.bf16.msra.mxu1 %v6146_v41  ;;  %v6698_v36 = vsel %vm1631_vm14, %v6690_v31, %v6692_v1  ;;  %v6727_v56 = vsel %vm118_vm1, %v6692_v1, 0 }
 0x82c   :  { %6209 = vmatprep.subr.bf16.mxu0 %v6160_v14  ;;  %9861 = vmatprep.mubr.msk.bf16.mxu1 %vm10506_vm2, %v15076_v17  ;;  %v6680_v61 = vpop.permute.xlu0 %6679 }
 0x82d   :  { %9899 = vmatprep.subr.bf16.mxu1 %v15076_v17 }
 0x82e   :  { %9545 = vmatmul.mubr.msk.bf16.gmra.mxu0 %vm5730_vm3, %v10393_v15  ;;  %v6686_v62 = vpop.permute.xlu1 %6685 }
 0x82f   :  { %6210 = vmatpush1.bf16.msra.mxu0 %v6159_v33  ;;  %6007 = vmatprep.mubr.bf16.mxu0 %v15203_v59  ;;  %v6696_v6 = vsel %vm1631_vm14, %v12966_v39, %v6686_v62  ;;  %v10410_v39 = vld [vmem:[%s15042_s11 + $0xa8] sm:$0xff]  }
 0x830   :  { %9593 = vmatprep.subr.msk.bf16.mxu0 %vm118_vm1, %v6431_v24  ;;  %v6955_v38 = vpop.permute.xlu0 %6954  ;;  %v10408_v24 = vld [vmem:[%s15042_s11 + $0x98] sm:$0xff]  }
 0x832   :  { %9862 = vmatmul.mubr.msk.bf16.gmra.mxu1 %vm5730_vm3, %v10394_v47  ;;  %v6678_v25 = vpop.permute.xlu1 %6677 }
 0x833   :  { %9865 = vmatprep.mubr.msk.bf16.mxu1 %vm10506_vm2, %v15076_v17  ;;  %v6694_v44 = vsel %vm1631_vm14, %v6678_v25, %v6680_v61 }
 0x834   :  { %v6959_v9 = vpop.permute.xlu0 %6958 }
 0x835   :  { %v6994_v35 = vsel %vm118_vm1, %v6959_v9, 0 }
 0x836   :  { %9546 = vmatmul.mubr.msk.bf16.gmra.mxu0 %vm5730_vm3, %v10394_v47  ;;  %v6676_v10 = vpop.permute.xlu1 %6675 }
 0x837   :  { %6017 = vmatprep.mubr.bf16.mxu0 %v15203_v59  ;;  %v6693_v41 = vsel %vm1631_vm14, %v6676_v10, %v6678_v25 }
 0x838   :  { %v6953_v40 = vpop.permute.xlu0 %6952 }
 0x83a   :  { %9866 = vmatmul.mubr.msk.bf16.gmra.mxu1 %vm5730_vm3, %v10395_v50  ;;  %v13022_v52 = vpop.permute.xlu1 %6950 }
 0x83b   :  { %9869 = vmatprep.mubr.msk.bf16.mxu1 %vm10506_vm2, %v15076_v17 }
 0x83c   :  { %v6945_v20 = vpop.permute.xlu0 %6944 }
 0x83e   :  { %9547 = vmatmul.mubr.msk.bf16.gmra.mxu0 %vm5730_vm3, %v10395_v50  ;;  %v6957_v26 = vpop.permute.xlu1 %6956  ;;  %v6963_v50 = vsel %vm1889_vm0, %v13022_v52, %v6953_v40 }
 0x83f   :  { %6027 = vmatprep.mubr.bf16.mxu0 %v15203_v59  ;;  %v6965_v12 = vsel %vm1889_vm0, %v6957_v26, %v6959_v9  ;;  %v6964_v58 = vsel %vm1889_vm0, %v6955_v38, %v6957_v26 }
 0x840   :  { %v6943_v27 = vpop.permute.xlu0 %6942  ;;  %v6988_v47 = vsel %vm118_vm1, %v6964_v58, 0  ;;  %v10414_v58 = vld [vmem:[%s15042_s11 + $0xc4] sm:$0xff]  }
 0x842   :  { %9870 = vmatmul.mubr.msk.bf16.gmra.mxu1 %vm5730_vm3, %v10396_v48  ;;  %v6949_v53 = vpop.permute.xlu1 %6948 }
 0x843   :  { %9879 = vmatprep.mubr.msk.bf16.mxu1 %vm10506_vm2, %v15076_v17 }
 0x844   :  { %v7235_v57 = vpop.permute.xlu0 %7234 }
 0x846   :  { %9548 = vmatmul.mubr.msk.bf16.gmra.mxu0 %vm5730_vm3, %v10396_v48  ;;  %v6947_v15 = vpop.permute.xlu1 %6946  ;;  %v6962_v48 = vsel %vm1889_vm0, %v6949_v53, %v13022_v52 }
 0x847   :  { %6227 = vmatprep.mubr.bf16.mxu0 %v15203_v59  ;;  %v6961_v7 = vsel %vm1889_vm0, %v6945_v20, %v6947_v15 }
 0x848   :  { %v13080_v33 = vpop.permute.xlu0 %7224 }
 0x84a   :  { %9880 = vmatmul.mubr.msk.bf16.vlgmr.msra.gmra.mxu1 %vm5730_vm3, %v10397_v32  ;;  %v13072_v14 = vpop.permute.xlu1 %7222 }
 0x84b   :  { %9900 = vmatpush3.bf16.msra.mxu1 %v6460_v13  ;;  %9883 = vmatprep.mubr.msk.bf16.mxu1 %vm10506_vm2, %v15076_v17  ;;  %v7240_v9 = vsel %vm2663_vm10, %v13072_v14, %v13080_v33 }
 0x84c   :  { %9901 = vmatprep.subr.bf16.mxu1 %v15076_v17  ;;  %v7231_v49 = vpop.permute.xlu0 %7230 }
 0x84e   :  { %9569 = vmatmul.mubr.msk.bf16.vlgmr.msra.gmra.mxu0 %vm5730_vm3, %v10397_v32  ;;  %v6960_v32 = vsel %vm1889_vm0, %v6943_v27, %v6945_v20 }
 0x84f   :  { %6473 = vmatpush1.bf16.msra.mxu0 %v6454_v45  ;;  %9902 = vmatpush3.bf16.msra.mxu1 %v6419_v55  ;;  %v7229_v55 = vpop.permute.xlu1 %7228 }
 0x850   :  { %6474 = vmatprep.subr.bf16.mxu0 %v6429_v0  ;;  %9903 = vmatprep.subr.bf16.mxu1 %v15076_v17  ;;  %v13109_v34 = vpop.permute.xlu0 %7214 }
 0x851   :  { %6237 = vmatprep.mubr.bf16.mxu0 %v15203_v59 }
 0x852   :  { %9884 = vmatmul.mubr.msk.bf16.gmra.mxu1 %vm5730_vm3, %v10398_v2 }
 0x853   :  { %6475 = vmatpush1.bf16.msra.mxu0 %v6428_v22  ;;  %9904 = vmatpush3.bf16.msra.mxu1 %v6413_v18  ;;  %v7233_v46 = vpop.permute.xlu1 %7232  ;;  %v10409_v18 = vld [vmem:[%s15042_s11 + $0xa0] sm:$0xff]  }
 0x854   :  { %6476 = vmatprep.subr.bf16.mxu0 %v6427_v8  ;;  %9887 = vmatprep.mubr.msk.bf16.mxu1 %vm10506_vm2, %v15076_v17  ;;  %v7243_v13 = vsel %vm2663_vm10, %v7231_v49, %v7233_v46 }
 0x855   :  { %9925 = vmatprep.subr.bf16.mxu1 %v15076_v17 }
 0x856   :  { %9570 = vmatmul.mubr.msk.bf16.gmra.mxu0 %vm5730_vm3, %v10398_v2  ;;  %v7227_v2 = vpop.permute.xlu0 %7226 }
 0x857   :  { %6477 = vmatpush1.bf16.msra.mxu0 %v6426_v3  ;;  %6247 = vmatprep.mubr.bf16.mxu0 %v15203_v59  ;;  %v7221_v45 = vpop.permute.xlu1 %7220 }
 0x858   :  { %9618 = vmatprep.subr.msk.bf16.mxu0 %vm118_vm1, %v6698_v36  ;;  %v10412_v36 = vld [vmem:[%s15042_s11 + $0xb4] sm:$0xff]  }
 0x85a   :  { %9888 = vmatmul.mubr.msk.bf16.gmra.mxu1 %vm5730_vm3, %v10399_v42  ;;  %v7219_v22 = vpop.permute.xlu0 %7218 }
 0x85b   :  { %9891 = vmatprep.mubr.msk.bf16.mxu1 %vm10506_vm2, %v15076_v17  ;;  %v7217_v0 = vpop.permute.xlu1 %7216 }
 0x85e   :  { %9571 = vmatmul.mubr.msk.bf16.gmra.mxu0 %vm5730_vm3, %v10399_v42 }
 0x85f   :  { %6257 = vmatprep.mubr.bf16.mxu0 %v15203_v59  ;;  %v7213_v31 = vpop.permute.xlu1 %7212 }
 0x862   :  { %9892 = vmatmul.mubr.msk.bf16.gmra.mxu1 %vm5730_vm3, %v10400_v54 }
 0x863   :  { %9895 = vmatprep.mubr.msk.bf16.mxu1 %vm10506_vm2, %v15076_v17  ;;  %v13143_v4 = vpop.permute.xlu1 %7498 }
 0x866   :  { %9572 = vmatmul.mubr.msk.bf16.gmra.mxu0 %vm5730_vm3, %v10400_v54  ;;  %v7244_v54 = vsel %vm2663_vm10, %v7233_v46, %v7235_v57  ;;  %v7236_v57 = vsel %vm2663_vm10, %v7213_v31, %v13109_v34 }
 0x867   :  { %6267 = vmatprep.mubr.bf16.mxu0 %v15203_v59  ;;  %v13170_v26 = vpop.permute.xlu1 %7504 }
 0x86a   :  { %9896 = vmatmul.mubr.msk.bf16.gmra.mxu1 %vm5730_vm3, %v10401_v21 }
 0x86b   :  { %9905 = vmatprep.mubr.msk.bf16.mxu1 %vm10506_vm2, %v15076_v17 }
 0x86e   :  { %9573 = vmatmul.mubr.msk.bf16.gmra.mxu0 %vm5730_vm3, %v10401_v21 }
 0x86f   :  { %6494 = vmatprep.mubr.bf16.mxu0 %v15203_v59 }
 0x872   :  { %9906 = vmatmul.mubr.msk.bf16.vlgmr.msra.gmra.mxu1 %vm5730_vm3, %v10402_v19 }
 0x873   :  { %9926 = vmatpush3.bf16.msra.mxu1 %v6727_v56  ;;  %9909 = vmatprep.mubr.msk.bf16.mxu1 %vm10506_vm2, %v15076_v17  ;;  %v7242_v56 = vsel %vm2663_vm10, %v7229_v55, %v7231_v49 }
 0x874   :  { %9927 = vmatprep.subr.bf16.mxu1 %v15076_v17 }
 0x876   :  { %9594 = vmatmul.mubr.msk.bf16.vlgmr.msra.gmra.mxu0 %vm5730_vm3, %v10402_v19 }
 0x877   :  { %6740 = vmatpush1.bf16.msra.mxu0 %v6721_v63  ;;  %9928 = vmatpush3.bf16.msra.mxu1 %v6686_v62  ;;  %v13138_v62 = vpop.permute.xlu0 %7510  ;;  %v7241_v63 = vsel %vm2663_vm10, %v13080_v33, %v7227_v2 }
 0x878   :  { %6741 = vmatprep.subr.bf16.mxu0 %v6696_v6  ;;  %9929 = vmatprep.subr.bf16.mxu1 %v15076_v17 }
 0x879   :  { %6504 = vmatprep.mubr.bf16.mxu0 %v15203_v59 }
 0x87a   :  { %9910 = vmatmul.mubr.msk.bf16.gmra.mxu1 %vm5730_vm3, %v10403_v37 }
 0x87b   :  { %6742 = vmatpush1.bf16.msra.mxu0 %v6695_v5  ;;  %9930 = vmatpush3.bf16.msra.mxu1 %v6680_v61  ;;  %v7273_v61 = vsel %vm118_vm1, %v7244_v54, 0  ;;  %v13157_v38 = vpop.permute.xlu0 %7500  ;;  %v7267_v5 = vsel %vm118_vm1, %v7242_v56, 0  ;;  %v10416_v54 = vld [vmem:[%s15042_s11 + $0xd4] ss:$0 sps:$4 sm:$0xff]  }
 0x87c   :  { %6743 = vmatprep.subr.bf16.mxu0 %v6694_v44  ;;  %9913 = vmatprep.mubr.msk.bf16.mxu1 %vm10506_vm2, %v15076_v17  ;;  %v10413_v44 = vld [vmem:[%s15042_s11 + $0xbc] sm:$0xff]  }
 0x87d   :  { %9951 = vmatprep.subr.bf16.mxu1 %v15076_v17 }
 0x87e   :  { %9595 = vmatmul.mubr.msk.bf16.gmra.mxu0 %vm5730_vm3, %v10403_v37 }
 0x87f   :  { %6744 = vmatpush1.bf16.msra.mxu0 %v6693_v41  ;;  %6514 = vmatprep.mubr.bf16.mxu0 %v15203_v59  ;;  %v13187_v53 = vpop.permute.xlu0 %7506 }
 0x880   :  { %9643 = vmatprep.subr.msk.bf16.mxu0 %vm118_vm1, %v6965_v12  ;;  %v7239_v12 = vsel %vm2663_vm10, %v7221_v45, %v13072_v14 }
 0x882   :  { %9914 = vmatmul.mubr.msk.bf16.gmra.mxu1 %vm5730_vm3, %v10404_v30 }
 0x883   :  { %9917 = vmatprep.mubr.msk.bf16.mxu1 %vm10506_vm2, %v15076_v17  ;;  %v13221_v49 = vpop.permute.xlu0 %7490 }
 0x886   :  { %9596 = vmatmul.mubr.msk.bf16.gmra.mxu0 %vm5730_vm3, %v10404_v30 }
 0x887   :  { %6524 = vmatprep.mubr.bf16.mxu0 %v15203_v59 }
 0x88a   :  { %9918 = vmatmul.mubr.msk.bf16.gmra.mxu1 %vm5730_vm3, %v10405_v43 }
 0x88b   :  { %9921 = vmatprep.mubr.msk.bf16.mxu1 %vm10506_vm2, %v15076_v17 }
 0x88e   :  { %9597 = vmatmul.mubr.msk.bf16.gmra.mxu0 %vm5730_vm3, %v10405_v43 }
 0x88f   :  { %6534 = vmatprep.mubr.bf16.mxu0 %v15203_v59 }
 0x892   :  { %9922 = vmatmul.mubr.msk.bf16.gmra.mxu1 %vm5730_vm3, %v10406_v29 }
 0x893   :  { %9931 = vmatprep.mubr.msk.bf16.mxu1 %vm10506_vm2, %v15076_v17 }
 0x896   :  { %9598 = vmatmul.mubr.msk.bf16.gmra.mxu0 %vm5730_vm3, %v10406_v29  ;;  %v7237_v29 = vsel %vm2663_vm10, %v13109_v34, %v7217_v0 }
 0x897   :  { %6761 = vmatprep.mubr.bf16.mxu0 %v15203_v59 }
 0x89a   :  { %9932 = vmatmul.mubr.msk.bf16.vlgmr.msra.gmra.mxu1 %vm5730_vm3, %v10407_v23 }
 0x89b   :  { %9952 = vmatpush3.bf16.msra.mxu1 %v6994_v35  ;;  %9935 = vmatprep.mubr.msk.bf16.mxu1 %vm10506_vm2, %v15076_v17 }
 0x89c   :  { %9953 = vmatprep.subr.bf16.mxu1 %v15076_v17 }
 0x89e   :  { %9619 = vmatmul.mubr.msk.bf16.vlgmr.msra.gmra.mxu0 %vm5730_vm3, %v10407_v23  ;;  %v7509_v23 = vpop.permute.xlu1 %7508 }
 0x89f   :  { %7007 = vmatpush1.bf16.msra.mxu0 %v6988_v47  ;;  %9954 = vmatpush3.bf16.msra.mxu1 %v6953_v40  ;;  %v7238_v40 = vsel %vm2663_vm10, %v7217_v0, %v7219_v22  ;;  %v7519_v33 = vsel %vm2921_vm15, %v13187_v53, %v7509_v23  ;;  %v7503_v0 = vpop.permute.xlu0 %7502 }
 0x8a0   :  { %7008 = vmatprep.subr.bf16.mxu0 %v6963_v50  ;;  %9955 = vmatprep.subr.bf16.mxu1 %v15076_v17 }
 0x8a1   :  { %6771 = vmatprep.mubr.bf16.mxu0 %v15203_v59 }
 0x8a2   :  { %9936 = vmatmul.mubr.msk.bf16.gmra.mxu1 %vm5730_vm3, %v10408_v24 }
 0x8a3   :  { %7009 = vmatpush1.bf16.msra.mxu0 %v6962_v48  ;;  %9956 = vmatpush3.bf16.msra.mxu1 %v6947_v15  ;;  %v7495_v56 = vpop.permute.xlu0 %7494 }
 0x8a4   :  { %7010 = vmatprep.subr.bf16.mxu0 %v6961_v7  ;;  %9939 = vmatprep.mubr.msk.bf16.mxu1 %vm10506_vm2, %v15076_v17 }
 0x8a5   :  { %9977 = vmatprep.subr.bf16.mxu1 %v15076_v17 }
 0x8a6   :  { %9620 = vmatmul.mubr.msk.bf16.gmra.mxu0 %vm5730_vm3, %v10408_v24 }
 0x8a7   :  { %7011 = vmatpush1.bf16.msra.mxu0 %v6960_v32  ;;  %6781 = vmatprep.mubr.bf16.mxu0 %v15203_v59 }
 0x8a8   :  { %9668 = vmatprep.subr.msk.bf16.mxu0 %vm118_vm1, %v7243_v13  ;;  %v13231_v13 = vpop.permute.xlu1 %7496 }
 0x8aa   :  { %9940 = vmatmul.mubr.msk.bf16.gmra.mxu1 %vm5730_vm3, %v10409_v18 }
 0x8ab   :  { %9943 = vmatprep.mubr.msk.bf16.mxu1 %vm10506_vm2, %v15076_v17 }
 0x8ac   :  { %v13245_v31 = vpop.permute.xlu1 %7492 }
 0x8ae   :  { %9621 = vmatmul.mubr.msk.bf16.gmra.mxu0 %vm5730_vm3, %v10409_v18  ;;  %v10415_v18 = vld [vmem:[%s15042_s11 + $0xcc] sm:$0xff]  }
 0x8af   :  { %6791 = vmatprep.mubr.bf16.mxu0 %v15203_v59 }
 0x8b2   :  { %9944 = vmatmul.mubr.msk.bf16.gmra.mxu1 %vm5730_vm3, %v10410_v39 }
 0x8b3   :  { %9947 = vmatprep.mubr.msk.bf16.mxu1 %vm10506_vm2, %v15076_v17 }
 0x8b6   :  { %9622 = vmatmul.mubr.msk.bf16.gmra.mxu0 %vm5730_vm3, %v10410_v39 }
 0x8b7   :  { %6801 = vmatprep.mubr.bf16.mxu0 %v15203_v59 }
 0x8ba   :  { %v13124_v8 = vpop.f32.mrf.mxu1  ;;  %9948 = vmatmul.mubr.msk.bf16.gmra.mxu1 %vm5730_vm3, %v10411_v28 }
 0x8bb   :  { %9957 = vmatprep.mubr.msk.bf16.mxu1 %vm10506_vm2, %v15076_v17 }
 0x8bc   :  { %v9829_v3 = vpop.f32.mrf.mxu1 }
 0x8be   :  { %v13129_v1 = vpop.f32.mrf.mxu0  ;;  %v13131_v42 = vpop.f32.mrf.mxu1  ;;  %9623 = vmatmul.mubr.msk.bf16.gmra.mxu0 %vm5730_vm3, %v10411_v28 }
 0x8bf   :  { %7028 = vmatprep.mubr.bf16.mxu0 %v15203_v59 }
 0x8c0   :  { %v13141_v21 = vpop.f32.mrf.mxu0  ;;  %v9830_v25 = vpop.f32.mrf.mxu1 }
 0x8c2   :  { %v13145_v19 = vpop.f32.mrf.mxu0  ;;  %v13147_v10 = vpop.f32.mrf.mxu1  ;;  %9958 = vmatmul.mubr.msk.bf16.vlgmr.msra.gmra.mxu1 %vm5730_vm3, %v10412_v36 }
 0x8c3   :  { %9978 = vmatpush3.bf16.msra.mxu1 %v7273_v61  ;;  %9961 = vmatprep.mubr.msk.bf16.mxu1 %vm10506_vm2, %v15076_v17 }
 0x8c4   :  { %v13154_v16 = vpop.f32.mrf.mxu0  ;;  %v9833_v52 = vpop.f32.mrf.mxu1  ;;  %9979 = vmatprep.subr.bf16.mxu1 %v15076_v17 }
 0x8c6   :  { %v13161_v37 = vpop.f32.mrf.mxu0  ;;  %v13163_v6 = vpop.f32.mrf.mxu1  ;;  %9644 = vmatmul.mubr.msk.bf16.vlgmr.msra.gmra.mxu0 %vm5730_vm3, %v10412_v36 }
 0x8c7   :  { %7286 = vmatpush1.bf16.msra.mxu0 %v7267_v5  ;;  %9980 = vmatpush3.bf16.msra.mxu1 %v7241_v63  ;;  %v13257_v5 = vpop.permute.xlu1 %7488 }
 0x8c8   :  { %7287 = vmatprep.subr.bf16.mxu0 %v7240_v9  ;;  %v13175_v41 = vpop.f32.mrf.mxu0  ;;  %v9834_v30 = vpop.f32.mrf.mxu1  ;;  %9981 = vmatprep.subr.bf16.mxu1 %v15076_v17 }
 0x8c9   :  { %7038 = vmatprep.mubr.bf16.mxu0 %v15203_v59 }
 0x8ca   :  { %v13182_v43 = vpop.f32.mrf.mxu0  ;;  %v13184_v20 = vpop.f32.mrf.mxu1  ;;  %9962 = vmatmul.mubr.msk.bf16.gmra.mxu1 %vm5730_vm3, %v10413_v44 }
 0x8cb   :  { %7288 = vmatpush1.bf16.msra.mxu0 %v7239_v12  ;;  %9982 = vmatpush3.bf16.msra.mxu1 %v7238_v40 }
 0x8cc   :  { %7289 = vmatprep.subr.bf16.mxu0 %v7237_v29  ;;  %v13191_v27 = vpop.f32.mrf.mxu0  ;;  %v9837_v15 = vpop.f32.mrf.mxu1  ;;  %9965 = vmatprep.mubr.msk.bf16.mxu1 %vm10506_vm2, %v15076_v17  ;;  %v10417_v29 = vld [vmem:[%s15042_s11 + $0xd8] sm:$0xff]  }
 0x8cd   :  { %10003 = vmatprep.subr.bf16.mxu1 %v15076_v17  ;;  %v7520_v15 = vsel %vm2921_vm15, %v7509_v23, %v13138_v62 }
 0x8ce   :  { %v13198_v14 = vpop.f32.mrf.mxu0  ;;  %v13200_v35 = vpop.f32.mrf.mxu1  ;;  %9645 = vmatmul.mubr.msk.bf16.gmra.mxu0 %vm5730_vm3, %v10413_v44  ;;  %v7549_v62 = vsel %vm118_vm1, %v7520_v15, 0 }
 0x8cf   :  { %7290 = vmatpush1.bf16.msra.mxu0 %v7236_v57  ;;  %7048 = vmatprep.mubr.bf16.mxu0 %v15203_v59  ;;  %v13270_v57 = vpop.permute.xlu0 %7786 }
 0x8d0   :  { %9693 = vmatprep.subr.msk.bf16.mxu0 %vm118_vm1, %v7519_v33  ;;  %v13210_v47 = vpop.f32.mrf.mxu0  ;;  %v9838_v24 = vpop.f32.mrf.mxu1 }
 0x8d2   :  { %v13212_v50 = vpop.f32.mrf.mxu0  ;;  %v13214_v55 = vpop.f32.mrf.mxu1  ;;  %9966 = vmatmul.mubr.msk.bf16.gmra.mxu1 %vm5730_vm3, %v10414_v58 }
 0x8d3   :  { %9969 = vmatprep.mubr.msk.bf16.mxu1 %vm10506_vm2, %v15076_v17 }
 0x8d4   :  { %v13219_v48 = vpop.f32.mrf.mxu0  ;;  %v9841_v7 = vpop.f32.mrf.mxu1 }
 0x8d5   :  { %v13279_v7 = vpop.permute.xlu1 %7774 }
 0x8d6   :  { %v13223_v32 = vpop.f32.mrf.mxu0  ;;  %v13225_v46 = vpop.f32.mrf.mxu1  ;;  %9646 = vmatmul.mubr.msk.bf16.gmra.mxu0 %vm5730_vm3, %v10414_v58 }
 0x8d7   :  { %7058 = vmatprep.mubr.bf16.mxu0 %v15203_v59 }
 0x8d8   :  { %v13234_v34 = vpop.f32.mrf.mxu0  ;;  %v9842_v39 = vpop.f32.mrf.mxu1 }
 0x8da   :  { %v13236_v45 = vpop.f32.mrf.mxu0  ;;  %v13238_v2 = vpop.f32.mrf.mxu1  ;;  %9970 = vmatmul.mubr.msk.bf16.gmra.mxu1 %vm5730_vm3, %v10415_v18 }
 0x8db   :  { %9973 = vmatprep.mubr.msk.bf16.mxu1 %vm10506_vm2, %v15076_v17 }
 0x8dc   :  { %v13243_v28 = vpop.f32.mrf.mxu0  ;;  %v9845_v22 = vpop.f32.mrf.mxu1 }
 0x8de   :  { %v13247_v3 = vpop.f32.mrf.mxu0  ;;  %v5905_v36 = vpop.f32.mrf.mxu1  ;;  %9647 = vmatmul.mubr.msk.bf16.gmra.mxu0 %vm5730_vm3, %v10415_v18 }
 0x8df   :  { %7068 = vmatprep.mubr.bf16.mxu0 %v15203_v59 }
 0x8e0   :  { %v13254_v25 = vpop.f32.mrf.mxu0  ;;  %v9846_v61 = vpop.f32.mrf.mxu1 }
 0x8e2   :  { %v5833_v52 = vpop.f32.mrf.mxu0  ;;  %v6070_v63 = vpop.f32.mrf.mxu1  ;;  %9974 = vmatmul.mubr.msk.bf16.gmra.mxu1 %vm5730_vm3, %v10416_v54 }
 0x8e3   :  { %v13260_v44 = vadd.f32 %v6070_v63, %v13124_v8  ;;  %9983 = vmatprep.mubr.msk.bf16.mxu1 %vm10506_vm2, %v15076_v17  ;;  %v10418_v52 = vld [vmem:[%s15042_s11 + $0xe0] sm:$0xff]   ;;  %v13310_v63 = vpop.permute.xlu1 %7780 }
 0x8e4   :  { %v5834_v9 = vpop.f32.mrf.mxu0  ;;  %v9855_v30 = vpop.f32.mrf.mxu1 }
 0x8e6   :  { %v5989_v12 = vpop.f32.mrf.mxu0  ;;  %v6073_v40 = vpop.f32.mrf.mxu1  ;;  %9648 = vmatmul.mubr.msk.bf16.gmra.mxu0 %vm5730_vm3, %v10416_v54 }
 0x8e7   :  { %v13273_v8 = vadd.f32 %v5989_v12, %v13129_v1  ;;  %v13276_v58 = vadd.f32 %v6073_v40, %v13131_v42  ;;  %7307 = vmatprep.mubr.bf16.mxu0 %v15203_v59  ;;  %v7518_v1 = vsel %vm2921_vm15, %v13170_v26, %v13187_v53  ;;  %v13298_v54 = vpop.permute.xlu0 %7776 }
 0x8e8   :  { %v5991_v33 = vpop.f32.mrf.mxu0  ;;  %v9856_v24 = vpop.f32.mrf.mxu1 }
 0x8e9   :  { %v13282_v18 = vadd.f32 %v5991_v33, %v13141_v21  ;;  %v13345_v24 = vpop.permute.xlu1 %7784 }
 0x8ea   :  { %v5993_v39 = vpop.f32.mrf.mxu0  ;;  %v6078_v22 = vpop.f32.mrf.mxu1  ;;  %9984 = vmatmul.mubr.msk.bf16.vlgmr.msra.gmra.mxu1 %vm5730_vm3, %v10417_v29 }
 0x8eb   :  { %v13290_v42 = vadd.f32 %v5993_v39, %v13145_v19  ;;  %v13293_v23 = vadd.f32 %v6078_v22, %v13147_v10  ;;  %10004 = vmatpush3.bf16.msra.mxu1 %v7549_v62  ;;  %9987 = vmatprep.mubr.msk.bf16.mxu1 %vm10506_vm2, %v15076_v17  ;;  %v7517_v19 = vsel %vm2921_vm15, %v13157_v38, %v7503_v0  ;;  %v7543_v10 = vsel %vm118_vm1, %v7518_v1, 0 }
 0x8ec   :  { %v5995_v21 = vpop.f32.mrf.mxu0  ;;  %v9859_v36 = vpop.f32.mrf.mxu1  ;;  %10005 = vmatprep.subr.bf16.mxu1 %v15076_v17  ;;  %v7516_v0 = vsel %vm2921_vm15, %v13143_v4, %v13157_v38 }
 0x8ed   :  { %v13301_v61 = vadd.f32 %v5995_v21, %v13154_v16  ;;  %v13332_v38 = vpop.permute.xlu0 %7782 }
 0x8ee   :  { %v5999_v26 = vpop.f32.mrf.mxu0  ;;  %v6081_v53 = vpop.f32.mrf.mxu1  ;;  %9669 = vmatmul.mubr.msk.bf16.vlgmr.msra.gmra.mxu0 %vm5730_vm3, %v10417_v29  ;;  %v7795_v1 = vsel %vm3179_vm11, %v13332_v38, %v13345_v24 }
 0x8ef   :  { %v13313_v9 = vadd.f32 %v5999_v26, %v13161_v37  ;;  %v13316_v16 = vadd.f32 %v6081_v53, %v13163_v6  ;;  %7562 = vmatpush1.bf16.msra.mxu0 %v7543_v10  ;;  %10006 = vmatpush3.bf16.msra.mxu1 %v7517_v19  ;;  %v7515_v37 = vsel %vm2921_vm15, %v13231_v13, %v13143_v4 }
 0x8f0   :  { %7563 = vmatprep.subr.bf16.mxu0 %v7516_v0  ;;  %v6001_v30 = vpop.f32.mrf.mxu0  ;;  %v9860_v12 = vpop.f32.mrf.mxu1  ;;  %10007 = vmatprep.subr.bf16.mxu1 %v15076_v17  ;;  %v7514_v6 = vsel %vm2921_vm15, %v13245_v31, %v7495_v56  ;;  %v7513_v4 = vsel %vm2921_vm15, %v13221_v49, %v13245_v31  ;;  %v10419_v31 = vld [vmem:[%s15042_s11 + $0xe8] sm:$0xff]  }
 0x8f1   :  { %v13323_v40 = vadd.f32 %v6001_v30, %v13175_v41  ;;  %7317 = vmatprep.mubr.bf16.mxu0 %v15203_v59 }
 0x8f2   :  { %v6003_v29 = vpop.f32.mrf.mxu0  ;;  %v6086_v15 = vpop.f32.mrf.mxu1  ;;  %9988 = vmatmul.mubr.msk.bf16.gmra.mxu1 %vm5730_vm3, %v10418_v52 }
 0x8f3   :  { %v13335_v33 = vadd.f32 %v6003_v29, %v13182_v43  ;;  %v13338_v41 = vadd.f32 %v6086_v15, %v13184_v20  ;;  %7564 = vmatpush1.bf16.msra.mxu0 %v7515_v37  ;;  %10008 = vmatpush3.bf16.msra.mxu1 %v7514_v6  ;;  %v7512_v20 = vsel %vm2921_vm15, %v13257_v5, %v13221_v49 }
 0x8f4   :  { %7565 = vmatprep.subr.bf16.mxu0 %v7513_v4  ;;  %v6005_v13 = vpop.f32.mrf.mxu0  ;;  %v9863_v56 = vpop.f32.mrf.mxu1  ;;  %9991 = vmatprep.mubr.msk.bf16.mxu1 %vm10506_vm2, %v15076_v17 }
 0x8f5   :  { %v13348_v43 = vadd.f32 %v6005_v13, %v13191_v27  ;;  %10029 = vmatprep.subr.bf16.mxu1 %v15076_v17 }
 0x8f6   :  { %v6009_v39 = vpop.f32.mrf.mxu0  ;;  %v6089_v22 = vpop.f32.mrf.mxu1  ;;  %9670 = vmatmul.mubr.msk.bf16.gmra.mxu0 %vm5730_vm3, %v10418_v52 }
 0x8f7   :  { %v13359_v62 = vadd.f32 %v6009_v39, %v13198_v14  ;;  %v13362_v27 = vadd.f32 %v6089_v22, %v13200_v35  ;;  %7566 = vmatpush1.bf16.msra.mxu0 %v7512_v20  ;;  %7327 = vmatprep.mubr.bf16.mxu0 %v15203_v59 }
 0x8f8   :  { %9718 = vmatprep.subr.msk.bf16.mxu0 %vm118_vm1, %v7795_v1  ;;  %v6011_v49 = vpop.f32.mrf.mxu0  ;;  %v9864_v5 = vpop.f32.mrf.mxu1 }
 0x8f9   :  { %v13370_v21 = vadd.f32 %v6011_v49, %v13210_v47 }
 0x8fa   :  { %v6013_v36 = vpop.f32.mrf.mxu0  ;;  %v6094_v14 = vpop.f32.mrf.mxu1  ;;  %9992 = vmatmul.mubr.msk.bf16.gmra.mxu1 %vm5730_vm3, %v10419_v31 }
 0x8fb   :  { %v13374_v35 = vadd.f32 %v6013_v36, %v13212_v50  ;;  %v13377_v19 = vadd.f32 %v6094_v14, %v13214_v55  ;;  %9995 = vmatprep.mubr.msk.bf16.mxu1 %vm10506_vm2, %v15076_v17  ;;  %v10420_v50 = vld [vmem:[%s15042_s11 + $0xf0] sm:$0xff]   ;;  %v7796_v14 = vsel %vm3179_vm11, %v13345_v24, %v13270_v57 }
 0x8fc   :  { %v6015_v26 = vpop.f32.mrf.mxu0  ;;  %v9867_v53 = vpop.f32.mrf.mxu1  ;;  %v7825_v57 = vsel %vm118_vm1, %v7796_v14, 0 }
 0x8fd   :  { %v13382_v10 = vadd.f32 %v6015_v26, %v13219_v48  ;;  %v7773_v26 = vpop.permute.xlu1 %7772 }
 0x8fe   :  { %v6019_v47 = vpop.f32.mrf.mxu0  ;;  %v6097_v52 = vpop.f32.mrf.mxu1  ;;  %9671 = vmatmul.mubr.msk.bf16.gmra.mxu0 %vm5730_vm3, %v10419_v31 }
 0x8ff   :  { %v13389_v0 = vadd.f32 %v6019_v47, %v13223_v32  ;;  %v13392_v55 = vadd.f32 %v6097_v52, %v13225_v46  ;;  %7337 = vmatprep.mubr.bf16.mxu0 %v15203_v59  ;;  %v13422_v31 = vpop.permute.xlu0 %7766 }
 0x900   :  { %v6021_v30 = vpop.f32.mrf.mxu0  ;;  %v9868_v12 = vpop.f32.mrf.mxu1 }
 0x901   :  { %v13396_v48 = vadd.f32 %v6021_v30, %v13234_v34 }
 0x902   :  { %v6023_v37 = vpop.f32.mrf.mxu0  ;;  %v6102_v6 = vpop.f32.mrf.mxu1  ;;  %9996 = vmatmul.mubr.msk.bf16.gmra.mxu1 %vm5730_vm3, %v10420_v50 }
 0x903   :  { %v13400_v29 = vadd.f32 %v6023_v37, %v13236_v45  ;;  %v13403_v32 = vadd.f32 %v6102_v6, %v13238_v2  ;;  %9999 = vmatprep.mubr.msk.bf16.mxu1 %vm10506_vm2, %v15076_v17  ;;  %v10421_v45 = vld [vmem:[%s15042_s11 + $0xf8] ss:$0 sps:$4 sm:$0xff]  }
 0x904   :  { %v6025_v46 = vpop.f32.mrf.mxu0  ;;  %v9871_v15 = vpop.f32.mrf.mxu1 }
 0x905   :  { %v13408_v4 = vadd.f32 %v6025_v46, %v13243_v28  ;;  %v7769_v46 = vpop.permute.xlu1 %7768 }
 0x906   :  { %v6029_v34 = vpop.f32.mrf.mxu0  ;;  %v6105_v13 = vpop.f32.mrf.mxu1  ;;  %9672 = vmatmul.mubr.msk.bf16.gmra.mxu0 %vm5730_vm3, %v10420_v50 }
 0x907   :  { %v13415_v56 = vadd.f32 %v6029_v34, %v13247_v3  ;;  %7347 = vmatprep.mubr.bf16.mxu0 %v15203_v59  ;;  %v7779_v50 = vpop.permute.xlu0 %7778  ;;  %v10423_v34 = vld [vmem:[%s15042_s11 + $0x104] sm:$0xff]  }
 0x908   :  { %v6031_v2 = vpop.f32.mrf.mxu0  ;;  %v9872_v20 = vpop.f32.mrf.mxu1 }
 0x909   :  { %v13419_v39 = vadd.f32 %v6031_v2, %v13254_v25  ;;  %v10422_v25 = vld [vmem:[%s15042_s11 + $0xfc] sm:$0xff]   ;;  %v7792_v2 = vsel %vm3179_vm11, %v13279_v7, %v13298_v54 }
 0x90a   :  { %v6033_v28 = vpop.f32.mrf.mxu0  ;;  %v6310_v22 = vpop.f32.mrf.mxu1  ;;  %10000 = vmatmul.mubr.msk.bf16.gmra.mxu1 %vm5730_vm3, %v10421_v45 }
 0x90b   :  { %v13425_v1 = vadd.f32 %v6310_v22, %v13260_v44  ;;  %10009 = vmatprep.mubr.msk.bf16.mxu1 %vm10506_vm2, %v15076_v17  ;;  %v7771_v13 = vpop.permute.xlu0 %7770 }
 0x90c   :  { %v6034_v3 = vpop.f32.mrf.mxu0  ;;  %v9881_v49 = vpop.f32.mrf.mxu1 }
 0x90e   :  { %v6229_v5 = vpop.f32.mrf.mxu0  ;;  %v6313_v36 = vpop.f32.mrf.mxu1  ;;  %9673 = vmatmul.mubr.msk.bf16.gmra.mxu0 %vm5730_vm3, %v10421_v45 }
 0x90f   :  { %v13437_v44 = vadd.f32 %v6229_v5, %v13273_v8  ;;  %v13440_v53 = vadd.f32 %v6313_v36, %v13276_v58  ;;  %7583 = vmatprep.mubr.bf16.mxu0 %v15203_v59  ;;  %v7794_v8 = vsel %vm3179_vm11, %v13310_v63, %v13332_v38  ;;  %v7793_v63 = vsel %vm3179_vm11, %v13298_v54, %v7779_v50  ;;  %v7765_v54 = vpop.permute.xlu1 %7764 }
 0x910   :  { %v6231_v47 = vpop.f32.mrf.mxu0  ;;  %v9882_v52 = vpop.f32.mrf.mxu1 }
 0x911   :  { %v13444_v30 = vadd.f32 %v6231_v47, %v13282_v18  ;;  %v10424_v47 = vld [vmem:[%s15042_s11 + $0x10c] sm:$0xff]  }
 0x912   :  { %v6233_v12 = vpop.f32.mrf.mxu0  ;;  %v6318_v37 = vpop.f32.mrf.mxu1  ;;  %10010 = vmatmul.mubr.msk.bf16.vlgmr.msra.gmra.mxu1 %vm5730_vm3, %v10422_v25 }
 0x913   :  { %v13452_v58 = vadd.f32 %v6233_v12, %v13290_v42  ;;  %v13455_v24 = vadd.f32 %v6318_v37, %v13293_v23  ;;  %10030 = vmatpush3.bf16.msra.mxu1 %v7825_v57  ;;  %10013 = vmatprep.mubr.msk.bf16.mxu1 %vm10506_vm2, %v15076_v17  ;;  %v7819_v23 = vsel %vm118_vm1, %v7794_v8, 0 }
 0x914   :  { %v6235_v18 = vpop.f32.mrf.mxu0  ;;  %v9885_v6 = vpop.f32.mrf.mxu1  ;;  %10031 = vmatprep.subr.bf16.mxu1 %v15076_v17 }
 0x915   :  { %v13461_v15 = vadd.f32 %v6235_v18, %v13301_v61 }
 0x916   :  { %v6239_v42 = vpop.f32.mrf.mxu0  ;;  %v6321_v38 = vpop.f32.mrf.mxu1  ;;  %9694 = vmatmul.mubr.msk.bf16.vlgmr.msra.gmra.mxu0 %vm5730_vm3, %v10422_v25 }
 0x917   :  { %v13471_v45 = vadd.f32 %v6239_v42, %v13313_v9  ;;  %v13474_v61 = vadd.f32 %v6321_v38, %v13316_v16  ;;  %7838 = vmatpush1.bf16.msra.mxu0 %v7819_v23  ;;  %10032 = vmatpush3.bf16.msra.mxu1 %v7793_v63  ;;  %v7791_v9 = vsel %vm3179_vm11, %v7773_v26, %v13279_v7 }
 0x918   :  { %7839 = vmatprep.subr.bf16.mxu0 %v7792_v2  ;;  %v6241_v20 = vpop.f32.mrf.mxu0  ;;  %v9886_v28 = vpop.f32.mrf.mxu1  ;;  %10033 = vmatprep.subr.bf16.mxu1 %v15076_v17  ;;  %v7790_v16 = vsel %vm3179_vm11, %v7769_v46, %v7771_v13 }
 0x919   :  { %v13481_v22 = vadd.f32 %v6241_v20, %v13323_v40  ;;  %7593 = vmatprep.mubr.bf16.mxu0 %v15203_v59  ;;  %v7789_v40 = vsel %vm3179_vm11, %v13422_v31, %v7769_v46 }
 0x91a   :  { %v6243_v3 = vpop.f32.mrf.mxu0  ;;  %v6326_v49 = vpop.f32.mrf.mxu1  ;;  %10014 = vmatmul.mubr.msk.bf16.gmra.mxu1 %vm5730_vm3, %v10423_v34 }
 0x91b   :  { %v13489_v5 = vadd.f32 %v6243_v3, %v13335_v33  ;;  %v13492_v36 = vadd.f32 %v6326_v49, %v13338_v41  ;;  %7840 = vmatpush1.bf16.msra.mxu0 %v7791_v9  ;;  %10034 = vmatpush3.bf16.msra.mxu1 %v7790_v16  ;;  %v7788_v33 = vsel %vm3179_vm11, %v7765_v54, %v13422_v31 }
 0x91c   :  { %7841 = vmatprep.subr.bf16.mxu0 %v7789_v40  ;;  %v6245_v7 = vpop.f32.mrf.mxu0  ;;  %v9889_v25 = vpop.f32.mrf.mxu1  ;;  %10017 = vmatprep.mubr.msk.bf16.mxu1 %vm10506_vm2, %v15076_v17 }
 0x91d   :  { %v13499_v14 = vadd.f32 %v6245_v7, %v13348_v43  ;;  %10077 = vmatprep.subr.bf16.mxu1 %v15076_v17 }
 0x91e   :  { %v6249_v41 = vpop.f32.mrf.mxu0  ;;  %v6329_v26 = vpop.f32.mrf.mxu1  ;;  %9695 = vmatmul.mubr.msk.bf16.gmra.mxu0 %vm5730_vm3, %v10423_v34 }
 0x91f   :  { %v13509_v52 = vadd.f32 %v6249_v41, %v13359_v62  ;;  %v13512_v50 = vadd.f32 %v6329_v26, %v13362_v27  ;;  %7842 = vmatpush1.bf16.msra.mxu0 %v7788_v33  ;;  %7603 = vmatprep.mubr.bf16.mxu0 %v15203_v59 }
 0x920   :  { %v6251_v43 = vpop.f32.mrf.mxu0  ;;  %v9890_v12 = vpop.f32.mrf.mxu1  ;;  %10055 = vmatprep.subr.bf16.mxu0 %v15076_v17 }
 0x921   :  { %v13517_v31 = vadd.f32 %v6251_v43, %v13370_v21 }
 0x922   :  { %v6253_v37 = vpop.f32.mrf.mxu0  ;;  %v6334_v57 = vpop.f32.mrf.mxu1  ;;  %10018 = vmatmul.mubr.msk.bf16.gmra.mxu1 %vm5730_vm3, %v10424_v47 }
 0x923   :  { %v13521_v62 = vadd.f32 %v6253_v37, %v13374_v35  ;;  %v13524_v27 = vadd.f32 %v6334_v57, %v13377_v19  ;;  %10021 = vmatprep.mubr.msk.bf16.mxu1 %vm10506_vm2, %v15076_v17  ;;  %v10425_v35 = vld [vmem:[%s15042_s11 + $0x114] sm:$0xff]  }
 0x924   :  { %v6255_v8 = vpop.f32.mrf.mxu0  ;;  %v9893_v18 = vpop.f32.mrf.mxu1 }
 0x925   :  { %v13529_v6 = vadd.f32 %v6255_v8, %v13382_v10 }
 0x926   :  { %v6259_v21 = vpop.f32.mrf.mxu0  ;;  %v6337_v46 = vpop.f32.mrf.mxu1  ;;  %9696 = vmatmul.mubr.msk.bf16.gmra.mxu0 %vm5730_vm3, %v10424_v47 }
 0x927   :  { %v13536_v63 = vadd.f32 %v6259_v21, %v13389_v0  ;;  %v13539_v19 = vadd.f32 %v6337_v46, %v13392_v55  ;;  %7613 = vmatprep.mubr.bf16.mxu0 %v15203_v59 }
 0x928   :  { %v6261_v42 = vpop.f32.mrf.mxu0  ;;  %v9894_v38 = vpop.f32.mrf.mxu1 }
 0x929   :  { %v13543_v10 = vadd.f32 %v6261_v42, %v13396_v48 }
 0x92a   :  { %v6263_v23 = vpop.f32.mrf.mxu0  ;;  %v6342_v34 = vpop.f32.mrf.mxu1  ;;  %10022 = vmatmul.mubr.msk.bf16.gmra.mxu1 %vm5730_vm3, %v10425_v35 }
 0x92b   :  { %v13547_v13 = vadd.f32 %v6263_v23, %v13400_v29  ;;  %v13550_v0 = vadd.f32 %v6342_v34, %v13403_v32  ;;  %10025 = vmatprep.mubr.msk.bf16.mxu1 %vm10506_vm2, %v15076_v17  ;;  %v10426_v29 = vld [vmem:[%s15042_s11 + $0x11c] ss:$0 sps:$4 sm:$0xff]  }
 0x92c   :  { %v6265_v55 = vpop.f32.mrf.mxu0  ;;  %v9897_v2 = vpop.f32.mrf.mxu1 }
 0x92d   :  { %v13555_v20 = vadd.f32 %v6265_v55, %v13408_v4 }
 0x92e   :  { %v6269_v48 = vpop.f32.mrf.mxu0  ;;  %v6345_v28 = vpop.f32.mrf.mxu1  ;;  %9697 = vmatmul.mubr.msk.bf16.gmra.mxu0 %vm5730_vm3, %v10425_v35 }
 0x92f   :  { %v13562_v9 = vadd.f32 %v6269_v48, %v13415_v56  ;;  %7623 = vmatprep.mubr.bf16.mxu0 %v15203_v59 }
 0x930   :  { %v6271_v32 = vpop.f32.mrf.mxu0  ;;  %v9898_v16 = vpop.f32.mrf.mxu1 }
 0x931   :  { %v13566_v3 = vadd.f32 %v6271_v32, %v13419_v39  ;;  %v10427_v39 = vld [vmem:[%s15042_s11 + $0x120] sm:$0xff]  }
 0x932   :  { %v6273_v4 = vpop.f32.mrf.mxu0  ;;  %v6577_v49 = vpop.f32.mrf.mxu1  ;;  %10026 = vmatmul.mubr.msk.bf16.gmra.mxu1 %vm5730_vm3, %v10426_v29 }
 0x933   :  { %v13570_v54 = vadd.f32 %v6577_v49, %v13425_v1  ;;  %10035 = vmatprep.mubr.msk.bf16.mxu1 %vm10506_vm2, %v15076_v17 }
 0x934   :  { %v6274_v40 = vpop.f32.mrf.mxu0  ;;  %v9907_v56 = vpop.f32.mrf.mxu1 }
 0x936   :  { %v6496_v7 = vpop.f32.mrf.mxu0  ;;  %v6580_v25 = vpop.f32.mrf.mxu1  ;;  %9698 = vmatmul.mubr.msk.bf16.gmra.mxu0 %vm5730_vm3, %v10426_v29 }
 0x937   :  { %v13579_v33 = vadd.f32 %v6496_v7, %v13437_v44  ;;  %v13582_v41 = vadd.f32 %v6580_v25, %v13440_v53  ;;  %7859 = vmatprep.mubr.bf16.mxu0 %v15203_v59 }
 0x938   :  { %v6498_v1 = vpop.f32.mrf.mxu0  ;;  %v9908_v26 = vpop.f32.mrf.mxu1 }
 0x939   :  { %v13586_v47 = vadd.f32 %v6498_v1, %v13444_v30 }
 0x93a   :  { %v6500_v43 = vpop.f32.mrf.mxu0  ;;  %v6585_v12 = vpop.f32.mrf.mxu1  ;;  %10036 = vmatmul.mubr.msk.bf16.vlgmr.msra.gmra.mxu1 %vm5730_vm3, %v10427_v39 }
 0x93b   :  { %v13590_v37 = vadd.f32 %v6500_v43, %v13452_v58  ;;  %v13593_v44 = vadd.f32 %v6585_v12, %v13455_v24  ;;  %10039 = vmatprep.mubr.msk.bf16.mxu1 %vm10506_vm2, %v15076_v17  ;;  %v10428_v58 = vld [vmem:[%s15042_s11 + $0x128] sm:$0xff]  }
 0x93c   :  { %v6502_v53 = vpop.f32.mrf.mxu0  ;;  %v9911_v57 = vpop.f32.mrf.mxu1 }
 0x93d   :  { %v13598_v8 = vadd.f32 %v6502_v53, %v13461_v15 }
 0x93e   :  { %v6506_v30 = vpop.f32.mrf.mxu0  ;;  %v6588_v18 = vpop.f32.mrf.mxu1  ;;  %9719 = vmatmul.mubr.msk.bf16.vlgmr.msra.gmra.mxu0 %vm5730_vm3, %v10427_v39 }
 0x93f   :  { %v13605_v21 = vadd.f32 %v6506_v30, %v13471_v45  ;;  %v13608_v24 = vadd.f32 %v6588_v18, %v13474_v61  ;;  %7869 = vmatprep.mubr.bf16.mxu0 %v15203_v59 }
 0x940   :  { %v6508_v46 = vpop.f32.mrf.mxu0  ;;  %v9912_v35 = vpop.f32.mrf.mxu1 }
 0x941   :  { %v13612_v15 = vadd.f32 %v6508_v46, %v13481_v22 }
 0x942   :  { %v6510_v42 = vpop.f32.mrf.mxu0  ;;  %v6593_v38 = vpop.f32.mrf.mxu1  ;;  %10040 = vmatmul.mubr.msk.bf16.gmra.mxu1 %vm5730_vm3, %v10428_v58 }
 0x943   :  { %v13616_v23 = vadd.f32 %v6510_v42, %v13489_v5  ;;  %v13619_v45 = vadd.f32 %v6593_v38, %v13492_v36  ;;  %10043 = vmatprep.mubr.msk.bf16.mxu1 %vm10506_vm2, %v15076_v17  ;;  %v10429_v5 = vld [vmem:[%s15042_s11 + $0x130] sm:$0xff]  }
 0x944   :  { %v6512_v61 = vpop.f32.mrf.mxu0  ;;  %v9915_v34 = vpop.f32.mrf.mxu1 }
 0x945   :  { %v13624_v55 = vadd.f32 %v6512_v61, %v13499_v14 }
 0x946   :  { %v6516_v22 = vpop.f32.mrf.mxu0  ;;  %v6596_v2 = vpop.f32.mrf.mxu1  ;;  %9720 = vmatmul.mubr.msk.bf16.gmra.mxu0 %vm5730_vm3, %v10428_v58 }
 0x947   :  { %v13631_v48 = vadd.f32 %v6516_v22, %v13509_v52  ;;  %v13634_v36 = vadd.f32 %v6596_v2, %v13512_v50  ;;  %7879 = vmatprep.mubr.bf16.mxu0 %v15203_v59 }
 0x948   :  { %v6518_v28 = vpop.f32.mrf.mxu0  ;;  %v9916_v29 = vpop.f32.mrf.mxu1 }
 0x949   :  { %v13638_v14 = vadd.f32 %v6518_v28, %v13517_v31  ;;  %v10430_v31 = vld [vmem:[%s15042_s11 + $0x138] sm:$0xff]  }
 0x94a   :  { %v6520_v32 = vpop.f32.mrf.mxu0  ;;  %v6601_v16 = vpop.f32.mrf.mxu1  ;;  %10044 = vmatmul.mubr.msk.bf16.gmra.mxu1 %vm5730_vm3, %v10429_v5 }
 0x94b   :  { %v13642_v4 = vadd.f32 %v6520_v32, %v13521_v62  ;;  %v13645_v52 = vadd.f32 %v6601_v16, %v13524_v27  ;;  %10047 = vmatprep.mubr.msk.bf16.mxu1 %vm10506_vm2, %v15076_v17 }
 0x94c   :  { %v13649_v50 = vpop.f32.mrf.mxu0  ;;  %v9919_v49 = vpop.f32.mrf.mxu1 }
 0x94e   :  { %v6526_v40 = vpop.f32.mrf.mxu0  ;;  %v6604_v56 = vpop.f32.mrf.mxu1  ;;  %9721 = vmatmul.mubr.msk.bf16.gmra.mxu0 %vm5730_vm3, %v10429_v5 }
 0x94f   :  { %v13656_v62 = vadd.f32 %v6526_v40, %v13536_v63  ;;  %v13659_v27 = vadd.f32 %v6604_v56, %v13539_v19  ;;  %7889 = vmatprep.mubr.bf16.mxu0 %v15203_v59 }
 0x950   :  { %v6528_v7 = vpop.f32.mrf.mxu0  ;;  %v9920_v25 = vpop.f32.mrf.mxu1 }
 0x951   :  { %v13663_v39 = vadd.f32 %v6528_v7, %v13543_v10  ;;  %v10431_v10 = vld [vmem:[%s15042_s11 + $0x140] ss:$0 sps:$4 sm:$0xff]  }
 0x952   :  { %v6530_v1 = vpop.f32.mrf.mxu0  ;;  %v6609_v26 = vpop.f32.mrf.mxu1  ;;  %10048 = vmatmul.mubr.msk.bf16.gmra.mxu1 %vm5730_vm3, %v10430_v31 }
 0x953   :  { %v13667_v43 = vadd.f32 %v6530_v1, %v13547_v13  ;;  %v13670_v63 = vadd.f32 %v6609_v26, %v13550_v0  ;;  %10051 = vmatprep.mubr.msk.bf16.mxu1 %vm10506_vm2, %v15076_v17 }
 0x954   :  { %v13674_v19 = vpop.f32.mrf.mxu0  ;;  %v9923_v12 = vpop.f32.mrf.mxu1 }
 0x956   :  { %v6536_v53 = vpop.f32.mrf.mxu0  ;;  %v6612_v57 = vpop.f32.mrf.mxu1  ;;  %9722 = vmatmul.mubr.msk.bf16.gmra.mxu0 %vm5730_vm3, %v10430_v31 }
 0x957   :  { %v13681_v13 = vadd.f32 %v6536_v53, %v13562_v9  ;;  %7899 = vmatprep.mubr.bf16.mxu0 %v15203_v59 }
 0x958   :  { %v6538_v0 = vpop.f32.mrf.mxu0  ;;  %v9924_v30 = vpop.f32.mrf.mxu1 }
 0x959   :  { %v13685_v18 = vadd.f32 %v6538_v0, %v13566_v3  ;;  %v6631_v30 = vadd.f32 %v13649_v50, %v13529_v6 }
 0x95a   :  { %v6540_v58 = vpop.f32.mrf.mxu0  ;;  %v6844_v46 = vpop.f32.mrf.mxu1  ;;  %10052 = vmatmul.mubr.msk.bf16.gmra.mxu1 %vm5730_vm3, %v10431_v10 }
 0x95b   :  { %v13689_v35 = vadd.f32 %v6844_v46, %v13570_v54  ;;  %10083 = vmatprep.mubr.msk.bf16.mxu1 %vm10506_vm2, %v15076_v17 }
 0x95c   :  { %v6541_v42 = vpop.f32.mrf.mxu0  ;;  %v9933_v9 = vpop.f32.mrf.mxu1 }
 0x95e   :  { %v6763_v38 = vpop.f32.mrf.mxu0  ;;  %v6847_v61 = vpop.f32.mrf.mxu1  ;;  %9723 = vmatmul.mubr.msk.bf16.gmra.mxu0 %vm5730_vm3, %v10431_v10 }
 0x95f   :  { %v13695_v59 = vadd.f32 %v6763_v38, %v13579_v33  ;;  %v13698_v3 = vadd.f32 %v6847_v61, %v13582_v41  ;;  %10065 = vmatprep.mubr.msk.bf16.mxu0 %vm10506_vm2, %v15076_v17 }
 0x960   :  { %v6765_v54 = vpop.f32.mrf.mxu0  ;;  %v9934_v34 = vpop.f32.mrf.mxu1 }
 0x961   :  { %v13703_v22 = vadd.f32 %v6765_v54, %v13586_v47  ;;  %v6637_v54 = vadd.f32 %v13674_v19, %v13555_v20 }
 0x962   :  { %v6767_v2 = vpop.f32.mrf.mxu0  ;;  %v6852_v5 = vpop.f32.mrf.mxu1 }
 0x963   :  { %v13706_v28 = vadd.f32 %v6767_v2, %v13590_v37  ;;  %v13709_v29 = vadd.f32 %v6852_v5, %v13593_v44 }
 0x964   :  { %v6769_v33 = vpop.f32.mrf.mxu0  ;;  %v9937_v32 = vpop.f32.mrf.mxu1 }
 0x965   :  { %v13712_v41 = vadd.f32 %v6769_v33, %v13598_v8 }
 0x966   :  { %v6773_v16 = vpop.f32.mrf.mxu0  ;;  %v6855_v49 = vpop.f32.mrf.mxu1 }
 0x967   :  { %v13715_v40 = vadd.f32 %v6773_v16, %v13605_v21  ;;  %v13718_v47 = vadd.f32 %v6855_v49, %v13608_v24 }
 0x968   :  { %v6775_v56 = vpop.f32.mrf.mxu0  ;;  %v9938_v31 = vpop.f32.mrf.mxu1 }
 0x969   :  { %v13721_v37 = vadd.f32 %v6775_v56, %v13612_v15 }
 0x96a   :  { %v6777_v44 = vpop.f32.mrf.mxu0  ;;  %v6860_v7 = vpop.f32.mrf.mxu1 }
 0x96b   :  { %v13724_v25 = vadd.f32 %v6777_v44, %v13616_v23  ;;  %v13727_v8 = vadd.f32 %v6860_v7, %v13619_v45 }
 0x96c   :  { %v6779_v1 = vpop.f32.mrf.mxu0  ;;  %v9941_v26 = vpop.f32.mrf.mxu1 }
 0x96d   :  { %v13730_v21 = vadd.f32 %v6779_v1, %v13624_v55 }
 0x96e   :  { %v6783_v24 = vpop.f32.mrf.mxu0  ;;  %v6863_v12 = vpop.f32.mrf.mxu1 }
 0x96f   :  { %v13733_v53 = vadd.f32 %v6783_v24, %v13631_v48  ;;  %v13736_v15 = vadd.f32 %v6863_v12, %v13634_v36 }
 0x970   :  { %v6785_v57 = vpop.f32.mrf.mxu0  ;;  %v9942_v10 = vpop.f32.mrf.mxu1 }
 0x971   :  { %v13739_v23 = vadd.f32 %v6785_v57, %v13638_v14 }
 0x972   :  { %v6787_v45 = vpop.f32.mrf.mxu0  ;;  %v6868_v0 = vpop.f32.mrf.mxu1 }
 0x973   :  { %v13744_v55 = vadd.f32 %v6787_v45, %v13642_v4  ;;  %v13747_v58 = vadd.f32 %v6868_v0, %v13645_v52 }
 0x974   :  { %v6789_v48 = vpop.f32.mrf.mxu0  ;;  %v9945_v46 = vpop.f32.mrf.mxu1 }
 0x975   :  { %v13749_v36 = vadd.f32 %v6789_v48, %v6631_v30 }
 0x976   :  { %v6793_v42 = vpop.f32.mrf.mxu0  ;;  %v6871_v9 = vpop.f32.mrf.mxu1 }
 0x977   :  { %v13752_v14 = vadd.f32 %v6793_v42, %v13656_v62  ;;  %v13755_v38 = vadd.f32 %v6871_v9, %v13659_v27 }
 0x978   :  { %v6795_v61 = vpop.f32.mrf.mxu0  ;;  %v9946_v6 = vpop.f32.mrf.mxu1 }
 0x979   :  { %v13758_v4 = vadd.f32 %v6795_v61, %v13663_v39 }
 0x97a   :  { %v6797_v50 = vpop.f32.mrf.mxu0  ;;  %v6876_v52 = vpop.f32.mrf.mxu1 }
 0x97b   :  { %v13763_v34 = vadd.f32 %v6797_v50, %v13667_v43  ;;  %v13766_v2 = vadd.f32 %v6876_v52, %v13670_v63 }
 0x97c   :  { %v6799_v62 = vpop.f32.mrf.mxu0  ;;  %v9949_v5 = vpop.f32.mrf.mxu1 }
 0x97d   :  { %v13768_v27 = vadd.f32 %v6799_v62, %v6637_v54 }
 0x97e   :  { %v6803_v33 = vpop.f32.mrf.mxu0  ;;  %v6879_v32 = vpop.f32.mrf.mxu1 }
 0x97f   :  { %v13771_v39 = vadd.f32 %v6803_v33, %v13681_v13 }
 0x980   :  { %v6805_v16 = vpop.f32.mrf.mxu0  ;;  %v9950_v49 = vpop.f32.mrf.mxu1 }
 0x981   :  { %v13774_v56 = vadd.f32 %v6805_v16, %v13685_v18 }
 0x982   :  { %v6807_v20 = vpop.f32.mrf.mxu0  ;;  %v7111_v43 = vpop.f32.mrf.mxu1 }
 0x983   :  { %v13777_v19 = vadd.f32 %v7111_v43, %v13689_v35 }
 0x984   :  { %v6808_v63 = vpop.f32.mrf.mxu0  ;;  %v9959_v31 = vpop.f32.mrf.mxu1 }
 0x986   :  { %v7030_v44 = vpop.f32.mrf.mxu0  ;;  %v7114_v7 = vpop.f32.mrf.mxu1 }
 0x987   :  { %v13780_v1 = vadd.f32 %v7030_v44, %v13695_v59  ;;  %v13783_v13 = vadd.f32 %v7114_v7, %v13698_v3 }
 0x988   :  { %v7032_v26 = vpop.f32.mrf.mxu0  ;;  %v9960_v24 = vpop.f32.mrf.mxu1 }
 0x989   :  { %v13786_v18 = vadd.f32 %v7032_v26, %v13703_v22 }
 0x98a   :  { %v7034_v12 = vpop.f32.mrf.mxu0  ;;  %v7119_v57 = vpop.f32.mrf.mxu1 }
 0x98b   :  { %v13789_v35 = vadd.f32 %v7034_v12, %v13706_v28  ;;  %v13792_v10 = vadd.f32 %v7119_v57, %v13709_v29 }
 0x98c   :  { %v7036_v45 = vpop.f32.mrf.mxu0  ;;  %v9963_v0 = vpop.f32.mrf.mxu1 }
 0x98d   :  { %v13795_v59 = vadd.f32 %v7036_v45, %v13712_v41 }
 0x98e   :  { %v7040_v3 = vpop.f32.mrf.mxu0  ;;  %v7122_v30 = vpop.f32.mrf.mxu1 }
 0x98f   :  { %v13798_v48 = vadd.f32 %v7040_v3, %v13715_v40  ;;  %v13801_v22 = vadd.f32 %v7122_v30, %v13718_v47 }
 0x990   :  { %v7042_v46 = vpop.f32.mrf.mxu0  ;;  %v9964_v42 = vpop.f32.mrf.mxu1 }
 0x991   :  { %v13804_v28 = vadd.f32 %v7042_v46, %v13721_v37 }
 0x992   :  { %v7044_v29 = vpop.f32.mrf.mxu0  ;;  %v7127_v9 = vpop.f32.mrf.mxu1 }
 0x993   :  { %v13807_v61 = vadd.f32 %v7044_v29, %v13724_v25  ;;  %v13810_v41 = vadd.f32 %v7127_v9, %v13727_v8 }
 0x994   :  { %v7046_v6 = vpop.f32.mrf.mxu0  ;;  %v9967_v50 = vpop.f32.mrf.mxu1 }
 0x995   :  { %v13813_v40 = vadd.f32 %v7046_v6, %v13730_v21 }
 0x996   :  { %v7050_v47 = vpop.f32.mrf.mxu0  ;;  %v7130_v52 = vpop.f32.mrf.mxu1 }
 0x997   :  { %v13816_v54 = vadd.f32 %v7050_v47, %v13733_v53  ;;  %v13819_v37 = vadd.f32 %v7130_v52, %v13736_v15 }
 0x998   :  { %v7052_v62 = vpop.f32.mrf.mxu0  ;;  %v9968_v5 = vpop.f32.mrf.mxu1 }
 0x999   :  { %v13822_v25 = vadd.f32 %v7052_v62, %v13739_v23 }
 0x99a   :  { %v7054_v8 = vpop.f32.mrf.mxu0  ;;  %v7135_v33 = vpop.f32.mrf.mxu1 }
 0x99b   :  { %v13825_v32 = vadd.f32 %v7054_v8, %v13744_v55  ;;  %v13828_v21 = vadd.f32 %v7135_v33, %v13747_v58 }
 0x99c   :  { %v7056_v16 = vpop.f32.mrf.mxu0  ;;  %v9971_v49 = vpop.f32.mrf.mxu1 }
 0x99d   :  { %v13831_v53 = vadd.f32 %v7056_v16, %v13749_v36 }
 0x99e   :  { %v7060_v15 = vpop.f32.mrf.mxu0  ;;  %v7138_v20 = vpop.f32.mrf.mxu1 }
 0x99f   :  { %v13834_v43 = vadd.f32 %v7060_v15, %v13752_v14  ;;  %v13837_v23 = vadd.f32 %v7138_v20, %v13755_v38 }
 0x9a0   :  { %v7062_v63 = vpop.f32.mrf.mxu0  ;;  %v9972_v31 = vpop.f32.mrf.mxu1 }
 0x9a1   :  { %v13840_v55 = vadd.f32 %v7062_v63, %v13758_v4 }
 0x9a2   :  { %v7064_v58 = vpop.f32.mrf.mxu0  ;;  %v7143_v44 = vpop.f32.mrf.mxu1 }
 0x9a3   :  { %v13843_v7 = vadd.f32 %v7064_v58, %v13763_v34  ;;  %v13846_v36 = vadd.f32 %v7143_v44, %v13766_v2 }
 0x9a4   :  { %v7066_v26 = vpop.f32.mrf.mxu0  ;;  %v9975_v24 = vpop.f32.mrf.mxu1 }
 0x9a5   :  { %v13849_v14 = vadd.f32 %v7066_v26, %v13768_v27 }
 0x9a6   :  { %v7070_v38 = vpop.f32.mrf.mxu0  ;;  %v7146_v12 = vpop.f32.mrf.mxu1 }
 0x9a7   :  { %v13852_v57 = vadd.f32 %v7070_v38, %v13771_v39 }
 0x9a8   :  { %v7072_v4 = vpop.f32.mrf.mxu0  ;;  %v9976_v45 = vpop.f32.mrf.mxu1 }
 0x9a9   :  { %v13855_v0 = vadd.f32 %v7072_v4, %v13774_v56 }
 0x9aa   :  { %v7074_v34 = vpop.f32.mrf.mxu0  ;;  %v7390_v3 = vpop.f32.mrf.mxu1 }
 0x9ab   :  { %v13858_v2 = vadd.f32 %v7390_v3, %v13777_v19 }
 0x9ac   :  { %v7075_v30 = vpop.f32.mrf.mxu0  ;;  %v9985_v46 = vpop.f32.mrf.mxu1 }
 0x9ae   :  { %v7309_v42 = vpop.f32.mrf.mxu0  ;;  %v7393_v27 = vpop.f32.mrf.mxu1 }
 0x9af   :  { %v13861_v29 = vadd.f32 %v7309_v42, %v13780_v1  ;;  %v13864_v39 = vadd.f32 %v7393_v27, %v13783_v13 }
 0x9b0   :  { %v7311_v9 = vpop.f32.mrf.mxu0  ;;  %v9986_v6 = vpop.f32.mrf.mxu1 }
 0x9b1   :  { %v13867_v56 = vadd.f32 %v7311_v9, %v13786_v18 }
 0x9b2   :  { %v7313_v50 = vpop.f32.mrf.mxu0  ;;  %v7398_v47 = vpop.f32.mrf.mxu1 }
 0x9b3   :  { %v13870_v19 = vadd.f32 %v7313_v50, %v13789_v35  ;;  %v13873_v52 = vadd.f32 %v7398_v47, %v13792_v10 }
 0x9b4   :  { %v7315_v62 = vpop.f32.mrf.mxu0  ;;  %v9989_v5 = vpop.f32.mrf.mxu1 }
 0x9b5   :  { %v13876_v1 = vadd.f32 %v7315_v62, %v13795_v59 }
 0x9b6   :  { %v7319_v13 = vpop.f32.mrf.mxu0  ;;  %v7401_v8 = vpop.f32.mrf.mxu1 }
 0x9b7   :  { %v13879_v33 = vadd.f32 %v7319_v13, %v13798_v48  ;;  %v13882_v18 = vadd.f32 %v7401_v8, %v13801_v22 }
 0x9b8   :  { %v7321_v16 = vpop.f32.mrf.mxu0  ;;  %v9990_v49 = vpop.f32.mrf.mxu1 }
 0x9b9   :  { %v13885_v35 = vadd.f32 %v7321_v16, %v13804_v28 }
 0x9ba   :  { %v7323_v10 = vpop.f32.mrf.mxu0  ;;  %v7406_v15 = vpop.f32.mrf.mxu1 }
 0x9bb   :  { %v13888_v20 = vadd.f32 %v7323_v10, %v13807_v61  ;;  %v13891_v59 = vadd.f32 %v7406_v15, %v13810_v41 }
 0x9bc   :  { %v7325_v63 = vpop.f32.mrf.mxu0  ;;  %v9993_v31 = vpop.f32.mrf.mxu1 }
 0x9bd   :  { %v13894_v48 = vadd.f32 %v7325_v63, %v13813_v40 }
 0x9be   :  { %v7329_v22 = vpop.f32.mrf.mxu0  ;;  %v7409_v58 = vpop.f32.mrf.mxu1 }
 0x9bf   :  { %v13897_v44 = vadd.f32 %v7329_v22, %v13816_v54  ;;  %v13900_v28 = vadd.f32 %v7409_v58, %v13819_v37 }
 0x9c0   :  { %v7331_v26 = vpop.f32.mrf.mxu0  ;;  %v9994_v24 = vpop.f32.mrf.mxu1 }
 0x9c1   :  { %v13903_v61 = vadd.f32 %v7331_v26, %v13822_v25 }
 0x9c2   :  { %v7333_v41 = vpop.f32.mrf.mxu0  ;;  %v7414_v38 = vpop.f32.mrf.mxu1 }
 0x9c3   :  { %v13906_v12 = vadd.f32 %v7333_v41, %v13825_v32  ;;  %v13909_v40 = vadd.f32 %v7414_v38, %v13828_v21 }
 0x9c4   :  { %v7335_v4 = vpop.f32.mrf.mxu0  ;;  %v9997_v45 = vpop.f32.mrf.mxu1 }
 0x9c5   :  { %v13912_v54 = vadd.f32 %v7335_v4, %v13831_v53 }
 0x9c6   :  { %v7339_v37 = vpop.f32.mrf.mxu0  ;;  %v7417_v34 = vpop.f32.mrf.mxu1 }
 0x9c7   :  { %v13915_v3 = vadd.f32 %v7339_v37, %v13834_v43  ;;  %v13918_v25 = vadd.f32 %v7417_v34, %v13837_v23 }
 0x9c8   :  { %v7341_v30 = vpop.f32.mrf.mxu0  ;;  %v9998_v46 = vpop.f32.mrf.mxu1 }
 0x9c9   :  { %v13921_v32 = vadd.f32 %v7341_v30, %v13840_v55 }
 0x9ca   :  { %v7343_v21 = vpop.f32.mrf.mxu0  ;;  %v7422_v42 = vpop.f32.mrf.mxu1 }
 0x9cb   :  { %v13924_v27 = vadd.f32 %v7343_v21, %v13843_v7  ;;  %v13927_v53 = vadd.f32 %v7422_v42, %v13846_v36 }
 0x9cc   :  { %v7345_v9 = vpop.f32.mrf.mxu0  ;;  %v10001_v6 = vpop.f32.mrf.mxu1 }
 0x9cd   :  { %v13930_v43 = vadd.f32 %v7345_v9, %v13849_v14 }
 0x9ce   :  { %v7349_v23 = vpop.f32.mrf.mxu0  ;;  %v7425_v50 = vpop.f32.mrf.mxu1 }
 0x9cf   :  { %v13933_v47 = vadd.f32 %v7349_v23, %v13852_v57 }
 0x9d0   :  { %v7351_v55 = vpop.f32.mrf.mxu0  ;;  %v10002_v62 = vpop.f32.mrf.mxu1 }
 0x9d1   :  { %v13936_v5 = vadd.f32 %v7351_v55, %v13855_v0 }
 0x9d2   :  { %v7353_v7 = vpop.f32.mrf.mxu0  ;;  %v7666_v13 = vpop.f32.mrf.mxu1 }
 0x9d3   :  { %v13939_v36 = vadd.f32 %v7666_v13, %v13858_v2 }
 0x9d4   :  { %v7354_v8 = vpop.f32.mrf.mxu0  ;;  %v10011_v16 = vpop.f32.mrf.mxu1 }
 0x9d6   :  { %v7585_v49 = vpop.f32.mrf.mxu0  ;;  %v7669_v14 = vpop.f32.mrf.mxu1 }
 0x9d7   :  { %v13942_v10 = vadd.f32 %v7585_v49, %v13861_v29  ;;  %v13945_v57 = vadd.f32 %v7669_v14, %v13864_v39 }
 0x9d8   :  { %v7587_v15 = vpop.f32.mrf.mxu0  ;;  %v10012_v63 = vpop.f32.mrf.mxu1 }
 0x9d9   :  { %15204 = vst [vmem:[#allocation23_spill] sm:$0xff] %v13942_v10  ;;  %15205 = vst [vmem:[#allocation25_spill] sm:$0xff] %v13945_v57  ;;  %v13948_v0 = vadd.f32 %v7587_v15, %v13867_v56  ;;  %v13975_v63 = vpop.permute.xlu1 %8058 }
 0x9da   :  { %v7589_v31 = vpop.f32.mrf.mxu0  ;;  %v7674_v22 = vpop.f32.mrf.mxu1  ;;  %15208 = vst [vmem:[#allocation6_spill] sm:$0xff] %v13975_v63 }
 0x9db   :  { %15206 = vst [vmem:[#allocation26_spill] sm:$0xff] %v13948_v0  ;;  %v13951_v2 = vadd.f32 %v7589_v31, %v13870_v19 }
 0x9dc   :  { %v7591_v58 = vpop.f32.mrf.mxu0  ;;  %v10015_v26 = vpop.f32.mrf.mxu1 }
 0x9dd   :  { %15207 = vst [vmem:[#allocation4_spill] sm:$0xff] %v13951_v2 }
 0x9de   :  { %v7595_v24 = vpop.f32.mrf.mxu0  ;;  %v7677_v41 = vpop.f32.mrf.mxu1 }
 0x9e0   :  { %v7597_v38 = vpop.f32.mrf.mxu0  ;;  %v10016_v29 = vpop.f32.mrf.mxu1 }
 0x9e1   :  { %v13979_v29 = vpop.permute.xlu0 %8048 }
 0x9e2   :  { %v7599_v4 = vpop.f32.mrf.mxu0  ;;  %v7682_v45 = vpop.f32.mrf.mxu1  ;;  %15209 = vst [vmem:[#allocation7_spill] sm:$0xff] %v13979_v29 }
 0x9e4   :  { %v7601_v39 = vpop.f32.mrf.mxu0  ;;  %v10019_v37 = vpop.f32.mrf.mxu1 }
 0x9e5   :  { %v13989_v0 = vpop.permute.xlu0 %8038 }
 0x9e6   :  { %v7605_v34 = vpop.f32.mrf.mxu0  ;;  %v7685_v30 = vpop.f32.mrf.mxu1 }
 0x9e8   :  { %v7607_v46 = vpop.f32.mrf.mxu0  ;;  %v10020_v56 = vpop.f32.mrf.mxu1 }
 0x9e9   :  { %v8029_v57 = vpop.permute.xlu0 %8028 }
 0x9ea   :  { %v13953_v21 = vpop.f32.mrf.mxu0  ;;  %v13955_v42 = vpop.f32.mrf.mxu1 }
 0x9ec   :  { %v13957_v19 = vpop.f32.mrf.mxu0  ;;  %v10023_v9 = vpop.f32.mrf.mxu1 }
 0x9ee   :  { %v13959_v6 = vpop.f32.mrf.mxu0  ;;  %v13961_v23 = vpop.f32.mrf.mxu1 }
 0x9f0   :  { %v13963_v50 = vpop.f32.mrf.mxu0  ;;  %v10024_v55 = vpop.f32.mrf.mxu1 }
 0x9f2   :  { %v13965_v62 = vpop.f32.mrf.mxu0  ;;  %v13967_v7 = vpop.f32.mrf.mxu1 }
 0x9f4   :  { %v13969_v13 = vpop.f32.mrf.mxu0  ;;  %v10027_v8 = vpop.f32.mrf.mxu1 }
 0x9f5   :  { %v13985_v8 = vpop.permute.xlu1 %8053 }
 0x9f6   :  { %v13971_v16 = vpop.f32.mrf.mxu0  ;;  %v7701_v49 = vpop.f32.mrf.mxu1  ;;  %15212 = vst [vmem:[#allocation11_spill] sm:$0xff] %v13985_v8  ;;  %v7710_v8 = vadd.f32 %v7595_v24, %v13879_v33 }
 0x9f8   :  { %v13973_v14 = vpop.f32.mrf.mxu0  ;;  %v10028_v15 = vpop.f32.mrf.mxu1 }
 0x9f9   :  { %v7712_v15 = vadd.f32 %v7674_v22, %v13873_v52 }
 0x9fa   :  { %v7629_v31 = vpop.f32.mrf.mxu0  ;;  %v13977_v26 = vpop.f32.mrf.mxu1 }
 0x9fc   :  { %v7630_v37 = vpop.f32.mrf.mxu0  ;;  %v10037_v56 = vpop.f32.mrf.mxu1 }
 0x9fd   :  { %v8088_v37 = vld [vmem:[%s15044_s15] sm:$0x7] }
 0x9fe   :  { %v13981_v9 = vpop.f32.mrf.mxu0  ;;  %v13983_v55 = vpop.f32.mrf.mxu1  ;;  %v14006_v52 = vrot.slane %v8088_v37, %v11448_v60 }
 0x9ff   :  { %15210 = vst [vmem:[#allocation8_spill] sm:$0xff] %v13981_v9  ;;  %15211 = vst [vmem:[#allocation15_spill] sm:$0xff] %v13983_v55  ;;  %v13999_v55 = vpop.permute.xlu1 %8043  ;;  %v7718_v9 = vadd.f32 %v7682_v45, %v13891_v59  ;;  %v7724_v59 = vadd.f32 %v13955_v42, %v13909_v40  ;;  %v14056_v42 = vadd.f32 %v13967_v7, %v13927_v53 }
 0xa00   :  { %v13987_v17 = vpop.f32.mrf.mxu0  ;;  %v10038_v49 = vpop.f32.mrf.mxu1 }
 0xa01   :  { %15213 = vst [vmem:[#allocation17_spill] sm:$0xff] %v13987_v17  ;;  %v14003_v49 = vrot.slane %v8088_v37, %v11435_v11  ;;  %v7713_v11 = vadd.f32 %v7599_v4, %v13888_v20  ;;  %v7719_v4 = vadd.f32 %v13953_v21, %v13906_v12 }
 0xa02   :  { %v13992_v31 = vpop.f32.mrf.mxu0  ;;  %v7950_v63 = vpop.f32.mrf.mxu1 }
 0xa03   :  { %15214 = vst [vmem:[#allocation13_spill] sm:$0xff] %v13992_v31  ;;  %v7988_v56 = vadd.f32 %v7950_v63, %v7712_v15  ;;  %v14009_v31 = vrot.slane %v8088_v37, %v11507_v51  ;;  %v7715_v63 = vadd.f32 %v7677_v41, %v13882_v18  ;;  %v7714_v51 = vadd.f32 %v7601_v39, %v13894_v48 }
 0xa04   :  { %v13997_v29 = vpop.f32.mrf.mxu0  ;;  %v10041_v2 = vpop.f32.mrf.mxu1  ;;  %v7716_v18 = vadd.f32 %v7605_v34, %v13897_v44  ;;  %v7720_v44 = vadd.f32 %v13957_v19, %v13912_v54  ;;  %v7723_v54 = vadd.f32 %v13963_v50, %v13921_v32  ;;  %v14062_v32 = vadd.f32 %v13969_v13, %v13930_v43 }
 0xa05   :  { %15215 = vst [vmem:[#allocation3_spill] sm:$0xff] %v13997_v29  ;;  %v7711_v2 = vadd.f32 %v7597_v38, %v13885_v35  ;;  %v14014_v29 = vadd.f32 %v7591_v58, %v13876_v1  ;;  %v14017_v33 = vadd.f32 %v8029_v57, %v7988_v56  ;;  %v7721_v35 = vadd.f32 %v7685_v30, %v13900_v28  ;;  %v8034_v38 = vpop.permute.xlu1 %8033 }
 0xa06   :  { %v7871_v22 = vpop.f32.mrf.mxu0  ;;  %v7953_v17 = vpop.f32.mrf.mxu1  ;;  %v7717_v1 = vadd.f32 %v7607_v46, %v13903_v61  ;;  %v7722_v28 = vadd.f32 %v13959_v6, %v13915_v3  ;;  %v7727_v61 = vadd.f32 %v13961_v23, %v13918_v25  ;;  %v14048_v3 = vadd.f32 %v13965_v62, %v13924_v27 }
 0xa07   :  { %v7986_v15 = vadd.f32 %v7871_v22, %v7710_v8  ;;  %v7991_v37 = vadd.f32 %v7953_v17, %v7715_v63  ;;  %v8113_v45 = vmul.f32 %v14009_v31, %v14017_v33  ;;  %v14066_v27 = vadd.f32 %v13971_v16, %v13933_v47 }
 0xa08   :  { %v7873_v60 = vpop.f32.mrf.mxu0  ;;  %v10042_v24 = vpop.f32.mrf.mxu1  ;;  %v14078_v13 = vadd.f32 %v13973_v14, %v13936_v5  ;;  %v15216_v14 = vld [vmem:[#allocation23_spill] sm:$0xff] }
 0xa09   :  { %v7987_v10 = vadd.f32 %v7873_v60, %v7711_v2  ;;  %v14024_v58 = vadd.f32 %v8029_v57, %v7986_v15  ;;  %v14040_v34 = vadd.f32 %v8034_v38, %v7991_v37  ;;  %v8144_v8 = vsel %vm8133_vm6, %v8113_v45, 0.0  ;;  %v15217_v24 = vld [vmem:[#allocation8_spill] sm:$0xff]  ;;  %v15218_v37 = vld [vmem:[#allocation25_spill] sm:$0xff] }
 0xa0a   :  { %v7875_v20 = vpop.f32.mrf.mxu0  ;;  %v7958_v41 = vpop.f32.mrf.mxu1  ;;  %v14087_v15 = vadd.f32 %v13977_v26, %v13939_v36 }
 0xa0b   :  { %v14030_v48 = vadd.f32 %v8029_v57, %v7987_v10  ;;  %v7989_v17 = vadd.f32 %v7875_v20, %v7713_v11  ;;  %v7994_v10 = vadd.f32 %v7958_v41, %v7718_v9  ;;  %v8111_v25 = vmul.f32 %v14003_v49, %v14024_v58 }
 0xa0c   :  { %v7877_v39 = vpop.f32.mrf.mxu0  ;;  %v10045_v12 = vpop.f32.mrf.mxu1  ;;  %v8116_v53 = vmul.f32 %v14009_v31, %v14040_v34 }
 0xa0d   :  { %v8112_v40 = vmul.f32 %v14006_v52, %v14030_v48  ;;  %v7990_v57 = vadd.f32 %v7877_v39, %v7714_v51  ;;  %v14052_v30 = vadd.f32 %v8034_v38, %v7989_v17  ;;  %v14072_v7 = vadd.f32 %v13989_v0, %v7994_v10  ;;  %v15220_v17 = vld [vmem:[#allocation3_spill] sm:$0xff] }
 0xa0e   :  { %v7881_v46 = vpop.f32.mrf.mxu0  ;;  %v7961_v21 = vpop.f32.mrf.mxu1  ;;  %v14097_v51 = vadd.f32 %v15217_v24, %v15216_v14  ;;  %v7984_v45 = vadd.f32 %v15220_v17, %v14014_v29 }
 0xa0f   :  { %v14058_v19 = vadd.f32 %v8034_v38, %v7990_v57  ;;  %v7992_v6 = vadd.f32 %v7881_v46, %v7716_v18  ;;  %v7997_v23 = vadd.f32 %v7961_v21, %v7721_v35  ;;  %v8143_v9 = vadd.f32 %v8112_v40, %v8111_v25  ;;  %v15219_v18 = vld [vmem:[#allocation15_spill] sm:$0xff]  ;;  %v8024_v57 = vpop.permute.xlu1 %8023  ;;  %v15221_v25 = vld [vmem:[#allocation4_spill] sm:$0xff]  ;;  %v15222_v46 = vld [vmem:[#allocation13_spill] sm:$0xff]  ;;  %v8019_v17 = vpop.permute.xlu0 %8018 }
 0xa10   :  { %v7883_v50 = vpop.f32.mrf.mxu0  ;;  %v10046_v62 = vpop.f32.mrf.mxu1  ;;  %v8114_v47 = vmul.f32 %v14003_v49, %v14052_v30  ;;  %v7985_v35 = vadd.f32 %v15219_v18, %v15218_v37  ;;  %v8119_v26 = vmul.f32 %v14009_v31, %v14072_v7  ;;  %v7983_v21 = vadd.f32 %v15222_v46, %v15221_v25 }
 0xa11   :  { %v8115_v56 = vmul.f32 %v14006_v52, %v14058_v19  ;;  %v7993_v43 = vadd.f32 %v7883_v50, %v7717_v1  ;;  %v14083_v16 = vadd.f32 %v13989_v0, %v7992_v6  ;;  %v8145_v2 = vadd.f32 %v8144_v8, %v8143_v9  ;;  %v15223_v50 = vld [vmem:[#allocation7_spill] sm:$0xff] }
 0xa12   :  { %v7885_v22 = vpop.f32.mrf.mxu0  ;;  %v7966_v63 = vpop.f32.mrf.mxu1  ;;  %v14090_v11 = vadd.f32 %v13999_v55, %v7997_v23  ;;  %v14120_v23 = vadd.f32 %v8024_v57, %v7985_v35  ;;  %v14137_v18 = vadd.f32 %v8024_v57, %v7983_v21 }
 0xa13   :  { %v14093_v60 = vadd.f32 %v13989_v0, %v7993_v43  ;;  %v7995_v5 = vadd.f32 %v7885_v22, %v7719_v4  ;;  %v8000_v1 = vadd.f32 %v7966_v63, %v7724_v59  ;;  %8146 = vadd.xlane.f32.xlu0 %v8145_v2  ;;  %v8148_v36 = vadd.f32 %v8115_v56, %v8114_v47  ;;  %v15225_v63 = vld [vmem:[#allocation17_spill] sm:$0xff] }
 0xa14   :  { %v7887_v20 = vpop.f32.mrf.mxu0  ;;  %v10049_v41 = vpop.f32.mrf.mxu1  ;;  %v8149_v4 = vsel %vm8133_vm6, %v8116_v53, 0.0  ;;  %v8117_v39 = vmul.f32 %v14003_v49, %v14083_v16  ;;  %v8108_v21 = vmul.f32 %v14003_v49, %v14137_v18 }
 0xa15   :  { %v8118_v0 = vmul.f32 %v14006_v52, %v14093_v60  ;;  %v7996_v38 = vadd.f32 %v7887_v20, %v7720_v44  ;;  %v14111_v59 = vadd.f32 %v13999_v55, %v7995_v5  ;;  %v8150_v10 = vadd.f32 %v8149_v4, %v8148_v36  ;;  %v15226_v41 = vld [vmem:[#allocation11_spill] sm:$0xff] }
 0xa16   :  { %v7891_v12 = vpop.f32.mrf.mxu0  ;;  %v7969_v40 = vpop.f32.mrf.mxu1  ;;  %v8122_v44 = vmul.f32 %v14009_v31, %v14090_v11  ;;  %v14123_v62 = vadd.f32 %v15223_v50, %v8000_v1  ;;  %v14133_v5 = vadd.f32 %v8024_v57, %v7984_v45 }
 0xa17   :  { %v14118_v6 = vadd.f32 %v13999_v55, %v7996_v38  ;;  %v7998_v29 = vadd.f32 %v7891_v12, %v7722_v28  ;;  %v8003_v9 = vadd.f32 %v7969_v40, %v7727_v61  ;;  %8151 = vadd.xlane.f32.xlu1 %v8150_v10  ;;  %v8153_v56 = vadd.f32 %v8118_v0, %v8117_v39  ;;  %v15224_v28 = vld [vmem:[#allocation26_spill] sm:$0xff] }
 0xa18   :  { %v7893_v8 = vpop.f32.mrf.mxu0  ;;  %v10050_v53 = vpop.f32.mrf.mxu1  ;;  %v8154_v55 = vsel %vm8133_vm6, %v8119_v26, 0.0  ;;  %v7981_v2 = vadd.f32 %v15225_v63, %v15224_v28  ;;  %v8120_v61 = vmul.f32 %v14003_v49, %v14111_v59  ;;  %v8159_v1 = vsel %vm8133_vm6, %v8122_v44, 0.0 }
 0xa19   :  { %v8121_v43 = vmul.f32 %v14006_v52, %v14118_v6  ;;  %v14128_v47 = vadd.f32 %v15223_v50, %v7998_v29  ;;  %v7999_v22 = vadd.f32 %v7893_v8, %v7723_v54  ;;  %v8155_v37 = vadd.f32 %v8154_v55, %v8153_v56  ;;  %v15227_v8 = vld [vmem:[#allocation6_spill] sm:$0xff] }
 0xa1a   :  { %v7895_v14 = vpop.f32.mrf.mxu0  ;;  %v7974_v24 = vpop.f32.mrf.mxu1  ;;  %v8125_v20 = vmul.f32 %v14009_v31, %v14123_v62  ;;  %v14147_v36 = vadd.f32 %v15226_v41, %v8003_v9  ;;  %v8110_v40 = vmul.f32 %v14009_v31, %v14120_v23  ;;  %v8109_v10 = vmul.f32 %v14006_v52, %v14133_v5 }
 0xa1b   :  { %v14140_v35 = vadd.f32 %v15223_v50, %v7999_v22  ;;  %v8001_v54 = vadd.f32 %v7895_v14, %v14048_v3  ;;  %v8006_v26 = vadd.f32 %v7974_v24, %v14056_v42  ;;  %8156 = vadd.xlane.f32.xlu0 %v8155_v37  ;;  %v8158_v4 = vadd.f32 %v8121_v43, %v8120_v61 }
 0xa1c   :  { %v7897_v0 = vpop.f32.mrf.mxu0  ;;  %v10053_v38 = vpop.f32.mrf.mxu1  ;;  %v8123_v45 = vmul.f32 %v14003_v49, %v14128_v47  ;;  %v14160_v42 = vadd.f32 %v8019_v17, %v7981_v2  ;;  %v8128_v50 = vmul.f32 %v14009_v31, %v14147_v36  ;;  %v8164_v22 = vsel %vm8133_vm6, %v8125_v20, 0.0 }
 0xa1d   :  { %v8124_v3 = vmul.f32 %v14006_v52, %v14140_v35  ;;  %v14155_v39 = vadd.f32 %v15226_v41, %v8001_v54  ;;  %v8002_v12 = vadd.f32 %v7897_v0, %v14062_v32  ;;  %v8160_v25 = vadd.f32 %v8159_v1, %v8158_v4 }
 0xa1e   :  { %v7901_v57 = vpop.f32.mrf.mxu0  ;;  %v7977_v46 = vpop.f32.mrf.mxu1  ;;  %v14175_v53 = vadd.f32 %v15227_v8, %v8006_v26  ;;  %v8138_v61 = vadd.f32 %v8109_v10, %v8108_v21  ;;  %v14185_v14 = vadd.f32 %v8019_v17, %v14097_v51  ;;  %v14191_v54 = vadd.f32 %v8019_v17, %v14087_v15  ;;  %v8374_v21 = vld [vmem:[%s15045_s13 + $0x38] sm:$0xff] }
 0xa1f   :  { %v14167_v44 = vadd.f32 %v15226_v41, %v8002_v12  ;;  %v8004_v29 = vadd.f32 %v7901_v57, %v14066_v27  ;;  %v8163_v32 = vadd.f32 %v8124_v3, %v8123_v45  ;;  %v8126_v9 = vmul.f32 %v14003_v49, %v14155_v39  ;;  %8161 = vadd.xlane.f32.xlu1 %v8160_v25  ;;  %v8373_v46 = vld [vmem:[%s15045_s13 + $0x30] sm:$0xff] }
 0xa20   :  { %v7903_v56 = vpop.f32.mrf.mxu0  ;;  %v10054_v43 = vpop.f32.mrf.mxu1  ;;  %v8106_v1 = vmul.f32 %v14006_v52, %v14160_v42  ;;  %v8131_v20 = vmul.f32 %v14009_v31, %v14175_v53  ;;  %v8169_v41 = vsel %vm8133_vm6, %v8128_v50, 0.0  ;;  %v8139_v0 = vsel %vm8133_vm6, %v8110_v40, 0.0  ;;  %v8375_v40 = vld [vmem:[%s15045_s13 + $0x40] sm:$0xff]  ;;  %v8372_v50 = vld [vmem:[%s15045_s13 + $0x28] sm:$0xff] }
 0xa21   :  { %v8127_v55 = vmul.f32 %v14006_v52, %v14167_v44  ;;  %v14181_v27 = vadd.f32 %v15227_v8, %v8004_v29  ;;  %v8005_v28 = vadd.f32 %v7903_v56, %v14078_v13  ;;  %v8165_v63 = vadd.f32 %v8164_v22, %v8163_v32  ;;  %v8455_v29 = vld [vmem:[%s15046_s14 + $0x38] sm:$0xff]  ;;  %v8456_v32 = vld [vmem:[%s15046_s14 + $0x40] sm:$0xff] }
 0xa22   :  { %v7905_v2 = vpop.f32.mrf.mxu0  ;;  %v8140_v38 = vadd.f32 %v8139_v0, %v8138_v61  ;;  %v8105_v4 = vmul.f32 %v14003_v49, %v14185_v14  ;;  %v8107_v45 = vmul.f32 %v14009_v31, %v14191_v54  ;;  %v8174_v3 = vsel %vm8133_vm6, %v8131_v20, 0.0 }
 0xa23   :  { %v14188_v24 = vadd.f32 %v15227_v8, %v8005_v28  ;;  %v8168_v37 = vadd.f32 %v8127_v55, %v8126_v9  ;;  %8166 = vadd.xlane.f32.xlu1 %v8165_v63  ;;  %v8129_v51 = vmul.f32 %v14003_v49, %v14181_v27  ;;  %v8454_v9 = vld [vmem:[%s15046_s14 + $0x30] sm:$0xff]  ;;  %v8371_v8 = vld [vmem:[%s15045_s13 + $0x20] sm:$0xff] }
 0xa24   :  { %v7906_v13 = vpop.f32.mrf.mxu0  ;;  %v8132_v10 = vadd.f32 %v8106_v1, %v8105_v4  ;;  %v8134_v57 = vsel %vm8133_vm6, %v8107_v45, 0.0 }
 0xa25   :  { %v8130_v26 = vmul.f32 %v14006_v52, %v14188_v24  ;;  %v8170_v15 = vadd.f32 %v8169_v41, %v8168_v37 }
 0xa26   :  { %v8135_v25 = vadd.f32 %v8134_v57, %v8132_v10 }
 0xa27   :  { %8171 = vadd.xlane.f32.xlu0 %v8170_v15  ;;  %v8173_v17 = vadd.f32 %v8130_v26, %v8129_v51  ;;  %8141 = vadd.xlane.f32.xlu1 %v8140_v38 }
 0xa29   :  { %v8175_v12 = vadd.f32 %v8174_v3, %v8173_v17 }
 0xa2b   :  { %8176 = vadd.xlane.f32.xlu0 %v8175_v12 }
 0xa2f   :  { %8136 = vadd.xlane.f32.xlu0 %v8135_v25 }
 0xa38   :  { %8418 = vperm.xlu1 %10118, %v8375_v40  }
 0xa3c   :  { %8408 = vperm.xlu1 %10118, %v8373_v46  }
 0xa40   :  { %8413 = vperm.xlu1 %10118, %v8374_v21  }
 0xa44   :  { %8494 = vperm.xlu1 %10118, %v8455_v29  }
 0xa45   :  { %8499 = vperm.xlu0 %10117, %v8456_v32  }
 0xa48   :  { %8403 = vperm.xlu1 %10118, %v8372_v50  }
 0xa49   :  { %8489 = vperm.xlu0 %10117, %v8454_v9  }
 0xa4d   :  { %8398 = vperm.xlu0 %10117, %v8371_v8  }
 0xa9c   :  { %v8147_v56 = vpop.xlane.xlu0 %8146 }
 0xa9d   :  { %v8180_v22 = vmul.f32 0.055555556, %v8147_v56 }
 0xa9f   :  { %v14234_v28 = vsub.f32 %v14024_v58, %v8180_v22  ;;  %v14237_v63 = vsub.f32 %v14030_v48, %v8180_v22  ;;  %v14249_v13 = vsub.f32 %v14017_v33, %v8180_v22 }
 0xaa0   :  { %v8152_v43 = vpop.xlane.xlu1 %8151 }
 0xaa1   :  { %v8181_v55 = vmul.f32 0.055555556, %v8152_v43  ;;  %v8220_v58 = vmul.f32 %v14234_v28, %v14234_v28  ;;  %v8221_v48 = vmul.f32 %v14237_v63, %v14237_v63  ;;  %v8222_v33 = vmul.f32 %v14249_v13, %v14249_v13 }
 0xaa3   :  { %v14240_v2 = vsub.f32 %v14052_v30, %v8181_v55  ;;  %v14243_v61 = vsub.f32 %v14058_v19, %v8181_v55  ;;  %v14246_v37 = vsub.f32 %v14040_v34, %v8181_v55  ;;  %v8247_v0 = vmul.f32 %v8220_v58, %v14003_v49 }
 0xaa4   :  { %v8157_v1 = vpop.xlane.xlu0 %8156  ;;  %v8248_v17 = vmul.f32 %v8221_v48, %v14006_v52  ;;  %v14284_v21 = vmul.f32 %v8222_v33, %v14009_v31 }
 0xaa5   :  { %v8223_v30 = vmul.f32 %v14240_v2, %v14240_v2  ;;  %v8224_v19 = vmul.f32 %v14243_v61, %v14243_v61  ;;  %v8182_v41 = vmul.f32 0.055555556, %v8157_v1  ;;  %v8225_v34 = vmul.f32 %v14246_v37, %v14246_v37 }
 0xaa6   :  { %v14293_v32 = vadd.f32 %v8248_v17, %v8247_v0 }
 0xaa7   :  { %v14265_v15 = vsub.f32 %v14083_v16, %v8182_v41  ;;  %v8250_v38 = vmul.f32 %v8223_v30, %v14003_v49  ;;  %v8251_v4 = vmul.f32 %v8224_v19, %v14006_v52  ;;  %v8252_v3 = vmul.f32 %v8225_v34, %v14009_v31 }
 0xaa8   :  { %v8162_v20 = vpop.xlane.xlu1 %8161  ;;  %v14272_v12 = vsub.f32 %v14093_v60, %v8182_v41  ;;  %v14287_v29 = vsub.f32 %v14072_v7, %v8182_v41 }
 0xaa9   :  { %v8183_v51 = vmul.f32 0.055555556, %v8162_v20  ;;  %v14291_v60 = vmul.f32 %v14265_v15, %v14265_v15  ;;  %v8284_v7 = vsel %vm8133_vm6, %v8252_v3, 0.0 }
 0xaaa   :  { %v8227_v8 = vmul.f32 %v14272_v12, %v14272_v12  ;;  %v8228_v1 = vmul.f32 %v14287_v29, %v14287_v29 }
 0xaab   :  { %v14275_v10 = vsub.f32 %v14111_v59, %v8183_v51  ;;  %v14278_v57 = vsub.f32 %v14118_v6, %v8183_v51  ;;  %v14281_v16 = vsub.f32 %v14090_v11, %v8183_v51  ;;  %v8283_v59 = vadd.f32 %v8251_v4, %v8250_v38 }
 0xaac   :  { %v8167_v26 = vpop.xlane.xlu1 %8166 }
 0xaad   :  { %v8229_v56 = vmul.f32 %v14275_v10, %v14275_v10  ;;  %v8230_v43 = vmul.f32 %v14278_v57, %v14278_v57  ;;  %v8285_v48 = vadd.f32 %v8284_v7, %v8283_v59 }
 0xaaf   :  { %v8256_v0 = vmul.f32 %v8229_v56, %v14003_v49  ;;  %v8257_v38 = vmul.f32 %v8230_v43, %v14006_v52 }
 0xab0   :  { %v8172_v45 = vpop.xlane.xlu0 %8171  ;;  %v8142_v25 = vpop.xlane.xlu1 %8141 }
 0xab1   :  { %v8179_v40 = vmul.f32 0.055555556, %v8142_v25  ;;  %v8185_v46 = vmul.f32 0.055555556, %v8172_v45 }
 0xab3   :  { %v14296_v6 = vsub.f32 %v14137_v18, %v8179_v40  ;;  %v14299_v11 = vsub.f32 %v14133_v5, %v8179_v40  ;;  %v14302_v50 = vsub.f32 %v14120_v23, %v8179_v40  ;;  %v8231_v18 = vmul.f32 %v14281_v16, %v14281_v16 }
 0xab4   :  { %v8177_v9 = vpop.xlane.xlu0 %8176  ;;  %v14320_v55 = vsub.f32 %v14155_v39, %v8185_v46  ;;  %v14325_v20 = vsub.f32 %v14167_v44, %v8185_v46  ;;  %v14328_v58 = vsub.f32 %v14147_v36, %v8185_v46  ;;  %v8184_v39 = vmul.f32 0.055555556, %v8167_v26 }
 0xab5   :  { %v8217_v5 = vmul.f32 %v14296_v6, %v14296_v6  ;;  %v8218_v23 = vmul.f32 %v14299_v11, %v14299_v11  ;;  %v8219_v22 = vmul.f32 %v14302_v50, %v14302_v50  ;;  %v8186_v30 = vmul.f32 0.055555556, %v8177_v9 }
 0xab6   :  { %v8235_v44 = vmul.f32 %v14320_v55, %v14320_v55  ;;  %v8258_v17 = vmul.f32 %v8231_v18, %v14009_v31  ;;  %v8236_v45 = vmul.f32 %v14325_v20, %v14325_v20  ;;  %v8237_v40 = vmul.f32 %v14328_v58, %v14328_v58 }
 0xab7   :  { %v8244_v41 = vmul.f32 %v8217_v5, %v14003_v49  ;;  %v8245_v34 = vmul.f32 %v8218_v23, %v14006_v52  ;;  %v8246_v51 = vmul.f32 %v8219_v22, %v14009_v31  ;;  %v14353_v46 = vsub.f32 %v14181_v27, %v8186_v30 }
 0xab8   :  { %v8137_v19 = vpop.xlane.xlu0 %8136  ;;  %v14356_v59 = vsub.f32 %v14188_v24, %v8186_v30  ;;  %v14359_v7 = vsub.f32 %v14175_v53, %v8186_v30  ;;  %v14368_v56 = vsub.f32 %v14128_v47, %v8184_v39  ;;  %v14371_v27 = vsub.f32 %v14140_v35, %v8184_v39 }
 0xab9   :  { %v8178_v33 = vmul.f32 0.055555556, %v8137_v19  ;;  %v8273_v36 = vadd.f32 %v8245_v34, %v8244_v41  ;;  %v8274_v4 = vsel %vm8133_vm6, %v8246_v51, 0.0  ;;  %v14374_v24 = vsub.f32 %v14123_v62, %v8184_v39 }
 0xaba   :  { %v8293_v53 = vadd.f32 %v8257_v38, %v8256_v0  ;;  %v8294_v43 = vsel %vm8133_vm6, %v8258_v17, 0.0  ;;  %v8238_v47 = vmul.f32 %v14353_v46, %v14353_v46  ;;  %v8239_v35 = vmul.f32 %v14356_v59, %v14356_v59 }
 0xabb   :  { %v14342_v3 = vsub.f32 %v14185_v14, %v8178_v33  ;;  %v14345_v26 = vsub.f32 %v14160_v42, %v8178_v33  ;;  %v14348_v25 = vsub.f32 %v14191_v54, %v8178_v33  ;;  %v8275_v9 = vadd.f32 %v8274_v4, %v8273_v36 }
 0xabc   :  { %v8262_v22 = vmul.f32 %v8235_v44, %v14003_v49  ;;  %v8263_v62 = vmul.f32 %v8236_v45, %v14006_v52  ;;  %v8240_v30 = vmul.f32 %v14359_v7, %v14359_v7  ;;  %v8264_v34 = vmul.f32 %v8237_v40, %v14009_v31 }
 0xabd   :  { %v8214_v42 = vmul.f32 %v14342_v3, %v14342_v3  ;;  %v8215_v14 = vmul.f32 %v14345_v26, %v14345_v26  ;;  %v8216_v54 = vmul.f32 %v14348_v25, %v14348_v25  ;;  %8276 = vadd.xlane.f32.xlu0 %v8275_v9  ;;  %v8279_v51 = vsel %vm8133_vm6, %v14284_v21, 0.0 }
 0xabe   :  { %v8253_v39 = vmul.f32 %v14291_v60, %v14003_v49  ;;  %v8254_v33 = vmul.f32 %v8227_v8, %v14006_v52  ;;  %v8255_v0 = vmul.f32 %v8228_v1, %v14009_v31  ;;  %v8232_v38 = vmul.f32 %v14368_v56, %v14368_v56 }
 0xabf   :  { %v8241_v18 = vmul.f32 %v8214_v42, %v14003_v49  ;;  %v8242_v5 = vmul.f32 %v8215_v14, %v14006_v52  ;;  %v8243_v23 = vmul.f32 %v8216_v54, %v14009_v31  ;;  %v8233_v44 = vmul.f32 %v14371_v27, %v14371_v27 }
 0xac0   :  { %v8234_v36 = vmul.f32 %v14374_v24, %v14374_v24  ;;  %v8295_v4 = vadd.f32 %v8294_v43, %v8293_v53  ;;  %v8303_v17 = vadd.f32 %v8263_v62, %v8262_v22  ;;  %v8265_v21 = vmul.f32 %v8238_v47, %v14003_v49  ;;  %v8369_v22 = vld [vmem:[%s15045_s13 + $0x10] sm:$0xff]  ;;  %v8451_v62 = vld [vmem:[%s15046_s14 + $0x18] sm:$0xff] }
 0xac1   :  { %v8268_v19 = vadd.f32 %v8242_v5, %v8241_v18  ;;  %v8269_v41 = vsel %vm8133_vm6, %v8243_v23, 0.0  ;;  %8286 = vadd.xlane.f32.xlu0 %v8285_v48  ;;  %v8266_v60 = vmul.f32 %v8239_v35, %v14006_v52  ;;  %v8304_v8 = vsel %vm8133_vm6, %v8264_v34, 0.0  ;;  %v8370_v35 = vld [vmem:[%s15045_s13 + $0x18] sm:$0xff]  ;;  %v8449_v34 = vld [vmem:[%s15046_s14 + $0x8] sm:$0xff] }
 0xac2   :  { %v8267_v1 = vmul.f32 %v8240_v30, %v14009_v31  ;;  %v8280_v45 = vadd.f32 %v8279_v51, %v14293_v32  ;;  %v8288_v40 = vadd.f32 %v8254_v33, %v8253_v39  ;;  %v8259_v9 = vmul.f32 %v8232_v38, %v14003_v49  ;;  %v8450_v30 = vld [vmem:[%s15046_s14 + $0x10] sm:$0xff]  ;;  %v8448_v51 = vld [vmem:[%s15046_s14] sm:$0xff]  ;;  %v14443_v39 = vpop.permute.xlu1 %8418  ;;  %v14445_v33 = vpop.permute.xlu0 %8499 }
 0xac3   :  { %v8270_v48 = vadd.f32 %v8269_v41, %v8268_v19  ;;  %v8260_v42 = vmul.f32 %v8233_v44, %v14006_v52  ;;  %v8305_v14 = vadd.f32 %v8304_v8, %v8303_v17  ;;  %v8308_v54 = vadd.f32 %v8266_v60, %v8265_v21  ;;  %v8453_v52 = vld [vmem:[%s15046_s14 + $0x28] sm:$0xff]  ;;  %v8367_v41 = vld [vmem:[%s15045_s13] sm:$0xff] }
 0xac4   :  { %v8289_v53 = vsel %vm8133_vm6, %v8255_v0, 0.0  ;;  %v8261_v43 = vmul.f32 %v8234_v36, %v14009_v31  ;;  %v8309_v18 = vsel %vm8133_vm6, %v8267_v1, 0.0  ;;  %v8452_v31 = vld [vmem:[%s15046_s14 + $0x20] sm:$0xff]  ;;  %v8368_v19 = vld [vmem:[%s15045_s13 + $0x8] sm:$0xff]  ;;  %s10507_s13 = smov 1  }
 0xac5   :  { %8271 = vadd.xlane.f32.xlu1 %v8270_v48  ;;  %8296 = vadd.xlane.f32.xlu0 %v8295_v4  ;;  %v8290_v5 = vadd.f32 %v8289_v53, %v8288_v40  ;;  %v8298_v23 = vadd.f32 %v8260_v42, %v8259_v9  ;;  %v8310_v47 = vadd.f32 %v8309_v18, %v8308_v54 }
 0xac6   :  { %v8299_v32 = vsel %vm8133_vm6, %v8261_v43, 0.0  ;;  %v14447_v0 = vpop.permute.xlu1 %8408  ;;  %v14449_v38 = vpop.permute.xlu0 %8489 }
 0xac7   :  { %v8300_v49 = vadd.f32 %v8299_v32, %v8298_v23 }
 0xac9   :  { %8281 = vadd.xlane.f32.xlu1 %v8280_v45  ;;  %8306 = vadd.xlane.f32.xlu0 %v8305_v14 }
 0xaca   :  { %v14451_v44 = vpop.permute.xlu1 %8413  ;;  %v14453_v36 = vpop.permute.xlu0 %8398 }
 0xacd   :  { %8291 = vadd.xlane.f32.xlu1 %v8290_v5  ;;  %8311 = vadd.xlane.f32.xlu0 %v8310_v47 }
 0xace   :  { %v14455_v48 = vpop.permute.xlu1 %8494 }
 0xad1   :  { %8301 = vadd.xlane.f32.xlu1 %v8300_v49 }
 0xad2   :  { %v14457_v17 = vpop.permute.xlu1 %8403 }
 0xae2   :  { %8484 = vperm.xlu1 %10118, %v8453_v52  }
 0xae3   :  { %8479 = vperm.xlu0 %10117, %v8452_v31  }
 0xae6   :  { %8393 = vperm.xlu1 %10118, %v8370_v35  }
 0xae7   :  { %8388 = vperm.xlu0 %10117, %v8369_v22  }
 0xaea   :  { %8474 = vperm.xlu1 %10118, %v8451_v62  }
 0xaeb   :  { %8469 = vperm.xlu0 %10117, %v8450_v30  }
 0xaee   :  { %8383 = vperm.xlu1 %10118, %v8368_v19  }
 0xaef   :  { %8378 = vperm.xlu0 %10117, %v8367_v41  }
 0xaf2   :  { %8464 = vperm.xlu1 %10118, %v8449_v34  }
 0xaf3   :  { %8459 = vperm.xlu0 %10117, %v8448_v51  }
 0xb46   :  { %v8277_v4 = vpop.xlane.xlu0 %8276 }
 0xb47   :  { %v8314_v45 = vmul.f32 0.055555556, %v8277_v4 }
 0xb49   :  { %v8323_v43 = vadd.f32 1e-05, %v8314_v45 }
 0xb4a   :  { %v8287_v21 = vpop.xlane.xlu0 %8286 }
 0xb4e   :  { %v8272_v60 = vpop.xlane.xlu1 %8271  ;;  %v8297_v8 = vpop.xlane.xlu0 %8296 }
 0xb4f   :  { %v8318_v1 = vmul.f32 0.055555556, %v8297_v8  ;;  %v8313_v41 = vmul.f32 0.055555556, %v8272_v60  ;;  %v8316_v8 = vmul.f32 0.055555556, %v8287_v21 }
 0xb51   :  { %v8327_v40 = vadd.f32 1e-05, %v8318_v1 }
 0xb52   :  { %v8282_v9 = vpop.xlane.xlu1 %8281  ;;  %v8307_v14 = vpop.xlane.xlu0 %8306 }
 0xb53   :  { %v8315_v42 = vmul.f32 0.055555556, %v8282_v9  ;;  %10450 = vrsqrt.f32 %v8327_v40  ;;  %v8320_v53 = vmul.f32 0.055555556, %v8307_v14  ;;  %v8322_v40 = vadd.f32 1e-05, %v8313_v41 }
 0xb55   :  { %v8324_v54 = vadd.f32 1e-05, %v8315_v42  ;;  %v8329_v47 = vadd.f32 1e-05, %v8320_v53 }
 0xb56   :  { %v8292_v18 = vpop.xlane.xlu1 %8291  ;;  %v8312_v23 = vpop.xlane.xlu0 %8311 }
 0xb57   :  { %10452 = vrsqrt.f32 %v8324_v54  ;;  %v8317_v5 = vmul.f32 0.055555556, %v8292_v18  ;;  %v8321_v52 = vmul.f32 0.055555556, %v8312_v23  ;;  %v8325_v54 = vadd.f32 1e-05, %v8316_v8 }
 0xb58   :  { %10454 = vrsqrt.f32 %v8323_v43 }
 0xb59   :  { %v8326_v32 = vadd.f32 1e-05, %v8317_v5  ;;  %v8330_v22 = vadd.f32 1e-05, %v8321_v52 }
 0xb5a   :  { %v8302_v49 = vpop.xlane.xlu1 %8301 }
 0xb5b   :  { %10456 = vrsqrt.f32 %v8326_v32  ;;  %v8319_v31 = vmul.f32 0.055555556, %v8302_v49 }
 0xb5c   :  { %10458 = vrsqrt.f32 %v8329_v47 }
 0xb5d   :  { %v8328_v30 = vadd.f32 1e-05, %v8319_v31  ;;  %10460 = vrsqrt.f32 %v8330_v22 }
 0xb5e   :  { %v14459_v35 = vpop.permute.xlu1 %8484  ;;  %v14461_v62 = vpop.permute.xlu0 %8479 }
 0xb5f   :  { %10462 = vrsqrt.f32 %v8328_v30 }
 0xb60   :  { %v14463_v19 = vpop.eup %10450  ;;  %10464 = vrsqrt.f32 %v8322_v40 }
 0xb61   :  { %v8357_v51 = vmul.f32 %v14463_v19, %v14281_v16  ;;  %10466 = vrsqrt.f32 %v8325_v54 }
 0xb62   :  { %v14465_v34 = vpop.permute.xlu1 %8393  ;;  %v14473_v45 = vpop.permute.xlu0 %8388 }
 0xb63   :  { %v8438_v60 = vmul.f32 %v14457_v17, %v8357_v51 }
 0xb64   :  { %v14469_v4 = vpop.eup %10452 }
 0xb65   :  { %v8348_v1 = vmul.f32 %v14469_v4, %v14249_v13  ;;  %v14477_v42 = vpop.eup %10454  ;;  %v14490_v43 = vadd.f32 %v14459_v35, %v8438_v60 }
 0xb66   :  { %v14475_v9 = vpop.permute.xlu1 %8474  ;;  %v14493_v5 = vpop.permute.xlu0 %8469  ;;  %v8344_v23 = vmul.f32 %v14477_v42, %v14299_v11 }
 0xb67   :  { %v8429_v16 = vmul.f32 %v14473_v45, %v8348_v1  ;;  %v15081_v52 = vmax.f32 %v14490_v43, 0.0 }
 0xb68   :  { %v14480_v14 = vpop.eup %10456 }
 0xb69   :  { %v8354_v21 = vmul.f32 %v14480_v14, %v14287_v29  ;;  %v14485_v53 = vpop.eup %10458  ;;  %v14498_v47 = vadd.f32 %v14493_v5, %v8429_v16  ;;  %v8352_v40 = vmul.f32 %v14480_v14, %v14265_v15 }
 0xb6a   :  { %v14487_v13 = vpop.permute.xlu1 %8383  ;;  %v8363_v32 = vmul.f32 %v14485_v53, %v14328_v58  ;;  %v14510_v22 = vpop.eup %10460  ;;  %v8362_v15 = vmul.f32 %v14485_v53, %v14325_v20 }
 0xb6b   :  { %v8435_v18 = vmul.f32 %v14453_v36, %v8354_v21  ;;  %v14501_v29 = vmul.f32 %v14487_v13, %v8344_v23  ;;  %v15082_v49 = vmax.f32 %v14498_v47, 0.0  ;;  %v8366_v1 = vmul.f32 %v14510_v22, %v14359_v7  ;;  %v14530_v60 = vpop.permute.xlu0 %8378 }
 0xb6c   :  { %v14512_v11 = vpop.eup %10462  ;;  %v8444_v41 = vmul.f32 %v14451_v44, %v8363_v32 }
 0xb6d   :  { %15228 = vst [vmem:[#allocation22_spill] sm:$0xff] %v14501_v29  ;;  %v14508_v31 = vadd.f32 %v14461_v62, %v8435_v18  ;;  %v10119_v30 = vpack.i.bf16 %v15082_v49, %v15081_v52  ;;  %v8360_v8 = vmul.f32 %v14512_v11, %v14374_v24  ;;  %v8447_v21 = vmul.f32 %v14443_v39, %v8366_v1  ;;  %v14535_v18 = vpop.eup %10464 }
 0xb6e   :  { %v14522_v51 = vadd.f32 %v14455_v48, %v8444_v41  ;;  %v14550_v32 = vpop.eup %10466  ;;  %v8433_v41 = vmul.f32 %v14453_v36, %v8352_v40 }
 0xb6f   :  { %v15084_v58 = vmax.f32 %v14508_v31, 0.0  ;;  %10120 = vrot.lane.b32.xlu1 %v10119_v30, %s10482_s1  ;;  %v8441_v16 = vmul.f32 %v14447_v0, %v8360_v8  ;;  %v14548_v23 = vadd.f32 %v14445_v33, %v8447_v21  ;;  %v8342_v8 = vmul.f32 %v14535_v18, %v14348_v25  ;;  %v14557_v52 = vpop.permute.xlu0 %8459 }
 0xb70   :  { %v15083_v54 = vmax.f32 %v14522_v51, 0.0  ;;  %v8364_v21 = vmul.f32 %v14510_v22, %v14353_v46  ;;  %v8351_v40 = vmul.f32 %v14550_v32, %v14246_v37  ;;  %v14568_v25 = vadd.f32 %v14461_v62, %v8433_v41 }
 0xb71   :  { %v14545_v7 = vadd.f32 %v14449_v38, %v8441_v16  ;;  %v15085_v20 = vmax.f32 %v14548_v23, 0.0  ;;  %v8443_v16 = vmul.f32 %v14451_v44, %v8362_v15  ;;  %v8423_v49 = vmul.f32 %v14530_v60, %v8342_v8 }
 0xb72   :  { %v10134_v24 = vpack.i.bf16 %v15084_v58, %v15083_v54  ;;  %v8345_v54 = vmul.f32 %v14477_v42, %v14302_v50  ;;  %v8432_v46 = vmul.f32 %v14465_v34, %v8351_v40  ;;  %v14578_v58 = vpop.permute.xlu1 %8464  ;;  %v8541_v8 = vmax.f32 %v14568_v25, 0.0 }
 0xb73   :  { %10125 = vrot.lane.b32.xlu1 %v10119_v30, %s15197_s8  ;;  %v15086_v1 = vmax.f32 %v14545_v7, 0.0  ;;  %v14581_v37 = vadd.f32 %v14557_v52, %v8423_v49  ;;  %v8524_v50 = vadd.f32 %v14455_v48, %v8443_v16  ;;  %v8359_v16 = vmul.f32 %v14512_v11, %v14371_v27 }
 0xb74   :  { %10135 = vrot.lane.b32.xlu0 %v10134_v24, %s15197_s8  ;;  %v8426_v41 = vmul.f32 %v14487_v13, %v8345_v54  ;;  %v14589_v29 = vadd.f32 %v14475_v9, %v8432_v46 }
 0xb75   :  { %v10149_v15 = vpack.i.bf16 %v15086_v1, %v15085_v20  ;;  %v8531_v49 = vmax.f32 %v14581_v37, 0.0  ;;  %v8551_v54 = vmax.f32 %v8524_v50, 0.0  ;;  %v8355_v50 = vmul.f32 %v14463_v19, %v14275_v10 }
 0xb76   :  { %v14592_v40 = vadd.f32 %v14578_v58, %v8426_v41  ;;  %v8540_v46 = vmax.f32 %v14589_v29, 0.0 }
 0xb77   :  { %10130 = vrot.lane.b32.xlu1 %v10134_v24, %s10482_s1  ;;  %v14609_v1 = vpack.i.bf16 %v8541_v8, %v8551_v54 }
 0xb78   :  { %10140 = vrot.lane.b32.xlu0 %v10134_v24, %s15198_s9  ;;  %v8445_v24 = vmul.f32 %v14443_v39, %v8364_v21  ;;  %v8353_v21 = vmul.f32 %v14480_v14, %v14272_v12  ;;  %v8534_v41 = vmax.f32 %v14592_v40, 0.0  ;;  %v10159_v12 = vpack.i.bf16 %v8531_v49, %v8540_v46 }
 0xb79   :  { %v8440_v14 = vmul.f32 %v14447_v0, %v8359_v16 }
 0xb7a   :  { %v14598_v20 = vadd.f32 %v14445_v33, %v8445_v24 }
 0xb7b   :  { %10150 = vrot.lane.b32.xlu1 %v10149_v15, %s15197_s8  ;;  %v8521_v24 = vadd.f32 %v14449_v38, %v8440_v14 }
 0xb7c   :  { %10145 = vrot.lane.b32.xlu0 %v10149_v15, %s10482_s1  ;;  %v8553_v27 = vmax.f32 %v14598_v20, 0.0 }
 0xb7e   :  { %v10189_v10 = vpack.i.bf16 %v8553_v27, %v8534_v41 }
 0xb7f   :  { %10165 = vrot.lane.b32.xlu1 %v10119_v30, %s15198_s9  ;;  %v8361_v30 = vmul.f32 %v14485_v53, %v14320_v55  ;;  %v8436_v53 = vmul.f32 %v14457_v17, %v8355_v50 }
 0xb80   :  { %10155 = vrot.lane.b32.xlu0 %v10149_v15, %s15198_s9  ;;  %v8434_v15 = vmul.f32 %v14453_v36, %v8353_v21  ;;  %v8346_v21 = vmul.f32 %v14469_v4, %v14234_v28 }
 0xb81   :  { %v8442_v55 = vmul.f32 %v14451_v44, %v8361_v30  ;;  %v14639_v16 = vadd.f32 %v14459_v35, %v8436_v53  ;;  %v8548_v44 = vmax.f32 %v8521_v24, 0.0  ;;  %v8356_v30 = vmul.f32 %v14463_v19, %v14278_v57 }
 0xb82   :  { %v8515_v54 = vadd.f32 %v14461_v62, %v8434_v15  ;;  %v8427_v14 = vmul.f32 %v14473_v45, %v8346_v21  ;;  %v8340_v57 = vmul.f32 %v14535_v18, %v14342_v3 }
 0xb83   :  { %10185 = vrot.lane.b32.xlu1 %v14609_v1, %s10482_s1  ;;  %v14636_v36 = vadd.f32 %v14455_v48, %v8442_v55  ;;  %v8544_v48 = vmax.f32 %v14639_v16, 0.0  ;;  %v8437_v15 = vmul.f32 %v14457_v17, %v8356_v30 }
 0xb84   :  { %10160 = vrot.lane.b32.xlu0 %v10159_v12, %s10482_s1  ;;  %v8542_v50 = vmax.f32 %v8515_v54, 0.0  ;;  %v14663_v55 = vadd.f32 %v14493_v5, %v8427_v14  ;;  %v8421_v53 = vmul.f32 %v14530_v60, %v8340_v57  ;;  %v8347_v54 = vmul.f32 %v14469_v4, %v14237_v63 }
 0xb85   :  { %v8550_v62 = vmax.f32 %v14636_v36, 0.0  ;;  %v8518_v17 = vadd.f32 %v14459_v35, %v8437_v15  ;;  %v8349_v63 = vmul.f32 %v14550_v32, %v14240_v2  ;;  %v8343_v4 = vmul.f32 %v14477_v42, %v14296_v6 }
 0xb86   :  { %v10214_v19 = vpack.i.bf16 %v8544_v48, %v8542_v50  ;;  %v14670_v3 = vadd.f32 %v14557_v52, %v8421_v53  ;;  %v8535_v21 = vmax.f32 %v14663_v55, 0.0  ;;  %v8428_v35 = vmul.f32 %v14473_v45, %v8347_v54 }
 0xb87   :  { %10190 = vrot.lane.b32.xlu1 %v10189_v10, %s10482_s1  ;;  %v10179_v28 = vpack.i.bf16 %v8550_v62, %v8548_v44  ;;  %v8545_v44 = vmax.f32 %v8518_v17, 0.0  ;;  %v8341_v14 = vmul.f32 %v14535_v18, %v14345_v26  ;;  %v8430_v15 = vmul.f32 %v14465_v34, %v8349_v63 }
 0xb88   :  { %10170 = vrot.lane.b32.xlu0 %v10159_v12, %s15197_s8  ;;  %v8529_v30 = vmax.f32 %v14670_v3, 0.0  ;;  %v8509_v57 = vadd.f32 %v14493_v5, %v8428_v35  ;;  %v8424_v2 = vmul.f32 %v14487_v13, %v8343_v4  ;;  %v8365_v26 = vmul.f32 %v14510_v22, %v14356_v59 }
 0xb89   :  { %v8422_v6 = vmul.f32 %v14530_v60, %v8341_v14  ;;  %v14706_v42 = vadd.f32 %v14475_v9, %v8430_v15  ;;  %v15229_v35 = vmax.f32 %v14508_v31, 0.0 }
 0xb8a   :  { %v14709_v18 = vadd.f32 %v14578_v58, %v8424_v2  ;;  %v8536_v13 = vmax.f32 %v8509_v57, 0.0  ;;  %v8446_v5 = vmul.f32 %v14443_v39, %v8365_v26  ;;  %v15231_v26 = vmax.f32 %v14498_v47, 0.0 }
 0xb8b   :  { %10195 = vrot.lane.b32.xlu1 %v10189_v10, %s15197_s8  ;;  %v8538_v59 = vmax.f32 %v14706_v42, 0.0 }
 0xb8c   :  { %10175 = vrot.lane.b32.xlu0 %v10159_v12, %s15198_s9  ;;  %v8350_v12 = vmul.f32 %v14550_v32, %v14243_v61 }
 0xb8e   :  { %v8431_v24 = vmul.f32 %v14465_v34, %v8350_v12 }
 0xb8f   :  { %10210 = vrot.lane.b32.xlu1 %v14609_v1, %s15197_s8 }
 0xb90   :  { %10180 = vrot.lane.b32.xlu0 %v10179_v28, %s10482_s1  ;;  %v8512_v61 = vadd.f32 %v14475_v9, %v8431_v24  ;;  %v8532_v9 = vmax.f32 %v14709_v18, 0.0 }
 0xb92   :  { %v8539_v50 = vmax.f32 %v8512_v61, 0.0 }
 0xb93   :  { %10215 = vrot.lane.b32.xlu1 %v10214_v19, %s10482_s1 }
 0xb94   :  { %10200 = vrot.lane.b32.xlu0 %v10189_v10, %s15198_s9  ;;  %v10219_v10 = vpack.i.bf16 %v8535_v21, %v8545_v44  ;;  %v14693_v45 = vpack.i.bf16 %v8529_v30, %v8539_v50 }
 0xb97   :  { %10225 = vrot.lane.b32.xlu1 %v10179_v28, %s15198_s9 }
 0xb98   :  { %10205 = vrot.lane.b32.xlu0 %v10179_v28, %s15197_s8  ;;  %v8358_v28 = vmul.f32 %v14512_v11, %v14368_v56  ;;  %v8503_v56 = vadd.f32 %v14557_v52, %v8422_v6  ;;  %v14725_v52 = vpack.i.bf16 %v8538_v59, %v8536_v13 }
 0xb9a   :  { %v8439_v34 = vmul.f32 %v14447_v0, %v8358_v28  ;;  %v8530_v22 = vmax.f32 %v8503_v56, 0.0  ;;  %v8527_v0 = vadd.f32 %v14445_v33, %v8446_v5 }
 0xb9b   :  { %10235 = vrot.lane.b32.xlu1 %v10214_v19, %s15197_s8 }
 0xb9c   :  { %10220 = vrot.lane.b32.xlu0 %v10219_v10, %s10482_s1  ;;  %v14721_v11 = vadd.f32 %v14449_v38, %v8439_v34  ;;  %v14734_v39 = vpack.i.bf16 %v8532_v9, %v8530_v22  ;;  %v8554_v38 = vmax.f32 %v8527_v0, 0.0 }
 0xb9e   :  { %v8547_v60 = vmax.f32 %v14721_v11, 0.0 }
 0xb9f   :  { %10250 = vrot.lane.b32.xlu1 %v14693_v45, %s10482_s1 }
 0xba0   :  { %10230 = vrot.lane.b32.xlu0 %v14609_v1, %s15198_s9  ;;  %v10279_v32 = vpack.i.bf16 %v8547_v60, %v8554_v38  ;;  %v15232_v38 = vmax.f32 %v14490_v43, 0.0 }
 0xba3   :  { %10260 = vrot.lane.b32.xlu1 %v10219_v10, %s15198_s9 }
 0xba4   :  { %10240 = vrot.lane.b32.xlu0 %v10219_v10, %s15197_s8  ;;  %v15230_v10 = vmax.f32 %v14522_v51, 0.0 }
 0xba7   :  { %10270 = vrot.lane.b32.xlu1 %v14693_v45, %s15197_s8 }
 0xba8   :  { %10245 = vrot.lane.b32.xlu0 %v14725_v52, %s10482_s1 }
 0xbab   :  { %10275 = vrot.lane.b32.xlu1 %v14734_v39, %s10482_s1 }
 0xbac   :  { %10255 = vrot.lane.b32.xlu0 %v10214_v19, %s15198_s9 }
 0xbaf   :  { %10280 = vrot.lane.b32.xlu1 %v10279_v32, %s10482_s1 }
 0xbb0   :  { %10265 = vrot.lane.b32.xlu0 %v14725_v52, %s15197_s8 }
 0xbb3   :  { %10290 = vrot.lane.b32.xlu1 %v10279_v32, %s15198_s9 }
 0xbb4   :  { %10285 = vrot.lane.b32.xlu0 %v10279_v32, %s15197_s8 }
 0xbe1   :  { %v10121_v33 = vpop.permute.xlu1 %10120 }
 0xbe2   :  { %v10123_v54 = vunpack.i.h.bf16 %v10121_v33  ;;  %v10122_v4 = vunpack.i.l.bf16 %v10121_v33 }
 0xbe4   :  { %v8670_v56 = vmax.f32 %v15231_v26, %v10123_v54  ;;  %v8676_v51 = vmax.f32 %v15232_v38, %v10122_v4  ;;  %v15235_v26 = vld [vmem:[#allocation22_spill] sm:$0xff] }
 0xbe5   :  { %v10126_v1 = vpop.permute.xlu1 %10125 }
 0xbe6   :  { %v10136_v12 = vpop.permute.xlu0 %10135  ;;  %v10128_v14 = vunpack.i.h.bf16 %v10126_v1  ;;  %v10127_v34 = vunpack.i.l.bf16 %v10126_v1 }
 0xbe7   :  { %v10138_v61 = vunpack.i.h.bf16 %v10136_v12  ;;  %v10137_v44 = vunpack.i.l.bf16 %v10136_v12 }
 0xbe8   :  { %v8770_v32 = vmax.f32 %v8670_v56, %v10128_v14  ;;  %v8776_v1 = vmax.f32 %v8676_v51, %v10127_v34  ;;  %v8506_v56 = vadd.f32 %v14578_v58, %v15235_v26 }
 0xbe9   :  { %v10131_v53 = vpop.permute.xlu1 %10130 }
 0xbea   :  { %v10133_v17 = vunpack.i.h.bf16 %v10131_v53  ;;  %v10132_v24 = vunpack.i.l.bf16 %v10131_v53  ;;  %v10141_v19 = vpop.permute.xlu0 %10140 }
 0xbeb   :  { %v10143_v15 = vunpack.i.h.bf16 %v10141_v19  ;;  %v10142_v57 = vunpack.i.l.bf16 %v10141_v19  ;;  %v15234_v19 = vmax.f32 %v14548_v23, 0.0 }
 0xbec   :  { %v8674_v50 = vmax.f32 %v15229_v35, %v10133_v17  ;;  %v8680_v63 = vmax.f32 %v15230_v10, %v10132_v24  ;;  %v15233_v17 = vmax.f32 %v14545_v7, 0.0 }
 0xbed   :  { %v10151_v28 = vpop.permute.xlu1 %10150 }
 0xbee   :  { %v8774_v2 = vmax.f32 %v8674_v50, %v10138_v61  ;;  %v8780_v6 = vmax.f32 %v8680_v63, %v10137_v44  ;;  %v10146_v13 = vpop.permute.xlu0 %10145  ;;  %v10153_v33 = vunpack.i.h.bf16 %v10151_v28  ;;  %v10152_v61 = vunpack.i.l.bf16 %v10151_v28 }
 0xbef   :  { %v10148_v0 = vunpack.i.h.bf16 %v10146_v13  ;;  %v10147_v31 = vunpack.i.l.bf16 %v10146_v13 }
 0xbf0   :  { %v8874_v5 = vmax.f32 %v8774_v2, %v10143_v15  ;;  %v8880_v22 = vmax.f32 %v8780_v6, %v10142_v57 }
 0xbf1   :  { %v10166_v12 = vpop.permute.xlu1 %10165  ;;  %v8678_v24 = vmax.f32 %v15233_v17, %v10148_v0  ;;  %v8682_v47 = vmax.f32 %v15234_v19, %v10147_v31  ;;  %v8533_v0 = vmax.f32 %v8506_v56, 0.0 }
 0xbf2   :  { %v10299_v53 = vpack.i.bf16 %v8874_v5, %v8880_v22  ;;  %v10168_v54 = vunpack.i.h.bf16 %v10166_v12  ;;  %v10167_v44 = vunpack.i.l.bf16 %v10166_v12  ;;  %v10156_v35 = vpop.permute.xlu0 %10155 }
 0xbf3   :  { %v10158_v10 = vunpack.i.h.bf16 %v10156_v35  ;;  %v10157_v63 = vunpack.i.l.bf16 %v10156_v35  ;;  %v8778_v43 = vmax.f32 %v8678_v24, %v10153_v33  ;;  %v8782_v14 = vmax.f32 %v8682_v47, %v10152_v61 }
 0xbf4   :  { %v8870_v50 = vmax.f32 %v8770_v32, %v10168_v54  ;;  %10300 = vrot.lane.b32.xlu1 %v10299_v53, %s10507_s13  ;;  %v8876_v4 = vmax.f32 %v8776_v1, %v10167_v44 }
 0xbf5   :  { %v14760_v15 = vpop.permute.xlu1 %10185  ;;  %v8878_v57 = vmax.f32 %v8778_v43, %v10158_v10  ;;  %v8882_v23 = vmax.f32 %v8782_v14, %v10157_v63  ;;  %v8943_v10 = vld [vmem:[%s15047_s17 + $0x20] sm:$0xf]  ;;  %v8942_v43 = vld [vmem:[%s15047_s17 + $0x18] sm:$0xff] }
 0xbf6   :  { %v10294_v7 = vpack.i.bf16 %v8870_v50, %v8876_v4  ;;  %v10161_v2 = vpop.permute.xlu0 %10160  ;;  %v10187_v53 = vunpack.i.l.bf16 %v14760_v15 }
 0xbf7   :  { %v10162_v6 = vunpack.i.l.bf16 %v10161_v2  ;;  %v10304_v34 = vpack.i.bf16 %v8878_v57, %v8882_v23  ;;  %v10163_v29 = vunpack.i.h.bf16 %v10161_v2  ;;  %v8940_v57 = vld [vmem:[%s15047_s17 + $0x8] sm:$0xff]  ;;  %v8941_v23 = vld [vmem:[%s15047_s17 + $0x10] sm:$0xff] }
 0xbf8   :  { %10310 = vrot.lane.b32.xlu1 %v14725_v52, %s15198_s9  ;;  %10295 = vrot.lane.b32.xlu0 %v10294_v7, %s10507_s13 }
 0xbf9   :  { %v14765_v28 = vpop.permute.xlu1 %10190  ;;  %v8672_v52 = vmax.f32 %v8540_v46, %v10162_v6  ;;  %v8666_v44 = vmax.f32 %v8531_v49, %v10163_v29  ;;  %v8939_v6 = vld [vmem:[%s15047_s17] sm:$0xff] }
 0xbfa   :  { %v10171_v13 = vpop.permute.xlu0 %10170  ;;  %v10192_v33 = vunpack.i.l.bf16 %v14765_v28 }
 0xbfb   :  { %v10172_v5 = vunpack.i.l.bf16 %v10171_v13  ;;  %v10173_v54 = vunpack.i.h.bf16 %v10171_v13 }
 0xbfc   :  { %10320 = vrot.lane.b32.xlu1 %v14734_v39, %s15197_s8  ;;  %10305 = vrot.lane.b32.xlu0 %v10304_v34, %s10507_s13  ;;  %v8668_v47 = vmax.f32 %v8534_v41, %v10192_v33 }
 0xbfd   :  { %v14772_v22 = vpop.permute.xlu1 %10195  ;;  %v8772_v38 = vmax.f32 %v8672_v52, %v10172_v5  ;;  %v8766_v40 = vmax.f32 %v8666_v44, %v10173_v54 }
 0xbfe   :  { %v10176_v31 = vpop.permute.xlu0 %10175  ;;  %v10197_v46 = vunpack.i.l.bf16 %v14772_v22 }
 0xbff   :  { %v10177_v51 = vunpack.i.l.bf16 %v10176_v31  ;;  %v10178_v50 = vunpack.i.h.bf16 %v10176_v31 }
 0xc00   :  { %8591 = vrot.lane.b32.xlu0 %v8533_v0, %s10482_s1  ;;  %v8768_v35 = vmax.f32 %v8668_v47, %v10197_v46 }
 0xc01   :  { %v14777_v58 = vpop.permute.xlu1 %10210  ;;  %v8872_v32 = vmax.f32 %v8772_v38, %v10177_v51  ;;  %v8866_v37 = vmax.f32 %v8766_v40, %v10178_v50  ;;  %v10193_v38 = vunpack.i.h.bf16 %v14765_v28 }
 0xc02   :  { %v14780_v12 = vpop.permute.xlu0 %10180 }
 0xc03   :  { %v10183_v17 = vunpack.i.h.bf16 %v14780_v12  ;;  %8898 = vrot.lane.b32.xlu1 %v8872_v32, %s10507_s13 }
 0xc04   :  { %10315 = vrot.lane.b32.xlu0 %v14693_v45, %s15198_s9 }
 0xc05   :  { %v14788_v24 = vpop.permute.xlu1 %10215  ;;  %v14791_v19 = vsel %vm341_vm4, %v10183_v17, %v10187_v53  ;;  %v10198_v53 = vunpack.i.h.bf16 %v14772_v22  ;;  %v10188_v22 = vunpack.i.h.bf16 %v14760_v15  ;;  %v10213_v15 = vunpack.i.h.bf16 %v14777_v58 }
 0xc06   :  { %v10201_v1 = vpop.permute.xlu0 %10200  ;;  %v10217_v28 = vunpack.i.l.bf16 %v14788_v24 }
 0xc07   :  { %v10202_v61 = vunpack.i.l.bf16 %v10201_v1  ;;  %8791 = vrot.lane.b32.xlu1 %v8533_v0, %s15198_s9  ;;  %v10203_v47 = vunpack.i.h.bf16 %v10201_v1  ;;  %v10212_v1 = vunpack.i.l.bf16 %v14777_v58 }
 0xc08   :  { %8691 = vrot.lane.b32.xlu0 %v8533_v0, %s15197_s8 }
 0xc09   :  { %v14799_v45 = vpop.permute.xlu1 %10225  ;;  %v8868_v41 = vmax.f32 %v8768_v35, %v10202_v61 }
 0xc0a   :  { %v10206_v63 = vpop.permute.xlu0 %10205 }
 0xc0b   :  { %8966 = vperm.xlu1 %10118, %v8943_v10   ;;  %v10329_v4 = vpack.i.bf16 %v8868_v41, %v8866_v37  ;;  %v10182_v10 = vunpack.i.l.bf16 %v14780_v12  ;;  %v10208_v41 = vunpack.i.h.bf16 %v10206_v63  ;;  %v8642_v37 = vsel %vm341_vm4, %v10188_v22, %v10217_v28 }
 0xc0c   :  { %10325 = vrot.lane.b32.xlu0 %v14734_v39, %s15198_s9 }
 0xc0d   :  { %v14809_v49 = vpop.permute.xlu1 %10235 }
 0xc0e   :  { %v14811_v14 = vpop.permute.xlu0 %10220  ;;  %v10238_v11 = vunpack.i.h.bf16 %v14809_v49 }
 0xc0f   :  { %8961 = vperm.xlu1 %10118, %v8942_v43   ;;  %v10207_v43 = vunpack.i.l.bf16 %v10206_v63  ;;  %v10222_v20 = vunpack.i.l.bf16 %v14811_v14  ;;  %v10228_v63 = vunpack.i.h.bf16 %v14799_v45  ;;  %v10223_v25 = vunpack.i.h.bf16 %v14811_v14 }
 0xc10   :  { %10330 = vrot.lane.b32.xlu0 %v10329_v4, %s10507_s13 }
 0xc11   :  { %v14814_v7 = vpop.permute.xlu1 %10250 }
 0xc12   :  { %v14822_v2 = vpop.permute.xlu0 %10230  ;;  %v10253_v55 = vunpack.i.h.bf16 %v14814_v7 }
 0xc13   :  { %8951 = vperm.xlu1 %10118, %v8940_v57   ;;  %v10232_v4 = vunpack.i.l.bf16 %v14822_v2  ;;  %v10218_v57 = vunpack.i.h.bf16 %v14788_v24  ;;  %v14869_v24 = vmax.f32 %v8541_v8, %v8642_v37 }
 0xc14   :  { %8956 = vperm.xlu0 %10117, %v8941_v23   ;;  %v10237_v23 = vunpack.i.l.bf16 %v14809_v49 }
 0xc15   :  { %v14824_v39 = vpop.permute.xlu1 %10260 }
 0xc16   :  { %v14829_v26 = vpop.permute.xlu0 %10240 }
 0xc17   :  { %v10242_v8 = vunpack.i.l.bf16 %v14829_v26 }
 0xc18   :  { %8946 = vperm.xlu0 %10117, %v8939_v6   ;;  %v8745_v6 = vsel %vm1373_vm12, %v10208_v41, %v10212_v1 }
 0xc19   :  { %v14831_v56 = vpop.permute.xlu1 %10270  ;;  %v8743_v28 = vsel %vm1373_vm12, %v10238_v11, %v10242_v8 }
 0xc1a   :  { %v14833_v34 = vpop.permute.xlu0 %10245 }
 0xc1d   :  { %v14835_v13 = vpop.permute.xlu1 %10275 }
 0xc1e   :  { %v14837_v5 = vpop.permute.xlu0 %10255 }
 0xc1f   :  { %v10258_v14 = vunpack.i.h.bf16 %v14837_v5 }
 0xc21   :  { %v10281_v52 = vpop.permute.xlu1 %10280 }
 0xc22   :  { %v10282_v0 = vunpack.i.l.bf16 %v10281_v52  ;;  %v14839_v31 = vpop.permute.xlu0 %10265  ;;  %v10283_v50 = vunpack.i.h.bf16 %v10281_v52 }
 0xc23   :  { %v10267_v22 = vunpack.i.l.bf16 %v14839_v31 }
 0xc24   :  { %v8646_v32 = vsel %vm341_vm4, %v10193_v38, %v10282_v0  ;;  %v8679_v0 = vmax.f32 %v8550_v62, %v14791_v19  ;;  %v8643_v38 = vsel %vm341_vm4, %v10218_v57, %v10222_v20  ;;  %v8742_v62 = vsel %vm1373_vm12, %v10213_v15, %v10237_v23 }
 0xc25   :  { %v10291_v51 = vpop.permute.xlu1 %10290  ;;  %v8681_v46 = vmax.f32 %v8553_v27, %v8646_v32  ;;  %v8644_v27 = vsel %vm341_vm4, %v10283_v50, %v10182_v10  ;;  %v8675_v19 = vmax.f32 %v8544_v48, %v8643_v38  ;;  %v10262_v48 = vunpack.i.l.bf16 %v14824_v39 }
 0xc26   :  { %v10286_v33 = vpop.permute.xlu0 %10285  ;;  %v10292_v17 = vunpack.i.l.bf16 %v10291_v51  ;;  %v8677_v52 = vmax.f32 %v8547_v60, %v8644_v27  ;;  %v10293_v32 = vunpack.i.h.bf16 %v10291_v51  ;;  %v8845_v60 = vsel %vm1631_vm14, %v10228_v63, %v10232_v4 }
 0xc27   :  { %v10287_v29 = vunpack.i.l.bf16 %v10286_v33  ;;  %v10288_v40 = vunpack.i.h.bf16 %v10286_v33  ;;  %v8779_v36 = vmax.f32 %v8679_v0, %v8745_v6  ;;  %v10252_v51 = vunpack.i.l.bf16 %v14814_v7 }
 0xc28   :  { %v8846_v44 = vsel %vm1631_vm14, %v10203_v47, %v10292_v17  ;;  %v10247_v47 = vunpack.i.l.bf16 %v14833_v34  ;;  %v10268_v10 = vunpack.i.h.bf16 %v14839_v31  ;;  %v10243_v20 = vunpack.i.h.bf16 %v14829_v26 }
 0xc29   :  { %v8746_v54 = vsel %vm1373_vm12, %v10198_v53, %v10287_v29  ;;  %v8744_v12 = vsel %vm1373_vm12, %v10288_v40, %v10207_v43  ;;  %v10227_v53 = vunpack.i.l.bf16 %v14799_v45  ;;  %v10233_v29 = vunpack.i.h.bf16 %v14822_v2 }
 0xc2a   :  { %v8781_v61 = vmax.f32 %v8681_v46, %v8746_v54  ;;  %v8777_v17 = vmax.f32 %v8677_v52, %v8744_v12  ;;  %v8879_v49 = vmax.f32 %v8779_v36, %v8845_v60  ;;  %v10248_v46 = vunpack.i.h.bf16 %v14833_v34 }
 0xc2b   :  { %v8844_v54 = vsel %vm1631_vm14, %v10293_v32, %v10227_v53  ;;  %v10257_v2 = vunpack.i.l.bf16 %v14837_v5  ;;  %v10272_v27 = vunpack.i.l.bf16 %v14831_v56  ;;  %v8640_v57 = vsel %vm341_vm4, %v10223_v25, %v10247_v47 }
 0xc2c   :  { %v8881_v35 = vmax.f32 %v8781_v61, %v8846_v44  ;;  %v8877_v44 = vmax.f32 %v8777_v17, %v8844_v54  ;;  %v8641_v5 = vsel %vm341_vm4, %v10248_v46, %v10252_v51  ;;  %v8843_v23 = vsel %vm1631_vm14, %v10258_v14, %v10262_v48 }
 0xc2d   :  { %v8773_v12 = vmax.f32 %v14869_v24, %v8742_v62  ;;  %v8775_v15 = vmax.f32 %v8675_v19, %v8743_v28  ;;  %v10263_v26 = vunpack.i.h.bf16 %v14824_v39  ;;  %v8842_v6 = vsel %vm1631_vm14, %v10233_v29, %v10257_v2 }
 0xc2e   :  { %v8741_v52 = vsel %vm1373_vm12, %v10268_v10, %v10272_v27  ;;  %v8740_v0 = vsel %vm1373_vm12, %v10243_v20, %v10267_v22  ;;  %v8671_v38 = vmax.f32 %v8538_v59, %v8641_v5  ;;  %v8669_v24 = vmax.f32 %v8535_v21, %v8640_v57 }
 0xc2f   :  { %v8875_v32 = vmax.f32 %v8775_v15, %v8843_v23  ;;  %v15236_v17 = vmov 0.0   ;;  %v10277_v39 = vunpack.i.l.bf16 %v14835_v13  ;;  %v8873_v8 = vmax.f32 %v8773_v12, %v8842_v6  ;;  %v10432_v23 = vld [vmem:[%s15048_s16] sm:$0xff]   ;;  %v10434_v12 = vld [vmem:[%s15048_s16 + $0x10] ss:$0 sps:$4 sm:$0x33]  }
 0xc30   :  { %v8769_v19 = vmax.f32 %v8669_v24, %v8740_v0  ;;  %v8771_v42 = vmax.f32 %v8671_v38, %v8741_v52  ;;  %v10278_v21 = vunpack.i.h.bf16 %v14835_v13  ;;  %v10273_v29 = vunpack.i.h.bf16 %v14831_v56 }
 0xc66   :  { %v14872_v33 = vpop.permute.xlu1 %10300 }
 0xc67   :  { %v10302_v45 = vunpack.i.l.bf16 %v14872_v33  ;;  %v10303_v53 = vunpack.i.h.bf16 %v14872_v33 }
 0xc69   :  { %v8927_v34 = vsel %vm8919_vm7, %v8879_v49, %v10302_v45  ;;  %v8924_v45 = vsel %vm8919_vm7, %v8873_v8, %v10303_v53 }
 0xc6a   :  { %v14874_v58 = vpop.permute.xlu0 %10295  ;;  %v10311_v40 = vpop.permute.xlu1 %10310 }
 0xc6b   :  { %v10312_v31 = vunpack.i.l.bf16 %v10311_v40  ;;  %v10297_v63 = vunpack.i.l.bf16 %v14874_v58  ;;  %v10313_v36 = vunpack.i.h.bf16 %v10311_v40 }
 0xc6d   :  { %v8840_v62 = vsel %vm1631_vm14, %v10263_v26, %v10312_v31  ;;  %v8925_v59 = vsel %vm8919_vm7, %v8875_v32, %v10297_v63  ;;  %v10433_v31 = vld [vmem:[%s15048_s16 + $0x8] sm:$0xff]  }
 0xc6e   :  { %v10306_v61 = vpop.permute.xlu0 %10305  ;;  %v10321_v11 = vpop.permute.xlu1 %10320  ;;  %v8869_v49 = vmax.f32 %v8769_v19, %v8840_v62  ;;  %v8936_v14 = vpack.c.bf16 %v8925_v59, %v8924_v45 }
 0xc6f   :  { %v10308_v50 = vunpack.i.h.bf16 %v10306_v61  ;;  %v10307_v16 = vunpack.i.l.bf16 %v10306_v61  ;;  %v10322_v33 = vunpack.i.l.bf16 %v10321_v11  ;;  %v8638_v61 = vsel %vm341_vm4, %v10253_v55, %v10277_v39 }
 0xc70   :  { %v10323_v7 = vunpack.i.h.bf16 %v10321_v11  ;;  %v8665_v48 = vmax.f32 %v8529_v30, %v8638_v61 }
 0xc71   :  { %v8926_v41 = vsel %vm8919_vm7, %v8877_v44, %v10308_v50  ;;  %v8928_v43 = vsel %vm8919_vm7, %v8881_v35, %v10307_v16  ;;  %v10298_v44 = vunpack.i.h.bf16 %v14874_v58  ;;  %v8738_v56 = vsel %vm1373_vm12, %v10273_v29, %v10322_v33 }
 0xc72   :  { %v8937_v1 = vpack.c.bf16 %v8927_v34, %v8926_v41  ;;  %v8592_v37 = vpop.permute.xlu0 %8591  ;;  %v8938_v4 = vpack.c.bf16 %v8928_v43, %v8928_v43  ;;  %v8765_v41 = vmax.f32 %v8665_v48, %v8738_v56 }
 0xc73   :  { %v8639_v13 = vsel %vm341_vm4, %v10278_v21, %v8592_v37  ;;  %v8922_v10 = vsel %vm8919_vm7, %v8869_v49, %v10298_v44  ;;  %vm8982_vm4 = vcmask 588800   ;;  %v9122_v49 = vld [vmem:[%s15049_s18 + $0x20] sm:$0xf] }
 0xc74   :  { %v8993_v35 = vsel %vm5190_vm13, %v8938_v4, 0  ;;  %v8667_v28 = vmax.f32 %v8532_v9, %v8639_v13 }
 0xc75   :  { %10056 = vmatpush3.bf16.msra.mxu0 %v8993_v35  ;;  %v8899_v46 = vpop.permute.xlu1 %8898 }
 0xc76   :  { %v10316_v60 = vpop.permute.xlu0 %10315  ;;  %10057 = vmatprep.subr.bf16.mxu0 %v15236_v17 }
 0xc77   :  { %v10317_v25 = vunpack.i.l.bf16 %v10316_v60  ;;  %v10318_v40 = vunpack.i.h.bf16 %v10316_v60 }
 0xc79   :  { %v8841_v51 = vsel %vm1631_vm14, %v10313_v36, %v10317_v25  ;;  %10058 = vmatpush3.bf16.msra.mxu0 %v8937_v1  ;;  %v8792_v43 = vpop.permute.xlu1 %8791 }
 0xc7a   :  { %v8871_v47 = vmax.f32 %v8771_v42, %v8841_v51  ;;  %v8692_v54 = vpop.permute.xlu0 %8691  ;;  %10059 = vmatprep.subr.bf16.mxu0 %v15236_v17 }
 0xc7b   :  { %v8739_v16 = vsel %vm1373_vm12, %v10323_v7, %v8692_v54  ;;  %vm9064_vm12 = vcmask 11264   ;;  %v9157_v54 = vld [vmem:[%s15050_s19 + $0x20] sm:$0xf] }
 0xc7c   :  { %v8923_v50 = vsel %vm8919_vm7, %v8871_v47, %v8899_v46  ;;  %v8767_v20 = vmax.f32 %v8667_v28, %v8739_v16  ;;  %v9120_v46 = vld [vmem:[%s15049_s18 + $0x10] sm:$0xff]  ;;  %v9121_v47 = vld [vmem:[%s15049_s18 + $0x18] sm:$0xff] }
 0xc7d   :  { %10060 = vmatpush3.bf16.msra.mxu0 %v8936_v14  ;;  %v8935_v34 = vpack.c.bf16 %v8923_v50, %v8922_v10 }
 0xc7e   :  { %v10326_v2 = vpop.permute.xlu0 %10325  ;;  %10061 = vmatprep.subr.bf16.mxu0 %v15236_v17 }
 0xc7f   :  { %v10328_v58 = vunpack.i.h.bf16 %v10326_v2  ;;  %v10327_v22 = vunpack.i.l.bf16 %v10326_v2 }
 0xc81   :  { %v8838_v27 = vsel %vm1631_vm14, %v10318_v40, %v10327_v22  ;;  %v8839_v3 = vsel %vm1631_vm14, %v10328_v58, %v8792_v43  ;;  %10062 = vmatpush3.bf16.msra.mxu0 %v8935_v34 }
 0xc82   :  { %v8865_v30 = vmax.f32 %v8765_v41, %v8838_v27  ;;  %v8867_v18 = vmax.f32 %v8767_v20, %v8839_v3  ;;  %v10331_v9 = vpop.permute.xlu0 %10330  ;;  %10063 = vmatprep.subr.bf16.mxu0 %v15236_v17 }
 0xc83   :  { %v10333_v1 = vunpack.i.h.bf16 %v10331_v9  ;;  %v10332_v37 = vunpack.i.l.bf16 %v10331_v9 }
 0xc85   :  { %v8920_v4 = vsel %vm8919_vm7, %v8865_v30, %v10332_v37  ;;  %v8921_v5 = vsel %vm8919_vm7, %v8867_v18, %v10333_v1  ;;  %v9156_v37 = vld [vmem:[%s15050_s19 + $0x18] sm:$0xff] }
 0xc86   :  { %v8934_v57 = vpack.c.bf16 %v8921_v5, %v8920_v4  ;;  %v8967_v15 = vpop.permute.xlu1 %8966  ;;  %v9155_v4 = vld [vmem:[%s15050_s19 + $0x10] sm:$0xff]  ;;  %v9119_v5 = vld [vmem:[%s15049_s18 + $0x8] sm:$0xff] }
 0xc88   :  { %10064 = vmatpush3.bf16.msra.mxu0 %v8934_v57  ;;  %v9118_v57 = vld [vmem:[%s15049_s18] sm:$0xff] }
 0xc8a   :  { %v8962_v26 = vpop.permute.xlu1 %8961 }
 0xc8b   :  { %10066 = vmatmul.mubr.msk.bf16.vlgmr.msra.gmra.mxu0 %vm8982_vm4, %v10432_v23  ;;  %v9154_v23 = vld [vmem:[%s15050_s19 + $0x8] sm:$0xff] }
 0xc8c   :  { %10069 = vmatprep.mubr.msk.bf16.mxu0 %vm10506_vm2, %v15236_v17 }
 0xc8e   :  { %v8952_v32 = vpop.permute.xlu1 %8951 }
 0xc8f   :  { %v8957_v0 = vpop.permute.xlu0 %8956 }
 0xc93   :  { %10070 = vmatmul.mubr.msk.bf16.gmra.mxu0 %vm8982_vm4, %v10433_v31  ;;  %v8947_v21 = vpop.permute.xlu0 %8946  ;;  %v9153_v31 = vld [vmem:[%s15050_s19] sm:$0xff] }
 0xc94   :  { %10073 = vmatprep.mubr.msk.bf16.mxu0 %vm10506_vm2, %v15236_v17 }
 0xc9b   :  { %10074 = vmatmul.mubr.msk.bf16.gmra.mxu0 %vm8982_vm4, %v10434_v12  ;;  %v9199_v12 = vld [vmem:[%s15051_s21 + $0x8] sm:$0x3] }
 0xd4b   :  { %v9029_v63 = vpop.f32.mrf.mxu0 }
 0xd4c   :  { %v9030_v51 = vadd.f32 %v9029_v63, %v8947_v21 }
 0xd4d   :  { %v10067_v35 = vpop.f32.mrf.mxu0 }
 0xd4e   :  { %v9052_v45 = vsel %vm9051_vm8, %v9030_v51, 0.0 }
 0xd4f   :  { %v9032_v6 = vpop.f32.mrf.mxu0 }
 0xd50   :  { %v9033_v11 = vadd.f32 %v9032_v6, %v8952_v32 }
 0xd51   :  { %v10068_v52 = vpop.f32.mrf.mxu0 }
 0xd52   :  { %v9055_v62 = vsel %vm9051_vm8, %v9033_v11, 0.0 }
 0xd53   :  { %v9037_v38 = vpop.f32.mrf.mxu0 }
 0xd54   :  { %v9038_v24 = vadd.f32 %v9037_v38, %v8957_v0 }
 0xd55   :  { %v10071_v53 = vpop.f32.mrf.mxu0 }
 0xd56   :  { %v9058_v60 = vsel %vm9051_vm8, %v9038_v24, 0.0 }
 0xd57   :  { %9059 = vadd.xlane.f32.xlu1 %v9058_v60  ;;  %v9040_v39 = vpop.f32.mrf.mxu0 }
 0xd58   :  { %v9041_v42 = vadd.f32 %v9040_v39, %v8962_v26 }
 0xd59   :  { %v10072_v36 = vpop.f32.mrf.mxu0 }
 0xd5a   :  { %v9061_v29 = vsel %vm9051_vm8, %v9041_v42, 0.0 }
 0xd5b   :  { %9056 = vadd.xlane.f32.xlu1 %v9055_v62  ;;  %v9045_v25 = vpop.f32.mrf.mxu0 }
 0xd5c   :  { %v9046_v8 = vadd.f32 %v9045_v25, %v8967_v15  ;;  %v9198_v15 = vld [vmem:[%s15051_s21] sm:$0xff] }
 0xd5d   :  { %v10075_v19 = vpop.f32.mrf.mxu0 }
 0xd5e   :  { %v9065_v59 = vsel %vm9064_vm12, %v9046_v8, 0.0 }
 0xd5f   :  { %9066 = vadd.xlane.f32.xlu0 %v9065_v59  ;;  %v9048_v55 = vpop.f32.mrf.mxu0 }
 0xd61   :  { %v10076_v33 = vpop.f32.mrf.mxu0 }
 0xd63   :  { %9062 = vadd.xlane.f32.xlu0 %v9061_v29 }
 0xd67   :  { %9053 = vadd.xlane.f32.xlu0 %v9052_v45 }
 0xd6c   :  { %9145 = vperm.xlu1 %10118, %v9122_v49  }
 0xd70   :  { %9135 = vperm.xlu1 %10118, %v9120_v46  }
 0xd74   :  { %9140 = vperm.xlu1 %10118, %v9121_v47  }
 0xd7d   :  { %9180 = vperm.xlu0 %10117, %v9157_v54  }
 0xde0   :  { %v9060_v61 = vpop.xlane.xlu1 %9059 }
 0xde1   :  { %v9070_v2 = vmul.f32 0.5, %v9060_v61 }
 0xde3   :  { %v14980_v41 = vsub.f32 %v9038_v24, %v9070_v2 }
 0xde4   :  { %v9057_v14 = vpop.xlane.xlu1 %9056 }
 0xde5   :  { %v9069_v7 = vmul.f32 0.5, %v9057_v14  ;;  %v9080_v9 = vmul.f32 %v14980_v41, %v14980_v41 }
 0xde7   :  { %v14973_v13 = vsub.f32 %v9033_v11, %v9069_v7  ;;  %v9089_v1 = vsel %vm9051_vm8, %v9080_v9, 0.0 }
 0xde8   :  { %v9067_v44 = vpop.xlane.xlu0 %9066  ;;  %v9146_v63 = vpop.permute.xlu1 %9145 }
 0xde9   :  { %v9079_v50 = vmul.f32 %v14973_v13, %v14973_v13  ;;  %v9072_v56 = vmul.f32 0.5, %v9067_v44 }
 0xdeb   :  { %v9086_v16 = vsel %vm9051_vm8, %v9079_v50, 0.0  ;;  %v14978_v10 = vsub.f32 %v9046_v8, %v9072_v56 }
 0xdec   :  { %9087 = vadd.xlane.f32.xlu0 %v9086_v16  ;;  %v9063_v48 = vpop.xlane.xlu0 %9062  ;;  %v9136_v26 = vpop.permute.xlu1 %9135 }
 0xded   :  { %v9071_v28 = vmul.f32 0.5, %v9063_v48  ;;  %v9082_v27 = vmul.f32 %v14978_v10, %v14978_v10 }
 0xdef   :  { %v9076_v40 = vsub.f32 %v9041_v42, %v9071_v28  ;;  %v9095_v30 = vsel %vm9064_vm12, %v9082_v27, 0.0 }
 0xdf0   :  { %v9054_v58 = vpop.xlane.xlu0 %9053  ;;  %v9141_v52 = vpop.permute.xlu1 %9140 }
 0xdf1   :  { %v9068_v22 = vmul.f32 0.5, %v9054_v58  ;;  %v9081_v34 = vmul.f32 %v9076_v40, %v9076_v40 }
 0xdf3   :  { %v9073_v43 = vsub.f32 %v9030_v51, %v9068_v22  ;;  %v9092_v20 = vsel %vm9051_vm8, %v9081_v34, 0.0 }
 0xdf4   :  { %9093 = vadd.xlane.f32.xlu0 %v9092_v20 }
 0xdf5   :  { %v9078_v3 = vmul.f32 %v9073_v43, %v9073_v43 }
 0xdf7   :  { %v9083_v18 = vsel %vm9051_vm8, %v9078_v3, 0.0 }
 0xdf8   :  { %9096 = vadd.xlane.f32.xlu0 %v9095_v30  ;;  %9084 = vadd.xlane.f32.xlu1 %v9083_v18  ;;  %v9181_v35 = vpop.permute.xlu0 %9180 }
 0xdfc   :  { %9090 = vadd.xlane.f32.xlu1 %v9089_v1  ;;  %v10435_v1 = vld [vmem:[%s15052_s20] sm:$0x1f]  }
 0xe0d   :  { %9175 = vperm.xlu1 %10118, %v9156_v37  }
 0xe0e   :  { %9170 = vperm.xlu0 %10117, %v9155_v4  }
 0xe11   :  { %9130 = vperm.xlu1 %10118, %v9119_v5  }
 0xe12   :  { %9125 = vperm.xlu0 %10117, %v9118_v57  }
 0xe15   :  { %9165 = vperm.xlu1 %10118, %v9154_v23  }
 0xe16   :  { %9160 = vperm.xlu0 %10117, %v9153_v31  }
 0xe19   :  { %9207 = vperm.xlu1 %10118, %v9199_v12  }
 0xe1a   :  { %9202 = vperm.xlu0 %10117, %v9198_v15  }
 0xe75   :  { %v9088_v6 = vpop.xlane.xlu0 %9087 }
 0xe76   :  { %v9099_v39 = vmul.f32 0.5, %v9088_v6 }
 0xe78   :  { %v9104_v19 = vadd.f32 1e-05, %v9099_v39 }
 0xe7d   :  { %v9094_v0 = vpop.xlane.xlu0 %9093 }
 0xe7e   :  { %v9101_v38 = vmul.f32 0.5, %v9094_v0 }
 0xe80   :  { %v9106_v24 = vadd.f32 1e-05, %v9101_v38 }
 0xe81   :  { %v9085_v32 = vpop.xlane.xlu1 %9084  ;;  %v9097_v53 = vpop.xlane.xlu0 %9096 }
 0xe82   :  { %10468 = vrsqrt.f32 %v9106_v24  ;;  %v9098_v11 = vmul.f32 0.5, %v9085_v32  ;;  %v9102_v60 = vmul.f32 0.5, %v9097_v53 }
 0xe84   :  { %v9103_v36 = vadd.f32 1e-05, %v9098_v11  ;;  %v9107_v62 = vadd.f32 1e-05, %v9102_v60 }
 0xe85   :  { %v9091_v25 = vpop.xlane.xlu1 %9090 }
 0xe86   :  { %10470 = vrsqrt.f32 %v9103_v36  ;;  %v9100_v8 = vmul.f32 0.5, %v9091_v25 }
 0xe87   :  { %10472 = vrsqrt.f32 %v9107_v62 }
 0xe88   :  { %v9105_v42 = vadd.f32 1e-05, %v9100_v8 }
 0xe89   :  { %v9176_v55 = vpop.permute.xlu1 %9175  ;;  %v9171_v21 = vpop.permute.xlu0 %9170 }
 0xe8a   :  { %10474 = vrsqrt.f32 %v9105_v42 }
 0xe8b   :  { %10476 = vrsqrt.f32 %v9104_v19 }
 0xe8d   :  { %v9131_v54 = vpop.permute.xlu1 %9130  ;;  %v9126_v61 = vpop.permute.xlu0 %9125 }
 0xe8f   :  { %v10469_v59 = vpop.eup %10468 }
 0xe90   :  { %v9116_v33 = vmul.f32 %v10469_v59, %v9076_v40 }
 0xe91   :  { %v9166_v58 = vpop.permute.xlu1 %9165  ;;  %v9161_v22 = vpop.permute.xlu0 %9160 }
 0xe92   :  { %v9151_v49 = vmul.f32 %v9141_v52, %v9116_v33 }
 0xe93   :  { %v10471_v51 = vpop.eup %10470 }
 0xe94   :  { %v10473_v29 = vpop.eup %10472  ;;  %v9113_v46 = vmul.f32 %v10471_v51, %v9073_v43  ;;  %v9186_v56 = vadd.f32 %v9176_v55, %v9151_v49 }
 0xe95   :  { %v9117_v45 = vmul.f32 %v10473_v29, %v14978_v10  ;;  %v9203_v37 = vpop.permute.xlu0 %9202  ;;  %v9208_v23 = vpop.permute.xlu1 %9207 }
 0xe96   :  { %v9148_v48 = vmul.f32 %v9126_v61, %v9113_v46  ;;  %v9191_v34 = vmax.f32 %v9186_v56, 0.0 }
 0xe97   :  { %v10475_v47 = vpop.eup %10474  ;;  %v9152_v14 = vmul.f32 %v9146_v63, %v9117_v45 }
 0xe98   :  { %v9115_v7 = vmul.f32 %v10475_v47, %v14980_v41  ;;  %v10477_v44 = vpop.eup %10476  ;;  %v9183_v27 = vadd.f32 %v9161_v22, %v9148_v48 }
 0xe99   :  { %v9187_v50 = vadd.f32 %v9181_v35, %v9152_v14  ;;  %v9114_v40 = vmul.f32 %v10477_v44, %v14973_v13 }
 0xe9a   :  { %v9150_v16 = vmul.f32 %v9136_v26, %v9115_v7  ;;  %v9188_v18 = vmax.f32 %v9183_v27, 0.0 }
 0xe9b   :  { %v9192_v28 = vmax.f32 %v9187_v50, 0.0  ;;  %v9149_v20 = vmul.f32 %v9131_v54, %v9114_v40 }
 0xe9c   :  { %v9185_v2 = vadd.f32 %v9171_v21, %v9150_v16 }
 0xe9d   :  { %v9197_v10 = vpack.c.bf16 %v9192_v28, %v9192_v28  ;;  %v9184_v41 = vadd.f32 %v9166_v58, %v9149_v20 }
 0xe9e   :  { %v9190_v43 = vmax.f32 %v9185_v2, 0.0 }
 0xe9f   :  { %v9219_v3 = vsel %vm118_vm1, %v9197_v10, 0  ;;  %v9189_v9 = vmax.f32 %v9184_v41, 0.0  ;;  %vm9263_vm1 = vcmask 9216  }
 0xea0   :  { %v9196_v30 = vpack.c.bf16 %v9191_v34, %v9190_v43  ;;  %10078 = vmatpush3.bf16.msra.mxu1 %v9219_v3 }
 0xea1   :  { %10079 = vmatprep.subr.bf16.mxu1 %v15236_v17  ;;  %v9195_v13 = vpack.c.bf16 %v9189_v9, %v9188_v18 }
 0xea4   :  { %10080 = vmatpush3.bf16.msra.mxu1 %v9196_v30 }
 0xea5   :  { %10081 = vmatprep.subr.bf16.mxu1 %v15236_v17 }
 0xea8   :  { %10082 = vmatpush3.bf16.msra.mxu1 %v9195_v13 }
 0xeab   :  { %10084 = vmatmul.mubr.msk.bf16.vlgmr.msra.gmra.mxu1 %vm5730_vm3, %v10435_v1 }
 0xf6b   :  { %v9255_v4 = vpop.f32.mrf.mxu1 }
 0xf6c   :  { %v9256_v5 = vadd.f32 %v9255_v4, %v9203_v37 }
 0xf6d   :  { %v10085_v57 = vpop.f32.mrf.mxu1 }
 0xf6e   :  { %9262 = vst.msk [vmem:[%s15053_s22] sm:$0xff] %vm9051_vm8, %v9256_v5 }
 0xf6f   :  { %v9258_v31 = vpop.f32.mrf.mxu1 }
 0xf70   :  { %v9259_v17 = vadd.f32 %v9258_v31, %v9208_v23 }
 0xf71   :  { %v10086_v12 = vpop.f32.mrf.mxu1 }
 0xf72   :  { %9264 = vst.msk [vmem:[%s15053_s22 + $0x8] sm:$0x3] %vm9263_vm1, %v9259_v17 }

</bundles_post_ra>
